<compile_context>
chip_gen: v7x
topology: tpu7x:2x2x1
jax: 0.10.0
libtpu: 0.0.40
codegen_flags: <defaults>
</compile_context>

<pallas_src>
import functools

import jax
import jax.numpy as jnp
from jax.experimental import pallas as pl
from jax.experimental.pallas import tpu as pltpu


def _tensorcores_per_chip():
    """Best-effort megacore detection (v7x has 2 TCs/chip). Perf-only heuristic."""
    try:
        kind = jax.devices()[0].device_kind.lower()
    except Exception:
        return 1
    return 2 if "v7" in kind else 1


# ----------------------------- Pallas kernels ------------------------------

def matmul_bias_act_kernel(x_ref, w_ref, b_ref, o_ref, *, apply_relu):
    """o = act(x @ w + b). x:(tile_m,K) bf16, w:(K,O) bf16, b:(1,O) f32.

    MXU operands are bf16; accumulation and the bias/ReLU epilogue are f32
    (keeps v5e, which has no bf16 VPU, on its fast path); the store casts to
    o_ref.dtype.
    """
    acc = jnp.dot(x_ref[...], w_ref[...], preferred_element_type=jnp.float32)
    acc = acc + b_ref[...]
    if apply_relu:
        acc = jnp.maximum(acc, 0.0)
    o_ref[...] = acc.astype(o_ref.dtype)


def fc_stack_kernel(x_ref, w1_ref, b1_ref, w2_ref, b2_ref, w3_ref, b3_ref,
                    o_ref):
    """Fused fc1->relu->fc2->relu->fc3 (Dropout == identity at inference).

    Intermediates never leave VMEM/vregs. x/w1 are bf16 (the only large
    operands); fc2/fc3 weights, biases and all epilogue math stay f32.
    """
    h = jnp.dot(x_ref[...], w1_ref[...], preferred_element_type=jnp.float32)
    h = jnp.maximum(h + b1_ref[...], 0.0)
    h = jnp.dot(h, w2_ref[...], preferred_element_type=jnp.float32)
    h = jnp.maximum(h + b2_ref[...], 0.0)
    h = jnp.dot(h, w3_ref[...], preferred_element_type=jnp.float32)
    o_ref[...] = (h + b3_ref[...]).astype(o_ref.dtype)


# ------------------------------- wrappers ----------------------------------

def matmul_bias_act(x, w, b, *, relu, tile_m, out_dtype):
    """y = act(x @ w + b) on the MXU.

    x:(M,K), w:(K,O), b:(1,O). K and O stay at their real (unpadded) sizes —
    block dim == full array dim satisfies the TPU tiling rule — and the ragged
    last M block is handled by Pallas (its tail rows are row-independent
    garbage whose store is clipped), so nothing needs padding or slicing.
    """
    m, k = x.shape
    k2, o = w.shape
    assert k == k2
    if tile_m >= m:
        tile_m = m                       # single full-array block
    assert tile_m == m or tile_m % 16 == 0, tile_m   # bf16 sublane multiple
    kernel = functools.partial(matmul_bias_act_kernel, apply_relu=relu)
    return pl.pallas_call(
        kernel,
        out_shape=jax.ShapeDtypeStruct((m, o), out_dtype),
        grid=(pl.cdiv(m, tile_m),),
        in_specs=[
            pl.BlockSpec((tile_m, k), lambda i: (i, 0)),
            pl.BlockSpec((k, o), lambda i: (0, 0)),
            pl.BlockSpec((1, o), lambda i: (0, 0)),
        ],
        out_specs=pl.BlockSpec((tile_m, o), lambda i: (i, 0)),
        compiler_params=pltpu.CompilerParams(
            dimension_semantics=("parallel",),     # shard M tiles over TCs (v7x)
            vmem_limit_bytes=32 * 1024 * 1024,     # headroom; <2 MiB actually used
        ),
    )(x, w, b)


def conv2d_relu_pallas(x_nhwc, w_mat, b_row, *, ksize, stride, pad, tile_m):
    """PyTorch-semantics Conv2d + ReLU, NHWC activations.

    Patches come from lax.conv_general_dilated_patches; with NHWC its feature
    order is (C, KH, KW), which matches the reshaped PyTorch OIHW weights
    (the final allclose vs. the plain-XLA reference is the regression test
    for this ordering assumption). The matmul+bias+ReLU runs in Pallas.
    """
    n = x_nhwc.shape[0]
    patches = jax.lax.conv_general_dilated_patches(
        x_nhwc, filter_shape=(ksize, ksize),
        window_strides=(stride, stride),
        padding=((pad, pad), (pad, pad)),
        dimension_numbers=("NHWC", "HWIO", "NHWC"))
    _, oh, ow, k = patches.shape
    out_ch = w_mat.shape[1]
    y = matmul_bias_act(patches.reshape(n * oh * ow, k), w_mat, b_row,
                        relu=True, tile_m=tile_m, out_dtype=x_nhwc.dtype)
    return y.reshape(n, oh, ow, out_ch)


def maxpool2x2_nhwc(x):
    """MaxPool2d(2,2) as a fused XLA reshape+max (no extra Pallas launch)."""
    n, h, w, c = x.shape
    return x.reshape(n, h // 2, 2, w // 2, 2, c).max(axis=(2, 4))


def fc_stack_pallas(x, w1, b1, w2, b2, w3, b3):
    """Whole FC head in one pallas_call (full-array blocks, everything in VMEM)."""
    bsz = x.shape[0]
    o = w3.shape[1]
    return pl.pallas_call(
        fc_stack_kernel,
        out_shape=jax.ShapeDtypeStruct((bsz, o), jnp.float32),
        compiler_params=pltpu.CompilerParams(vmem_limit_bytes=32 * 1024 * 1024),
    )(x, w1, b1, w2, b2, w3, b3)


# ------------------------------ the network --------------------------------

def init_raw_params(key, out_chl):
    """Parameters in the original PyTorch layouts (f32)."""
    ks = jax.random.split(key, 10)

    def u(k, shape, scale):
        return scale * jax.random.uniform(k, shape, jnp.float32, -1.0, 1.0)

    return {
        "conv1_w": u(ks[0], (8, 3, 5, 5), 0.10),
        "conv1_b": u(ks[1], (8,), 0.10),
        "conv2_w": u(ks[2], (16, 8, 3, 3), 0.10),
        "conv2_b": u(ks[3], (16,), 0.10),
        "fc1_w": u(ks[4], (128, 16 * 9 * 9), 0.05),
        "fc1_b": u(ks[5], (128,), 0.05),
        "fc2_w": u(ks[6], (56, 128), 0.05),
        "fc2_b": u(ks[7], (56,), 0.05),
        "fc3_w": u(ks[8], (out_chl, 56), 0.05),
        "fc3_b": u(ks[9], (out_chl,), 0.05),
        # TODO(synk): conv1by1 (3->1, 1x1) exists in __init__ but is unused in forward().
    }


def prepare_params(raw, out_chl):
    """One-time weight prep (not in the hot path).

    Conv weights: (O,C,KH,KW) -> (C*KH*KW, O), unpadded, matching the
    (C,KH,KW) feature order of conv_general_dilated_patches(NHWC). fc1's
    columns are permuted once from PyTorch's NCHW flatten (C,H,W) to the
    runtime NHWC flatten (H,W,C). Large matmul operands (conv weights, fc1)
    are bf16; biases and the small fc2/fc3 weights stay f32.
    """
    p = {}
    p["conv1_w"] = raw["conv1_w"].reshape(8, 3 * 5 * 5).T.astype(jnp.bfloat16)   # (75, 8)
    p["conv1_b"] = raw["conv1_b"].reshape(1, 8)
    p["conv2_w"] = raw["conv2_w"].reshape(16, 8 * 3 * 3).T.astype(jnp.bfloat16)  # (72, 16)
    p["conv2_b"] = raw["conv2_b"].reshape(1, 16)
    w1 = raw["fc1_w"].reshape(128, 16, 9, 9).transpose(0, 2, 3, 1)               # NCHW -> NHWC flatten order
    p["fc1_w"] = w1.reshape(128, 9 * 9 * 16).T.astype(jnp.bfloat16)              # (1296, 128)
    p["fc1_b"] = raw["fc1_b"].reshape(1, 128)
    p["fc2_w"] = raw["fc2_w"].T                                                   # (128, 56) f32
    p["fc2_b"] = raw["fc2_b"].reshape(1, 56)
    p["fc3_w"] = raw["fc3_w"].T                                                   # (56, out_chl) f32
    p["fc3_b"] = raw["fc3_b"].reshape(1, out_chl)
    return p


def simple_cnn_forward(params, x_nchw, *, num_tc=1):
    x = jnp.transpose(x_nchw, (0, 2, 3, 1)).astype(jnp.bfloat16)  # NCHW->NHWC + bf16, once
    # x = pool(relu(conv1(x)))
    x = conv2d_relu_pallas(x, params["conv1_w"], params["conv1_b"],
                           ksize=5, stride=3, pad=1,
                           tile_m=2048 if num_tc >= 2 else 4096)   # (N,74,74,8)
    x = maxpool2x2_nhwc(x)                                          # (N,37,37,8)
    # x = pool(relu(drop_2d(conv2(x))))  — Dropout2d == identity at inference
    x = conv2d_relu_pallas(x, params["conv2_w"], params["conv2_b"],
                           ksize=3, stride=2, pad=0,
                           tile_m=336 if num_tc >= 2 else 4096)     # (N,18,18,16)
    x = maxpool2x2_nhwc(x)                                          # (N,9,9,16)
    # x.view(-1, 16*9*9): the PyTorch NCHW flatten order is folded into fc1's
    # columns, so this NHWC row-major flatten is a free metadata reshape.
    xf = x.reshape(x.shape[0], 9 * 9 * 16)
    # fc1 -> relu -> fc2 -> relu -> fc3, one fused kernel (Dropout == identity).
    return fc_stack_pallas(xf, params["fc1_w"], params["fc1_b"],
                           params["fc2_w"], params["fc2_b"],
                           params["fc3_w"], params["fc3_b"])


# -------------------- plain-XLA reference (for validation) -----------------

def reference_forward(raw, x_nchw):
    hp = jax.lax.Precision.HIGHEST

    def conv(x, w, b, stride, pad):
        y = jax.lax.conv_general_dilated(
            x, w, window_strides=(stride, stride),
            padding=((pad, pad), (pad, pad)),
            dimension_numbers=("NCHW", "OIHW", "NCHW"), precision=hp)
        return y + b[None, :, None, None]

    def pool(x):
        n, c, h, w = x.shape
        return x.reshape(n, c, h // 2, 2, w // 2, 2).max(axis=(3, 5))

    y = pool(jax.nn.relu(conv(x_nchw, raw["conv1_w"], raw["conv1_b"], 3, 1)))
    y = pool(jax.nn.relu(conv(y, raw["conv2_w"], raw["conv2_b"], 2, 0)))
    y = y.reshape(y.shape[0], -1)                       # NCHW flatten
    y = jax.nn.relu(jnp.dot(y, raw["fc1_w"].T, precision=hp) + raw["fc1_b"])
    y = jax.nn.relu(jnp.dot(y, raw["fc2_w"].T, precision=hp) + raw["fc2_b"])
    return jnp.dot(y, raw["fc3_w"].T, precision=hp) + raw["fc3_b"]


if __name__ == "__main__":
    key = jax.random.PRNGKey(0)
    pkey, xkey = jax.random.split(key)

    out_chl = 10
    raw = init_raw_params(pkey, out_chl)
    params = prepare_params(raw, out_chl)

    # Spatial size 3x224x224 is dictated by the module itself (fc1 expects
    # 16*9*9 features after the two conv+pool stages); batch kept small (N=2).
    x = jax.random.normal(xkey, (2, 3, 224, 224), jnp.float32)

    num_tc = _tensorcores_per_chip()
    fwd = jax.jit(functools.partial(simple_cnn_forward, num_tc=num_tc))
    y = fwd(params, x)
    jax.block_until_ready(y)

    assert y.shape == (2, out_chl)
    assert y.dtype == jnp.float32

    # Validate against a plain-XLA f32 reference of the PyTorch forward pass.
    # Tolerance covers the bf16 MXU operands (review-sanctioned) plus MXU
    # rounding; f32 accumulation keeps the error well inside this budget.
    y_ref = reference_forward(raw, x)
    assert jnp.allclose(y, y_ref, rtol=5e-2, atol=1e-2), (
        float(jnp.max(jnp.abs(y - y_ref))))

    print("KERNEL_OK")
</pallas_src>

<mosaic_0001>
module attributes {stable_mosaic.version = 11 : i64} {
  func.func @matmul_bias_act_kernel(%arg0: i32, %arg1: memref<4096x75xbf16, #tpu.memory_space<vmem>>, %arg2: memref<75x8xbf16, #tpu.memory_space<vmem>>, %arg3: memref<1x8xf32, #tpu.memory_space<vmem>>, %arg4: memref<4096x8xbf16, #tpu.memory_space<vmem>>) attributes {dimension_semantics = [#tpu.dimension_semantics<parallel>], iteration_bounds = array<i64: 3>, scalar_prefetch = 0 : i64, scratch_operands = 0 : i64, tpu.core_type = #tpu.core_type<tc>, window_params = [{transform_indices = @transform_0, window_bounds = array<i64: 4096, 75>}, {pipeline_mode = #tpu.pipeline_mode<synchronous>, transform_indices = @transform_1, window_bounds = array<i64: 75, 8>}, {pipeline_mode = #tpu.pipeline_mode<synchronous>, transform_indices = @transform_2, window_bounds = array<i64: 1, 8>}, {transform_indices = @transform_3, window_bounds = array<i64: 4096, 8>}]} {
    %c0 = arith.constant 0 : index
    %c0_0 = arith.constant 0 : index
    %0 = vector.load %arg1[%c0, %c0_0] : memref<4096x75xbf16, #tpu.memory_space<vmem>>, vector<4096x75xbf16>
    %c0_1 = arith.constant 0 : index
    %c0_2 = arith.constant 0 : index
    %1 = vector.load %arg2[%c0_1, %c0_2] : memref<75x8xbf16, #tpu.memory_space<vmem>>, vector<75x8xbf16>
    %cst = arith.constant dense<0.000000e+00> : vector<4096x8xf32>
    %2 = tpu.matmul %0, %1, %cst {dimension_numbers = #tpu.dot_dimension_numbers<[1], [0], [0], [1], [0, 0, 1, 1], [], []>} : vector<4096x75xbf16>, vector<75x8xbf16>, vector<4096x8xf32> -> vector<4096x8xf32>
    %c0_3 = arith.constant 0 : index
    %c0_4 = arith.constant 0 : index
    %3 = vector.load %arg3[%c0_3, %c0_4] : memref<1x8xf32, #tpu.memory_space<vmem>>, vector<1x8xf32>
    %4 = vector.broadcast %3 : vector<1x8xf32> to vector<4096x8xf32>
    %5 = arith.addf %2, %4 : vector<4096x8xf32>
    %cst_5 = arith.constant 0.000000e+00 : f32
    %6 = vector.broadcast %cst_5 : f32 to vector<4096x8xf32>
    %7 = arith.maximumf %5, %6 : vector<4096x8xf32>
    %8 = arith.truncf %7 : vector<4096x8xf32> to vector<4096x8xbf16>
    %c0_6 = arith.constant 0 : index
    %c0_7 = arith.constant 0 : index
    %9 = vector.load %arg4[%c0_6, %c0_7] : memref<4096x8xbf16, #tpu.memory_space<vmem>>, vector<4096x8xbf16>
    tpu.vector_store %arg4[%c0_6, %c0_7], %8 {strides = array<i32>} : memref<4096x8xbf16, #tpu.memory_space<vmem>>, vector<4096x8xbf16>,
    return
  }
  func.func @transform_0(%arg0: i32) -> (i32, i32) {
    %c0_i32 = arith.constant 0 : i32
    %c0_i32_0 = arith.constant 0 : i32
    return %arg0, %c0_i32 : i32, i32
  }
  func.func @transform_1(%arg0: i32) -> (i32, i32) {
    %c0_i32 = arith.constant 0 : i32
    %c0_i32_0 = arith.constant 0 : i32
    %c0_i32_1 = arith.constant 0 : i32
    return %c0_i32, %c0_i32_0 : i32, i32
  }
  func.func @transform_2(%arg0: i32) -> (i32, i32) {
    %c0_i32 = arith.constant 0 : i32
    %c0_i32_0 = arith.constant 0 : i32
    %c0_i32_1 = arith.constant 0 : i32
    return %c0_i32, %c0_i32_0 : i32, i32
  }
  func.func @transform_3(%arg0: i32) -> (i32, i32) {
    %c0_i32 = arith.constant 0 : i32
    %c0_i32_0 = arith.constant 0 : i32
    return %arg0, %c0_i32 : i32, i32
  }
}

module attributes {stable_mosaic.version = 11 : i64} {
  func.func @matmul_bias_act_kernel(%arg0: i32, %arg1: memref<648x72xbf16, #tpu.memory_space<vmem>>, %arg2: memref<72x16xbf16, #tpu.memory_space<vmem>>, %arg3: memref<1x16xf32, #tpu.memory_space<vmem>>, %arg4: memref<648x16xbf16, #tpu.memory_space<vmem>>) attributes {dimension_semantics = [#tpu.dimension_semantics<parallel>], iteration_bounds = array<i64: 1>, scalar_prefetch = 0 : i64, scratch_operands = 0 : i64, tpu.core_type = #tpu.core_type<tc>, window_params = [{transform_indices = @transform_0, window_bounds = array<i64: 648, 72>}, {pipeline_mode = #tpu.pipeline_mode<synchronous>, transform_indices = @transform_1, window_bounds = array<i64: 72, 16>}, {pipeline_mode = #tpu.pipeline_mode<synchronous>, transform_indices = @transform_2, window_bounds = array<i64: 1, 16>}, {transform_indices = @transform_3, window_bounds = array<i64: 648, 16>}]} {
    %c0 = arith.constant 0 : index
    %c0_0 = arith.constant 0 : index
    %0 = vector.load %arg1[%c0, %c0_0] : memref<648x72xbf16, #tpu.memory_space<vmem>>, vector<648x72xbf16>
    %c0_1 = arith.constant 0 : index
    %c0_2 = arith.constant 0 : index
    %1 = vector.load %arg2[%c0_1, %c0_2] : memref<72x16xbf16, #tpu.memory_space<vmem>>, vector<72x16xbf16>
    %cst = arith.constant dense<0.000000e+00> : vector<648x16xf32>
    %2 = tpu.matmul %0, %1, %cst {dimension_numbers = #tpu.dot_dimension_numbers<[1], [0], [0], [1], [0, 0, 1, 1], [], []>} : vector<648x72xbf16>, vector<72x16xbf16>, vector<648x16xf32> -> vector<648x16xf32>
    %c0_3 = arith.constant 0 : index
    %c0_4 = arith.constant 0 : index
    %3 = vector.load %arg3[%c0_3, %c0_4] : memref<1x16xf32, #tpu.memory_space<vmem>>, vector<1x16xf32>
    %4 = vector.broadcast %3 : vector<1x16xf32> to vector<648x16xf32>
    %5 = arith.addf %2, %4 : vector<648x16xf32>
    %cst_5 = arith.constant 0.000000e+00 : f32
    %6 = vector.broadcast %cst_5 : f32 to vector<648x16xf32>
    %7 = arith.maximumf %5, %6 : vector<648x16xf32>
    %8 = arith.truncf %7 : vector<648x16xf32> to vector<648x16xbf16>
    %c0_6 = arith.constant 0 : index
    %c0_7 = arith.constant 0 : index
    %9 = vector.load %arg4[%c0_6, %c0_7] : memref<648x16xbf16, #tpu.memory_space<vmem>>, vector<648x16xbf16>
    tpu.vector_store %arg4[%c0_6, %c0_7], %8 {strides = array<i32>} : memref<648x16xbf16, #tpu.memory_space<vmem>>, vector<648x16xbf16>,
    return
  }
  func.func @transform_0(%arg0: i32) -> (i32, i32) {
    %c0_i32 = arith.constant 0 : i32
    %c0_i32_0 = arith.constant 0 : i32
    return %arg0, %c0_i32 : i32, i32
  }
  func.func @transform_1(%arg0: i32) -> (i32, i32) {
    %c0_i32 = arith.constant 0 : i32
    %c0_i32_0 = arith.constant 0 : i32
    %c0_i32_1 = arith.constant 0 : i32
    return %c0_i32, %c0_i32_0 : i32, i32
  }
  func.func @transform_2(%arg0: i32) -> (i32, i32) {
    %c0_i32 = arith.constant 0 : i32
    %c0_i32_0 = arith.constant 0 : i32
    %c0_i32_1 = arith.constant 0 : i32
    return %c0_i32, %c0_i32_0 : i32, i32
  }
  func.func @transform_3(%arg0: i32) -> (i32, i32) {
    %c0_i32 = arith.constant 0 : i32
    %c0_i32_0 = arith.constant 0 : i32
    return %arg0, %c0_i32 : i32, i32
  }
}

module attributes {stable_mosaic.version = 11 : i64} {
  func.func @fc_stack_kernel(%arg0: memref<2x1296xbf16, #tpu.memory_space<vmem>>, %arg1: memref<1296x128xbf16, #tpu.memory_space<vmem>>, %arg2: memref<1x128xf32, #tpu.memory_space<vmem>>, %arg3: memref<128x56xf32, #tpu.memory_space<vmem>>, %arg4: memref<1x56xf32, #tpu.memory_space<vmem>>, %arg5: memref<56x10xf32, #tpu.memory_space<vmem>>, %arg6: memref<1x10xf32, #tpu.memory_space<vmem>>, %arg7: memref<2x10xf32, #tpu.memory_space<vmem>>) attributes {dimension_semantics = [], scalar_prefetch = 0 : i64, scratch_operands = 0 : i64, tpu.core_type = #tpu.core_type<tc>} {
    %c0 = arith.constant 0 : index
    %c0_0 = arith.constant 0 : index
    %0 = vector.load %arg0[%c0, %c0_0] : memref<2x1296xbf16, #tpu.memory_space<vmem>>, vector<2x1296xbf16>
    %c0_1 = arith.constant 0 : index
    %c0_2 = arith.constant 0 : index
    %1 = vector.load %arg1[%c0_1, %c0_2] : memref<1296x128xbf16, #tpu.memory_space<vmem>>, vector<1296x128xbf16>
    %cst = arith.constant dense<0.000000e+00> : vector<2x128xf32>
    %2 = tpu.matmul %0, %1, %cst {dimension_numbers = #tpu.dot_dimension_numbers<[1], [0], [0], [1], [0, 0, 1, 1], [], []>} : vector<2x1296xbf16>, vector<1296x128xbf16>, vector<2x128xf32> -> vector<2x128xf32>
    %c0_3 = arith.constant 0 : index
    %c0_4 = arith.constant 0 : index
    %3 = vector.load %arg2[%c0_3, %c0_4] : memref<1x128xf32, #tpu.memory_space<vmem>>, vector<1x128xf32>
    %4 = vector.broadcast %3 : vector<1x128xf32> to vector<2x128xf32>
    %5 = arith.addf %2, %4 : vector<2x128xf32>
    %cst_5 = arith.constant 0.000000e+00 : f32
    %6 = vector.broadcast %cst_5 : f32 to vector<2x128xf32>
    %7 = arith.maximumf %5, %6 : vector<2x128xf32>
    %c0_6 = arith.constant 0 : index
    %c0_7 = arith.constant 0 : index
    %8 = vector.load %arg3[%c0_6, %c0_7] : memref<128x56xf32, #tpu.memory_space<vmem>>, vector<128x56xf32>
    %cst_8 = arith.constant dense<0.000000e+00> : vector<2x56xf32>
    %9 = tpu.matmul %7, %8, %cst_8 {dimension_numbers = #tpu.dot_dimension_numbers<[1], [0], [0], [1], [0, 0, 1, 1], [], []>} : vector<2x128xf32>, vector<128x56xf32>, vector<2x56xf32> -> vector<2x56xf32>
    %c0_9 = arith.constant 0 : index
    %c0_10 = arith.constant 0 : index
    %10 = vector.load %arg4[%c0_9, %c0_10] : memref<1x56xf32, #tpu.memory_space<vmem>>, vector<1x56xf32>
    %11 = vector.broadcast %10 : vector<1x56xf32> to vector<2x56xf32>
    %12 = arith.addf %9, %11 : vector<2x56xf32>
    %cst_11 = arith.constant 0.000000e+00 : f32
    %13 = vector.broadcast %cst_11 : f32 to vector<2x56xf32>
    %14 = arith.maximumf %12, %13 : vector<2x56xf32>
    %c0_12 = arith.constant 0 : index
    %c0_13 = arith.constant 0 : index
    %15 = vector.load %arg5[%c0_12, %c0_13] : memref<56x10xf32, #tpu.memory_space<vmem>>, vector<56x10xf32>
    %cst_14 = arith.constant dense<0.000000e+00> : vector<2x10xf32>
    %16 = tpu.matmul %14, %15, %cst_14 {dimension_numbers = #tpu.dot_dimension_numbers<[1], [0], [0], [1], [0, 0, 1, 1], [], []>} : vector<2x56xf32>, vector<56x10xf32>, vector<2x10xf32> -> vector<2x10xf32>
    %c0_15 = arith.constant 0 : index
    %c0_16 = arith.constant 0 : index
    %17 = vector.load %arg6[%c0_15, %c0_16] : memref<1x10xf32, #tpu.memory_space<vmem>>, vector<1x10xf32>
    %18 = vector.broadcast %17 : vector<1x10xf32> to vector<2x10xf32>
    %19 = arith.addf %16, %18 : vector<2x10xf32>
    %c0_17 = arith.constant 0 : index
    %c0_18 = arith.constant 0 : index
    %20 = vector.load %arg7[%c0_17, %c0_18] : memref<2x10xf32, #tpu.memory_space<vmem>>, vector<2x10xf32>
    tpu.vector_store %arg7[%c0_17, %c0_18], %19 {strides = array<i32>} : memref<2x10xf32, #tpu.memory_space<vmem>>, vector<2x10xf32>,
    return
  }
}

</mosaic_0001>

<bundles_post_ra>
// kernel: simple_cnn_forward.3
= control target key start
LH: loop header
LB: loop body
LE: loop exit
PB: predicated region body
PF: predicated region fallthrough
CT: control target
= control target key end

     0   :  { %s11253_s12 = smov 0   ;;  %s11255_s13 = smov 0   ;;  %s13590_s0 = inlined_call_operand.vmem [shape: bf16[10952,75], index: 0, kind: input, shape index: {}]   ;;  %s13591_s1 = inlined_call_operand.vmem [shape: bf16[75,8], index: 1, kind: input, shape index: {}]   ;;  %s13592_s2 = inlined_call_operand.vmem [shape: f32[1,8], index: 2, kind: input, shape index: {}]   ;;  %s13593_s3 = inlined_call_operand.vmem [shape: bf16[10952,8], index: 3, kind: output, shape index: {}]  }
   0x1   :  { %s11257_s14 = smov 0  }
   0x2 LB: > { %s11266_s15 = sadd.s32 4294967295, %s11198_s14   ;;  %s11268_s16 = sadd.s32 1, %s11198_s14   ;;  %s11198_s14 = sphi %s11257_s14, %s13600_s14   ;;  %s11194_s13 = sphi %s11255_s13, %s13599_s13   ;;  %s11190_s12 = sphi %s11253_s12, %s13598_s12  }
   0x3   : > { %s85_s17 = ssub.s32 %s11198_s14, %s11268_s16  ;;  %s88_s18 = sadd.s32 1, %s11194_s13 }
   0x4   : > { %p86_p0 = scmp.eq.s32.totalorder %s85_s17, 0  ;;  %p98_p1 = scmp.ne.s32.totalorder %s11194_s13, %s11190_s12 }
   0x5   : > { %p99_p2 = scmp.eq.s32.totalorder %s11266_s15, 2  ;;  %p8430_p3 = scmp.ge.s32.totalorder %s11198_s14, 1 }
   0x6   : > { %s11276_s19 = scalar_select %p86_p0, %s11194_s13, %s88_s18  }
   0x7   : > { %p11278_p4 = por %p99_p2, %p98_p1  ;;  %p146_p5 = scmp.lt.s32.totalorder %s11198_s14, 4 }
   0x9   : > { %p147_p6 = pnand %p8430_p3, %p146_p5 }
   0xa   : > { %v10878_v0 = vld [vmem:[%s13591_s1] sm:$0xff] (!%p147_p6)   ;;  %v10879_v1 = vld [vmem:[%s13591_s1 + $0x8] sm:$0xff] (!%p147_p6)   ;;  %vm2800_vm0 = vcmask (!%p147_p6), 1044480   ;;  %v10880_v2 = vld [vmem:[%s13591_s1 + $0x10] sm:$0xff] (!%p147_p6)   ;;  %s11292_s27 = sshll.u32 (!%p147_p6), %s11266_s15, 9  ;;  %vm2801_vm1 = vcmask (!%p147_p6), 1045504  }
   0xb   : > { %150 = sbr.rel (%p147_p6) target bundleno = 848 (0x350), region = 32  ;;  %10257 = vmatprep.subr.bf16.mxu0 (!%p147_p6), %v10878_v0  ;;  %10779 = vmatprep.subr.bf16.mxu1 (!%p147_p6), %v10878_v0  ;;  %v11232_v3 = vmov (!%p147_p6), 65535   ;;  %p178_p7 = scmp.lt.s32.totalorder (!%p147_p6), %s11292_s27, 1368  ;;  %v10881_v5 = vld [vmem:[%s13591_s1 + $0x18] sm:$0xff] (!%p147_p6)   ;;  %v10882_v6 = vld [vmem:[%s13591_s1 + $0x20] sm:$0x3f] (!%p147_p6)  }
   0xc   : > { %10258 = vmatpush3.bf16.msra.mxu0 (!%p147_p6), %v10878_v0  ;;  %10784 = vmatpush3.bf16.msra.mxu1 (!%p147_p6), %v10878_v0  ;;  %v2802_v4 = vsel (!%p147_p6), %vm2800_vm0, 4294967295, %v11232_v3  ;;  %vm2031_vm2 = vcmask (!%p147_p6), 613376   ;;  %s170_s10 = sand.u32 (!%p147_p6), 1, %s11190_s12   ;;  %vm7448_vm3 = vcmask (!%p147_p6), 60416  }
   0xd   : > { %10259 = vmatprep.subr.bf16.mxu0 (!%p147_p6), %v10879_v1  ;;  %10780 = vmatprep.subr.bf16.mxu1 (!%p147_p6), %v10879_v1  ;;  %v2803_v7 = vsel (!%p147_p6), %vm2801_vm1, %v2802_v4, 0  ;;  %s11524_s11 = sshll.u32 (!%p147_p6), %s170_s10, 11 }
   0xe   : > { %v2805_v8 = vand.u32 (!%p147_p6), %v10882_v6, %v2803_v7  ;;  %s11552_s12 = scalar_lea.vmem (!%p147_p6), [#allocation2], %s11524_s11  }
  0x10   : > { %10260 = vmatpush3.bf16.msra.mxu0 (!%p147_p6), %v10879_v1  ;;  %10785 = vmatpush3.bf16.msra.mxu1 (!%p147_p6), %v10879_v1 }
  0x11   : > { %10261 = vmatprep.subr.bf16.mxu0 (!%p147_p6), %v10880_v2  ;;  %10781 = vmatprep.subr.bf16.mxu1 (!%p147_p6), %v10880_v2 }
  0x12   : > { %s179_s5 = scalar_select %p178_p7, %s11292_s27, 1368 }
  0x13   : > { %s7969_s4 = ssub.s32 (%p11278_p4), 1369, %s11292_s27 }
  0x14   : > { %s8433_s6 = sshll.u32 %s179_s5, 2  ;;  %10262 = vmatpush3.bf16.msra.mxu0 %v10880_v2  ;;  %10786 = vmatpush3.bf16.msra.mxu1 %v10880_v2  ;;  %s9993_s5 = sshll.u32 (%p11278_p4), %s11266_s15, 11 }
  0x15   : > { %s11305_s9 = scalar_lea.vmem %s13590_s0, %s8433_s6  ;;  %10263 = vmatprep.subr.bf16.mxu0 %v10881_v5  ;;  %10782 = vmatprep.subr.bf16.mxu1 %v10881_v5  ;;  %p7970_p8 = scmp.lt.s32.totalorder (%p11278_p4), %s7969_s4, 512 }
  0x16   : > { %v10883_v9 = vld [vmem:[%s11305_s9] sm:$0xff]   ;;  %v10885_v11 = vld [vmem:[%s11305_s9 + $0x8] sm:$0xff]   ;;  %v10887_v13 = vld [vmem:[%s11305_s9 + $0x10] sm:$0xff]   ;;  %s13398_s8 = scalar_lea.vmem (%p11278_p4), %s13593_s3, %s9993_s5  }
  0x17   : > { %v10884_v10 = vld [vmem:[%s11305_s9 + $0x400] sm:$0xff]   ;;  %10267 = vmatprep.mubr.msk.bf16.mxu0 %vm2031_vm2, %v10883_v9  ;;  %v10886_v12 = vld [vmem:[%s11305_s9 + $0x408] sm:$0xff]   ;;  %v10888_v14 = vld [vmem:[%s11305_s9 + $0x410] sm:$0xff]  }
  0x18   : > { %10264 = vmatpush3.bf16.msra.mxu0 %v10881_v5  ;;  %10787 = vmatpush3.bf16.msra.mxu1 %v10881_v5  ;;  %v10889_v15 = vld [vmem:[%s11305_s9 + $0x18] sm:$0xff]   ;;  %v10891_v17 = vld [vmem:[%s11305_s9 + $0x20] sm:$0xff]   ;;  %v10893_v19 = vld [vmem:[%s11305_s9 + $0x28] sm:$0xff]  }
  0x19   : > { %10265 = vmatprep.subr.bf16.mxu0 %v2805_v8  ;;  %10783 = vmatprep.subr.bf16.mxu1 %v2805_v8  ;;  %v10890_v16 = vld [vmem:[%s11305_s9 + $0x418] sm:$0xff]   ;;  %v10892_v18 = vld [vmem:[%s11305_s9 + $0x420] sm:$0xff]   ;;  %v10894_v20 = vld [vmem:[%s11305_s9 + $0x428] sm:$0xff]  }
  0x1a   : > { %10523 = vmatprep.mubr.msk.bf16.mxu1 %vm2031_vm2, %v10884_v10  ;;  %v10895_v21 = vld [vmem:[%s11305_s9 + $0x30] sm:$0xff]   ;;  %v10897_v23 = vld [vmem:[%s11305_s9 + $0x38] sm:$0xff]   ;;  %v10899_v25 = vld [vmem:[%s11305_s9 + $0x40] sm:$0xff]  }
  0x1b   : > { %v10896_v22 = vld [vmem:[%s11305_s9 + $0x430] sm:$0xff]   ;;  %v10898_v24 = vld [vmem:[%s11305_s9 + $0x438] sm:$0xff]   ;;  %v10900_v26 = vld [vmem:[%s11305_s9 + $0x440] sm:$0xff]  }
  0x1c   : > { %10266 = vmatpush3.bf16.msra.mxu0 %v2805_v8  ;;  %10788 = vmatpush3.bf16.msra.mxu1 %v2805_v8  ;;  %v10901_v27 = vld [vmem:[%s11305_s9 + $0x48] sm:$0xff]   ;;  %v10903_v29 = vld [vmem:[%s11305_s9 + $0x50] sm:$0xff]   ;;  %v10905_v31 = vld [vmem:[%s11305_s9 + $0x58] sm:$0xff]  }
  0x1d   : > { %v10902_v28 = vld [vmem:[%s11305_s9 + $0x448] sm:$0xff]   ;;  %v10904_v30 = vld [vmem:[%s11305_s9 + $0x450] sm:$0xff]   ;;  %v10906_v32 = vld [vmem:[%s11305_s9 + $0x458] sm:$0xff]  }
  0x1e   : > { %v10907_v33 = vld [vmem:[%s11305_s9 + $0x60] sm:$0xff]   ;;  %v10909_v35 = vld [vmem:[%s11305_s9 + $0x68] sm:$0xff]   ;;  %v10911_v37 = vld [vmem:[%s11305_s9 + $0x70] sm:$0xff]  }
  0x1f   : > { %10268 = vmatmul.mubr.msk.bf16.vlgmr.msra.gmra.mrb[0].mxu0 %vm2031_vm2, %v10885_v11  ;;  %10524 = vmatmul.mubr.msk.bf16.vlgmr.msra.gmra.mrb[0].mxu1 %vm2031_vm2, %v10886_v12  ;;  %v10908_v34 = vld [vmem:[%s11305_s9 + $0x460] sm:$0xff]   ;;  %v10910_v36 = vld [vmem:[%s11305_s9 + $0x468] sm:$0xff]   ;;  %v10912_v38 = vld [vmem:[%s11305_s9 + $0x470] sm:$0xff]  }
  0x20   : > { %10271 = vmatprep.mubr.msk.bf16.mxu0 %vm2031_vm2, %v10887_v13  ;;  %10527 = vmatprep.mubr.msk.bf16.mxu1 %vm2031_vm2, %v10888_v14  ;;  %v10913_v39 = vld [vmem:[%s11305_s9 + $0x78] sm:$0xff]   ;;  %v10915_v41 = vld [vmem:[%s11305_s9 + $0x80] sm:$0xff]   ;;  %v10917_v43 = vld [vmem:[%s11305_s9 + $0x88] sm:$0xff]  }
  0x21   : > { %v10914_v40 = vld [vmem:[%s11305_s9 + $0x478] sm:$0xff]   ;;  %v10916_v42 = vld [vmem:[%s11305_s9 + $0x480] sm:$0xff]   ;;  %v10918_v44 = vld [vmem:[%s11305_s9 + $0x488] sm:$0xff]  }
  0x22   : > { %v10919_v45 = vld [vmem:[%s11305_s9 + $0x90] sm:$0xff]   ;;  %v10921_v47 = vld [vmem:[%s11305_s9 + $0x98] sm:$0xff]   ;;  %v10923_v49 = vld [vmem:[%s11305_s9 + $0xa0] sm:$0xff]  }
  0x23   : > { %v10920_v46 = vld [vmem:[%s11305_s9 + $0x490] sm:$0xff]   ;;  %v10922_v48 = vld [vmem:[%s11305_s9 + $0x498] sm:$0xff]   ;;  %v10924_v50 = vld [vmem:[%s11305_s9 + $0x4a0] sm:$0xff]  }
  0x24   : > { %v10925_v51 = vld [vmem:[%s11305_s9 + $0xa8] sm:$0xff]   ;;  %v10927_v53 = vld [vmem:[%s11305_s9 + $0xb0] sm:$0xff]   ;;  %v10929_v55 = vld [vmem:[%s11305_s9 + $0xb8] sm:$0xff]  }
  0x25   : > { %v10926_v52 = vld [vmem:[%s11305_s9 + $0x4a8] sm:$0xff]   ;;  %v10928_v54 = vld [vmem:[%s11305_s9 + $0x4b0] sm:$0xff]   ;;  %v10930_v56 = vld [vmem:[%s11305_s9 + $0x4b8] sm:$0xff]  }
  0x26   : > { %v10931_v57 = vld [vmem:[%s11305_s9 + $0xc0] sm:$0xff]   ;;  %v10933_v59 = vld [vmem:[%s11305_s9 + $0xc8] sm:$0xff]   ;;  %v10935_v61 = vld [vmem:[%s11305_s9 + $0xd0] sm:$0xff]  }
  0x27   : > { %10272 = vmatmul.mubr.msk.bf16.gmra.mrb[4].mxu0 %vm2031_vm2, %v10889_v15  ;;  %10528 = vmatmul.mubr.msk.bf16.gmra.mrb[4].mxu1 %vm2031_vm2, %v10890_v16  ;;  %v10932_v58 = vld [vmem:[%s11305_s9 + $0x4c0] sm:$0xff]   ;;  %v10934_v60 = vld [vmem:[%s11305_s9 + $0x4c8] sm:$0xff]   ;;  %v10936_v62 = vld [vmem:[%s11305_s9 + $0x4d0] sm:$0xff]  }
  0x28   : > { %10275 = vmatprep.mubr.msk.bf16.mxu0 %vm2031_vm2, %v10891_v17  ;;  %10531 = vmatprep.mubr.msk.bf16.mxu1 %vm2031_vm2, %v10892_v18  ;;  %v10937_v63 = vld [vmem:[%s11305_s9 + $0xd8] sm:$0xff]   ;;  %v10939_v1 = vld [vmem:[%s11305_s9 + $0xe0] sm:$0xff]   ;;  %v10941_v3 = vld [vmem:[%s11305_s9 + $0xe8] sm:$0xff]  }
  0x29   : > { %v10938_v0 = vld [vmem:[%s11305_s9 + $0x4d8] sm:$0xff]   ;;  %v10940_v2 = vld [vmem:[%s11305_s9 + $0x4e0] sm:$0xff]   ;;  %v10942_v4 = vld [vmem:[%s11305_s9 + $0x4e8] sm:$0xff]  }
  0x2a   : > { %v10943_v5 = vld [vmem:[%s11305_s9 + $0xf0] sm:$0xff]   ;;  %v10945_v7 = vld [vmem:[%s11305_s9 + $0xf8] sm:$0xff]   ;;  %v10947_v9 = vld [vmem:[%s11305_s9 + $0x100] sm:$0xff]  }
  0x2b   : > { %v10944_v6 = vld [vmem:[%s11305_s9 + $0x4f0] sm:$0xff]   ;;  %v10946_v8 = vld [vmem:[%s11305_s9 + $0x4f8] sm:$0xff]   ;;  %v10948_v10 = vld [vmem:[%s11305_s9 + $0x500] sm:$0xff]  }
  0x2c   : > { %v10949_v11 = vld [vmem:[%s11305_s9 + $0x108] sm:$0xff]   ;;  %v10951_v13 = vld [vmem:[%s11305_s9 + $0x110] sm:$0xff]   ;;  %v10953_v15 = vld [vmem:[%s11305_s9 + $0x118] sm:$0xff]  }
  0x2d   : > { %v10950_v12 = vld [vmem:[%s11305_s9 + $0x508] sm:$0xff]   ;;  %v10952_v14 = vld [vmem:[%s11305_s9 + $0x510] sm:$0xff]   ;;  %v10954_v16 = vld [vmem:[%s11305_s9 + $0x518] sm:$0xff]  }
  0x2e   : > { %v10955_v17 = vld [vmem:[%s11305_s9 + $0x120] sm:$0xff]  }
  0x2f   : > { %10276 = vmatmul.mubr.msk.bf16.gmra.mrb[8].mxu0 %vm2031_vm2, %v10893_v19  ;;  %10532 = vmatmul.mubr.msk.bf16.gmra.mrb[8].mxu1 %vm2031_vm2, %v10894_v20  ;;  %v10956_v18 = vld [vmem:[%s11305_s9 + $0x520] sm:$0xff]   ;;  %v10957_v19 = vld [vmem:[%s11305_s9 + $0x128] sm:$0xff]  }
  0x30   : > { %10279 = vmatprep.mubr.msk.bf16.mxu0 %vm2031_vm2, %v10895_v21  ;;  %10535 = vmatprep.mubr.msk.bf16.mxu1 %vm2031_vm2, %v10896_v22  ;;  %v10958_v20 = vld [vmem:[%s11305_s9 + $0x528] sm:$0xff]   ;;  %v10959_v21 = vld [vmem:[%s11305_s9 + $0x130] sm:$0xff]  }
  0x31   : > { %v10960_v22 = vld [vmem:[%s11305_s9 + $0x530] sm:$0xff]  }
  0x37   : > { %10280 = vmatmul.mubr.msk.bf16.gmra.mrb[12].mxu0 %vm2031_vm2, %v10897_v23  ;;  %10536 = vmatmul.mubr.msk.bf16.gmra.mrb[12].mxu1 %vm2031_vm2, %v10898_v24  ;;  %v10961_v23 = vld [vmem:[%s11305_s9 + $0x138] sm:$0xff]  }
  0x38   : > { %10283 = vmatprep.mubr.msk.bf16.mxu0 %vm2031_vm2, %v10899_v25  ;;  %10539 = vmatprep.mubr.msk.bf16.mxu1 %vm2031_vm2, %v10900_v26  ;;  %v10962_v24 = vld [vmem:[%s11305_s9 + $0x538] sm:$0xff]   ;;  %v10963_v25 = vld [vmem:[%s11305_s9 + $0x140] sm:$0xff]  }
  0x39   : > { %v10964_v26 = vld [vmem:[%s11305_s9 + $0x540] sm:$0xff]  }
  0x3f   : > { %10284 = vmatmul.mubr.msk.bf16.gmra.mrb[16].mxu0 %vm2031_vm2, %v10901_v27  ;;  %10540 = vmatmul.mubr.msk.bf16.gmra.mrb[16].mxu1 %vm2031_vm2, %v10902_v28  ;;  %v10965_v27 = vld [vmem:[%s11305_s9 + $0x148] sm:$0xff]  }
  0x40   : > { %10287 = vmatprep.mubr.msk.bf16.mxu0 %vm2031_vm2, %v10903_v29  ;;  %10543 = vmatprep.mubr.msk.bf16.mxu1 %vm2031_vm2, %v10904_v30  ;;  %v10966_v28 = vld [vmem:[%s11305_s9 + $0x548] sm:$0xff]   ;;  %v10967_v29 = vld [vmem:[%s11305_s9 + $0x150] sm:$0xff]  }
  0x41   : > { %v10968_v30 = vld [vmem:[%s11305_s9 + $0x550] sm:$0xff]  }
  0x47   : > { %10288 = vmatmul.mubr.msk.bf16.gmra.mrb[20].mxu0 %vm2031_vm2, %v10905_v31  ;;  %10544 = vmatmul.mubr.msk.bf16.gmra.mrb[20].mxu1 %vm2031_vm2, %v10906_v32  ;;  %v10969_v31 = vld [vmem:[%s11305_s9 + $0x158] sm:$0xff]  }
  0x48   : > { %10291 = vmatprep.mubr.msk.bf16.mxu0 %vm2031_vm2, %v10907_v33  ;;  %10547 = vmatprep.mubr.msk.bf16.mxu1 %vm2031_vm2, %v10908_v34  ;;  %v10970_v32 = vld [vmem:[%s11305_s9 + $0x558] sm:$0xff]   ;;  %v10971_v33 = vld [vmem:[%s11305_s9 + $0x160] sm:$0xff]  }
  0x49   : > { %v10972_v34 = vld [vmem:[%s11305_s9 + $0x560] sm:$0xff]  }
  0x4f   : > { %10292 = vmatmul.mubr.msk.bf16.gmra.mrb[24].mxu0 %vm2031_vm2, %v10909_v35  ;;  %10548 = vmatmul.mubr.msk.bf16.gmra.mrb[24].mxu1 %vm2031_vm2, %v10910_v36  ;;  %v10973_v35 = vld [vmem:[%s11305_s9 + $0x168] sm:$0xff]  }
  0x50   : > { %10295 = vmatprep.mubr.msk.bf16.mxu0 %vm2031_vm2, %v10911_v37  ;;  %10551 = vmatprep.mubr.msk.bf16.mxu1 %vm2031_vm2, %v10912_v38  ;;  %v10974_v36 = vld [vmem:[%s11305_s9 + $0x568] sm:$0xff]   ;;  %v10975_v37 = vld [vmem:[%s11305_s9 + $0x170] sm:$0xff]  }
  0x51   : > { %v10976_v38 = vld [vmem:[%s11305_s9 + $0x570] sm:$0xff]  }
  0x57   : > { %10296 = vmatmul.mubr.msk.bf16.gmra.mrb[28].mxu0 %vm2031_vm2, %v10913_v39  ;;  %10552 = vmatmul.mubr.msk.bf16.gmra.mrb[28].mxu1 %vm2031_vm2, %v10914_v40  ;;  %v10977_v39 = vld [vmem:[%s11305_s9 + $0x178] sm:$0xff]  }
  0x58   : > { %10299 = vmatprep.mubr.msk.bf16.mxu0 %vm2031_vm2, %v10915_v41  ;;  %10555 = vmatprep.mubr.msk.bf16.mxu1 %vm2031_vm2, %v10916_v42  ;;  %v10978_v40 = vld [vmem:[%s11305_s9 + $0x578] sm:$0xff]   ;;  %v10979_v41 = vld [vmem:[%s11305_s9 + $0x180] sm:$0xff]  }
  0x59   : > { %v10980_v42 = vld [vmem:[%s11305_s9 + $0x580] sm:$0xff]  }
  0x5f   : > { %10300 = vmatmul.mubr.msk.bf16.gmra.mrb[32].mxu0 %vm2031_vm2, %v10917_v43  ;;  %10556 = vmatmul.mubr.msk.bf16.gmra.mrb[32].mxu1 %vm2031_vm2, %v10918_v44  ;;  %v10981_v43 = vld [vmem:[%s11305_s9 + $0x188] sm:$0xff]  }
  0x60   : > { %10303 = vmatprep.mubr.msk.bf16.mxu0 %vm2031_vm2, %v10919_v45  ;;  %10559 = vmatprep.mubr.msk.bf16.mxu1 %vm2031_vm2, %v10920_v46  ;;  %v10982_v44 = vld [vmem:[%s11305_s9 + $0x588] sm:$0xff]   ;;  %v10983_v45 = vld [vmem:[%s11305_s9 + $0x190] sm:$0xff]  }
  0x61   : > { %v10984_v46 = vld [vmem:[%s11305_s9 + $0x590] sm:$0xff]  }
  0x67   : > { %10304 = vmatmul.mubr.msk.bf16.gmra.mrb[36].mxu0 %vm2031_vm2, %v10921_v47  ;;  %10560 = vmatmul.mubr.msk.bf16.gmra.mrb[36].mxu1 %vm2031_vm2, %v10922_v48  ;;  %v10985_v47 = vld [vmem:[%s11305_s9 + $0x198] sm:$0xff]  }
  0x68   : > { %10307 = vmatprep.mubr.msk.bf16.mxu0 %vm2031_vm2, %v10923_v49  ;;  %10563 = vmatprep.mubr.msk.bf16.mxu1 %vm2031_vm2, %v10924_v50  ;;  %v10986_v48 = vld [vmem:[%s11305_s9 + $0x598] sm:$0xff]   ;;  %v10987_v49 = vld [vmem:[%s11305_s9 + $0x1a0] sm:$0xff]  }
  0x69   : > { %v10988_v50 = vld [vmem:[%s11305_s9 + $0x5a0] sm:$0xff]  }
  0x6f   : > { %10308 = vmatmul.mubr.msk.bf16.gmra.mrb[40].mxu0 %vm2031_vm2, %v10925_v51  ;;  %10564 = vmatmul.mubr.msk.bf16.gmra.mrb[40].mxu1 %vm2031_vm2, %v10926_v52  ;;  %v10989_v51 = vld [vmem:[%s11305_s9 + $0x1a8] sm:$0xff]  }
  0x70   : > { %10311 = vmatprep.mubr.msk.bf16.mxu0 %vm2031_vm2, %v10927_v53  ;;  %10567 = vmatprep.mubr.msk.bf16.mxu1 %vm2031_vm2, %v10928_v54  ;;  %v10990_v52 = vld [vmem:[%s11305_s9 + $0x5a8] sm:$0xff]   ;;  %v10991_v53 = vld [vmem:[%s11305_s9 + $0x1b0] sm:$0xff]  }
  0x71   : > { %v10992_v54 = vld [vmem:[%s11305_s9 + $0x5b0] sm:$0xff]  }
  0x77   : > { %10312 = vmatmul.mubr.msk.bf16.gmra.mrb[44].mxu0 %vm2031_vm2, %v10929_v55  ;;  %10568 = vmatmul.mubr.msk.bf16.gmra.mrb[44].mxu1 %vm2031_vm2, %v10930_v56  ;;  %v11529_v55 = vld [vmem:[%s13592_s2] ss:$0 sm:$0xff]  ;;  %v10993_v56 = vld [vmem:[%s11305_s9 + $0x1b8] sm:$0xff]  }
  0x78   : > { %10315 = vmatprep.mubr.msk.bf16.mxu0 %vm2031_vm2, %v10931_v57  ;;  %10571 = vmatprep.mubr.msk.bf16.mxu1 %vm2031_vm2, %v10932_v58  ;;  %v10994_v57 = vld [vmem:[%s11305_s9 + $0x5b8] sm:$0xff]  }
  0x7f   : > { %10316 = vmatmul.mubr.msk.bf16.gmra.mrb[48].mxu0 %vm2031_vm2, %v10933_v59  ;;  %10572 = vmatmul.mubr.msk.bf16.gmra.mrb[48].mxu1 %vm2031_vm2, %v10934_v60 }
  0x80   : > { %10319 = vmatprep.mubr.msk.bf16.mxu0 %vm2031_vm2, %v10935_v61  ;;  %10575 = vmatprep.mubr.msk.bf16.mxu1 %vm2031_vm2, %v10936_v62 }
  0x87   : > { %10320 = vmatmul.mubr.msk.bf16.gmra.mrb[52].mxu0 %vm2031_vm2, %v10937_v63  ;;  %10576 = vmatmul.mubr.msk.bf16.gmra.mrb[52].mxu1 %vm2031_vm2, %v10938_v0 }
  0x88   : > { %10323 = vmatprep.mubr.msk.bf16.mxu0 %vm2031_vm2, %v10939_v1  ;;  %10579 = vmatprep.mubr.msk.bf16.mxu1 %vm2031_vm2, %v10940_v2 }
  0x8f   : > { %10324 = vmatmul.mubr.msk.bf16.gmra.mrb[56].mxu0 %vm2031_vm2, %v10941_v3  ;;  %10580 = vmatmul.mubr.msk.bf16.gmra.mrb[56].mxu1 %vm2031_vm2, %v10942_v4  ;;  %v10995_v4 = vld [vmem:[%s11305_s9 + $0x1c0] sm:$0xff]  }
  0x90   : > { %10327 = vmatprep.mubr.msk.bf16.mxu0 %vm2031_vm2, %v10943_v5  ;;  %10583 = vmatprep.mubr.msk.bf16.mxu1 %vm2031_vm2, %v10944_v6  ;;  %v10996_v5 = vld [vmem:[%s11305_s9 + $0x5c0] sm:$0xff]  }
  0x97   : > { %10328 = vmatmul.mubr.msk.bf16.gmra.mrb[60].mxu0 %vm2031_vm2, %v10945_v7  ;;  %10584 = vmatmul.mubr.msk.bf16.gmra.mrb[60].mxu1 %vm2031_vm2, %v10946_v8 }
  0x98   : > { %10331 = vmatprep.mubr.msk.bf16.mxu0 %vm2031_vm2, %v10947_v9  ;;  %10587 = vmatprep.mubr.msk.bf16.mxu1 %vm2031_vm2, %v10948_v10 }
  0x9f   : > { %10332 = vmatmul.mubr.msk.bf16.gmra.mrb[64].mxu0 %vm2031_vm2, %v10949_v11  ;;  %10588 = vmatmul.mubr.msk.bf16.gmra.mrb[64].mxu1 %vm2031_vm2, %v10950_v12 }
  0xa0   : > { %10335 = vmatprep.mubr.msk.bf16.mxu0 %vm2031_vm2, %v10951_v13  ;;  %10591 = vmatprep.mubr.msk.bf16.mxu1 %vm2031_vm2, %v10952_v14 }
  0xa7   : > { %10336 = vmatmul.mubr.msk.bf16.gmra.mrb[68].mxu0 %vm2031_vm2, %v10953_v15  ;;  %10592 = vmatmul.mubr.msk.bf16.gmra.mrb[68].mxu1 %vm2031_vm2, %v10954_v16 }
  0xa8   : > { %10339 = vmatprep.mubr.msk.bf16.mxu0 %vm2031_vm2, %v10955_v17  ;;  %10595 = vmatprep.mubr.msk.bf16.mxu1 %vm2031_vm2, %v10956_v18 }
  0xaf   : > { %10340 = vmatmul.mubr.msk.bf16.gmra.mrb[72].mxu0 %vm2031_vm2, %v10957_v19  ;;  %10596 = vmatmul.mubr.msk.bf16.gmra.mrb[72].mxu1 %vm2031_vm2, %v10958_v20 }
  0xb0   : > { %10343 = vmatprep.mubr.msk.bf16.mxu0 %vm2031_vm2, %v10959_v21  ;;  %10599 = vmatprep.mubr.msk.bf16.mxu1 %vm2031_vm2, %v10960_v22 }
  0xb7   : > { %10344 = vmatmul.mubr.msk.bf16.gmra.mrb[76].mxu0 %vm2031_vm2, %v10961_v23  ;;  %10600 = vmatmul.mubr.msk.bf16.gmra.mrb[76].mxu1 %vm2031_vm2, %v10962_v24 }
  0xb8   : > { %10347 = vmatprep.mubr.msk.bf16.mxu0 %vm2031_vm2, %v10963_v25  ;;  %10603 = vmatprep.mubr.msk.bf16.mxu1 %vm2031_vm2, %v10964_v26  ;;  %v10997_v26 = vld [vmem:[%s11305_s9 + $0x1c8] sm:$0xff]  }
  0xbf   : > { %10348 = vmatmul.mubr.msk.bf16.gmra.mrb[80].mxu0 %vm2031_vm2, %v10965_v27  ;;  %10604 = vmatmul.mubr.msk.bf16.gmra.mrb[80].mxu1 %vm2031_vm2, %v10966_v28  ;;  %v10998_v27 = vld [vmem:[%s11305_s9 + $0x5c8] sm:$0xff]  }
  0xc0   : > { %10351 = vmatprep.mubr.msk.bf16.mxu0 %vm2031_vm2, %v10967_v29  ;;  %10607 = vmatprep.mubr.msk.bf16.mxu1 %vm2031_vm2, %v10968_v30 }
  0xc7   : > { %10352 = vmatmul.mubr.msk.bf16.gmra.mrb[84].mxu0 %vm2031_vm2, %v10969_v31  ;;  %10608 = vmatmul.mubr.msk.bf16.gmra.mrb[84].mxu1 %vm2031_vm2, %v10970_v32 }
  0xc8   : > { %10355 = vmatprep.mubr.msk.bf16.mxu0 %vm2031_vm2, %v10971_v33  ;;  %10611 = vmatprep.mubr.msk.bf16.mxu1 %vm2031_vm2, %v10972_v34 }
  0xcf   : > { %10356 = vmatmul.mubr.msk.bf16.gmra.mrb[88].mxu0 %vm2031_vm2, %v10973_v35  ;;  %10612 = vmatmul.mubr.msk.bf16.gmra.mrb[88].mxu1 %vm2031_vm2, %v10974_v36 }
  0xd0   : > { %10359 = vmatprep.mubr.msk.bf16.mxu0 %vm2031_vm2, %v10975_v37  ;;  %10615 = vmatprep.mubr.msk.bf16.mxu1 %vm2031_vm2, %v10976_v38 }
  0xd7   : > { %10360 = vmatmul.mubr.msk.bf16.gmra.mrb[92].mxu0 %vm2031_vm2, %v10977_v39  ;;  %10616 = vmatmul.mubr.msk.bf16.gmra.mrb[92].mxu1 %vm2031_vm2, %v10978_v40  ;;  %v10999_v40 = vld [vmem:[%s11305_s9 + $0x1d0] sm:$0xff]  }
  0xd8   : > { %10363 = vmatprep.mubr.msk.bf16.mxu0 %vm2031_vm2, %v10979_v41  ;;  %10619 = vmatprep.mubr.msk.bf16.mxu1 %vm2031_vm2, %v10980_v42  ;;  %v11000_v41 = vld [vmem:[%s11305_s9 + $0x5d0] sm:$0xff]  }
  0xdf   : > { %10364 = vmatmul.mubr.msk.bf16.gmra.mrb[96].mxu0 %vm2031_vm2, %v10981_v43  ;;  %10620 = vmatmul.mubr.msk.bf16.gmra.mrb[96].mxu1 %vm2031_vm2, %v10982_v44 }
  0xe0   : > { %10367 = vmatprep.mubr.msk.bf16.mxu0 %vm2031_vm2, %v10983_v45  ;;  %10623 = vmatprep.mubr.msk.bf16.mxu1 %vm2031_vm2, %v10984_v46 }
  0xe7   : > { %10368 = vmatmul.mubr.msk.bf16.gmra.mrb[100].mxu0 %vm2031_vm2, %v10985_v47  ;;  %10624 = vmatmul.mubr.msk.bf16.gmra.mrb[100].mxu1 %vm2031_vm2, %v10986_v48 }
  0xe8   : > { %10371 = vmatprep.mubr.msk.bf16.mxu0 %vm2031_vm2, %v10987_v49  ;;  %10627 = vmatprep.mubr.msk.bf16.mxu1 %vm2031_vm2, %v10988_v50 }
  0xef   : > { %10372 = vmatmul.mubr.msk.bf16.gmra.mrb[104].mxu0 %vm2031_vm2, %v10989_v51  ;;  %10628 = vmatmul.mubr.msk.bf16.gmra.mrb[104].mxu1 %vm2031_vm2, %v10990_v52 }
  0xf0   : > { %10375 = vmatprep.mubr.msk.bf16.mxu0 %vm2031_vm2, %v10991_v53  ;;  %10631 = vmatprep.mubr.msk.bf16.mxu1 %vm2031_vm2, %v10992_v54 }
  0xf2   : > { %v10269_v58 = vpop.f32.mrb[0].mxu0  ;;  %v10525_v59 = vpop.f32.mrb[0].mxu1 }
  0xf3   : > { %v2850_v60 = vadd.f32 %v10269_v58, %v11529_v55  ;;  %v3874_v61 = vadd.f32 %v10525_v59, %v11529_v55  ;;  %v2841_v62 = vpop.f32.mrb[1].mxu0  ;;  %v3865_v63 = vpop.f32.mrb[1].mxu1 }
  0xf4   : > { %v2842_v0 = vadd.f32 %v11529_v55, %v2841_v62  ;;  %v3866_v1 = vadd.f32 %v11529_v55, %v3865_v63  ;;  %v10270_v2 = vpop.f32.mrb[2].mxu0  ;;  %v10526_v3 = vpop.f32.mrb[2].mxu1 }
  0xf5   : > { %v4890_v6 = vmax.f32 %v2850_v60, 0.0  ;;  %v5146_v7 = vmax.f32 %v3874_v61, 0.0  ;;  %v2853_v8 = vadd.f32 %v10270_v2, %v11529_v55  ;;  %v3877_v9 = vadd.f32 %v10526_v3, %v11529_v55  ;;  %v2844_v10 = vpop.f32.mrb[3].mxu0  ;;  %v3868_v11 = vpop.f32.mrb[3].mxu1 }
  0xf6   : > { %v4888_v12 = vmax.f32 %v2842_v0, 0.0  ;;  %v5144_v13 = vmax.f32 %v3866_v1, 0.0  ;;  %v2845_v14 = vadd.f32 %v11529_v55, %v2844_v10  ;;  %v3869_v15 = vadd.f32 %v11529_v55, %v3868_v11 }
  0xf7   : > { %v9483_v16 = vpack.c.bf16 %v4890_v6, %v4890_v6  ;;  %v9739_v17 = vpack.c.bf16 %v5146_v7, %v5146_v7  ;;  %v4891_v18 = vmax.f32 %v2853_v8, 0.0  ;;  %v5147_v19 = vmax.f32 %v3877_v9, 0.0  ;;  %10376 = vmatmul.mubr.msk.bf16.gmra.mrb[108].mxu0 %vm2031_vm2, %v10993_v56  ;;  %10632 = vmatmul.mubr.msk.bf16.gmra.mrb[108].mxu1 %vm2031_vm2, %v10994_v57  ;;  %v11001_v7 = vld [vmem:[%s11305_s9 + $0x1d8] sm:$0xff]  }
  0xf8   : > { %v9481_v20 = vpack.c.bf16 %v4888_v12, %v4888_v12  ;;  %v9737_v21 = vpack.c.bf16 %v5144_v13, %v5144_v13  ;;  %v4889_v22 = vmax.f32 %v2845_v14, 0.0  ;;  %v5145_v23 = vmax.f32 %v3869_v15, 0.0  ;;  %10379 = vmatprep.mubr.msk.bf16.mxu0 %vm2031_vm2, %v10995_v4  ;;  %10635 = vmatprep.mubr.msk.bf16.mxu1 %vm2031_vm2, %v10996_v5  ;;  %v11002_v8 = vld [vmem:[%s11305_s9 + $0x5d8] sm:$0xff]   ;;  %v11003_v13 = vld [vmem:[%s11305_s9 + $0x1e0] sm:$0xff]  }
  0xf9   : > { %7451 = vst.msk [vmem:[%s11552_s12 + $0x8] sm:$0xf] %vm7448_vm3, %v9483_v16  ;;  %7707 = vst.msk [vmem:[%s11552_s12 + $0x408] sm:$0xf] %vm7448_vm3, %v9739_v17  ;;  %v9484_v24 = vpack.c.bf16 %v4891_v18, %v4891_v18  ;;  %v9740_v25 = vpack.c.bf16 %v5147_v19, %v5147_v19  ;;  %v11004_v14 = vld [vmem:[%s11305_s9 + $0x5e0] sm:$0xff]  }
  0xfa   : > { %7449 = vst.msk [vmem:[%s11552_s12] sm:$0xf] %vm7448_vm3, %v9481_v20  ;;  %7705 = vst.msk [vmem:[%s11552_s12 + $0x400] sm:$0xf] %vm7448_vm3, %v9737_v21  ;;  %v9482_v28 = vpack.c.bf16 %v4889_v22, %v4889_v22  ;;  %v9738_v29 = vpack.c.bf16 %v5145_v23, %v5145_v23  ;;  %v10273_v30 = vpop.f32.mrb[4].mxu0  ;;  %v10529_v31 = vpop.f32.mrb[4].mxu1 }
  0xfb   : > { %7452 = vst.msk [vmem:[%s11552_s12 + $0xc] sm:$0xf] %vm7448_vm3, %v9484_v24  ;;  %7708 = vst.msk [vmem:[%s11552_s12 + $0x40c] sm:$0xf] %vm7448_vm3, %v9740_v25  ;;  %v2866_v32 = vadd.f32 %v10273_v30, %v11529_v55  ;;  %v3890_v33 = vadd.f32 %v10529_v31, %v11529_v55  ;;  %v2857_v34 = vpop.f32.mrb[5].mxu0  ;;  %v3881_v35 = vpop.f32.mrb[5].mxu1 }
  0xfc   : > { %7450 = vst.msk [vmem:[%s11552_s12 + $0x4] sm:$0xf] %vm7448_vm3, %v9482_v28  ;;  %7706 = vst.msk [vmem:[%s11552_s12 + $0x404] sm:$0xf] %vm7448_vm3, %v9738_v29  ;;  %v2858_v36 = vadd.f32 %v11529_v55, %v2857_v34  ;;  %v3882_v37 = vadd.f32 %v11529_v55, %v3881_v35  ;;  %v10274_v38 = vpop.f32.mrb[6].mxu0  ;;  %v10530_v39 = vpop.f32.mrb[6].mxu1 }
  0xfd   : > { %v4894_v42 = vmax.f32 %v2866_v32, 0.0  ;;  %v5150_v43 = vmax.f32 %v3890_v33, 0.0  ;;  %v2869_v44 = vadd.f32 %v10274_v38, %v11529_v55  ;;  %v3893_v45 = vadd.f32 %v10530_v39, %v11529_v55  ;;  %v2860_v46 = vpop.f32.mrb[7].mxu0  ;;  %v3884_v47 = vpop.f32.mrb[7].mxu1 }
  0xfe   : > { %v4892_v48 = vmax.f32 %v2858_v36, 0.0  ;;  %v5148_v49 = vmax.f32 %v3882_v37, 0.0  ;;  %v2861_v50 = vadd.f32 %v11529_v55, %v2860_v46  ;;  %v3885_v51 = vadd.f32 %v11529_v55, %v3884_v47 }
  0xff   : > { %v9487_v52 = vpack.c.bf16 %v4894_v42, %v4894_v42  ;;  %v9743_v53 = vpack.c.bf16 %v5150_v43, %v5150_v43  ;;  %v4895_v54 = vmax.f32 %v2869_v44, 0.0  ;;  %v5151_v56 = vmax.f32 %v3893_v45, 0.0  ;;  %10380 = vmatmul.mubr.msk.bf16.gmra.mrb[112].mxu0 %vm2031_vm2, %v10997_v26  ;;  %10636 = vmatmul.mubr.msk.bf16.gmra.mrb[112].mxu1 %vm2031_vm2, %v10998_v27  ;;  %v11005_v43 = vld [vmem:[%s11305_s9 + $0x1e8] sm:$0xff]  }
 0x100   : > { %v9485_v57 = vpack.c.bf16 %v4892_v48, %v4892_v48  ;;  %v9741_v58 = vpack.c.bf16 %v5148_v49, %v5148_v49  ;;  %v4893_v59 = vmax.f32 %v2861_v50, 0.0  ;;  %v5149_v60 = vmax.f32 %v3885_v51, 0.0  ;;  %10383 = vmatprep.mubr.msk.bf16.mxu0 %vm2031_vm2, %v10999_v40  ;;  %10639 = vmatprep.mubr.msk.bf16.mxu1 %vm2031_vm2, %v11000_v41  ;;  %v11006_v44 = vld [vmem:[%s11305_s9 + $0x5e8] sm:$0xff]   ;;  %v11007_v49 = vld [vmem:[%s11305_s9 + $0x1f0] sm:$0xff]  }
 0x101   : > { %7455 = vst.msk [vmem:[%s11552_s12 + $0x18] sm:$0xf] %vm7448_vm3, %v9487_v52  ;;  %7711 = vst.msk [vmem:[%s11552_s12 + $0x418] sm:$0xf] %vm7448_vm3, %v9743_v53  ;;  %v9488_v61 = vpack.c.bf16 %v4895_v54, %v4895_v54  ;;  %v9744_v62 = vpack.c.bf16 %v5151_v56, %v5151_v56  ;;  %v11008_v50 = vld [vmem:[%s11305_s9 + $0x5f0] sm:$0xff]  }
 0x102   : > { %7453 = vst.msk [vmem:[%s11552_s12 + $0x10] sm:$0xf] %vm7448_vm3, %v9485_v57  ;;  %7709 = vst.msk [vmem:[%s11552_s12 + $0x410] sm:$0xf] %vm7448_vm3, %v9741_v58  ;;  %v9486_v63 = vpack.c.bf16 %v4893_v59, %v4893_v59  ;;  %v9742_v0 = vpack.c.bf16 %v5149_v60, %v5149_v60  ;;  %v10277_v1 = vpop.f32.mrb[8].mxu0  ;;  %v10533_v2 = vpop.f32.mrb[8].mxu1 }
 0x103   : > { %7456 = vst.msk [vmem:[%s11552_s12 + $0x1c] sm:$0xf] %vm7448_vm3, %v9488_v61  ;;  %7712 = vst.msk [vmem:[%s11552_s12 + $0x41c] sm:$0xf] %vm7448_vm3, %v9744_v62  ;;  %v2882_v3 = vadd.f32 %v10277_v1, %v11529_v55  ;;  %v3906_v4 = vadd.f32 %v10533_v2, %v11529_v55  ;;  %v2873_v5 = vpop.f32.mrb[9].mxu0  ;;  %v3897_v6 = vpop.f32.mrb[9].mxu1 }
 0x104   : > { %7454 = vst.msk [vmem:[%s11552_s12 + $0x14] sm:$0xf] %vm7448_vm3, %v9486_v63  ;;  %7710 = vst.msk [vmem:[%s11552_s12 + $0x414] sm:$0xf] %vm7448_vm3, %v9742_v0  ;;  %v2874_v9 = vadd.f32 %v11529_v55, %v2873_v5  ;;  %v3898_v10 = vadd.f32 %v11529_v55, %v3897_v6  ;;  %v10278_v11 = vpop.f32.mrb[10].mxu0  ;;  %v10534_v12 = vpop.f32.mrb[10].mxu1 }
 0x105   : > { %v4898_v15 = vmax.f32 %v2882_v3, 0.0  ;;  %v5154_v16 = vmax.f32 %v3906_v4, 0.0  ;;  %v2885_v17 = vadd.f32 %v10278_v11, %v11529_v55  ;;  %v3909_v18 = vadd.f32 %v10534_v12, %v11529_v55  ;;  %v2876_v19 = vpop.f32.mrb[11].mxu0  ;;  %v3900_v20 = vpop.f32.mrb[11].mxu1 }
 0x106   : > { %v4896_v21 = vmax.f32 %v2874_v9, 0.0  ;;  %v5152_v22 = vmax.f32 %v3898_v10, 0.0  ;;  %v2877_v23 = vadd.f32 %v11529_v55, %v2876_v19  ;;  %v3901_v24 = vadd.f32 %v11529_v55, %v3900_v20 }
 0x107   : > { %v9491_v25 = vpack.c.bf16 %v4898_v15, %v4898_v15  ;;  %v9747_v26 = vpack.c.bf16 %v5154_v16, %v5154_v16  ;;  %v4899_v27 = vmax.f32 %v2885_v17, 0.0  ;;  %v5155_v28 = vmax.f32 %v3909_v18, 0.0  ;;  %10384 = vmatmul.mubr.msk.bf16.gmra.mrb[116].mxu0 %vm2031_vm2, %v11001_v7  ;;  %10640 = vmatmul.mubr.msk.bf16.gmra.mrb[116].mxu1 %vm2031_vm2, %v11002_v8  ;;  %v11009_v16 = vld [vmem:[%s11305_s9 + $0x1f8] sm:$0xff]  }
 0x108   : > { %v9489_v29 = vpack.c.bf16 %v4896_v21, %v4896_v21  ;;  %v9745_v30 = vpack.c.bf16 %v5152_v22, %v5152_v22  ;;  %v4897_v31 = vmax.f32 %v2877_v23, 0.0  ;;  %v5153_v32 = vmax.f32 %v3901_v24, 0.0  ;;  %10387 = vmatprep.mubr.msk.bf16.mxu0 %vm2031_vm2, %v11003_v13  ;;  %10643 = vmatprep.mubr.msk.bf16.mxu1 %vm2031_vm2, %v11004_v14  ;;  %v11010_v17 = vld [vmem:[%s11305_s9 + $0x5f8] sm:$0xff]   ;;  %v11011_v22 = vld [vmem:[%s11305_s9 + $0x200] sm:$0xff]  }
 0x109   : > { %7459 = vst.msk [vmem:[%s11552_s12 + $0x28] sm:$0xf] %vm7448_vm3, %v9491_v25  ;;  %7715 = vst.msk [vmem:[%s11552_s12 + $0x428] sm:$0xf] %vm7448_vm3, %v9747_v26  ;;  %v9492_v33 = vpack.c.bf16 %v4899_v27, %v4899_v27  ;;  %v9748_v34 = vpack.c.bf16 %v5155_v28, %v5155_v28  ;;  %v11012_v23 = vld [vmem:[%s11305_s9 + $0x600] sm:$0xff]  }
 0x10a   : > { %7457 = vst.msk [vmem:[%s11552_s12 + $0x20] sm:$0xf] %vm7448_vm3, %v9489_v29  ;;  %7713 = vst.msk [vmem:[%s11552_s12 + $0x420] sm:$0xf] %vm7448_vm3, %v9745_v30  ;;  %v9490_v35 = vpack.c.bf16 %v4897_v31, %v4897_v31  ;;  %v9746_v36 = vpack.c.bf16 %v5153_v32, %v5153_v32  ;;  %v10281_v37 = vpop.f32.mrb[12].mxu0  ;;  %v10537_v38 = vpop.f32.mrb[12].mxu1 }
 0x10b   : > { %7460 = vst.msk [vmem:[%s11552_s12 + $0x2c] sm:$0xf] %vm7448_vm3, %v9492_v33  ;;  %7716 = vst.msk [vmem:[%s11552_s12 + $0x42c] sm:$0xf] %vm7448_vm3, %v9748_v34  ;;  %v2898_v39 = vadd.f32 %v10281_v37, %v11529_v55  ;;  %v3922_v40 = vadd.f32 %v10537_v38, %v11529_v55  ;;  %v2889_v41 = vpop.f32.mrb[13].mxu0  ;;  %v3913_v42 = vpop.f32.mrb[13].mxu1 }
 0x10c   : > { %7458 = vst.msk [vmem:[%s11552_s12 + $0x24] sm:$0xf] %vm7448_vm3, %v9490_v35  ;;  %7714 = vst.msk [vmem:[%s11552_s12 + $0x424] sm:$0xf] %vm7448_vm3, %v9746_v36  ;;  %v2890_v45 = vadd.f32 %v11529_v55, %v2889_v41  ;;  %v3914_v46 = vadd.f32 %v11529_v55, %v3913_v42  ;;  %v10282_v47 = vpop.f32.mrb[14].mxu0  ;;  %v10538_v48 = vpop.f32.mrb[14].mxu1 }
 0x10d   : > { %v4902_v51 = vmax.f32 %v2898_v39, 0.0  ;;  %v5158_v52 = vmax.f32 %v3922_v40, 0.0  ;;  %v2901_v53 = vadd.f32 %v10282_v47, %v11529_v55  ;;  %v3925_v54 = vadd.f32 %v10538_v48, %v11529_v55  ;;  %v2892_v56 = vpop.f32.mrb[15].mxu0  ;;  %v3916_v57 = vpop.f32.mrb[15].mxu1 }
 0x10e   : > { %v4900_v58 = vmax.f32 %v2890_v45, 0.0  ;;  %v5156_v59 = vmax.f32 %v3914_v46, 0.0  ;;  %v2893_v60 = vadd.f32 %v11529_v55, %v2892_v56  ;;  %v3917_v61 = vadd.f32 %v11529_v55, %v3916_v57 }
 0x10f   : > { %v9495_v62 = vpack.c.bf16 %v4902_v51, %v4902_v51  ;;  %v9751_v63 = vpack.c.bf16 %v5158_v52, %v5158_v52  ;;  %v4903_v0 = vmax.f32 %v2901_v53, 0.0  ;;  %v5159_v1 = vmax.f32 %v3925_v54, 0.0  ;;  %10388 = vmatmul.mubr.msk.bf16.gmra.mrb[120].mxu0 %vm2031_vm2, %v11005_v43  ;;  %10644 = vmatmul.mubr.msk.bf16.gmra.mrb[120].mxu1 %vm2031_vm2, %v11006_v44  ;;  %v11013_v52 = vld [vmem:[%s11305_s9 + $0x208] sm:$0xff]  }
 0x110   : > { %v9493_v2 = vpack.c.bf16 %v4900_v58, %v4900_v58  ;;  %v9749_v3 = vpack.c.bf16 %v5156_v59, %v5156_v59  ;;  %v4901_v4 = vmax.f32 %v2893_v60, 0.0  ;;  %v5157_v5 = vmax.f32 %v3917_v61, 0.0  ;;  %10391 = vmatprep.mubr.msk.bf16.mxu0 %vm2031_vm2, %v11007_v49  ;;  %10647 = vmatprep.mubr.msk.bf16.mxu1 %vm2031_vm2, %v11008_v50  ;;  %v11014_v53 = vld [vmem:[%s11305_s9 + $0x608] sm:$0xff]   ;;  %v11015_v59 = vld [vmem:[%s11305_s9 + $0x210] sm:$0xff]  }
 0x111   : > { %7463 = vst.msk [vmem:[%s11552_s12 + $0x38] sm:$0xf] %vm7448_vm3, %v9495_v62  ;;  %7719 = vst.msk [vmem:[%s11552_s12 + $0x438] sm:$0xf] %vm7448_vm3, %v9751_v63  ;;  %v9496_v6 = vpack.c.bf16 %v4903_v0, %v4903_v0  ;;  %v9752_v7 = vpack.c.bf16 %v5159_v1, %v5159_v1  ;;  %v11016_v60 = vld [vmem:[%s11305_s9 + $0x610] sm:$0xff]  }
 0x112   : > { %7461 = vst.msk [vmem:[%s11552_s12 + $0x30] sm:$0xf] %vm7448_vm3, %v9493_v2  ;;  %7717 = vst.msk [vmem:[%s11552_s12 + $0x430] sm:$0xf] %vm7448_vm3, %v9749_v3  ;;  %v9494_v8 = vpack.c.bf16 %v4901_v4, %v4901_v4  ;;  %v9750_v9 = vpack.c.bf16 %v5157_v5, %v5157_v5  ;;  %v10285_v10 = vpop.f32.mrb[16].mxu0  ;;  %v10541_v11 = vpop.f32.mrb[16].mxu1 }
 0x113   : > { %7464 = vst.msk [vmem:[%s11552_s12 + $0x3c] sm:$0xf] %vm7448_vm3, %v9496_v6  ;;  %7720 = vst.msk [vmem:[%s11552_s12 + $0x43c] sm:$0xf] %vm7448_vm3, %v9752_v7  ;;  %v2914_v12 = vadd.f32 %v10285_v10, %v11529_v55  ;;  %v3938_v13 = vadd.f32 %v10541_v11, %v11529_v55  ;;  %v2905_v14 = vpop.f32.mrb[17].mxu0  ;;  %v3929_v15 = vpop.f32.mrb[17].mxu1 }
 0x114   : > { %7462 = vst.msk [vmem:[%s11552_s12 + $0x34] sm:$0xf] %vm7448_vm3, %v9494_v8  ;;  %7718 = vst.msk [vmem:[%s11552_s12 + $0x434] sm:$0xf] %vm7448_vm3, %v9750_v9  ;;  %v2906_v18 = vadd.f32 %v11529_v55, %v2905_v14  ;;  %v3930_v19 = vadd.f32 %v11529_v55, %v3929_v15  ;;  %v10286_v20 = vpop.f32.mrb[18].mxu0  ;;  %v10542_v21 = vpop.f32.mrb[18].mxu1 }
 0x115   : > { %v4906_v24 = vmax.f32 %v2914_v12, 0.0  ;;  %v5162_v25 = vmax.f32 %v3938_v13, 0.0  ;;  %v2917_v26 = vadd.f32 %v10286_v20, %v11529_v55  ;;  %v3941_v27 = vadd.f32 %v10542_v21, %v11529_v55  ;;  %v2908_v28 = vpop.f32.mrb[19].mxu0  ;;  %v3932_v29 = vpop.f32.mrb[19].mxu1 }
 0x116   : > { %v4904_v30 = vmax.f32 %v2906_v18, 0.0  ;;  %v5160_v31 = vmax.f32 %v3930_v19, 0.0  ;;  %v2909_v32 = vadd.f32 %v11529_v55, %v2908_v28  ;;  %v3933_v33 = vadd.f32 %v11529_v55, %v3932_v29 }
 0x117   : > { %v9499_v34 = vpack.c.bf16 %v4906_v24, %v4906_v24  ;;  %v9755_v35 = vpack.c.bf16 %v5162_v25, %v5162_v25  ;;  %v4907_v36 = vmax.f32 %v2917_v26, 0.0  ;;  %v5163_v37 = vmax.f32 %v3941_v27, 0.0  ;;  %10392 = vmatmul.mubr.msk.bf16.gmra.mrb[124].mxu0 %vm2031_vm2, %v11009_v16  ;;  %10648 = vmatmul.mubr.msk.bf16.gmra.mrb[124].mxu1 %vm2031_vm2, %v11010_v17  ;;  %v11017_v25 = vld [vmem:[%s11305_s9 + $0x218] sm:$0xff]  }
 0x118   : > { %v9497_v38 = vpack.c.bf16 %v4904_v30, %v4904_v30  ;;  %v9753_v39 = vpack.c.bf16 %v5160_v31, %v5160_v31  ;;  %v4905_v40 = vmax.f32 %v2909_v32, 0.0  ;;  %v5161_v41 = vmax.f32 %v3933_v33, 0.0  ;;  %10395 = vmatprep.mubr.msk.bf16.mxu0 %vm2031_vm2, %v11011_v22  ;;  %10651 = vmatprep.mubr.msk.bf16.mxu1 %vm2031_vm2, %v11012_v23  ;;  %v11018_v26 = vld [vmem:[%s11305_s9 + $0x618] sm:$0xff]   ;;  %v11019_v31 = vld [vmem:[%s11305_s9 + $0x220] sm:$0xff]  }
 0x119   : > { %7467 = vst.msk [vmem:[%s11552_s12 + $0x48] sm:$0xf] %vm7448_vm3, %v9499_v34  ;;  %7723 = vst.msk [vmem:[%s11552_s12 + $0x448] sm:$0xf] %vm7448_vm3, %v9755_v35  ;;  %v9500_v42 = vpack.c.bf16 %v4907_v36, %v4907_v36  ;;  %v9756_v43 = vpack.c.bf16 %v5163_v37, %v5163_v37  ;;  %v11020_v32 = vld [vmem:[%s11305_s9 + $0x620] sm:$0xff]  }
 0x11a   : > { %7465 = vst.msk [vmem:[%s11552_s12 + $0x40] sm:$0xf] %vm7448_vm3, %v9497_v38  ;;  %7721 = vst.msk [vmem:[%s11552_s12 + $0x440] sm:$0xf] %vm7448_vm3, %v9753_v39  ;;  %v9498_v44 = vpack.c.bf16 %v4905_v40, %v4905_v40  ;;  %v9754_v45 = vpack.c.bf16 %v5161_v41, %v5161_v41  ;;  %v10289_v46 = vpop.f32.mrb[20].mxu0  ;;  %v10545_v47 = vpop.f32.mrb[20].mxu1 }
 0x11b   : > { %7468 = vst.msk [vmem:[%s11552_s12 + $0x4c] sm:$0xf] %vm7448_vm3, %v9500_v42  ;;  %7724 = vst.msk [vmem:[%s11552_s12 + $0x44c] sm:$0xf] %vm7448_vm3, %v9756_v43  ;;  %v2930_v48 = vadd.f32 %v10289_v46, %v11529_v55  ;;  %v3954_v49 = vadd.f32 %v10545_v47, %v11529_v55  ;;  %v2921_v50 = vpop.f32.mrb[21].mxu0  ;;  %v3945_v51 = vpop.f32.mrb[21].mxu1 }
 0x11c   : > { %7466 = vst.msk [vmem:[%s11552_s12 + $0x44] sm:$0xf] %vm7448_vm3, %v9498_v44  ;;  %7722 = vst.msk [vmem:[%s11552_s12 + $0x444] sm:$0xf] %vm7448_vm3, %v9754_v45  ;;  %v2922_v54 = vadd.f32 %v11529_v55, %v2921_v50  ;;  %v3946_v56 = vadd.f32 %v11529_v55, %v3945_v51  ;;  %v10290_v57 = vpop.f32.mrb[22].mxu0  ;;  %v10546_v58 = vpop.f32.mrb[22].mxu1 }
 0x11d   : > { %v4910_v61 = vmax.f32 %v2930_v48, 0.0  ;;  %v5166_v62 = vmax.f32 %v3954_v49, 0.0  ;;  %v2933_v63 = vadd.f32 %v10290_v57, %v11529_v55  ;;  %v3957_v0 = vadd.f32 %v10546_v58, %v11529_v55  ;;  %v2924_v1 = vpop.f32.mrb[23].mxu0  ;;  %v3948_v2 = vpop.f32.mrb[23].mxu1 }
 0x11e   : > { %v4908_v3 = vmax.f32 %v2922_v54, 0.0  ;;  %v5164_v4 = vmax.f32 %v3946_v56, 0.0  ;;  %v2925_v5 = vadd.f32 %v11529_v55, %v2924_v1  ;;  %v3949_v6 = vadd.f32 %v11529_v55, %v3948_v2 }
 0x11f   : > { %v9503_v7 = vpack.c.bf16 %v4910_v61, %v4910_v61  ;;  %v9759_v8 = vpack.c.bf16 %v5166_v62, %v5166_v62  ;;  %v4911_v9 = vmax.f32 %v2933_v63, 0.0  ;;  %v5167_v10 = vmax.f32 %v3957_v0, 0.0  ;;  %10396 = vmatmul.mubr.msk.bf16.gmra.mrb[128].mxu0 %vm2031_vm2, %v11013_v52  ;;  %10652 = vmatmul.mubr.msk.bf16.gmra.mrb[128].mxu1 %vm2031_vm2, %v11014_v53  ;;  %v11021_v62 = vld [vmem:[%s11305_s9 + $0x228] sm:$0xff]  }
 0x120   : > { %v9501_v11 = vpack.c.bf16 %v4908_v3, %v4908_v3  ;;  %v9757_v12 = vpack.c.bf16 %v5164_v4, %v5164_v4  ;;  %v4909_v13 = vmax.f32 %v2925_v5, 0.0  ;;  %v5165_v14 = vmax.f32 %v3949_v6, 0.0  ;;  %10399 = vmatprep.mubr.msk.bf16.mxu0 %vm2031_vm2, %v11015_v59  ;;  %10655 = vmatprep.mubr.msk.bf16.mxu1 %vm2031_vm2, %v11016_v60  ;;  %v11022_v63 = vld [vmem:[%s11305_s9 + $0x628] sm:$0xff]   ;;  %v11023_v4 = vld [vmem:[%s11305_s9 + $0x230] sm:$0xff]  }
 0x121   : > { %7471 = vst.msk [vmem:[%s11552_s12 + $0x58] sm:$0xf] %vm7448_vm3, %v9503_v7  ;;  %7727 = vst.msk [vmem:[%s11552_s12 + $0x458] sm:$0xf] %vm7448_vm3, %v9759_v8  ;;  %v9504_v15 = vpack.c.bf16 %v4911_v9, %v4911_v9  ;;  %v9760_v16 = vpack.c.bf16 %v5167_v10, %v5167_v10  ;;  %v11024_v5 = vld [vmem:[%s11305_s9 + $0x630] sm:$0xff]  }
 0x122   : > { %7469 = vst.msk [vmem:[%s11552_s12 + $0x50] sm:$0xf] %vm7448_vm3, %v9501_v11  ;;  %7725 = vst.msk [vmem:[%s11552_s12 + $0x450] sm:$0xf] %vm7448_vm3, %v9757_v12  ;;  %v9502_v17 = vpack.c.bf16 %v4909_v13, %v4909_v13  ;;  %v9758_v18 = vpack.c.bf16 %v5165_v14, %v5165_v14  ;;  %v10293_v19 = vpop.f32.mrb[24].mxu0  ;;  %v10549_v20 = vpop.f32.mrb[24].mxu1 }
 0x123   : > { %7472 = vst.msk [vmem:[%s11552_s12 + $0x5c] sm:$0xf] %vm7448_vm3, %v9504_v15  ;;  %7728 = vst.msk [vmem:[%s11552_s12 + $0x45c] sm:$0xf] %vm7448_vm3, %v9760_v16  ;;  %v2946_v21 = vadd.f32 %v10293_v19, %v11529_v55  ;;  %v3970_v22 = vadd.f32 %v10549_v20, %v11529_v55  ;;  %v2937_v23 = vpop.f32.mrb[25].mxu0  ;;  %v3961_v24 = vpop.f32.mrb[25].mxu1 }
 0x124   : > { %7470 = vst.msk [vmem:[%s11552_s12 + $0x54] sm:$0xf] %vm7448_vm3, %v9502_v17  ;;  %7726 = vst.msk [vmem:[%s11552_s12 + $0x454] sm:$0xf] %vm7448_vm3, %v9758_v18  ;;  %v2938_v27 = vadd.f32 %v11529_v55, %v2937_v23  ;;  %v3962_v28 = vadd.f32 %v11529_v55, %v3961_v24  ;;  %v10294_v29 = vpop.f32.mrb[26].mxu0  ;;  %v10550_v30 = vpop.f32.mrb[26].mxu1 }
 0x125   : > { %v4914_v33 = vmax.f32 %v2946_v21, 0.0  ;;  %v5170_v34 = vmax.f32 %v3970_v22, 0.0  ;;  %v2949_v35 = vadd.f32 %v10294_v29, %v11529_v55  ;;  %v3973_v36 = vadd.f32 %v10550_v30, %v11529_v55  ;;  %v2940_v37 = vpop.f32.mrb[27].mxu0  ;;  %v3964_v38 = vpop.f32.mrb[27].mxu1 }
 0x126   : > { %v4912_v39 = vmax.f32 %v2938_v27, 0.0  ;;  %v5168_v40 = vmax.f32 %v3962_v28, 0.0  ;;  %v2941_v41 = vadd.f32 %v11529_v55, %v2940_v37  ;;  %v3965_v42 = vadd.f32 %v11529_v55, %v3964_v38 }
 0x127   : > { %v9507_v43 = vpack.c.bf16 %v4914_v33, %v4914_v33  ;;  %v9763_v44 = vpack.c.bf16 %v5170_v34, %v5170_v34  ;;  %v4915_v45 = vmax.f32 %v2949_v35, 0.0  ;;  %v5171_v46 = vmax.f32 %v3973_v36, 0.0  ;;  %10400 = vmatmul.mubr.msk.bf16.gmra.mrb[132].mxu0 %vm2031_vm2, %v11017_v25  ;;  %10656 = vmatmul.mubr.msk.bf16.gmra.mrb[132].mxu1 %vm2031_vm2, %v11018_v26  ;;  %v11025_v34 = vld [vmem:[%s11305_s9 + $0x238] sm:$0xff]  }
 0x128   : > { %v9505_v47 = vpack.c.bf16 %v4912_v39, %v4912_v39  ;;  %v9761_v48 = vpack.c.bf16 %v5168_v40, %v5168_v40  ;;  %v4913_v49 = vmax.f32 %v2941_v41, 0.0  ;;  %v5169_v50 = vmax.f32 %v3965_v42, 0.0  ;;  %10403 = vmatprep.mubr.msk.bf16.mxu0 %vm2031_vm2, %v11019_v31  ;;  %10659 = vmatprep.mubr.msk.bf16.mxu1 %vm2031_vm2, %v11020_v32  ;;  %v11026_v35 = vld [vmem:[%s11305_s9 + $0x638] sm:$0xff]   ;;  %v11027_v40 = vld [vmem:[%s11305_s9 + $0x240] sm:$0xff]  }
 0x129   : > { %7475 = vst.msk [vmem:[%s11552_s12 + $0x68] sm:$0xf] %vm7448_vm3, %v9507_v43  ;;  %7731 = vst.msk [vmem:[%s11552_s12 + $0x468] sm:$0xf] %vm7448_vm3, %v9763_v44  ;;  %v9508_v51 = vpack.c.bf16 %v4915_v45, %v4915_v45  ;;  %v9764_v52 = vpack.c.bf16 %v5171_v46, %v5171_v46  ;;  %v11028_v41 = vld [vmem:[%s11305_s9 + $0x640] sm:$0xff]  }
 0x12a   : > { %7473 = vst.msk [vmem:[%s11552_s12 + $0x60] sm:$0xf] %vm7448_vm3, %v9505_v47  ;;  %7729 = vst.msk [vmem:[%s11552_s12 + $0x460] sm:$0xf] %vm7448_vm3, %v9761_v48  ;;  %v9506_v53 = vpack.c.bf16 %v4913_v49, %v4913_v49  ;;  %v9762_v54 = vpack.c.bf16 %v5169_v50, %v5169_v50  ;;  %v10297_v56 = vpop.f32.mrb[28].mxu0  ;;  %v10553_v57 = vpop.f32.mrb[28].mxu1 }
 0x12b   : > { %7476 = vst.msk [vmem:[%s11552_s12 + $0x6c] sm:$0xf] %vm7448_vm3, %v9508_v51  ;;  %7732 = vst.msk [vmem:[%s11552_s12 + $0x46c] sm:$0xf] %vm7448_vm3, %v9764_v52  ;;  %v2962_v58 = vadd.f32 %v10297_v56, %v11529_v55  ;;  %v3986_v59 = vadd.f32 %v10553_v57, %v11529_v55  ;;  %v2953_v60 = vpop.f32.mrb[29].mxu0  ;;  %v3977_v61 = vpop.f32.mrb[29].mxu1 }
 0x12c   : > { %7474 = vst.msk [vmem:[%s11552_s12 + $0x64] sm:$0xf] %vm7448_vm3, %v9506_v53  ;;  %7730 = vst.msk [vmem:[%s11552_s12 + $0x464] sm:$0xf] %vm7448_vm3, %v9762_v54  ;;  %v2954_v0 = vadd.f32 %v11529_v55, %v2953_v60  ;;  %v3978_v1 = vadd.f32 %v11529_v55, %v3977_v61  ;;  %v10298_v2 = vpop.f32.mrb[30].mxu0  ;;  %v10554_v3 = vpop.f32.mrb[30].mxu1 }
 0x12d   : > { %v4918_v6 = vmax.f32 %v2962_v58, 0.0  ;;  %v5174_v7 = vmax.f32 %v3986_v59, 0.0  ;;  %v2965_v8 = vadd.f32 %v10298_v2, %v11529_v55  ;;  %v3989_v9 = vadd.f32 %v10554_v3, %v11529_v55  ;;  %v2956_v10 = vpop.f32.mrb[31].mxu0  ;;  %v3980_v11 = vpop.f32.mrb[31].mxu1 }
 0x12e   : > { %v4916_v12 = vmax.f32 %v2954_v0, 0.0  ;;  %v5172_v13 = vmax.f32 %v3978_v1, 0.0  ;;  %v2957_v14 = vadd.f32 %v11529_v55, %v2956_v10  ;;  %v3981_v15 = vadd.f32 %v11529_v55, %v3980_v11 }
 0x12f   : > { %v9511_v16 = vpack.c.bf16 %v4918_v6, %v4918_v6  ;;  %v9767_v17 = vpack.c.bf16 %v5174_v7, %v5174_v7  ;;  %v4919_v18 = vmax.f32 %v2965_v8, 0.0  ;;  %v5175_v19 = vmax.f32 %v3989_v9, 0.0  ;;  %10404 = vmatmul.mubr.msk.bf16.gmra.mrb[136].mxu0 %vm2031_vm2, %v11021_v62  ;;  %10660 = vmatmul.mubr.msk.bf16.gmra.mrb[136].mxu1 %vm2031_vm2, %v11022_v63  ;;  %v11029_v7 = vld [vmem:[%s11305_s9 + $0x248] sm:$0xff]  }
 0x130   : > { %v9509_v20 = vpack.c.bf16 %v4916_v12, %v4916_v12  ;;  %v9765_v21 = vpack.c.bf16 %v5172_v13, %v5172_v13  ;;  %v4917_v22 = vmax.f32 %v2957_v14, 0.0  ;;  %v5173_v23 = vmax.f32 %v3981_v15, 0.0  ;;  %10407 = vmatprep.mubr.msk.bf16.mxu0 %vm2031_vm2, %v11023_v4  ;;  %10663 = vmatprep.mubr.msk.bf16.mxu1 %vm2031_vm2, %v11024_v5  ;;  %v11030_v8 = vld [vmem:[%s11305_s9 + $0x648] sm:$0xff]   ;;  %v11031_v13 = vld [vmem:[%s11305_s9 + $0x250] sm:$0xff]  }
 0x131   : > { %7479 = vst.msk [vmem:[%s11552_s12 + $0x78] sm:$0xf] %vm7448_vm3, %v9511_v16  ;;  %7735 = vst.msk [vmem:[%s11552_s12 + $0x478] sm:$0xf] %vm7448_vm3, %v9767_v17  ;;  %v9512_v24 = vpack.c.bf16 %v4919_v18, %v4919_v18  ;;  %v9768_v25 = vpack.c.bf16 %v5175_v19, %v5175_v19  ;;  %v11032_v14 = vld [vmem:[%s11305_s9 + $0x650] sm:$0xff]  }
 0x132   : > { %7477 = vst.msk [vmem:[%s11552_s12 + $0x70] sm:$0xf] %vm7448_vm3, %v9509_v20  ;;  %7733 = vst.msk [vmem:[%s11552_s12 + $0x470] sm:$0xf] %vm7448_vm3, %v9765_v21  ;;  %v9510_v26 = vpack.c.bf16 %v4917_v22, %v4917_v22  ;;  %v9766_v27 = vpack.c.bf16 %v5173_v23, %v5173_v23  ;;  %v10301_v28 = vpop.f32.mrb[32].mxu0  ;;  %v10557_v29 = vpop.f32.mrb[32].mxu1 }
 0x133   : > { %7480 = vst.msk [vmem:[%s11552_s12 + $0x7c] sm:$0xf] %vm7448_vm3, %v9512_v24  ;;  %7736 = vst.msk [vmem:[%s11552_s12 + $0x47c] sm:$0xf] %vm7448_vm3, %v9768_v25  ;;  %v2978_v30 = vadd.f32 %v10301_v28, %v11529_v55  ;;  %v4002_v31 = vadd.f32 %v10557_v29, %v11529_v55  ;;  %v2969_v32 = vpop.f32.mrb[33].mxu0  ;;  %v3993_v33 = vpop.f32.mrb[33].mxu1 }
 0x134   : > { %7478 = vst.msk [vmem:[%s11552_s12 + $0x74] sm:$0xf] %vm7448_vm3, %v9510_v26  ;;  %7734 = vst.msk [vmem:[%s11552_s12 + $0x474] sm:$0xf] %vm7448_vm3, %v9766_v27  ;;  %v2970_v36 = vadd.f32 %v11529_v55, %v2969_v32  ;;  %v3994_v37 = vadd.f32 %v11529_v55, %v3993_v33  ;;  %v10302_v38 = vpop.f32.mrb[34].mxu0  ;;  %v10558_v39 = vpop.f32.mrb[34].mxu1 }
 0x135   : > { %v4922_v42 = vmax.f32 %v2978_v30, 0.0  ;;  %v5178_v43 = vmax.f32 %v4002_v31, 0.0  ;;  %v2981_v44 = vadd.f32 %v10302_v38, %v11529_v55  ;;  %v4005_v45 = vadd.f32 %v10558_v39, %v11529_v55  ;;  %v2972_v46 = vpop.f32.mrb[35].mxu0  ;;  %v3996_v47 = vpop.f32.mrb[35].mxu1  ;;  %v11857_v38 = vld [vmem:[%s13592_s2] ss:$0 sm:$0xff] }
 0x136   : > { %v4920_v48 = vmax.f32 %v2970_v36, 0.0  ;;  %v5176_v49 = vmax.f32 %v3994_v37, 0.0  ;;  %v2973_v50 = vadd.f32 %v11529_v55, %v2972_v46  ;;  %v3997_v51 = vadd.f32 %v11529_v55, %v3996_v47 }
 0x137   : > { %v9515_v52 = vpack.c.bf16 %v4922_v42, %v4922_v42  ;;  %v9771_v53 = vpack.c.bf16 %v5178_v43, %v5178_v43  ;;  %v4923_v54 = vmax.f32 %v2981_v44, 0.0  ;;  %v5179_v56 = vmax.f32 %v4005_v45, 0.0  ;;  %10408 = vmatmul.mubr.msk.bf16.gmra.mrb[140].mxu0 %vm2031_vm2, %v11025_v34  ;;  %10664 = vmatmul.mubr.msk.bf16.gmra.mrb[140].mxu1 %vm2031_vm2, %v11026_v35  ;;  %v11033_v43 = vld [vmem:[%s11305_s9 + $0x258] sm:$0xff]  }
 0x138   : > { %v9513_v57 = vpack.c.bf16 %v4920_v48, %v4920_v48  ;;  %v9769_v58 = vpack.c.bf16 %v5176_v49, %v5176_v49  ;;  %v4921_v59 = vmax.f32 %v2973_v50, 0.0  ;;  %v5177_v60 = vmax.f32 %v3997_v51, 0.0  ;;  %10411 = vmatprep.mubr.msk.bf16.mxu0 %vm2031_vm2, %v11027_v40  ;;  %10667 = vmatprep.mubr.msk.bf16.mxu1 %vm2031_vm2, %v11028_v41  ;;  %v11034_v44 = vld [vmem:[%s11305_s9 + $0x658] sm:$0xff]   ;;  %v11035_v49 = vld [vmem:[%s11305_s9 + $0x260] sm:$0xff]  }
 0x139   : > { %7483 = vst.msk [vmem:[%s11552_s12 + $0x88] sm:$0xf] %vm7448_vm3, %v9515_v52  ;;  %7739 = vst.msk [vmem:[%s11552_s12 + $0x488] sm:$0xf] %vm7448_vm3, %v9771_v53  ;;  %v9516_v61 = vpack.c.bf16 %v4923_v54, %v4923_v54  ;;  %v9772_v62 = vpack.c.bf16 %v5179_v56, %v5179_v56  ;;  %v11036_v50 = vld [vmem:[%s11305_s9 + $0x660] sm:$0xff]  }
 0x13a   : > { %7481 = vst.msk [vmem:[%s11552_s12 + $0x80] sm:$0xf] %vm7448_vm3, %v9513_v57  ;;  %7737 = vst.msk [vmem:[%s11552_s12 + $0x480] sm:$0xf] %vm7448_vm3, %v9769_v58  ;;  %v9514_v63 = vpack.c.bf16 %v4921_v59, %v4921_v59  ;;  %v9770_v0 = vpack.c.bf16 %v5177_v60, %v5177_v60  ;;  %v10305_v1 = vpop.f32.mrb[36].mxu0  ;;  %v10561_v2 = vpop.f32.mrb[36].mxu1 }
 0x13b   : > { %7484 = vst.msk [vmem:[%s11552_s12 + $0x8c] sm:$0xf] %vm7448_vm3, %v9516_v61  ;;  %7740 = vst.msk [vmem:[%s11552_s12 + $0x48c] sm:$0xf] %vm7448_vm3, %v9772_v62  ;;  %v2994_v3 = vadd.f32 %v10305_v1, %v11529_v55  ;;  %v4018_v4 = vadd.f32 %v10561_v2, %v11529_v55  ;;  %v2985_v5 = vpop.f32.mrb[37].mxu0  ;;  %v4009_v6 = vpop.f32.mrb[37].mxu1 }
 0x13c   : > { %7482 = vst.msk [vmem:[%s11552_s12 + $0x84] sm:$0xf] %vm7448_vm3, %v9514_v63  ;;  %7738 = vst.msk [vmem:[%s11552_s12 + $0x484] sm:$0xf] %vm7448_vm3, %v9770_v0  ;;  %v2986_v9 = vadd.f32 %v11529_v55, %v2985_v5  ;;  %v4010_v10 = vadd.f32 %v11529_v55, %v4009_v6  ;;  %v10306_v11 = vpop.f32.mrb[38].mxu0  ;;  %v10562_v12 = vpop.f32.mrb[38].mxu1 }
 0x13d   : > { %v4926_v15 = vmax.f32 %v2994_v3, 0.0  ;;  %v5182_v16 = vmax.f32 %v4018_v4, 0.0  ;;  %v2997_v17 = vadd.f32 %v10306_v11, %v11529_v55  ;;  %v4021_v18 = vadd.f32 %v10562_v12, %v11529_v55  ;;  %v2988_v19 = vpop.f32.mrb[39].mxu0  ;;  %v4012_v20 = vpop.f32.mrb[39].mxu1 }
 0x13e   : > { %v4924_v21 = vmax.f32 %v2986_v9, 0.0  ;;  %v5180_v22 = vmax.f32 %v4010_v10, 0.0  ;;  %v2989_v23 = vadd.f32 %v11529_v55, %v2988_v19  ;;  %v4013_v24 = vadd.f32 %v11529_v55, %v4012_v20 }
 0x13f   : > { %v9519_v25 = vpack.c.bf16 %v4926_v15, %v4926_v15  ;;  %v9775_v26 = vpack.c.bf16 %v5182_v16, %v5182_v16  ;;  %v4927_v27 = vmax.f32 %v2997_v17, 0.0  ;;  %v5183_v28 = vmax.f32 %v4021_v18, 0.0  ;;  %10412 = vmatmul.mubr.msk.bf16.gmra.mrb[144].mxu0 %vm2031_vm2, %v11029_v7  ;;  %10668 = vmatmul.mubr.msk.bf16.gmra.mrb[144].mxu1 %vm2031_vm2, %v11030_v8  ;;  %v11037_v16 = vld [vmem:[%s11305_s9 + $0x268] sm:$0xff]  }
 0x140   : > { %v9517_v29 = vpack.c.bf16 %v4924_v21, %v4924_v21  ;;  %v9773_v30 = vpack.c.bf16 %v5180_v22, %v5180_v22  ;;  %v4925_v31 = vmax.f32 %v2989_v23, 0.0  ;;  %v5181_v32 = vmax.f32 %v4013_v24, 0.0  ;;  %10415 = vmatprep.mubr.msk.bf16.mxu0 %vm2031_vm2, %v11031_v13  ;;  %10671 = vmatprep.mubr.msk.bf16.mxu1 %vm2031_vm2, %v11032_v14  ;;  %v11038_v17 = vld [vmem:[%s11305_s9 + $0x668] sm:$0xff]   ;;  %v11039_v22 = vld [vmem:[%s11305_s9 + $0x270] sm:$0xff]  }
 0x141   : > { %7487 = vst.msk [vmem:[%s11552_s12 + $0x98] sm:$0xf] %vm7448_vm3, %v9519_v25  ;;  %7743 = vst.msk [vmem:[%s11552_s12 + $0x498] sm:$0xf] %vm7448_vm3, %v9775_v26  ;;  %v9520_v55 = vpack.c.bf16 %v4927_v27, %v4927_v27  ;;  %v9776_v33 = vpack.c.bf16 %v5183_v28, %v5183_v28  ;;  %v11040_v23 = vld [vmem:[%s11305_s9 + $0x670] sm:$0xff]  }
 0x142   : > { %7485 = vst.msk [vmem:[%s11552_s12 + $0x90] sm:$0xf] %vm7448_vm3, %v9517_v29  ;;  %7741 = vst.msk [vmem:[%s11552_s12 + $0x490] sm:$0xf] %vm7448_vm3, %v9773_v30  ;;  %v9518_v34 = vpack.c.bf16 %v4925_v31, %v4925_v31  ;;  %v9774_v35 = vpack.c.bf16 %v5181_v32, %v5181_v32  ;;  %v10309_v36 = vpop.f32.mrb[40].mxu0  ;;  %v10565_v37 = vpop.f32.mrb[40].mxu1 }
 0x143   : > { %7488 = vst.msk [vmem:[%s11552_s12 + $0x9c] sm:$0xf] %vm7448_vm3, %v9520_v55  ;;  %7744 = vst.msk [vmem:[%s11552_s12 + $0x49c] sm:$0xf] %vm7448_vm3, %v9776_v33  ;;  %v3010_v39 = vadd.f32 %v11857_v38, %v10309_v36  ;;  %v4034_v40 = vadd.f32 %v11857_v38, %v10565_v37  ;;  %v3001_v41 = vpop.f32.mrb[41].mxu0  ;;  %v4025_v42 = vpop.f32.mrb[41].mxu1 }
 0x144   : > { %7486 = vst.msk [vmem:[%s11552_s12 + $0x94] sm:$0xf] %vm7448_vm3, %v9518_v34  ;;  %7742 = vst.msk [vmem:[%s11552_s12 + $0x494] sm:$0xf] %vm7448_vm3, %v9774_v35  ;;  %v3002_v45 = vadd.f32 %v11857_v38, %v3001_v41  ;;  %v4026_v46 = vadd.f32 %v11857_v38, %v4025_v42  ;;  %v10310_v47 = vpop.f32.mrb[42].mxu0  ;;  %v10566_v48 = vpop.f32.mrb[42].mxu1 }
 0x145   : > { %v4930_v51 = vmax.f32 %v3010_v39, 0.0  ;;  %v5186_v52 = vmax.f32 %v4034_v40, 0.0  ;;  %v3013_v53 = vadd.f32 %v11857_v38, %v10310_v47  ;;  %v4037_v54 = vadd.f32 %v11857_v38, %v10566_v48  ;;  %v3004_v56 = vpop.f32.mrb[43].mxu0  ;;  %v4028_v57 = vpop.f32.mrb[43].mxu1 }
 0x146   : > { %v4928_v58 = vmax.f32 %v3002_v45, 0.0  ;;  %v5184_v59 = vmax.f32 %v4026_v46, 0.0  ;;  %v3005_v60 = vadd.f32 %v11857_v38, %v3004_v56  ;;  %v4029_v61 = vadd.f32 %v11857_v38, %v4028_v57 }
 0x147   : > { %v9523_v62 = vpack.c.bf16 %v4930_v51, %v4930_v51  ;;  %v9779_v63 = vpack.c.bf16 %v5186_v52, %v5186_v52  ;;  %v4931_v0 = vmax.f32 %v3013_v53, 0.0  ;;  %v5187_v1 = vmax.f32 %v4037_v54, 0.0  ;;  %10416 = vmatmul.mubr.msk.bf16.gmra.mrb[148].mxu0 %vm2031_vm2, %v11033_v43  ;;  %10672 = vmatmul.mubr.msk.bf16.gmra.mrb[148].mxu1 %vm2031_vm2, %v11034_v44  ;;  %v11041_v52 = vld [vmem:[%s11305_s9 + $0x278] sm:$0xff]  }
 0x148   : > { %v9521_v2 = vpack.c.bf16 %v4928_v58, %v4928_v58  ;;  %v9777_v3 = vpack.c.bf16 %v5184_v59, %v5184_v59  ;;  %v4929_v4 = vmax.f32 %v3005_v60, 0.0  ;;  %v5185_v5 = vmax.f32 %v4029_v61, 0.0  ;;  %10419 = vmatprep.mubr.msk.bf16.mxu0 %vm2031_vm2, %v11035_v49  ;;  %10675 = vmatprep.mubr.msk.bf16.mxu1 %vm2031_vm2, %v11036_v50  ;;  %v11042_v53 = vld [vmem:[%s11305_s9 + $0x678] sm:$0xff]   ;;  %v11043_v59 = vld [vmem:[%s11305_s9 + $0x280] sm:$0xff]  }
 0x149   : > { %7491 = vst.msk [vmem:[%s11552_s12 + $0xa8] sm:$0xf] %vm7448_vm3, %v9523_v62  ;;  %7747 = vst.msk [vmem:[%s11552_s12 + $0x4a8] sm:$0xf] %vm7448_vm3, %v9779_v63  ;;  %v9524_v6 = vpack.c.bf16 %v4931_v0, %v4931_v0  ;;  %v9780_v7 = vpack.c.bf16 %v5187_v1, %v5187_v1  ;;  %v11044_v60 = vld [vmem:[%s11305_s9 + $0x680] sm:$0xff]  }
 0x14a   : > { %7489 = vst.msk [vmem:[%s11552_s12 + $0xa0] sm:$0xf] %vm7448_vm3, %v9521_v2  ;;  %7745 = vst.msk [vmem:[%s11552_s12 + $0x4a0] sm:$0xf] %vm7448_vm3, %v9777_v3  ;;  %v9522_v8 = vpack.c.bf16 %v4929_v4, %v4929_v4  ;;  %v9778_v9 = vpack.c.bf16 %v5185_v5, %v5185_v5  ;;  %v10313_v10 = vpop.f32.mrb[44].mxu0  ;;  %v10569_v11 = vpop.f32.mrb[44].mxu1 }
 0x14b   : > { %7492 = vst.msk [vmem:[%s11552_s12 + $0xac] sm:$0xf] %vm7448_vm3, %v9524_v6  ;;  %7748 = vst.msk [vmem:[%s11552_s12 + $0x4ac] sm:$0xf] %vm7448_vm3, %v9780_v7  ;;  %v3026_v12 = vadd.f32 %v11857_v38, %v10313_v10  ;;  %v4050_v13 = vadd.f32 %v11857_v38, %v10569_v11  ;;  %v3017_v14 = vpop.f32.mrb[45].mxu0  ;;  %v4041_v15 = vpop.f32.mrb[45].mxu1 }
 0x14c   : > { %7490 = vst.msk [vmem:[%s11552_s12 + $0xa4] sm:$0xf] %vm7448_vm3, %v9522_v8  ;;  %7746 = vst.msk [vmem:[%s11552_s12 + $0x4a4] sm:$0xf] %vm7448_vm3, %v9778_v9  ;;  %v3018_v18 = vadd.f32 %v11857_v38, %v3017_v14  ;;  %v4042_v19 = vadd.f32 %v11857_v38, %v4041_v15  ;;  %v10314_v20 = vpop.f32.mrb[46].mxu0  ;;  %v10570_v21 = vpop.f32.mrb[46].mxu1 }
 0x14d   : > { %v4934_v24 = vmax.f32 %v3026_v12, 0.0  ;;  %v5190_v25 = vmax.f32 %v4050_v13, 0.0  ;;  %v3029_v26 = vadd.f32 %v11857_v38, %v10314_v20  ;;  %v4053_v27 = vadd.f32 %v11857_v38, %v10570_v21  ;;  %v3020_v28 = vpop.f32.mrb[47].mxu0  ;;  %v4044_v29 = vpop.f32.mrb[47].mxu1 }
 0x14e   : > { %v4932_v30 = vmax.f32 %v3018_v18, 0.0  ;;  %v5188_v31 = vmax.f32 %v4042_v19, 0.0  ;;  %v3021_v32 = vadd.f32 %v11857_v38, %v3020_v28  ;;  %v4045_v55 = vadd.f32 %v11857_v38, %v4044_v29 }
 0x14f   : > { %v9527_v33 = vpack.c.bf16 %v4934_v24, %v4934_v24  ;;  %v9783_v34 = vpack.c.bf16 %v5190_v25, %v5190_v25  ;;  %v4935_v35 = vmax.f32 %v3029_v26, 0.0  ;;  %v5191_v36 = vmax.f32 %v4053_v27, 0.0  ;;  %10420 = vmatmul.mubr.msk.bf16.gmra.mrb[152].mxu0 %vm2031_vm2, %v11037_v16  ;;  %10676 = vmatmul.mubr.msk.bf16.gmra.mrb[152].mxu1 %vm2031_vm2, %v11038_v17  ;;  %v11045_v25 = vld [vmem:[%s11305_s9 + $0x288] sm:$0xff]  }
 0x150   : > { %v9525_v37 = vpack.c.bf16 %v4932_v30, %v4932_v30  ;;  %v9781_v39 = vpack.c.bf16 %v5188_v31, %v5188_v31  ;;  %v4933_v40 = vmax.f32 %v3021_v32, 0.0  ;;  %v5189_v41 = vmax.f32 %v4045_v55, 0.0  ;;  %10423 = vmatprep.mubr.msk.bf16.mxu0 %vm2031_vm2, %v11039_v22  ;;  %10679 = vmatprep.mubr.msk.bf16.mxu1 %vm2031_vm2, %v11040_v23  ;;  %v11046_v26 = vld [vmem:[%s11305_s9 + $0x688] sm:$0xff]   ;;  %v11047_v31 = vld [vmem:[%s11305_s9 + $0x290] sm:$0xff]  }
 0x151   : > { %7495 = vst.msk [vmem:[%s11552_s12 + $0xb8] sm:$0xf] %vm7448_vm3, %v9527_v33  ;;  %7751 = vst.msk [vmem:[%s11552_s12 + $0x4b8] sm:$0xf] %vm7448_vm3, %v9783_v34  ;;  %v9528_v42 = vpack.c.bf16 %v4935_v35, %v4935_v35  ;;  %v9784_v43 = vpack.c.bf16 %v5191_v36, %v5191_v36  ;;  %v11048_v32 = vld [vmem:[%s11305_s9 + $0x690] sm:$0xff]  }
 0x152   : > { %7493 = vst.msk [vmem:[%s11552_s12 + $0xb0] sm:$0xf] %vm7448_vm3, %v9525_v37  ;;  %7749 = vst.msk [vmem:[%s11552_s12 + $0x4b0] sm:$0xf] %vm7448_vm3, %v9781_v39  ;;  %v9526_v44 = vpack.c.bf16 %v4933_v40, %v4933_v40  ;;  %v9782_v45 = vpack.c.bf16 %v5189_v41, %v5189_v41  ;;  %v10317_v46 = vpop.f32.mrb[48].mxu0  ;;  %v10573_v47 = vpop.f32.mrb[48].mxu1 }
 0x153   : > { %7496 = vst.msk [vmem:[%s11552_s12 + $0xbc] sm:$0xf] %vm7448_vm3, %v9528_v42  ;;  %7752 = vst.msk [vmem:[%s11552_s12 + $0x4bc] sm:$0xf] %vm7448_vm3, %v9784_v43  ;;  %v3042_v48 = vadd.f32 %v11857_v38, %v10317_v46  ;;  %v4066_v49 = vadd.f32 %v11857_v38, %v10573_v47  ;;  %v3033_v50 = vpop.f32.mrb[49].mxu0  ;;  %v4057_v51 = vpop.f32.mrb[49].mxu1 }
 0x154   : > { %7494 = vst.msk [vmem:[%s11552_s12 + $0xb4] sm:$0xf] %vm7448_vm3, %v9526_v44  ;;  %7750 = vst.msk [vmem:[%s11552_s12 + $0x4b4] sm:$0xf] %vm7448_vm3, %v9782_v45  ;;  %v3034_v54 = vadd.f32 %v11857_v38, %v3033_v50  ;;  %v4058_v56 = vadd.f32 %v11857_v38, %v4057_v51  ;;  %v10318_v57 = vpop.f32.mrb[50].mxu0  ;;  %v10574_v58 = vpop.f32.mrb[50].mxu1 }
 0x155   : > { %v4938_v61 = vmax.f32 %v3042_v48, 0.0  ;;  %v5194_v62 = vmax.f32 %v4066_v49, 0.0  ;;  %v3045_v63 = vadd.f32 %v11857_v38, %v10318_v57  ;;  %v4069_v0 = vadd.f32 %v11857_v38, %v10574_v58  ;;  %v3036_v1 = vpop.f32.mrb[51].mxu0  ;;  %v4060_v2 = vpop.f32.mrb[51].mxu1 }
 0x156   : > { %v4936_v3 = vmax.f32 %v3034_v54, 0.0  ;;  %v5192_v4 = vmax.f32 %v4058_v56, 0.0  ;;  %v3037_v5 = vadd.f32 %v11857_v38, %v3036_v1  ;;  %v4061_v6 = vadd.f32 %v11857_v38, %v4060_v2 }
 0x157   : > { %v9531_v7 = vpack.c.bf16 %v4938_v61, %v4938_v61  ;;  %v9787_v8 = vpack.c.bf16 %v5194_v62, %v5194_v62  ;;  %v4939_v9 = vmax.f32 %v3045_v63, 0.0  ;;  %v5195_v10 = vmax.f32 %v4069_v0, 0.0  ;;  %10424 = vmatmul.mubr.msk.bf16.gmra.mrb[156].mxu0 %vm2031_vm2, %v11041_v52  ;;  %10680 = vmatmul.mubr.msk.bf16.gmra.mrb[156].mxu1 %vm2031_vm2, %v11042_v53  ;;  %v11049_v62 = vld [vmem:[%s11305_s9 + $0x298] sm:$0xff]  }
 0x158   : > { %v9529_v11 = vpack.c.bf16 %v4936_v3, %v4936_v3  ;;  %v9785_v12 = vpack.c.bf16 %v5192_v4, %v5192_v4  ;;  %v4937_v13 = vmax.f32 %v3037_v5, 0.0  ;;  %v5193_v14 = vmax.f32 %v4061_v6, 0.0  ;;  %10427 = vmatprep.mubr.msk.bf16.mxu0 %vm2031_vm2, %v11043_v59  ;;  %10683 = vmatprep.mubr.msk.bf16.mxu1 %vm2031_vm2, %v11044_v60  ;;  %v11050_v63 = vld [vmem:[%s11305_s9 + $0x698] sm:$0xff]   ;;  %v11051_v4 = vld [vmem:[%s11305_s9 + $0x2a0] sm:$0xff]  }
 0x159   : > { %7499 = vst.msk [vmem:[%s11552_s12 + $0xc8] sm:$0xf] %vm7448_vm3, %v9531_v7  ;;  %7755 = vst.msk [vmem:[%s11552_s12 + $0x4c8] sm:$0xf] %vm7448_vm3, %v9787_v8  ;;  %v9532_v15 = vpack.c.bf16 %v4939_v9, %v4939_v9  ;;  %v9788_v16 = vpack.c.bf16 %v5195_v10, %v5195_v10  ;;  %v11052_v5 = vld [vmem:[%s11305_s9 + $0x6a0] sm:$0xff]  }
 0x15a   : > { %7497 = vst.msk [vmem:[%s11552_s12 + $0xc0] sm:$0xf] %vm7448_vm3, %v9529_v11  ;;  %7753 = vst.msk [vmem:[%s11552_s12 + $0x4c0] sm:$0xf] %vm7448_vm3, %v9785_v12  ;;  %v9530_v17 = vpack.c.bf16 %v4937_v13, %v4937_v13  ;;  %v9786_v18 = vpack.c.bf16 %v5193_v14, %v5193_v14  ;;  %v10321_v19 = vpop.f32.mrb[52].mxu0  ;;  %v10577_v20 = vpop.f32.mrb[52].mxu1 }
 0x15b   : > { %7500 = vst.msk [vmem:[%s11552_s12 + $0xcc] sm:$0xf] %vm7448_vm3, %v9532_v15  ;;  %7756 = vst.msk [vmem:[%s11552_s12 + $0x4cc] sm:$0xf] %vm7448_vm3, %v9788_v16  ;;  %v3058_v21 = vadd.f32 %v11857_v38, %v10321_v19  ;;  %v4082_v22 = vadd.f32 %v11857_v38, %v10577_v20  ;;  %v3049_v23 = vpop.f32.mrb[53].mxu0  ;;  %v4073_v24 = vpop.f32.mrb[53].mxu1 }
 0x15c   : > { %7498 = vst.msk [vmem:[%s11552_s12 + $0xc4] sm:$0xf] %vm7448_vm3, %v9530_v17  ;;  %7754 = vst.msk [vmem:[%s11552_s12 + $0x4c4] sm:$0xf] %vm7448_vm3, %v9786_v18  ;;  %v3050_v27 = vadd.f32 %v11857_v38, %v3049_v23  ;;  %v4074_v28 = vadd.f32 %v11857_v38, %v4073_v24  ;;  %v10322_v29 = vpop.f32.mrb[54].mxu0  ;;  %v10578_v30 = vpop.f32.mrb[54].mxu1 }
 0x15d   : > { %v4942_v55 = vmax.f32 %v3058_v21, 0.0  ;;  %v5198_v33 = vmax.f32 %v4082_v22, 0.0  ;;  %v3061_v34 = vadd.f32 %v11857_v38, %v10322_v29  ;;  %v4085_v35 = vadd.f32 %v11857_v38, %v10578_v30  ;;  %v3052_v36 = vpop.f32.mrb[55].mxu0  ;;  %v4076_v37 = vpop.f32.mrb[55].mxu1 }
 0x15e   : > { %v4940_v39 = vmax.f32 %v3050_v27, 0.0  ;;  %v5196_v40 = vmax.f32 %v4074_v28, 0.0  ;;  %v3053_v41 = vadd.f32 %v11857_v38, %v3052_v36  ;;  %v4077_v42 = vadd.f32 %v11857_v38, %v4076_v37 }
 0x15f   : > { %v9535_v43 = vpack.c.bf16 %v4942_v55, %v4942_v55  ;;  %v9791_v44 = vpack.c.bf16 %v5198_v33, %v5198_v33  ;;  %v4943_v45 = vmax.f32 %v3061_v34, 0.0  ;;  %v5199_v46 = vmax.f32 %v4085_v35, 0.0  ;;  %10428 = vmatmul.mubr.msk.bf16.gmra.mrb[160].mxu0 %vm2031_vm2, %v11045_v25  ;;  %10684 = vmatmul.mubr.msk.bf16.gmra.mrb[160].mxu1 %vm2031_vm2, %v11046_v26  ;;  %v11053_v33 = vld [vmem:[%s11305_s9 + $0x2a8] sm:$0xff]  }
 0x160   : > { %v9533_v47 = vpack.c.bf16 %v4940_v39, %v4940_v39  ;;  %v9789_v48 = vpack.c.bf16 %v5196_v40, %v5196_v40  ;;  %v4941_v49 = vmax.f32 %v3053_v41, 0.0  ;;  %v5197_v50 = vmax.f32 %v4077_v42, 0.0  ;;  %10431 = vmatprep.mubr.msk.bf16.mxu0 %vm2031_vm2, %v11047_v31  ;;  %10687 = vmatprep.mubr.msk.bf16.mxu1 %vm2031_vm2, %v11048_v32  ;;  %v11054_v34 = vld [vmem:[%s11305_s9 + $0x6a8] sm:$0xff]   ;;  %v11055_v40 = vld [vmem:[%s11305_s9 + $0x2b0] sm:$0xff]  }
 0x161   : > { %7503 = vst.msk [vmem:[%s11552_s12 + $0xd8] sm:$0xf] %vm7448_vm3, %v9535_v43  ;;  %7759 = vst.msk [vmem:[%s11552_s12 + $0x4d8] sm:$0xf] %vm7448_vm3, %v9791_v44  ;;  %v9536_v51 = vpack.c.bf16 %v4943_v45, %v4943_v45  ;;  %v9792_v52 = vpack.c.bf16 %v5199_v46, %v5199_v46  ;;  %v11056_v41 = vld [vmem:[%s11305_s9 + $0x6b0] sm:$0xff]  }
 0x162   : > { %7501 = vst.msk [vmem:[%s11552_s12 + $0xd0] sm:$0xf] %vm7448_vm3, %v9533_v47  ;;  %7757 = vst.msk [vmem:[%s11552_s12 + $0x4d0] sm:$0xf] %vm7448_vm3, %v9789_v48  ;;  %v9534_v53 = vpack.c.bf16 %v4941_v49, %v4941_v49  ;;  %v9790_v54 = vpack.c.bf16 %v5197_v50, %v5197_v50  ;;  %v10325_v56 = vpop.f32.mrb[56].mxu0  ;;  %v10581_v57 = vpop.f32.mrb[56].mxu1 }
 0x163   : > { %7504 = vst.msk [vmem:[%s11552_s12 + $0xdc] sm:$0xf] %vm7448_vm3, %v9536_v51  ;;  %7760 = vst.msk [vmem:[%s11552_s12 + $0x4dc] sm:$0xf] %vm7448_vm3, %v9792_v52  ;;  %v3074_v58 = vadd.f32 %v11857_v38, %v10325_v56  ;;  %v4098_v59 = vadd.f32 %v11857_v38, %v10581_v57  ;;  %v3065_v60 = vpop.f32.mrb[57].mxu0  ;;  %v4089_v61 = vpop.f32.mrb[57].mxu1 }
 0x164   : > { %7502 = vst.msk [vmem:[%s11552_s12 + $0xd4] sm:$0xf] %vm7448_vm3, %v9534_v53  ;;  %7758 = vst.msk [vmem:[%s11552_s12 + $0x4d4] sm:$0xf] %vm7448_vm3, %v9790_v54  ;;  %v3066_v0 = vadd.f32 %v11857_v38, %v3065_v60  ;;  %v4090_v1 = vadd.f32 %v11857_v38, %v4089_v61  ;;  %v10326_v2 = vpop.f32.mrb[58].mxu0  ;;  %v10582_v3 = vpop.f32.mrb[58].mxu1 }
 0x165   : > { %v4946_v6 = vmax.f32 %v3074_v58, 0.0  ;;  %v5202_v7 = vmax.f32 %v4098_v59, 0.0  ;;  %v3077_v8 = vadd.f32 %v11857_v38, %v10326_v2  ;;  %v4101_v9 = vadd.f32 %v11857_v38, %v10582_v3  ;;  %v3068_v10 = vpop.f32.mrb[59].mxu0  ;;  %v4092_v11 = vpop.f32.mrb[59].mxu1 }
 0x166   : > { %v4944_v12 = vmax.f32 %v3066_v0, 0.0  ;;  %v5200_v13 = vmax.f32 %v4090_v1, 0.0  ;;  %v3069_v14 = vadd.f32 %v11857_v38, %v3068_v10  ;;  %v4093_v15 = vadd.f32 %v11857_v38, %v4092_v11 }
 0x167   : > { %v9539_v16 = vpack.c.bf16 %v4946_v6, %v4946_v6  ;;  %v9795_v17 = vpack.c.bf16 %v5202_v7, %v5202_v7  ;;  %v4947_v18 = vmax.f32 %v3077_v8, 0.0  ;;  %v5203_v19 = vmax.f32 %v4101_v9, 0.0  ;;  %10432 = vmatmul.mubr.msk.bf16.gmra.mrb[164].mxu0 %vm2031_vm2, %v11049_v62  ;;  %10688 = vmatmul.mubr.msk.bf16.gmra.mrb[164].mxu1 %vm2031_vm2, %v11050_v63  ;;  %v11057_v7 = vld [vmem:[%s11305_s9 + $0x2b8] sm:$0xff]  }
 0x168   : > { %v9537_v20 = vpack.c.bf16 %v4944_v12, %v4944_v12  ;;  %v9793_v21 = vpack.c.bf16 %v5200_v13, %v5200_v13  ;;  %v4945_v22 = vmax.f32 %v3069_v14, 0.0  ;;  %v5201_v23 = vmax.f32 %v4093_v15, 0.0  ;;  %10435 = vmatprep.mubr.msk.bf16.mxu0 %vm2031_vm2, %v11051_v4  ;;  %10691 = vmatprep.mubr.msk.bf16.mxu1 %vm2031_vm2, %v11052_v5  ;;  %v11058_v8 = vld [vmem:[%s11305_s9 + $0x6b8] sm:$0xff]   ;;  %v11059_v13 = vld [vmem:[%s11305_s9 + $0x2c0] sm:$0xff]  }
 0x169   : > { %7507 = vst.msk [vmem:[%s11552_s12 + $0xe8] sm:$0xf] %vm7448_vm3, %v9539_v16  ;;  %7763 = vst.msk [vmem:[%s11552_s12 + $0x4e8] sm:$0xf] %vm7448_vm3, %v9795_v17  ;;  %v9540_v24 = vpack.c.bf16 %v4947_v18, %v4947_v18  ;;  %v9796_v25 = vpack.c.bf16 %v5203_v19, %v5203_v19  ;;  %v11060_v14 = vld [vmem:[%s11305_s9 + $0x6c0] sm:$0xff]  }
 0x16a   : > { %7505 = vst.msk [vmem:[%s11552_s12 + $0xe0] sm:$0xf] %vm7448_vm3, %v9537_v20  ;;  %7761 = vst.msk [vmem:[%s11552_s12 + $0x4e0] sm:$0xf] %vm7448_vm3, %v9793_v21  ;;  %v9538_v26 = vpack.c.bf16 %v4945_v22, %v4945_v22  ;;  %v9794_v27 = vpack.c.bf16 %v5201_v23, %v5201_v23  ;;  %v10329_v28 = vpop.f32.mrb[60].mxu0  ;;  %v10585_v29 = vpop.f32.mrb[60].mxu1 }
 0x16b   : > { %7508 = vst.msk [vmem:[%s11552_s12 + $0xec] sm:$0xf] %vm7448_vm3, %v9540_v24  ;;  %7764 = vst.msk [vmem:[%s11552_s12 + $0x4ec] sm:$0xf] %vm7448_vm3, %v9796_v25  ;;  %v3090_v30 = vadd.f32 %v11857_v38, %v10329_v28  ;;  %v4114_v31 = vadd.f32 %v11857_v38, %v10585_v29  ;;  %v3081_v32 = vpop.f32.mrb[61].mxu0  ;;  %v4105_v55 = vpop.f32.mrb[61].mxu1 }
 0x16c   : > { %7506 = vst.msk [vmem:[%s11552_s12 + $0xe4] sm:$0xf] %vm7448_vm3, %v9538_v26  ;;  %7762 = vst.msk [vmem:[%s11552_s12 + $0x4e4] sm:$0xf] %vm7448_vm3, %v9794_v27  ;;  %v3082_v35 = vadd.f32 %v11857_v38, %v3081_v32  ;;  %v4106_v36 = vadd.f32 %v11857_v38, %v4105_v55  ;;  %v10330_v37 = vpop.f32.mrb[62].mxu0  ;;  %v10586_v39 = vpop.f32.mrb[62].mxu1 }
 0x16d   : > { %v4950_v42 = vmax.f32 %v3090_v30, 0.0  ;;  %v5206_v43 = vmax.f32 %v4114_v31, 0.0  ;;  %v3093_v44 = vadd.f32 %v11857_v38, %v10330_v37  ;;  %v4117_v45 = vadd.f32 %v11857_v38, %v10586_v39  ;;  %v3084_v46 = vpop.f32.mrb[63].mxu0  ;;  %v4108_v47 = vpop.f32.mrb[63].mxu1 }
 0x16e   : > { %v4948_v48 = vmax.f32 %v3082_v35, 0.0  ;;  %v5204_v49 = vmax.f32 %v4106_v36, 0.0  ;;  %v3085_v50 = vadd.f32 %v11857_v38, %v3084_v46  ;;  %v4109_v51 = vadd.f32 %v11857_v38, %v4108_v47 }
 0x16f   : > { %v9543_v52 = vpack.c.bf16 %v4950_v42, %v4950_v42  ;;  %v9799_v53 = vpack.c.bf16 %v5206_v43, %v5206_v43  ;;  %v4951_v54 = vmax.f32 %v3093_v44, 0.0  ;;  %v5207_v56 = vmax.f32 %v4117_v45, 0.0  ;;  %10436 = vmatmul.mubr.msk.bf16.gmra.mrb[168].mxu0 %vm2031_vm2, %v11053_v33  ;;  %10692 = vmatmul.mubr.msk.bf16.gmra.mrb[168].mxu1 %vm2031_vm2, %v11054_v34  ;;  %v11061_v43 = vld [vmem:[%s11305_s9 + $0x2c8] sm:$0xff]  }
 0x170   : > { %v9541_v57 = vpack.c.bf16 %v4948_v48, %v4948_v48  ;;  %v9797_v58 = vpack.c.bf16 %v5204_v49, %v5204_v49  ;;  %v4949_v59 = vmax.f32 %v3085_v50, 0.0  ;;  %v5205_v60 = vmax.f32 %v4109_v51, 0.0  ;;  %10439 = vmatprep.mubr.msk.bf16.mxu0 %vm2031_vm2, %v11055_v40  ;;  %10695 = vmatprep.mubr.msk.bf16.mxu1 %vm2031_vm2, %v11056_v41  ;;  %v11062_v44 = vld [vmem:[%s11305_s9 + $0x6c8] sm:$0xff]   ;;  %v11063_v49 = vld [vmem:[%s11305_s9 + $0x2d0] sm:$0xff]  }
 0x171   : > { %7511 = vst.msk [vmem:[%s11552_s12 + $0xf8] sm:$0xf] %vm7448_vm3, %v9543_v52  ;;  %7767 = vst.msk [vmem:[%s11552_s12 + $0x4f8] sm:$0xf] %vm7448_vm3, %v9799_v53  ;;  %v9544_v61 = vpack.c.bf16 %v4951_v54, %v4951_v54  ;;  %v9800_v62 = vpack.c.bf16 %v5207_v56, %v5207_v56  ;;  %v11064_v50 = vld [vmem:[%s11305_s9 + $0x6d0] sm:$0xff]  }
 0x172   : > { %7509 = vst.msk [vmem:[%s11552_s12 + $0xf0] sm:$0xf] %vm7448_vm3, %v9541_v57  ;;  %7765 = vst.msk [vmem:[%s11552_s12 + $0x4f0] sm:$0xf] %vm7448_vm3, %v9797_v58  ;;  %v9542_v63 = vpack.c.bf16 %v4949_v59, %v4949_v59  ;;  %v9798_v0 = vpack.c.bf16 %v5205_v60, %v5205_v60  ;;  %v10333_v1 = vpop.f32.mrb[64].mxu0  ;;  %v10589_v2 = vpop.f32.mrb[64].mxu1 }
 0x173   : > { %7512 = vst.msk [vmem:[%s11552_s12 + $0xfc] sm:$0xf] %vm7448_vm3, %v9544_v61  ;;  %7768 = vst.msk [vmem:[%s11552_s12 + $0x4fc] sm:$0xf] %vm7448_vm3, %v9800_v62  ;;  %v3106_v3 = vadd.f32 %v11857_v38, %v10333_v1  ;;  %v4130_v4 = vadd.f32 %v11857_v38, %v10589_v2  ;;  %v3097_v5 = vpop.f32.mrb[65].mxu0  ;;  %v4121_v6 = vpop.f32.mrb[65].mxu1 }
 0x174   : > { %7510 = vst.msk [vmem:[%s11552_s12 + $0xf4] sm:$0xf] %vm7448_vm3, %v9542_v63  ;;  %7766 = vst.msk [vmem:[%s11552_s12 + $0x4f4] sm:$0xf] %vm7448_vm3, %v9798_v0  ;;  %v3098_v9 = vadd.f32 %v11857_v38, %v3097_v5  ;;  %v4122_v10 = vadd.f32 %v11857_v38, %v4121_v6  ;;  %v10334_v11 = vpop.f32.mrb[66].mxu0  ;;  %v10590_v12 = vpop.f32.mrb[66].mxu1 }
 0x175   : > { %v4954_v15 = vmax.f32 %v3106_v3, 0.0  ;;  %v5210_v16 = vmax.f32 %v4130_v4, 0.0  ;;  %v3109_v17 = vadd.f32 %v11857_v38, %v10334_v11  ;;  %v4133_v18 = vadd.f32 %v11857_v38, %v10590_v12  ;;  %v3100_v19 = vpop.f32.mrb[67].mxu0  ;;  %v4124_v20 = vpop.f32.mrb[67].mxu1 }
 0x176   : > { %v4952_v21 = vmax.f32 %v3098_v9, 0.0  ;;  %v5208_v22 = vmax.f32 %v4122_v10, 0.0  ;;  %v3101_v23 = vadd.f32 %v11857_v38, %v3100_v19  ;;  %v4125_v24 = vadd.f32 %v11857_v38, %v4124_v20 }
 0x177   : > { %v9547_v25 = vpack.c.bf16 %v4954_v15, %v4954_v15  ;;  %v9803_v26 = vpack.c.bf16 %v5210_v16, %v5210_v16  ;;  %v4955_v27 = vmax.f32 %v3109_v17, 0.0  ;;  %v5211_v28 = vmax.f32 %v4133_v18, 0.0  ;;  %10440 = vmatmul.mubr.msk.bf16.gmra.mrb[172].mxu0 %vm2031_vm2, %v11057_v7  ;;  %10696 = vmatmul.mubr.msk.bf16.gmra.mrb[172].mxu1 %vm2031_vm2, %v11058_v8  ;;  %v11065_v16 = vld [vmem:[%s11305_s9 + $0x2d8] sm:$0xff]  }
 0x178   : > { %v9545_v29 = vpack.c.bf16 %v4952_v21, %v4952_v21  ;;  %v9801_v30 = vpack.c.bf16 %v5208_v22, %v5208_v22  ;;  %v4953_v31 = vmax.f32 %v3101_v23, 0.0  ;;  %v5209_v32 = vmax.f32 %v4125_v24, 0.0  ;;  %10443 = vmatprep.mubr.msk.bf16.mxu0 %vm2031_vm2, %v11059_v13  ;;  %10699 = vmatprep.mubr.msk.bf16.mxu1 %vm2031_vm2, %v11060_v14  ;;  %v11066_v17 = vld [vmem:[%s11305_s9 + $0x6d8] sm:$0xff]   ;;  %v11067_v22 = vld [vmem:[%s11305_s9 + $0x2e0] sm:$0xff]  }
 0x179   : > { %7515 = vst.msk [vmem:[%s11552_s12 + $0x108] sm:$0xf] %vm7448_vm3, %v9547_v25  ;;  %7771 = vst.msk [vmem:[%s11552_s12 + $0x508] sm:$0xf] %vm7448_vm3, %v9803_v26  ;;  %v9548_v55 = vpack.c.bf16 %v4955_v27, %v4955_v27  ;;  %v9804_v33 = vpack.c.bf16 %v5211_v28, %v5211_v28  ;;  %v11068_v23 = vld [vmem:[%s11305_s9 + $0x6e0] sm:$0xff]  }
 0x17a   : > { %7513 = vst.msk [vmem:[%s11552_s12 + $0x100] sm:$0xf] %vm7448_vm3, %v9545_v29  ;;  %7769 = vst.msk [vmem:[%s11552_s12 + $0x500] sm:$0xf] %vm7448_vm3, %v9801_v30  ;;  %v9546_v34 = vpack.c.bf16 %v4953_v31, %v4953_v31  ;;  %v9802_v35 = vpack.c.bf16 %v5209_v32, %v5209_v32  ;;  %v10337_v36 = vpop.f32.mrb[68].mxu0  ;;  %v10593_v37 = vpop.f32.mrb[68].mxu1 }
 0x17b   : > { %7516 = vst.msk [vmem:[%s11552_s12 + $0x10c] sm:$0xf] %vm7448_vm3, %v9548_v55  ;;  %7772 = vst.msk [vmem:[%s11552_s12 + $0x50c] sm:$0xf] %vm7448_vm3, %v9804_v33  ;;  %v3122_v39 = vadd.f32 %v11857_v38, %v10337_v36  ;;  %v4146_v40 = vadd.f32 %v11857_v38, %v10593_v37  ;;  %v3113_v41 = vpop.f32.mrb[69].mxu0  ;;  %v4137_v42 = vpop.f32.mrb[69].mxu1 }
 0x17c   : > { %7514 = vst.msk [vmem:[%s11552_s12 + $0x104] sm:$0xf] %vm7448_vm3, %v9546_v34  ;;  %7770 = vst.msk [vmem:[%s11552_s12 + $0x504] sm:$0xf] %vm7448_vm3, %v9802_v35  ;;  %v3114_v45 = vadd.f32 %v11857_v38, %v3113_v41  ;;  %v4138_v46 = vadd.f32 %v11857_v38, %v4137_v42  ;;  %v10338_v47 = vpop.f32.mrb[70].mxu0  ;;  %v10594_v48 = vpop.f32.mrb[70].mxu1 }
 0x17d   : > { %v4958_v51 = vmax.f32 %v3122_v39, 0.0  ;;  %v5214_v52 = vmax.f32 %v4146_v40, 0.0  ;;  %v3125_v53 = vadd.f32 %v11857_v38, %v10338_v47  ;;  %v4149_v54 = vadd.f32 %v11857_v38, %v10594_v48  ;;  %v3116_v56 = vpop.f32.mrb[71].mxu0  ;;  %v4140_v57 = vpop.f32.mrb[71].mxu1 }
 0x17e   : > { %v4956_v58 = vmax.f32 %v3114_v45, 0.0  ;;  %v5212_v59 = vmax.f32 %v4138_v46, 0.0  ;;  %v3117_v60 = vadd.f32 %v11857_v38, %v3116_v56  ;;  %v4141_v61 = vadd.f32 %v11857_v38, %v4140_v57 }
 0x17f   : > { %v9551_v62 = vpack.c.bf16 %v4958_v51, %v4958_v51  ;;  %v9807_v63 = vpack.c.bf16 %v5214_v52, %v5214_v52  ;;  %v4959_v0 = vmax.f32 %v3125_v53, 0.0  ;;  %v5215_v1 = vmax.f32 %v4149_v54, 0.0  ;;  %10444 = vmatmul.mubr.msk.bf16.gmra.mrb[176].mxu0 %vm2031_vm2, %v11061_v43  ;;  %10700 = vmatmul.mubr.msk.bf16.gmra.mrb[176].mxu1 %vm2031_vm2, %v11062_v44  ;;  %v11069_v52 = vld [vmem:[%s11305_s9 + $0x2e8] sm:$0xff]  }
 0x180   : > { %v9549_v2 = vpack.c.bf16 %v4956_v58, %v4956_v58  ;;  %v9805_v3 = vpack.c.bf16 %v5212_v59, %v5212_v59  ;;  %v4957_v4 = vmax.f32 %v3117_v60, 0.0  ;;  %v5213_v5 = vmax.f32 %v4141_v61, 0.0  ;;  %10447 = vmatprep.mubr.msk.bf16.mxu0 %vm2031_vm2, %v11063_v49  ;;  %10703 = vmatprep.mubr.msk.bf16.mxu1 %vm2031_vm2, %v11064_v50  ;;  %v11070_v53 = vld [vmem:[%s11305_s9 + $0x6e8] sm:$0xff]   ;;  %v11071_v59 = vld [vmem:[%s11305_s9 + $0x2f0] sm:$0xff]  }
 0x181   : > { %7519 = vst.msk [vmem:[%s11552_s12 + $0x118] sm:$0xf] %vm7448_vm3, %v9551_v62  ;;  %7775 = vst.msk [vmem:[%s11552_s12 + $0x518] sm:$0xf] %vm7448_vm3, %v9807_v63  ;;  %v9552_v6 = vpack.c.bf16 %v4959_v0, %v4959_v0  ;;  %v9808_v7 = vpack.c.bf16 %v5215_v1, %v5215_v1  ;;  %v11072_v60 = vld [vmem:[%s11305_s9 + $0x6f0] sm:$0xff]  }
 0x182   : > { %7517 = vst.msk [vmem:[%s11552_s12 + $0x110] sm:$0xf] %vm7448_vm3, %v9549_v2  ;;  %7773 = vst.msk [vmem:[%s11552_s12 + $0x510] sm:$0xf] %vm7448_vm3, %v9805_v3  ;;  %v9550_v8 = vpack.c.bf16 %v4957_v4, %v4957_v4  ;;  %v9806_v9 = vpack.c.bf16 %v5213_v5, %v5213_v5  ;;  %v10341_v10 = vpop.f32.mrb[72].mxu0  ;;  %v10597_v11 = vpop.f32.mrb[72].mxu1 }
 0x183   : > { %7520 = vst.msk [vmem:[%s11552_s12 + $0x11c] sm:$0xf] %vm7448_vm3, %v9552_v6  ;;  %7776 = vst.msk [vmem:[%s11552_s12 + $0x51c] sm:$0xf] %vm7448_vm3, %v9808_v7  ;;  %v3138_v12 = vadd.f32 %v11857_v38, %v10341_v10  ;;  %v4162_v13 = vadd.f32 %v11857_v38, %v10597_v11  ;;  %v3129_v14 = vpop.f32.mrb[73].mxu0  ;;  %v4153_v15 = vpop.f32.mrb[73].mxu1 }
 0x184   : > { %7518 = vst.msk [vmem:[%s11552_s12 + $0x114] sm:$0xf] %vm7448_vm3, %v9550_v8  ;;  %7774 = vst.msk [vmem:[%s11552_s12 + $0x514] sm:$0xf] %vm7448_vm3, %v9806_v9  ;;  %v3130_v18 = vadd.f32 %v11857_v38, %v3129_v14  ;;  %v4154_v19 = vadd.f32 %v11857_v38, %v4153_v15  ;;  %v10342_v20 = vpop.f32.mrb[74].mxu0  ;;  %v10598_v21 = vpop.f32.mrb[74].mxu1 }
 0x185   : > { %v4962_v24 = vmax.f32 %v3138_v12, 0.0  ;;  %v5218_v25 = vmax.f32 %v4162_v13, 0.0  ;;  %v3141_v26 = vadd.f32 %v11857_v38, %v10342_v20  ;;  %v4165_v27 = vadd.f32 %v11857_v38, %v10598_v21  ;;  %v3132_v28 = vpop.f32.mrb[75].mxu0  ;;  %v4156_v29 = vpop.f32.mrb[75].mxu1 }
 0x186   : > { %v4960_v30 = vmax.f32 %v3130_v18, 0.0  ;;  %v5216_v31 = vmax.f32 %v4154_v19, 0.0  ;;  %v3133_v32 = vadd.f32 %v11857_v38, %v3132_v28  ;;  %v4157_v55 = vadd.f32 %v11857_v38, %v4156_v29 }
 0x187   : > { %v9555_v33 = vpack.c.bf16 %v4962_v24, %v4962_v24  ;;  %v9811_v34 = vpack.c.bf16 %v5218_v25, %v5218_v25  ;;  %v4963_v35 = vmax.f32 %v3141_v26, 0.0  ;;  %v5219_v36 = vmax.f32 %v4165_v27, 0.0  ;;  %10448 = vmatmul.mubr.msk.bf16.gmra.mrb[180].mxu0 %vm2031_vm2, %v11065_v16  ;;  %10704 = vmatmul.mubr.msk.bf16.gmra.mrb[180].mxu1 %vm2031_vm2, %v11066_v17  ;;  %v11073_v25 = vld [vmem:[%s11305_s9 + $0x2f8] sm:$0xff]  }
 0x188   : > { %v9553_v37 = vpack.c.bf16 %v4960_v30, %v4960_v30  ;;  %v9809_v39 = vpack.c.bf16 %v5216_v31, %v5216_v31  ;;  %v4961_v40 = vmax.f32 %v3133_v32, 0.0  ;;  %v5217_v41 = vmax.f32 %v4157_v55, 0.0  ;;  %10451 = vmatprep.mubr.msk.bf16.mxu0 %vm2031_vm2, %v11067_v22  ;;  %10707 = vmatprep.mubr.msk.bf16.mxu1 %vm2031_vm2, %v11068_v23  ;;  %v11074_v26 = vld [vmem:[%s11305_s9 + $0x6f8] sm:$0xff]   ;;  %v11075_v31 = vld [vmem:[%s11305_s9 + $0x300] sm:$0xff]  }
 0x189   : > { %7523 = vst.msk [vmem:[%s11552_s12 + $0x128] sm:$0xf] %vm7448_vm3, %v9555_v33  ;;  %7779 = vst.msk [vmem:[%s11552_s12 + $0x528] sm:$0xf] %vm7448_vm3, %v9811_v34  ;;  %v9556_v42 = vpack.c.bf16 %v4963_v35, %v4963_v35  ;;  %v9812_v43 = vpack.c.bf16 %v5219_v36, %v5219_v36  ;;  %v11076_v32 = vld [vmem:[%s11305_s9 + $0x700] sm:$0xff]  }
 0x18a   : > { %7521 = vst.msk [vmem:[%s11552_s12 + $0x120] sm:$0xf] %vm7448_vm3, %v9553_v37  ;;  %7777 = vst.msk [vmem:[%s11552_s12 + $0x520] sm:$0xf] %vm7448_vm3, %v9809_v39  ;;  %v9554_v44 = vpack.c.bf16 %v4961_v40, %v4961_v40  ;;  %v9810_v45 = vpack.c.bf16 %v5217_v41, %v5217_v41  ;;  %v10345_v46 = vpop.f32.mrb[76].mxu0  ;;  %v10601_v47 = vpop.f32.mrb[76].mxu1 }
 0x18b   : > { %7524 = vst.msk [vmem:[%s11552_s12 + $0x12c] sm:$0xf] %vm7448_vm3, %v9556_v42  ;;  %7780 = vst.msk [vmem:[%s11552_s12 + $0x52c] sm:$0xf] %vm7448_vm3, %v9812_v43  ;;  %v3154_v48 = vadd.f32 %v11857_v38, %v10345_v46  ;;  %v4178_v49 = vadd.f32 %v11857_v38, %v10601_v47  ;;  %v3145_v50 = vpop.f32.mrb[77].mxu0  ;;  %v4169_v51 = vpop.f32.mrb[77].mxu1 }
 0x18c   : > { %7522 = vst.msk [vmem:[%s11552_s12 + $0x124] sm:$0xf] %vm7448_vm3, %v9554_v44  ;;  %7778 = vst.msk [vmem:[%s11552_s12 + $0x524] sm:$0xf] %vm7448_vm3, %v9810_v45  ;;  %v3146_v54 = vadd.f32 %v11857_v38, %v3145_v50  ;;  %v4170_v56 = vadd.f32 %v11857_v38, %v4169_v51  ;;  %v10346_v57 = vpop.f32.mrb[78].mxu0  ;;  %v10602_v58 = vpop.f32.mrb[78].mxu1 }
 0x18d   : > { %v4966_v61 = vmax.f32 %v3154_v48, 0.0  ;;  %v5222_v62 = vmax.f32 %v4178_v49, 0.0  ;;  %v3157_v63 = vadd.f32 %v11857_v38, %v10346_v57  ;;  %v4181_v0 = vadd.f32 %v11857_v38, %v10602_v58  ;;  %v3148_v1 = vpop.f32.mrb[79].mxu0  ;;  %v4172_v2 = vpop.f32.mrb[79].mxu1  ;;  %v12214_v57 = vld [vmem:[%s13592_s2] ss:$0 sm:$0xff] }
 0x18e   : > { %v4964_v3 = vmax.f32 %v3146_v54, 0.0  ;;  %v5220_v4 = vmax.f32 %v4170_v56, 0.0  ;;  %v3149_v5 = vadd.f32 %v11857_v38, %v3148_v1  ;;  %v4173_v6 = vadd.f32 %v11857_v38, %v4172_v2 }
 0x18f   : > { %v9559_v7 = vpack.c.bf16 %v4966_v61, %v4966_v61  ;;  %v9815_v8 = vpack.c.bf16 %v5222_v62, %v5222_v62  ;;  %v4967_v9 = vmax.f32 %v3157_v63, 0.0  ;;  %v5223_v10 = vmax.f32 %v4181_v0, 0.0  ;;  %10452 = vmatmul.mubr.msk.bf16.gmra.mrb[184].mxu0 %vm2031_vm2, %v11069_v52  ;;  %10708 = vmatmul.mubr.msk.bf16.gmra.mrb[184].mxu1 %vm2031_vm2, %v11070_v53  ;;  %v11077_v62 = vld [vmem:[%s11305_s9 + $0x308] sm:$0xff]  }
 0x190   : > { %v9557_v11 = vpack.c.bf16 %v4964_v3, %v4964_v3  ;;  %v9813_v12 = vpack.c.bf16 %v5220_v4, %v5220_v4  ;;  %v4965_v13 = vmax.f32 %v3149_v5, 0.0  ;;  %v5221_v14 = vmax.f32 %v4173_v6, 0.0  ;;  %10455 = vmatprep.mubr.msk.bf16.mxu0 %vm2031_vm2, %v11071_v59  ;;  %10711 = vmatprep.mubr.msk.bf16.mxu1 %vm2031_vm2, %v11072_v60  ;;  %v11078_v63 = vld [vmem:[%s11305_s9 + $0x708] sm:$0xff]   ;;  %v11079_v4 = vld [vmem:[%s11305_s9 + $0x310] sm:$0xff]  }
 0x191   : > { %7527 = vst.msk [vmem:[%s11552_s12 + $0x138] sm:$0xf] %vm7448_vm3, %v9559_v7  ;;  %7783 = vst.msk [vmem:[%s11552_s12 + $0x538] sm:$0xf] %vm7448_vm3, %v9815_v8  ;;  %v9560_v15 = vpack.c.bf16 %v4967_v9, %v4967_v9  ;;  %v9816_v16 = vpack.c.bf16 %v5223_v10, %v5223_v10  ;;  %v11080_v5 = vld [vmem:[%s11305_s9 + $0x710] sm:$0xff]  }
 0x192   : > { %7525 = vst.msk [vmem:[%s11552_s12 + $0x130] sm:$0xf] %vm7448_vm3, %v9557_v11  ;;  %7781 = vst.msk [vmem:[%s11552_s12 + $0x530] sm:$0xf] %vm7448_vm3, %v9813_v12  ;;  %v9558_v17 = vpack.c.bf16 %v4965_v13, %v4965_v13  ;;  %v9814_v18 = vpack.c.bf16 %v5221_v14, %v5221_v14  ;;  %v10349_v19 = vpop.f32.mrb[80].mxu0  ;;  %v10605_v20 = vpop.f32.mrb[80].mxu1 }
 0x193   : > { %7528 = vst.msk [vmem:[%s11552_s12 + $0x13c] sm:$0xf] %vm7448_vm3, %v9560_v15  ;;  %7784 = vst.msk [vmem:[%s11552_s12 + $0x53c] sm:$0xf] %vm7448_vm3, %v9816_v16  ;;  %v3170_v21 = vadd.f32 %v11857_v38, %v10349_v19  ;;  %v4194_v22 = vadd.f32 %v11857_v38, %v10605_v20  ;;  %v3161_v23 = vpop.f32.mrb[81].mxu0  ;;  %v4185_v24 = vpop.f32.mrb[81].mxu1 }
 0x194   : > { %7526 = vst.msk [vmem:[%s11552_s12 + $0x134] sm:$0xf] %vm7448_vm3, %v9558_v17  ;;  %7782 = vst.msk [vmem:[%s11552_s12 + $0x534] sm:$0xf] %vm7448_vm3, %v9814_v18  ;;  %v3162_v27 = vadd.f32 %v11857_v38, %v3161_v23  ;;  %v4186_v28 = vadd.f32 %v11857_v38, %v4185_v24  ;;  %v10350_v29 = vpop.f32.mrb[82].mxu0  ;;  %v10606_v30 = vpop.f32.mrb[82].mxu1 }
 0x195   : > { %v4970_v55 = vmax.f32 %v3170_v21, 0.0  ;;  %v5226_v33 = vmax.f32 %v4194_v22, 0.0  ;;  %v3173_v34 = vadd.f32 %v11857_v38, %v10350_v29  ;;  %v4197_v35 = vadd.f32 %v11857_v38, %v10606_v30  ;;  %v3164_v36 = vpop.f32.mrb[83].mxu0  ;;  %v4188_v37 = vpop.f32.mrb[83].mxu1 }
 0x196   : > { %v4968_v39 = vmax.f32 %v3162_v27, 0.0  ;;  %v5224_v40 = vmax.f32 %v4186_v28, 0.0  ;;  %v3165_v41 = vadd.f32 %v11857_v38, %v3164_v36  ;;  %v4189_v42 = vadd.f32 %v11857_v38, %v4188_v37 }
 0x197   : > { %v9563_v43 = vpack.c.bf16 %v4970_v55, %v4970_v55  ;;  %v9819_v44 = vpack.c.bf16 %v5226_v33, %v5226_v33  ;;  %v4971_v45 = vmax.f32 %v3173_v34, 0.0  ;;  %v5227_v46 = vmax.f32 %v4197_v35, 0.0  ;;  %10456 = vmatmul.mubr.msk.bf16.gmra.mrb[188].mxu0 %vm2031_vm2, %v11073_v25  ;;  %10712 = vmatmul.mubr.msk.bf16.gmra.mrb[188].mxu1 %vm2031_vm2, %v11074_v26  ;;  %v11081_v33 = vld [vmem:[%s11305_s9 + $0x318] sm:$0xff]  }
 0x198   : > { %v9561_v47 = vpack.c.bf16 %v4968_v39, %v4968_v39  ;;  %v9817_v48 = vpack.c.bf16 %v5224_v40, %v5224_v40  ;;  %v4969_v49 = vmax.f32 %v3165_v41, 0.0  ;;  %v5225_v50 = vmax.f32 %v4189_v42, 0.0  ;;  %10459 = vmatprep.mubr.msk.bf16.mxu0 %vm2031_vm2, %v11075_v31  ;;  %10715 = vmatprep.mubr.msk.bf16.mxu1 %vm2031_vm2, %v11076_v32  ;;  %v11082_v34 = vld [vmem:[%s11305_s9 + $0x718] sm:$0xff]   ;;  %v11083_v40 = vld [vmem:[%s11305_s9 + $0x320] sm:$0xff]  }
 0x199   : > { %7531 = vst.msk [vmem:[%s11552_s12 + $0x148] sm:$0xf] %vm7448_vm3, %v9563_v43  ;;  %7787 = vst.msk [vmem:[%s11552_s12 + $0x548] sm:$0xf] %vm7448_vm3, %v9819_v44  ;;  %v9564_v38 = vpack.c.bf16 %v4971_v45, %v4971_v45  ;;  %v9820_v51 = vpack.c.bf16 %v5227_v46, %v5227_v46  ;;  %v11084_v41 = vld [vmem:[%s11305_s9 + $0x720] sm:$0xff]  }
 0x19a   : > { %7529 = vst.msk [vmem:[%s11552_s12 + $0x140] sm:$0xf] %vm7448_vm3, %v9561_v47  ;;  %7785 = vst.msk [vmem:[%s11552_s12 + $0x540] sm:$0xf] %vm7448_vm3, %v9817_v48  ;;  %v9562_v52 = vpack.c.bf16 %v4969_v49, %v4969_v49  ;;  %v9818_v53 = vpack.c.bf16 %v5225_v50, %v5225_v50  ;;  %v10353_v54 = vpop.f32.mrb[84].mxu0  ;;  %v10609_v56 = vpop.f32.mrb[84].mxu1 }
 0x19b   : > { %7532 = vst.msk [vmem:[%s11552_s12 + $0x14c] sm:$0xf] %vm7448_vm3, %v9564_v38  ;;  %7788 = vst.msk [vmem:[%s11552_s12 + $0x54c] sm:$0xf] %vm7448_vm3, %v9820_v51  ;;  %v3186_v58 = vadd.f32 %v12214_v57, %v10353_v54  ;;  %v4210_v59 = vadd.f32 %v12214_v57, %v10609_v56  ;;  %v3177_v60 = vpop.f32.mrb[85].mxu0  ;;  %v4201_v61 = vpop.f32.mrb[85].mxu1 }
 0x19c   : > { %7530 = vst.msk [vmem:[%s11552_s12 + $0x144] sm:$0xf] %vm7448_vm3, %v9562_v52  ;;  %7786 = vst.msk [vmem:[%s11552_s12 + $0x544] sm:$0xf] %vm7448_vm3, %v9818_v53  ;;  %v3178_v0 = vadd.f32 %v12214_v57, %v3177_v60  ;;  %v4202_v1 = vadd.f32 %v12214_v57, %v4201_v61  ;;  %v10354_v2 = vpop.f32.mrb[86].mxu0  ;;  %v10610_v3 = vpop.f32.mrb[86].mxu1 }
 0x19d   : > { %v4974_v6 = vmax.f32 %v3186_v58, 0.0  ;;  %v5230_v7 = vmax.f32 %v4210_v59, 0.0  ;;  %v3189_v8 = vadd.f32 %v12214_v57, %v10354_v2  ;;  %v4213_v9 = vadd.f32 %v12214_v57, %v10610_v3  ;;  %v3180_v10 = vpop.f32.mrb[87].mxu0  ;;  %v4204_v11 = vpop.f32.mrb[87].mxu1 }
 0x19e   : > { %v4972_v12 = vmax.f32 %v3178_v0, 0.0  ;;  %v5228_v13 = vmax.f32 %v4202_v1, 0.0  ;;  %v3181_v14 = vadd.f32 %v12214_v57, %v3180_v10  ;;  %v4205_v15 = vadd.f32 %v12214_v57, %v4204_v11 }
 0x19f   : > { %v9567_v16 = vpack.c.bf16 %v4974_v6, %v4974_v6  ;;  %v9823_v17 = vpack.c.bf16 %v5230_v7, %v5230_v7  ;;  %v4975_v18 = vmax.f32 %v3189_v8, 0.0  ;;  %v5231_v19 = vmax.f32 %v4213_v9, 0.0  ;;  %10460 = vmatmul.mubr.msk.bf16.gmra.mrb[192].mxu0 %vm2031_vm2, %v11077_v62  ;;  %10716 = vmatmul.mubr.msk.bf16.gmra.mrb[192].mxu1 %vm2031_vm2, %v11078_v63  ;;  %v11085_v7 = vld [vmem:[%s11305_s9 + $0x328] sm:$0xff]  }
 0x1a0   : > { %v9565_v20 = vpack.c.bf16 %v4972_v12, %v4972_v12  ;;  %v9821_v21 = vpack.c.bf16 %v5228_v13, %v5228_v13  ;;  %v4973_v22 = vmax.f32 %v3181_v14, 0.0  ;;  %v5229_v23 = vmax.f32 %v4205_v15, 0.0  ;;  %10463 = vmatprep.mubr.msk.bf16.mxu0 %vm2031_vm2, %v11079_v4  ;;  %10719 = vmatprep.mubr.msk.bf16.mxu1 %vm2031_vm2, %v11080_v5  ;;  %v11086_v8 = vld [vmem:[%s11305_s9 + $0x728] sm:$0xff]   ;;  %v11087_v13 = vld [vmem:[%s11305_s9 + $0x330] sm:$0xff]  }
 0x1a1   : > { %7535 = vst.msk [vmem:[%s11552_s12 + $0x158] sm:$0xf] %vm7448_vm3, %v9567_v16  ;;  %7791 = vst.msk [vmem:[%s11552_s12 + $0x558] sm:$0xf] %vm7448_vm3, %v9823_v17  ;;  %v9568_v24 = vpack.c.bf16 %v4975_v18, %v4975_v18  ;;  %v9824_v25 = vpack.c.bf16 %v5231_v19, %v5231_v19  ;;  %v11088_v14 = vld [vmem:[%s11305_s9 + $0x730] sm:$0xff]  }
 0x1a2   : > { %7533 = vst.msk [vmem:[%s11552_s12 + $0x150] sm:$0xf] %vm7448_vm3, %v9565_v20  ;;  %7789 = vst.msk [vmem:[%s11552_s12 + $0x550] sm:$0xf] %vm7448_vm3, %v9821_v21  ;;  %v9566_v26 = vpack.c.bf16 %v4973_v22, %v4973_v22  ;;  %v9822_v27 = vpack.c.bf16 %v5229_v23, %v5229_v23  ;;  %v10357_v28 = vpop.f32.mrb[88].mxu0  ;;  %v10613_v29 = vpop.f32.mrb[88].mxu1 }
 0x1a3   : > { %7536 = vst.msk [vmem:[%s11552_s12 + $0x15c] sm:$0xf] %vm7448_vm3, %v9568_v24  ;;  %7792 = vst.msk [vmem:[%s11552_s12 + $0x55c] sm:$0xf] %vm7448_vm3, %v9824_v25  ;;  %v3202_v30 = vadd.f32 %v12214_v57, %v10357_v28  ;;  %v4226_v31 = vadd.f32 %v12214_v57, %v10613_v29  ;;  %v3193_v32 = vpop.f32.mrb[89].mxu0  ;;  %v4217_v55 = vpop.f32.mrb[89].mxu1 }
 0x1a4   : > { %7534 = vst.msk [vmem:[%s11552_s12 + $0x154] sm:$0xf] %vm7448_vm3, %v9566_v26  ;;  %7790 = vst.msk [vmem:[%s11552_s12 + $0x554] sm:$0xf] %vm7448_vm3, %v9822_v27  ;;  %v3194_v35 = vadd.f32 %v12214_v57, %v3193_v32  ;;  %v4218_v36 = vadd.f32 %v12214_v57, %v4217_v55  ;;  %v10358_v37 = vpop.f32.mrb[90].mxu0  ;;  %v10614_v39 = vpop.f32.mrb[90].mxu1 }
 0x1a5   : > { %v4978_v42 = vmax.f32 %v3202_v30, 0.0  ;;  %v5234_v43 = vmax.f32 %v4226_v31, 0.0  ;;  %v3205_v44 = vadd.f32 %v12214_v57, %v10358_v37  ;;  %v4229_v45 = vadd.f32 %v12214_v57, %v10614_v39  ;;  %v3196_v46 = vpop.f32.mrb[91].mxu0  ;;  %v4220_v47 = vpop.f32.mrb[91].mxu1 }
 0x1a6   : > { %v4976_v48 = vmax.f32 %v3194_v35, 0.0  ;;  %v5232_v49 = vmax.f32 %v4218_v36, 0.0  ;;  %v3197_v50 = vadd.f32 %v12214_v57, %v3196_v46  ;;  %v4221_v38 = vadd.f32 %v12214_v57, %v4220_v47 }
 0x1a7   : > { %v9571_v51 = vpack.c.bf16 %v4978_v42, %v4978_v42  ;;  %v9827_v52 = vpack.c.bf16 %v5234_v43, %v5234_v43  ;;  %v4979_v53 = vmax.f32 %v3205_v44, 0.0  ;;  %v5235_v54 = vmax.f32 %v4229_v45, 0.0  ;;  %10464 = vmatmul.mubr.msk.bf16.gmra.mrb[196].mxu0 %vm2031_vm2, %v11081_v33  ;;  %10720 = vmatmul.mubr.msk.bf16.gmra.mrb[196].mxu1 %vm2031_vm2, %v11082_v34  ;;  %v11089_v43 = vld [vmem:[%s11305_s9 + $0x338] sm:$0xff]  }
 0x1a8   : > { %v9569_v56 = vpack.c.bf16 %v4976_v48, %v4976_v48  ;;  %v9825_v58 = vpack.c.bf16 %v5232_v49, %v5232_v49  ;;  %v4977_v59 = vmax.f32 %v3197_v50, 0.0  ;;  %v5233_v60 = vmax.f32 %v4221_v38, 0.0  ;;  %10467 = vmatprep.mubr.msk.bf16.mxu0 %vm2031_vm2, %v11083_v40  ;;  %10723 = vmatprep.mubr.msk.bf16.mxu1 %vm2031_vm2, %v11084_v41  ;;  %v11090_v44 = vld [vmem:[%s11305_s9 + $0x738] sm:$0xff]   ;;  %v11091_v49 = vld [vmem:[%s11305_s9 + $0x340] sm:$0xff]  }
 0x1a9   : > { %7539 = vst.msk [vmem:[%s11552_s12 + $0x168] sm:$0xf] %vm7448_vm3, %v9571_v51  ;;  %7795 = vst.msk [vmem:[%s11552_s12 + $0x568] sm:$0xf] %vm7448_vm3, %v9827_v52  ;;  %v9572_v61 = vpack.c.bf16 %v4979_v53, %v4979_v53  ;;  %v9828_v62 = vpack.c.bf16 %v5235_v54, %v5235_v54  ;;  %v11092_v50 = vld [vmem:[%s11305_s9 + $0x740] sm:$0xff]  }
 0x1aa   : > { %7537 = vst.msk [vmem:[%s11552_s12 + $0x160] sm:$0xf] %vm7448_vm3, %v9569_v56  ;;  %7793 = vst.msk [vmem:[%s11552_s12 + $0x560] sm:$0xf] %vm7448_vm3, %v9825_v58  ;;  %v9570_v63 = vpack.c.bf16 %v4977_v59, %v4977_v59  ;;  %v9826_v0 = vpack.c.bf16 %v5233_v60, %v5233_v60  ;;  %v10361_v1 = vpop.f32.mrb[92].mxu0  ;;  %v10617_v2 = vpop.f32.mrb[92].mxu1 }
 0x1ab   : > { %7540 = vst.msk [vmem:[%s11552_s12 + $0x16c] sm:$0xf] %vm7448_vm3, %v9572_v61  ;;  %7796 = vst.msk [vmem:[%s11552_s12 + $0x56c] sm:$0xf] %vm7448_vm3, %v9828_v62  ;;  %v3218_v3 = vadd.f32 %v12214_v57, %v10361_v1  ;;  %v4242_v4 = vadd.f32 %v12214_v57, %v10617_v2  ;;  %v3209_v5 = vpop.f32.mrb[93].mxu0  ;;  %v4233_v6 = vpop.f32.mrb[93].mxu1 }
 0x1ac   : > { %7538 = vst.msk [vmem:[%s11552_s12 + $0x164] sm:$0xf] %vm7448_vm3, %v9570_v63  ;;  %7794 = vst.msk [vmem:[%s11552_s12 + $0x564] sm:$0xf] %vm7448_vm3, %v9826_v0  ;;  %v3210_v9 = vadd.f32 %v12214_v57, %v3209_v5  ;;  %v4234_v10 = vadd.f32 %v12214_v57, %v4233_v6  ;;  %v10362_v11 = vpop.f32.mrb[94].mxu0  ;;  %v10618_v12 = vpop.f32.mrb[94].mxu1 }
 0x1ad   : > { %v4982_v15 = vmax.f32 %v3218_v3, 0.0  ;;  %v5238_v16 = vmax.f32 %v4242_v4, 0.0  ;;  %v3221_v17 = vadd.f32 %v12214_v57, %v10362_v11  ;;  %v4245_v18 = vadd.f32 %v12214_v57, %v10618_v12  ;;  %v3212_v19 = vpop.f32.mrb[95].mxu0  ;;  %v4236_v20 = vpop.f32.mrb[95].mxu1 }
 0x1ae   : > { %v4980_v21 = vmax.f32 %v3210_v9, 0.0  ;;  %v5236_v22 = vmax.f32 %v4234_v10, 0.0  ;;  %v3213_v23 = vadd.f32 %v12214_v57, %v3212_v19  ;;  %v4237_v24 = vadd.f32 %v12214_v57, %v4236_v20 }
 0x1af   : > { %v9575_v25 = vpack.c.bf16 %v4982_v15, %v4982_v15  ;;  %v9831_v26 = vpack.c.bf16 %v5238_v16, %v5238_v16  ;;  %v4983_v27 = vmax.f32 %v3221_v17, 0.0  ;;  %v5239_v28 = vmax.f32 %v4245_v18, 0.0  ;;  %10468 = vmatmul.mubr.msk.bf16.gmra.mrb[200].mxu0 %vm2031_vm2, %v11085_v7  ;;  %10724 = vmatmul.mubr.msk.bf16.gmra.mrb[200].mxu1 %vm2031_vm2, %v11086_v8  ;;  %v11093_v16 = vld [vmem:[%s11305_s9 + $0x348] sm:$0xff]  }
 0x1b0   : > { %v9573_v29 = vpack.c.bf16 %v4980_v21, %v4980_v21  ;;  %v9829_v30 = vpack.c.bf16 %v5236_v22, %v5236_v22  ;;  %v4981_v31 = vmax.f32 %v3213_v23, 0.0  ;;  %v5237_v32 = vmax.f32 %v4237_v24, 0.0  ;;  %10471 = vmatprep.mubr.msk.bf16.mxu0 %vm2031_vm2, %v11087_v13  ;;  %10727 = vmatprep.mubr.msk.bf16.mxu1 %vm2031_vm2, %v11088_v14  ;;  %v11094_v17 = vld [vmem:[%s11305_s9 + $0x748] sm:$0xff]   ;;  %v11095_v22 = vld [vmem:[%s11305_s9 + $0x350] sm:$0xff]  }
 0x1b1   : > { %7543 = vst.msk [vmem:[%s11552_s12 + $0x178] sm:$0xf] %vm7448_vm3, %v9575_v25  ;;  %7799 = vst.msk [vmem:[%s11552_s12 + $0x578] sm:$0xf] %vm7448_vm3, %v9831_v26  ;;  %v9576_v55 = vpack.c.bf16 %v4983_v27, %v4983_v27  ;;  %v9832_v33 = vpack.c.bf16 %v5239_v28, %v5239_v28  ;;  %v11096_v23 = vld [vmem:[%s11305_s9 + $0x750] sm:$0xff]  }
 0x1b2   : > { %7541 = vst.msk [vmem:[%s11552_s12 + $0x170] sm:$0xf] %vm7448_vm3, %v9573_v29  ;;  %7797 = vst.msk [vmem:[%s11552_s12 + $0x570] sm:$0xf] %vm7448_vm3, %v9829_v30  ;;  %v9574_v34 = vpack.c.bf16 %v4981_v31, %v4981_v31  ;;  %v9830_v35 = vpack.c.bf16 %v5237_v32, %v5237_v32  ;;  %v10365_v36 = vpop.f32.mrb[96].mxu0  ;;  %v10621_v37 = vpop.f32.mrb[96].mxu1 }
 0x1b3   : > { %7544 = vst.msk [vmem:[%s11552_s12 + $0x17c] sm:$0xf] %vm7448_vm3, %v9576_v55  ;;  %7800 = vst.msk [vmem:[%s11552_s12 + $0x57c] sm:$0xf] %vm7448_vm3, %v9832_v33  ;;  %v3234_v39 = vadd.f32 %v12214_v57, %v10365_v36  ;;  %v4258_v40 = vadd.f32 %v12214_v57, %v10621_v37  ;;  %v3225_v41 = vpop.f32.mrb[97].mxu0  ;;  %v4249_v42 = vpop.f32.mrb[97].mxu1 }
 0x1b4   : > { %7542 = vst.msk [vmem:[%s11552_s12 + $0x174] sm:$0xf] %vm7448_vm3, %v9574_v34  ;;  %7798 = vst.msk [vmem:[%s11552_s12 + $0x574] sm:$0xf] %vm7448_vm3, %v9830_v35  ;;  %v3226_v45 = vadd.f32 %v12214_v57, %v3225_v41  ;;  %v4250_v46 = vadd.f32 %v12214_v57, %v4249_v42  ;;  %v10366_v47 = vpop.f32.mrb[98].mxu0  ;;  %v10622_v48 = vpop.f32.mrb[98].mxu1 }
 0x1b5   : > { %v4986_v38 = vmax.f32 %v3234_v39, 0.0  ;;  %v5242_v51 = vmax.f32 %v4258_v40, 0.0  ;;  %v3237_v52 = vadd.f32 %v12214_v57, %v10366_v47  ;;  %v4261_v53 = vadd.f32 %v12214_v57, %v10622_v48  ;;  %v3228_v54 = vpop.f32.mrb[99].mxu0  ;;  %v4252_v56 = vpop.f32.mrb[99].mxu1 }
 0x1b6   : > { %v4984_v58 = vmax.f32 %v3226_v45, 0.0  ;;  %v5240_v59 = vmax.f32 %v4250_v46, 0.0  ;;  %v3229_v60 = vadd.f32 %v12214_v57, %v3228_v54  ;;  %v4253_v61 = vadd.f32 %v12214_v57, %v4252_v56 }
 0x1b7   : > { %v9579_v62 = vpack.c.bf16 %v4986_v38, %v4986_v38  ;;  %v9835_v63 = vpack.c.bf16 %v5242_v51, %v5242_v51  ;;  %v4987_v0 = vmax.f32 %v3237_v52, 0.0  ;;  %v5243_v1 = vmax.f32 %v4261_v53, 0.0  ;;  %10472 = vmatmul.mubr.msk.bf16.gmra.mrb[204].mxu0 %vm2031_vm2, %v11089_v43  ;;  %10728 = vmatmul.mubr.msk.bf16.gmra.mrb[204].mxu1 %vm2031_vm2, %v11090_v44  ;;  %v11097_v51 = vld [vmem:[%s11305_s9 + $0x358] sm:$0xff]  }
 0x1b8   : > { %v9577_v2 = vpack.c.bf16 %v4984_v58, %v4984_v58  ;;  %v9833_v3 = vpack.c.bf16 %v5240_v59, %v5240_v59  ;;  %v4985_v4 = vmax.f32 %v3229_v60, 0.0  ;;  %v5241_v5 = vmax.f32 %v4253_v61, 0.0  ;;  %10475 = vmatprep.mubr.msk.bf16.mxu0 %vm2031_vm2, %v11091_v49  ;;  %10731 = vmatprep.mubr.msk.bf16.mxu1 %vm2031_vm2, %v11092_v50  ;;  %v11098_v52 = vld [vmem:[%s11305_s9 + $0x758] sm:$0xff]   ;;  %v11099_v59 = vld [vmem:[%s11305_s9 + $0x360] sm:$0xff]  }
 0x1b9   : > { %7547 = vst.msk [vmem:[%s11552_s12 + $0x188] sm:$0xf] %vm7448_vm3, %v9579_v62  ;;  %7803 = vst.msk [vmem:[%s11552_s12 + $0x588] sm:$0xf] %vm7448_vm3, %v9835_v63  ;;  %v9580_v6 = vpack.c.bf16 %v4987_v0, %v4987_v0  ;;  %v9836_v7 = vpack.c.bf16 %v5243_v1, %v5243_v1  ;;  %v11100_v60 = vld [vmem:[%s11305_s9 + $0x760] sm:$0xff]  }
 0x1ba   : > { %7545 = vst.msk [vmem:[%s11552_s12 + $0x180] sm:$0xf] %vm7448_vm3, %v9577_v2  ;;  %7801 = vst.msk [vmem:[%s11552_s12 + $0x580] sm:$0xf] %vm7448_vm3, %v9833_v3  ;;  %v9578_v8 = vpack.c.bf16 %v4985_v4, %v4985_v4  ;;  %v9834_v9 = vpack.c.bf16 %v5241_v5, %v5241_v5  ;;  %v10369_v10 = vpop.f32.mrb[100].mxu0  ;;  %v10625_v11 = vpop.f32.mrb[100].mxu1 }
 0x1bb   : > { %7548 = vst.msk [vmem:[%s11552_s12 + $0x18c] sm:$0xf] %vm7448_vm3, %v9580_v6  ;;  %7804 = vst.msk [vmem:[%s11552_s12 + $0x58c] sm:$0xf] %vm7448_vm3, %v9836_v7  ;;  %v3250_v12 = vadd.f32 %v12214_v57, %v10369_v10  ;;  %v4274_v13 = vadd.f32 %v12214_v57, %v10625_v11  ;;  %v3241_v14 = vpop.f32.mrb[101].mxu0  ;;  %v4265_v15 = vpop.f32.mrb[101].mxu1 }
 0x1bc   : > { %7546 = vst.msk [vmem:[%s11552_s12 + $0x184] sm:$0xf] %vm7448_vm3, %v9578_v8  ;;  %7802 = vst.msk [vmem:[%s11552_s12 + $0x584] sm:$0xf] %vm7448_vm3, %v9834_v9  ;;  %v3242_v18 = vadd.f32 %v12214_v57, %v3241_v14  ;;  %v4266_v19 = vadd.f32 %v12214_v57, %v4265_v15  ;;  %v10370_v20 = vpop.f32.mrb[102].mxu0  ;;  %v10626_v21 = vpop.f32.mrb[102].mxu1 }
 0x1bd   : > { %v4990_v24 = vmax.f32 %v3250_v12, 0.0  ;;  %v5246_v25 = vmax.f32 %v4274_v13, 0.0  ;;  %v3253_v26 = vadd.f32 %v12214_v57, %v10370_v20  ;;  %v4277_v27 = vadd.f32 %v12214_v57, %v10626_v21  ;;  %v3244_v28 = vpop.f32.mrb[103].mxu0  ;;  %v4268_v29 = vpop.f32.mrb[103].mxu1 }
 0x1be   : > { %v4988_v30 = vmax.f32 %v3242_v18, 0.0  ;;  %v5244_v31 = vmax.f32 %v4266_v19, 0.0  ;;  %v3245_v32 = vadd.f32 %v12214_v57, %v3244_v28  ;;  %v4269_v55 = vadd.f32 %v12214_v57, %v4268_v29 }
 0x1bf   : > { %v9583_v33 = vpack.c.bf16 %v4990_v24, %v4990_v24  ;;  %v9839_v34 = vpack.c.bf16 %v5246_v25, %v5246_v25  ;;  %v4991_v35 = vmax.f32 %v3253_v26, 0.0  ;;  %v5247_v36 = vmax.f32 %v4277_v27, 0.0  ;;  %10476 = vmatmul.mubr.msk.bf16.gmra.mrb[208].mxu0 %vm2031_vm2, %v11093_v16  ;;  %10732 = vmatmul.mubr.msk.bf16.gmra.mrb[208].mxu1 %vm2031_vm2, %v11094_v17  ;;  %v11101_v25 = vld [vmem:[%s11305_s9 + $0x368] sm:$0xff]  }
 0x1c0   : > { %v9581_v37 = vpack.c.bf16 %v4988_v30, %v4988_v30  ;;  %v9837_v39 = vpack.c.bf16 %v5244_v31, %v5244_v31  ;;  %v4989_v40 = vmax.f32 %v3245_v32, 0.0  ;;  %v5245_v41 = vmax.f32 %v4269_v55, 0.0  ;;  %10479 = vmatprep.mubr.msk.bf16.mxu0 %vm2031_vm2, %v11095_v22  ;;  %10735 = vmatprep.mubr.msk.bf16.mxu1 %vm2031_vm2, %v11096_v23  ;;  %v11102_v26 = vld [vmem:[%s11305_s9 + $0x768] sm:$0xff]   ;;  %v11103_v31 = vld [vmem:[%s11305_s9 + $0x370] sm:$0xff]  }
 0x1c1   : > { %7551 = vst.msk [vmem:[%s11552_s12 + $0x198] sm:$0xf] %vm7448_vm3, %v9583_v33  ;;  %7807 = vst.msk [vmem:[%s11552_s12 + $0x598] sm:$0xf] %vm7448_vm3, %v9839_v34  ;;  %v9584_v42 = vpack.c.bf16 %v4991_v35, %v4991_v35  ;;  %v9840_v43 = vpack.c.bf16 %v5247_v36, %v5247_v36  ;;  %v11104_v32 = vld [vmem:[%s11305_s9 + $0x770] sm:$0xff]  }
 0x1c2   : > { %7549 = vst.msk [vmem:[%s11552_s12 + $0x190] sm:$0xf] %vm7448_vm3, %v9581_v37  ;;  %7805 = vst.msk [vmem:[%s11552_s12 + $0x590] sm:$0xf] %vm7448_vm3, %v9837_v39  ;;  %v9582_v44 = vpack.c.bf16 %v4989_v40, %v4989_v40  ;;  %v9838_v45 = vpack.c.bf16 %v5245_v41, %v5245_v41  ;;  %v10373_v46 = vpop.f32.mrb[104].mxu0  ;;  %v10629_v47 = vpop.f32.mrb[104].mxu1 }
 0x1c3   : > { %7552 = vst.msk [vmem:[%s11552_s12 + $0x19c] sm:$0xf] %vm7448_vm3, %v9584_v42  ;;  %7808 = vst.msk [vmem:[%s11552_s12 + $0x59c] sm:$0xf] %vm7448_vm3, %v9840_v43  ;;  %v3266_v48 = vadd.f32 %v12214_v57, %v10373_v46  ;;  %v4290_v49 = vadd.f32 %v12214_v57, %v10629_v47  ;;  %v3257_v50 = vpop.f32.mrb[105].mxu0  ;;  %v4281_v38 = vpop.f32.mrb[105].mxu1 }
 0x1c4   : > { %7550 = vst.msk [vmem:[%s11552_s12 + $0x194] sm:$0xf] %vm7448_vm3, %v9582_v44  ;;  %7806 = vst.msk [vmem:[%s11552_s12 + $0x594] sm:$0xf] %vm7448_vm3, %v9838_v45  ;;  %v3258_v53 = vadd.f32 %v12214_v57, %v3257_v50  ;;  %v4282_v54 = vadd.f32 %v12214_v57, %v4281_v38  ;;  %v10374_v56 = vpop.f32.mrb[106].mxu0  ;;  %v10630_v58 = vpop.f32.mrb[106].mxu1 }
 0x1c5   : > { %v4994_v61 = vmax.f32 %v3266_v48, 0.0  ;;  %v5250_v62 = vmax.f32 %v4290_v49, 0.0  ;;  %v3269_v63 = vadd.f32 %v12214_v57, %v10374_v56  ;;  %v4293_v0 = vadd.f32 %v12214_v57, %v10630_v58  ;;  %v3260_v1 = vpop.f32.mrb[107].mxu0  ;;  %v4284_v2 = vpop.f32.mrb[107].mxu1 }
 0x1c6   : > { %v4992_v3 = vmax.f32 %v3258_v53, 0.0  ;;  %v5248_v4 = vmax.f32 %v4282_v54, 0.0  ;;  %v3261_v5 = vadd.f32 %v12214_v57, %v3260_v1  ;;  %v4285_v6 = vadd.f32 %v12214_v57, %v4284_v2 }
 0x1c7   : > { %v9587_v7 = vpack.c.bf16 %v4994_v61, %v4994_v61  ;;  %v9843_v8 = vpack.c.bf16 %v5250_v62, %v5250_v62  ;;  %v4995_v9 = vmax.f32 %v3269_v63, 0.0  ;;  %v5251_v10 = vmax.f32 %v4293_v0, 0.0  ;;  %10480 = vmatmul.mubr.msk.bf16.gmra.mrb[212].mxu0 %vm2031_vm2, %v11097_v51  ;;  %10736 = vmatmul.mubr.msk.bf16.gmra.mrb[212].mxu1 %vm2031_vm2, %v11098_v52  ;;  %v11105_v62 = vld [vmem:[%s11305_s9 + $0x378] sm:$0xff]  }
 0x1c8   : > { %v9585_v11 = vpack.c.bf16 %v4992_v3, %v4992_v3  ;;  %v9841_v12 = vpack.c.bf16 %v5248_v4, %v5248_v4  ;;  %v4993_v13 = vmax.f32 %v3261_v5, 0.0  ;;  %v5249_v14 = vmax.f32 %v4285_v6, 0.0  ;;  %10483 = vmatprep.mubr.msk.bf16.mxu0 %vm2031_vm2, %v11099_v59  ;;  %10739 = vmatprep.mubr.msk.bf16.mxu1 %vm2031_vm2, %v11100_v60  ;;  %v11106_v63 = vld [vmem:[%s11305_s9 + $0x778] sm:$0xff]   ;;  %v11107_v4 = vld [vmem:[%s11305_s9 + $0x380] sm:$0xff]  }
 0x1c9   : > { %7555 = vst.msk [vmem:[%s11552_s12 + $0x1a8] sm:$0xf] %vm7448_vm3, %v9587_v7  ;;  %7811 = vst.msk [vmem:[%s11552_s12 + $0x5a8] sm:$0xf] %vm7448_vm3, %v9843_v8  ;;  %v9588_v15 = vpack.c.bf16 %v4995_v9, %v4995_v9  ;;  %v9844_v16 = vpack.c.bf16 %v5251_v10, %v5251_v10  ;;  %v11108_v5 = vld [vmem:[%s11305_s9 + $0x780] sm:$0xff]  }
 0x1ca   : > { %7553 = vst.msk [vmem:[%s11552_s12 + $0x1a0] sm:$0xf] %vm7448_vm3, %v9585_v11  ;;  %7809 = vst.msk [vmem:[%s11552_s12 + $0x5a0] sm:$0xf] %vm7448_vm3, %v9841_v12  ;;  %v9586_v17 = vpack.c.bf16 %v4993_v13, %v4993_v13  ;;  %v9842_v18 = vpack.c.bf16 %v5249_v14, %v5249_v14  ;;  %v10377_v19 = vpop.f32.mrb[108].mxu0  ;;  %v10633_v20 = vpop.f32.mrb[108].mxu1 }
 0x1cb   : > { %7556 = vst.msk [vmem:[%s11552_s12 + $0x1ac] sm:$0xf] %vm7448_vm3, %v9588_v15  ;;  %7812 = vst.msk [vmem:[%s11552_s12 + $0x5ac] sm:$0xf] %vm7448_vm3, %v9844_v16  ;;  %v3282_v21 = vadd.f32 %v12214_v57, %v10377_v19  ;;  %v4306_v22 = vadd.f32 %v12214_v57, %v10633_v20  ;;  %v3273_v23 = vpop.f32.mrb[109].mxu0  ;;  %v4297_v24 = vpop.f32.mrb[109].mxu1 }
 0x1cc   : > { %7554 = vst.msk [vmem:[%s11552_s12 + $0x1a4] sm:$0xf] %vm7448_vm3, %v9586_v17  ;;  %7810 = vst.msk [vmem:[%s11552_s12 + $0x5a4] sm:$0xf] %vm7448_vm3, %v9842_v18  ;;  %v3274_v27 = vadd.f32 %v12214_v57, %v3273_v23  ;;  %v4298_v28 = vadd.f32 %v12214_v57, %v4297_v24  ;;  %v10378_v29 = vpop.f32.mrb[110].mxu0  ;;  %v10634_v30 = vpop.f32.mrb[110].mxu1 }
 0x1cd   : > { %v4998_v55 = vmax.f32 %v3282_v21, 0.0  ;;  %v5254_v33 = vmax.f32 %v4306_v22, 0.0  ;;  %v3285_v34 = vadd.f32 %v12214_v57, %v10378_v29  ;;  %v4309_v35 = vadd.f32 %v12214_v57, %v10634_v30  ;;  %v3276_v36 = vpop.f32.mrb[111].mxu0  ;;  %v4300_v37 = vpop.f32.mrb[111].mxu1 }
 0x1ce   : > { %v4996_v39 = vmax.f32 %v3274_v27, 0.0  ;;  %v5252_v40 = vmax.f32 %v4298_v28, 0.0  ;;  %v3277_v41 = vadd.f32 %v12214_v57, %v3276_v36  ;;  %v4301_v42 = vadd.f32 %v12214_v57, %v4300_v37 }
 0x1cf   : > { %v9591_v43 = vpack.c.bf16 %v4998_v55, %v4998_v55  ;;  %v9847_v44 = vpack.c.bf16 %v5254_v33, %v5254_v33  ;;  %v4999_v45 = vmax.f32 %v3285_v34, 0.0  ;;  %v5255_v46 = vmax.f32 %v4309_v35, 0.0  ;;  %10484 = vmatmul.mubr.msk.bf16.gmra.mrb[216].mxu0 %vm2031_vm2, %v11101_v25  ;;  %10740 = vmatmul.mubr.msk.bf16.gmra.mrb[216].mxu1 %vm2031_vm2, %v11102_v26  ;;  %v11109_v33 = vld [vmem:[%s11305_s9 + $0x388] sm:$0xff]  }
 0x1d0   : > { %v9589_v47 = vpack.c.bf16 %v4996_v39, %v4996_v39  ;;  %v9845_v48 = vpack.c.bf16 %v5252_v40, %v5252_v40  ;;  %v4997_v49 = vmax.f32 %v3277_v41, 0.0  ;;  %v5253_v50 = vmax.f32 %v4301_v42, 0.0  ;;  %10487 = vmatprep.mubr.msk.bf16.mxu0 %vm2031_vm2, %v11103_v31  ;;  %10743 = vmatprep.mubr.msk.bf16.mxu1 %vm2031_vm2, %v11104_v32  ;;  %v11110_v34 = vld [vmem:[%s11305_s9 + $0x788] sm:$0xff]   ;;  %v11111_v40 = vld [vmem:[%s11305_s9 + $0x390] sm:$0xff]  }
 0x1d1   : > { %7559 = vst.msk [vmem:[%s11552_s12 + $0x1b8] sm:$0xf] %vm7448_vm3, %v9591_v43  ;;  %7815 = vst.msk [vmem:[%s11552_s12 + $0x5b8] sm:$0xf] %vm7448_vm3, %v9847_v44  ;;  %v9592_v38 = vpack.c.bf16 %v4999_v45, %v4999_v45  ;;  %v9848_v51 = vpack.c.bf16 %v5255_v46, %v5255_v46  ;;  %v11112_v41 = vld [vmem:[%s11305_s9 + $0x790] sm:$0xff]  }
 0x1d2   : > { %7557 = vst.msk [vmem:[%s11552_s12 + $0x1b0] sm:$0xf] %vm7448_vm3, %v9589_v47  ;;  %7813 = vst.msk [vmem:[%s11552_s12 + $0x5b0] sm:$0xf] %vm7448_vm3, %v9845_v48  ;;  %v9590_v52 = vpack.c.bf16 %v4997_v49, %v4997_v49  ;;  %v9846_v53 = vpack.c.bf16 %v5253_v50, %v5253_v50  ;;  %v10381_v54 = vpop.f32.mrb[112].mxu0  ;;  %v10637_v56 = vpop.f32.mrb[112].mxu1 }
 0x1d3   : > { %7560 = vst.msk [vmem:[%s11552_s12 + $0x1bc] sm:$0xf] %vm7448_vm3, %v9592_v38  ;;  %7816 = vst.msk [vmem:[%s11552_s12 + $0x5bc] sm:$0xf] %vm7448_vm3, %v9848_v51  ;;  %v3298_v58 = vadd.f32 %v12214_v57, %v10381_v54  ;;  %v4322_v59 = vadd.f32 %v12214_v57, %v10637_v56  ;;  %v3289_v60 = vpop.f32.mrb[113].mxu0  ;;  %v4313_v61 = vpop.f32.mrb[113].mxu1 }
 0x1d4   : > { %7558 = vst.msk [vmem:[%s11552_s12 + $0x1b4] sm:$0xf] %vm7448_vm3, %v9590_v52  ;;  %7814 = vst.msk [vmem:[%s11552_s12 + $0x5b4] sm:$0xf] %vm7448_vm3, %v9846_v53  ;;  %v3290_v0 = vadd.f32 %v12214_v57, %v3289_v60  ;;  %v4314_v1 = vadd.f32 %v12214_v57, %v4313_v61  ;;  %v10382_v2 = vpop.f32.mrb[114].mxu0  ;;  %v10638_v3 = vpop.f32.mrb[114].mxu1 }
 0x1d5   : > { %v5002_v6 = vmax.f32 %v3298_v58, 0.0  ;;  %v5258_v7 = vmax.f32 %v4322_v59, 0.0  ;;  %v3301_v8 = vadd.f32 %v12214_v57, %v10382_v2  ;;  %v4325_v9 = vadd.f32 %v12214_v57, %v10638_v3  ;;  %v3292_v10 = vpop.f32.mrb[115].mxu0  ;;  %v4316_v11 = vpop.f32.mrb[115].mxu1 }
 0x1d6   : > { %v5000_v12 = vmax.f32 %v3290_v0, 0.0  ;;  %v5256_v13 = vmax.f32 %v4314_v1, 0.0  ;;  %v3293_v14 = vadd.f32 %v12214_v57, %v3292_v10  ;;  %v4317_v15 = vadd.f32 %v12214_v57, %v4316_v11 }
 0x1d7   : > { %v9595_v16 = vpack.c.bf16 %v5002_v6, %v5002_v6  ;;  %v9851_v17 = vpack.c.bf16 %v5258_v7, %v5258_v7  ;;  %v5003_v18 = vmax.f32 %v3301_v8, 0.0  ;;  %v5259_v19 = vmax.f32 %v4325_v9, 0.0  ;;  %10488 = vmatmul.mubr.msk.bf16.gmra.mrb[220].mxu0 %vm2031_vm2, %v11105_v62  ;;  %10744 = vmatmul.mubr.msk.bf16.gmra.mrb[220].mxu1 %vm2031_vm2, %v11106_v63  ;;  %v11113_v7 = vld [vmem:[%s11305_s9 + $0x398] sm:$0xff]  }
 0x1d8   : > { %v9593_v20 = vpack.c.bf16 %v5000_v12, %v5000_v12  ;;  %v9849_v21 = vpack.c.bf16 %v5256_v13, %v5256_v13  ;;  %v5001_v22 = vmax.f32 %v3293_v14, 0.0  ;;  %v5257_v23 = vmax.f32 %v4317_v15, 0.0  ;;  %10491 = vmatprep.mubr.msk.bf16.mxu0 %vm2031_vm2, %v11107_v4  ;;  %10747 = vmatprep.mubr.msk.bf16.mxu1 %vm2031_vm2, %v11108_v5  ;;  %v11114_v8 = vld [vmem:[%s11305_s9 + $0x798] sm:$0xff]   ;;  %v11115_v13 = vld [vmem:[%s11305_s9 + $0x3a0] sm:$0xff]  }
 0x1d9   : > { %7563 = vst.msk [vmem:[%s11552_s12 + $0x1c8] sm:$0xf] %vm7448_vm3, %v9595_v16  ;;  %7819 = vst.msk [vmem:[%s11552_s12 + $0x5c8] sm:$0xf] %vm7448_vm3, %v9851_v17  ;;  %v9596_v24 = vpack.c.bf16 %v5003_v18, %v5003_v18  ;;  %v9852_v25 = vpack.c.bf16 %v5259_v19, %v5259_v19  ;;  %v11116_v14 = vld [vmem:[%s11305_s9 + $0x7a0] sm:$0xff]  }
 0x1da   : > { %7561 = vst.msk [vmem:[%s11552_s12 + $0x1c0] sm:$0xf] %vm7448_vm3, %v9593_v20  ;;  %7817 = vst.msk [vmem:[%s11552_s12 + $0x5c0] sm:$0xf] %vm7448_vm3, %v9849_v21  ;;  %v9594_v26 = vpack.c.bf16 %v5001_v22, %v5001_v22  ;;  %v9850_v27 = vpack.c.bf16 %v5257_v23, %v5257_v23  ;;  %v10385_v28 = vpop.f32.mrb[116].mxu0  ;;  %v10641_v29 = vpop.f32.mrb[116].mxu1 }
 0x1db   : > { %7564 = vst.msk [vmem:[%s11552_s12 + $0x1cc] sm:$0xf] %vm7448_vm3, %v9596_v24  ;;  %7820 = vst.msk [vmem:[%s11552_s12 + $0x5cc] sm:$0xf] %vm7448_vm3, %v9852_v25  ;;  %v3314_v30 = vadd.f32 %v12214_v57, %v10385_v28  ;;  %v4338_v31 = vadd.f32 %v12214_v57, %v10641_v29  ;;  %v3305_v32 = vpop.f32.mrb[117].mxu0  ;;  %v4329_v55 = vpop.f32.mrb[117].mxu1 }
 0x1dc   : > { %7562 = vst.msk [vmem:[%s11552_s12 + $0x1c4] sm:$0xf] %vm7448_vm3, %v9594_v26  ;;  %7818 = vst.msk [vmem:[%s11552_s12 + $0x5c4] sm:$0xf] %vm7448_vm3, %v9850_v27  ;;  %v3306_v35 = vadd.f32 %v12214_v57, %v3305_v32  ;;  %v4330_v36 = vadd.f32 %v12214_v57, %v4329_v55  ;;  %v10386_v37 = vpop.f32.mrb[118].mxu0  ;;  %v10642_v39 = vpop.f32.mrb[118].mxu1 }
 0x1dd   : > { %v5006_v42 = vmax.f32 %v3314_v30, 0.0  ;;  %v5262_v43 = vmax.f32 %v4338_v31, 0.0  ;;  %v3317_v44 = vadd.f32 %v12214_v57, %v10386_v37  ;;  %v4341_v45 = vadd.f32 %v12214_v57, %v10642_v39  ;;  %v3308_v46 = vpop.f32.mrb[119].mxu0  ;;  %v4332_v47 = vpop.f32.mrb[119].mxu1 }
 0x1de   : > { %v5004_v48 = vmax.f32 %v3306_v35, 0.0  ;;  %v5260_v49 = vmax.f32 %v4330_v36, 0.0  ;;  %v3309_v50 = vadd.f32 %v12214_v57, %v3308_v46  ;;  %v4333_v38 = vadd.f32 %v12214_v57, %v4332_v47 }
 0x1df   : > { %v9599_v51 = vpack.c.bf16 %v5006_v42, %v5006_v42  ;;  %v9855_v52 = vpack.c.bf16 %v5262_v43, %v5262_v43  ;;  %v5007_v53 = vmax.f32 %v3317_v44, 0.0  ;;  %v5263_v54 = vmax.f32 %v4341_v45, 0.0  ;;  %10492 = vmatmul.mubr.msk.bf16.gmra.mrb[224].mxu0 %vm2031_vm2, %v11109_v33  ;;  %10748 = vmatmul.mubr.msk.bf16.gmra.mrb[224].mxu1 %vm2031_vm2, %v11110_v34  ;;  %v11117_v43 = vld [vmem:[%s11305_s9 + $0x3a8] sm:$0xff]  }
 0x1e0   : > { %v9597_v56 = vpack.c.bf16 %v5004_v48, %v5004_v48  ;;  %v9853_v58 = vpack.c.bf16 %v5260_v49, %v5260_v49  ;;  %v5005_v59 = vmax.f32 %v3309_v50, 0.0  ;;  %v5261_v60 = vmax.f32 %v4333_v38, 0.0  ;;  %10495 = vmatprep.mubr.msk.bf16.mxu0 %vm2031_vm2, %v11111_v40  ;;  %10751 = vmatprep.mubr.msk.bf16.mxu1 %vm2031_vm2, %v11112_v41  ;;  %v11118_v44 = vld [vmem:[%s11305_s9 + $0x7a8] sm:$0xff]   ;;  %v11119_v49 = vld [vmem:[%s11305_s9 + $0x3b0] sm:$0xff]  }
 0x1e1   : > { %7567 = vst.msk [vmem:[%s11552_s12 + $0x1d8] sm:$0xf] %vm7448_vm3, %v9599_v51  ;;  %7823 = vst.msk [vmem:[%s11552_s12 + $0x5d8] sm:$0xf] %vm7448_vm3, %v9855_v52  ;;  %v9600_v61 = vpack.c.bf16 %v5007_v53, %v5007_v53  ;;  %v9856_v62 = vpack.c.bf16 %v5263_v54, %v5263_v54  ;;  %v11120_v50 = vld [vmem:[%s11305_s9 + $0x7b0] sm:$0xff]  }
 0x1e2   : > { %7565 = vst.msk [vmem:[%s11552_s12 + $0x1d0] sm:$0xf] %vm7448_vm3, %v9597_v56  ;;  %7821 = vst.msk [vmem:[%s11552_s12 + $0x5d0] sm:$0xf] %vm7448_vm3, %v9853_v58  ;;  %v9598_v63 = vpack.c.bf16 %v5005_v59, %v5005_v59  ;;  %v9854_v0 = vpack.c.bf16 %v5261_v60, %v5261_v60  ;;  %v10389_v1 = vpop.f32.mrb[120].mxu0  ;;  %v10645_v2 = vpop.f32.mrb[120].mxu1 }
 0x1e3   : > { %7568 = vst.msk [vmem:[%s11552_s12 + $0x1dc] sm:$0xf] %vm7448_vm3, %v9600_v61  ;;  %7824 = vst.msk [vmem:[%s11552_s12 + $0x5dc] sm:$0xf] %vm7448_vm3, %v9856_v62  ;;  %v3330_v3 = vadd.f32 %v12214_v57, %v10389_v1  ;;  %v4354_v4 = vadd.f32 %v12214_v57, %v10645_v2  ;;  %v3321_v5 = vpop.f32.mrb[121].mxu0  ;;  %v4345_v6 = vpop.f32.mrb[121].mxu1 }
 0x1e4   : > { %7566 = vst.msk [vmem:[%s11552_s12 + $0x1d4] sm:$0xf] %vm7448_vm3, %v9598_v63  ;;  %7822 = vst.msk [vmem:[%s11552_s12 + $0x5d4] sm:$0xf] %vm7448_vm3, %v9854_v0  ;;  %v3322_v9 = vadd.f32 %v12214_v57, %v3321_v5  ;;  %v4346_v10 = vadd.f32 %v12214_v57, %v4345_v6  ;;  %v10390_v11 = vpop.f32.mrb[122].mxu0  ;;  %v10646_v12 = vpop.f32.mrb[122].mxu1 }
 0x1e5   : > { %v5010_v15 = vmax.f32 %v3330_v3, 0.0  ;;  %v5266_v16 = vmax.f32 %v4354_v4, 0.0  ;;  %v3333_v17 = vadd.f32 %v12214_v57, %v10390_v11  ;;  %v4357_v18 = vadd.f32 %v12214_v57, %v10646_v12  ;;  %v3324_v19 = vpop.f32.mrb[123].mxu0  ;;  %v4348_v20 = vpop.f32.mrb[123].mxu1  ;;  %v12571_v11 = vld [vmem:[%s13592_s2] ss:$0 sm:$0xff] }
 0x1e6   : > { %v5008_v21 = vmax.f32 %v3322_v9, 0.0  ;;  %v5264_v22 = vmax.f32 %v4346_v10, 0.0  ;;  %v3325_v23 = vadd.f32 %v12214_v57, %v3324_v19  ;;  %v4349_v24 = vadd.f32 %v12214_v57, %v4348_v20 }
 0x1e7   : > { %v9603_v25 = vpack.c.bf16 %v5010_v15, %v5010_v15  ;;  %v9859_v26 = vpack.c.bf16 %v5266_v16, %v5266_v16  ;;  %v5011_v27 = vmax.f32 %v3333_v17, 0.0  ;;  %v5267_v28 = vmax.f32 %v4357_v18, 0.0  ;;  %10496 = vmatmul.mubr.msk.bf16.gmra.mrb[228].mxu0 %vm2031_vm2, %v11113_v7  ;;  %10752 = vmatmul.mubr.msk.bf16.gmra.mrb[228].mxu1 %vm2031_vm2, %v11114_v8  ;;  %v11121_v16 = vld [vmem:[%s11305_s9 + $0x3b8] sm:$0xff]  }
 0x1e8   : > { %v9601_v29 = vpack.c.bf16 %v5008_v21, %v5008_v21  ;;  %v9857_v30 = vpack.c.bf16 %v5264_v22, %v5264_v22  ;;  %v5009_v31 = vmax.f32 %v3325_v23, 0.0  ;;  %v5265_v32 = vmax.f32 %v4349_v24, 0.0  ;;  %10499 = vmatprep.mubr.msk.bf16.mxu0 %vm2031_vm2, %v11115_v13  ;;  %10755 = vmatprep.mubr.msk.bf16.mxu1 %vm2031_vm2, %v11116_v14  ;;  %v11122_v17 = vld [vmem:[%s11305_s9 + $0x7b8] sm:$0xff]   ;;  %v11123_v22 = vld [vmem:[%s11305_s9 + $0x3c0] sm:$0xff]  }
 0x1e9   : > { %7571 = vst.msk [vmem:[%s11552_s12 + $0x1e8] sm:$0xf] %vm7448_vm3, %v9603_v25  ;;  %7827 = vst.msk [vmem:[%s11552_s12 + $0x5e8] sm:$0xf] %vm7448_vm3, %v9859_v26  ;;  %v9604_v55 = vpack.c.bf16 %v5011_v27, %v5011_v27  ;;  %v9860_v33 = vpack.c.bf16 %v5267_v28, %v5267_v28  ;;  %v11124_v23 = vld [vmem:[%s11305_s9 + $0x7c0] sm:$0xff]  }
 0x1ea   : > { %7569 = vst.msk [vmem:[%s11552_s12 + $0x1e0] sm:$0xf] %vm7448_vm3, %v9601_v29  ;;  %7825 = vst.msk [vmem:[%s11552_s12 + $0x5e0] sm:$0xf] %vm7448_vm3, %v9857_v30  ;;  %v9602_v34 = vpack.c.bf16 %v5009_v31, %v5009_v31  ;;  %v9858_v35 = vpack.c.bf16 %v5265_v32, %v5265_v32  ;;  %v10393_v36 = vpop.f32.mrb[124].mxu0  ;;  %v10649_v37 = vpop.f32.mrb[124].mxu1 }
 0x1eb   : > { %7572 = vst.msk [vmem:[%s11552_s12 + $0x1ec] sm:$0xf] %vm7448_vm3, %v9604_v55  ;;  %7828 = vst.msk [vmem:[%s11552_s12 + $0x5ec] sm:$0xf] %vm7448_vm3, %v9860_v33  ;;  %v3346_v39 = vadd.f32 %v12214_v57, %v10393_v36  ;;  %v4370_v40 = vadd.f32 %v12214_v57, %v10649_v37  ;;  %v3337_v41 = vpop.f32.mrb[125].mxu0  ;;  %v4361_v42 = vpop.f32.mrb[125].mxu1 }
 0x1ec   : > { %7570 = vst.msk [vmem:[%s11552_s12 + $0x1e4] sm:$0xf] %vm7448_vm3, %v9602_v34  ;;  %7826 = vst.msk [vmem:[%s11552_s12 + $0x5e4] sm:$0xf] %vm7448_vm3, %v9858_v35  ;;  %v3338_v45 = vadd.f32 %v12214_v57, %v3337_v41  ;;  %v4362_v46 = vadd.f32 %v12214_v57, %v4361_v42  ;;  %v10394_v47 = vpop.f32.mrb[126].mxu0  ;;  %v10650_v48 = vpop.f32.mrb[126].mxu1 }
 0x1ed   : > { %v5014_v38 = vmax.f32 %v3346_v39, 0.0  ;;  %v5270_v51 = vmax.f32 %v4370_v40, 0.0  ;;  %v3349_v52 = vadd.f32 %v12214_v57, %v10394_v47  ;;  %v4373_v53 = vadd.f32 %v12214_v57, %v10650_v48  ;;  %v3340_v54 = vpop.f32.mrb[127].mxu0  ;;  %v4364_v56 = vpop.f32.mrb[127].mxu1 }
 0x1ee   : > { %v5012_v58 = vmax.f32 %v3338_v45, 0.0  ;;  %v5268_v59 = vmax.f32 %v4362_v46, 0.0  ;;  %v3341_v60 = vadd.f32 %v12214_v57, %v3340_v54  ;;  %v4365_v61 = vadd.f32 %v12214_v57, %v4364_v56 }
 0x1ef   : > { %v9607_v62 = vpack.c.bf16 %v5014_v38, %v5014_v38  ;;  %v9863_v63 = vpack.c.bf16 %v5270_v51, %v5270_v51  ;;  %v5015_v0 = vmax.f32 %v3349_v52, 0.0  ;;  %v5271_v1 = vmax.f32 %v4373_v53, 0.0  ;;  %10500 = vmatmul.mubr.msk.bf16.gmra.mrb[232].mxu0 %vm2031_vm2, %v11117_v43  ;;  %10756 = vmatmul.mubr.msk.bf16.gmra.mrb[232].mxu1 %vm2031_vm2, %v11118_v44  ;;  %v11125_v51 = vld [vmem:[%s11305_s9 + $0x3c8] sm:$0xff]  }
 0x1f0   : > { %v9605_v2 = vpack.c.bf16 %v5012_v58, %v5012_v58  ;;  %v9861_v3 = vpack.c.bf16 %v5268_v59, %v5268_v59  ;;  %v5013_v4 = vmax.f32 %v3341_v60, 0.0  ;;  %v5269_v5 = vmax.f32 %v4365_v61, 0.0  ;;  %10503 = vmatprep.mubr.msk.bf16.mxu0 %vm2031_vm2, %v11119_v49  ;;  %10759 = vmatprep.mubr.msk.bf16.mxu1 %vm2031_vm2, %v11120_v50  ;;  %v11126_v52 = vld [vmem:[%s11305_s9 + $0x7c8] sm:$0xff]   ;;  %v11127_v59 = vld [vmem:[%s11305_s9 + $0x3d0] sm:$0xff]  }
 0x1f1   : > { %7575 = vst.msk [vmem:[%s11552_s12 + $0x1f8] sm:$0xf] %vm7448_vm3, %v9607_v62  ;;  %7831 = vst.msk [vmem:[%s11552_s12 + $0x5f8] sm:$0xf] %vm7448_vm3, %v9863_v63  ;;  %v9608_v57 = vpack.c.bf16 %v5015_v0, %v5015_v0  ;;  %v9864_v6 = vpack.c.bf16 %v5271_v1, %v5271_v1  ;;  %v11128_v60 = vld [vmem:[%s11305_s9 + $0x7d0] sm:$0xff]  }
 0x1f2   : > { %7573 = vst.msk [vmem:[%s11552_s12 + $0x1f0] sm:$0xf] %vm7448_vm3, %v9605_v2  ;;  %7829 = vst.msk [vmem:[%s11552_s12 + $0x5f0] sm:$0xf] %vm7448_vm3, %v9861_v3  ;;  %v9606_v7 = vpack.c.bf16 %v5013_v4, %v5013_v4  ;;  %v9862_v8 = vpack.c.bf16 %v5269_v5, %v5269_v5  ;;  %v10397_v9 = vpop.f32.mrb[128].mxu0  ;;  %v10653_v10 = vpop.f32.mrb[128].mxu1 }
 0x1f3   : > { %7576 = vst.msk [vmem:[%s11552_s12 + $0x1fc] sm:$0xf] %vm7448_vm3, %v9608_v57  ;;  %7832 = vst.msk [vmem:[%s11552_s12 + $0x5fc] sm:$0xf] %vm7448_vm3, %v9864_v6  ;;  %v3362_v12 = vadd.f32 %v12571_v11, %v10397_v9  ;;  %v4386_v13 = vadd.f32 %v12571_v11, %v10653_v10  ;;  %v3353_v14 = vpop.f32.mrb[129].mxu0  ;;  %v4377_v15 = vpop.f32.mrb[129].mxu1 }
 0x1f4   : > { %7574 = vst.msk [vmem:[%s11552_s12 + $0x1f4] sm:$0xf] %vm7448_vm3, %v9606_v7  ;;  %7830 = vst.msk [vmem:[%s11552_s12 + $0x5f4] sm:$0xf] %vm7448_vm3, %v9862_v8  ;;  %v3354_v18 = vadd.f32 %v12571_v11, %v3353_v14  ;;  %v4378_v19 = vadd.f32 %v12571_v11, %v4377_v15  ;;  %v10398_v20 = vpop.f32.mrb[130].mxu0  ;;  %v10654_v21 = vpop.f32.mrb[130].mxu1 }
 0x1f5   : > { %v5018_v24 = vmax.f32 %v3362_v12, 0.0  ;;  %v5274_v25 = vmax.f32 %v4386_v13, 0.0  ;;  %v3365_v26 = vadd.f32 %v12571_v11, %v10398_v20  ;;  %v4389_v27 = vadd.f32 %v12571_v11, %v10654_v21  ;;  %v3356_v28 = vpop.f32.mrb[131].mxu0  ;;  %v4380_v29 = vpop.f32.mrb[131].mxu1 }
 0x1f6   : > { %v5016_v30 = vmax.f32 %v3354_v18, 0.0  ;;  %v5272_v31 = vmax.f32 %v4378_v19, 0.0  ;;  %v3357_v32 = vadd.f32 %v12571_v11, %v3356_v28  ;;  %v4381_v55 = vadd.f32 %v12571_v11, %v4380_v29 }
 0x1f7   : > { %v9611_v33 = vpack.c.bf16 %v5018_v24, %v5018_v24  ;;  %v9867_v34 = vpack.c.bf16 %v5274_v25, %v5274_v25  ;;  %v5019_v35 = vmax.f32 %v3365_v26, 0.0  ;;  %v5275_v36 = vmax.f32 %v4389_v27, 0.0  ;;  %10504 = vmatmul.mubr.msk.bf16.gmra.mrb[236].mxu0 %vm2031_vm2, %v11121_v16  ;;  %10760 = vmatmul.mubr.msk.bf16.gmra.mrb[236].mxu1 %vm2031_vm2, %v11122_v17  ;;  %v11129_v25 = vld [vmem:[%s11305_s9 + $0x3d8] sm:$0xff]  }
 0x1f8   : > { %v9609_v37 = vpack.c.bf16 %v5016_v30, %v5016_v30  ;;  %v9865_v39 = vpack.c.bf16 %v5272_v31, %v5272_v31  ;;  %v5017_v40 = vmax.f32 %v3357_v32, 0.0  ;;  %v5273_v41 = vmax.f32 %v4381_v55, 0.0  ;;  %10507 = vmatprep.mubr.msk.bf16.mxu0 %vm2031_vm2, %v11123_v22  ;;  %10763 = vmatprep.mubr.msk.bf16.mxu1 %vm2031_vm2, %v11124_v23  ;;  %v11130_v26 = vld [vmem:[%s11305_s9 + $0x7d8] sm:$0xff]   ;;  %v11131_v31 = vld [vmem:[%s11305_s9 + $0x3e0] sm:$0xff]  }
 0x1f9   : > { %7579 = vst.msk [vmem:[%s11552_s12 + $0x208] sm:$0xf] %vm7448_vm3, %v9611_v33  ;;  %7835 = vst.msk [vmem:[%s11552_s12 + $0x608] sm:$0xf] %vm7448_vm3, %v9867_v34  ;;  %v9612_v42 = vpack.c.bf16 %v5019_v35, %v5019_v35  ;;  %v9868_v43 = vpack.c.bf16 %v5275_v36, %v5275_v36  ;;  %v11132_v32 = vld [vmem:[%s11305_s9 + $0x7e0] sm:$0xff]  }
 0x1fa   : > { %7577 = vst.msk [vmem:[%s11552_s12 + $0x200] sm:$0xf] %vm7448_vm3, %v9609_v37  ;;  %7833 = vst.msk [vmem:[%s11552_s12 + $0x600] sm:$0xf] %vm7448_vm3, %v9865_v39  ;;  %v9610_v44 = vpack.c.bf16 %v5017_v40, %v5017_v40  ;;  %v9866_v45 = vpack.c.bf16 %v5273_v41, %v5273_v41  ;;  %v10401_v46 = vpop.f32.mrb[132].mxu0  ;;  %v10657_v47 = vpop.f32.mrb[132].mxu1 }
 0x1fb   : > { %7580 = vst.msk [vmem:[%s11552_s12 + $0x20c] sm:$0xf] %vm7448_vm3, %v9612_v42  ;;  %7836 = vst.msk [vmem:[%s11552_s12 + $0x60c] sm:$0xf] %vm7448_vm3, %v9868_v43  ;;  %v3378_v48 = vadd.f32 %v12571_v11, %v10401_v46  ;;  %v4402_v49 = vadd.f32 %v12571_v11, %v10657_v47  ;;  %v3369_v50 = vpop.f32.mrb[133].mxu0  ;;  %v4393_v38 = vpop.f32.mrb[133].mxu1 }
 0x1fc   : > { %7578 = vst.msk [vmem:[%s11552_s12 + $0x204] sm:$0xf] %vm7448_vm3, %v9610_v44  ;;  %7834 = vst.msk [vmem:[%s11552_s12 + $0x604] sm:$0xf] %vm7448_vm3, %v9866_v45  ;;  %v3370_v53 = vadd.f32 %v12571_v11, %v3369_v50  ;;  %v4394_v54 = vadd.f32 %v12571_v11, %v4393_v38  ;;  %v10402_v56 = vpop.f32.mrb[134].mxu0  ;;  %v10658_v58 = vpop.f32.mrb[134].mxu1 }
 0x1fd   : > { %v5022_v61 = vmax.f32 %v3378_v48, 0.0  ;;  %v5278_v62 = vmax.f32 %v4402_v49, 0.0  ;;  %v3381_v63 = vadd.f32 %v12571_v11, %v10402_v56  ;;  %v4405_v0 = vadd.f32 %v12571_v11, %v10658_v58  ;;  %v3372_v1 = vpop.f32.mrb[135].mxu0  ;;  %v4396_v2 = vpop.f32.mrb[135].mxu1 }
 0x1fe   : > { %v5020_v3 = vmax.f32 %v3370_v53, 0.0  ;;  %v5276_v4 = vmax.f32 %v4394_v54, 0.0  ;;  %v3373_v5 = vadd.f32 %v12571_v11, %v3372_v1  ;;  %v4397_v57 = vadd.f32 %v12571_v11, %v4396_v2 }
 0x1ff   : > { %v9615_v6 = vpack.c.bf16 %v5022_v61, %v5022_v61  ;;  %v9871_v7 = vpack.c.bf16 %v5278_v62, %v5278_v62  ;;  %v5023_v8 = vmax.f32 %v3381_v63, 0.0  ;;  %v5279_v9 = vmax.f32 %v4405_v0, 0.0  ;;  %10508 = vmatmul.mubr.msk.bf16.gmra.mrb[240].mxu0 %vm2031_vm2, %v11125_v51  ;;  %10764 = vmatmul.mubr.msk.bf16.gmra.mrb[240].mxu1 %vm2031_vm2, %v11126_v52  ;;  %v11133_v62 = vld [vmem:[%s11305_s9 + $0x3e8] sm:$0xff]  }
 0x200   : > { %v9613_v10 = vpack.c.bf16 %v5020_v3, %v5020_v3  ;;  %v9869_v12 = vpack.c.bf16 %v5276_v4, %v5276_v4  ;;  %v5021_v13 = vmax.f32 %v3373_v5, 0.0  ;;  %v5277_v14 = vmax.f32 %v4397_v57, 0.0  ;;  %10511 = vmatprep.mubr.msk.bf16.mxu0 %vm2031_vm2, %v11127_v59  ;;  %10767 = vmatprep.mubr.msk.bf16.mxu1 %vm2031_vm2, %v11128_v60  ;;  %v11134_v63 = vld [vmem:[%s11305_s9 + $0x7e8] sm:$0xff]   ;;  %v11135_v4 = vld [vmem:[%s11305_s9 + $0x3f0] sm:$0xff]  }
 0x201   : > { %7583 = vst.msk [vmem:[%s11552_s12 + $0x218] sm:$0xf] %vm7448_vm3, %v9615_v6  ;;  %7839 = vst.msk [vmem:[%s11552_s12 + $0x618] sm:$0xf] %vm7448_vm3, %v9871_v7  ;;  %v9616_v15 = vpack.c.bf16 %v5023_v8, %v5023_v8  ;;  %v9872_v16 = vpack.c.bf16 %v5279_v9, %v5279_v9  ;;  %v11136_v5 = vld [vmem:[%s11305_s9 + $0x7f0] sm:$0xff]  }
 0x202   : > { %7581 = vst.msk [vmem:[%s11552_s12 + $0x210] sm:$0xf] %vm7448_vm3, %v9613_v10  ;;  %7837 = vst.msk [vmem:[%s11552_s12 + $0x610] sm:$0xf] %vm7448_vm3, %v9869_v12  ;;  %v9614_v17 = vpack.c.bf16 %v5021_v13, %v5021_v13  ;;  %v9870_v18 = vpack.c.bf16 %v5277_v14, %v5277_v14  ;;  %v10405_v19 = vpop.f32.mrb[136].mxu0  ;;  %v10661_v20 = vpop.f32.mrb[136].mxu1 }
 0x203   : > { %7584 = vst.msk [vmem:[%s11552_s12 + $0x21c] sm:$0xf] %vm7448_vm3, %v9616_v15  ;;  %7840 = vst.msk [vmem:[%s11552_s12 + $0x61c] sm:$0xf] %vm7448_vm3, %v9872_v16  ;;  %v3394_v21 = vadd.f32 %v12571_v11, %v10405_v19  ;;  %v4418_v22 = vadd.f32 %v12571_v11, %v10661_v20  ;;  %v3385_v23 = vpop.f32.mrb[137].mxu0  ;;  %v4409_v24 = vpop.f32.mrb[137].mxu1 }
 0x204   : > { %7582 = vst.msk [vmem:[%s11552_s12 + $0x214] sm:$0xf] %vm7448_vm3, %v9614_v17  ;;  %7838 = vst.msk [vmem:[%s11552_s12 + $0x614] sm:$0xf] %vm7448_vm3, %v9870_v18  ;;  %v3386_v27 = vadd.f32 %v12571_v11, %v3385_v23  ;;  %v4410_v28 = vadd.f32 %v12571_v11, %v4409_v24  ;;  %v10406_v29 = vpop.f32.mrb[138].mxu0  ;;  %v10662_v30 = vpop.f32.mrb[138].mxu1 }
 0x205   : > { %v5026_v55 = vmax.f32 %v3394_v21, 0.0  ;;  %v5282_v33 = vmax.f32 %v4418_v22, 0.0  ;;  %v3397_v34 = vadd.f32 %v12571_v11, %v10406_v29  ;;  %v4421_v35 = vadd.f32 %v12571_v11, %v10662_v30  ;;  %v3388_v36 = vpop.f32.mrb[139].mxu0  ;;  %v4412_v37 = vpop.f32.mrb[139].mxu1 }
 0x206   : > { %v5024_v39 = vmax.f32 %v3386_v27, 0.0  ;;  %v5280_v40 = vmax.f32 %v4410_v28, 0.0  ;;  %v3389_v41 = vadd.f32 %v12571_v11, %v3388_v36  ;;  %v4413_v42 = vadd.f32 %v12571_v11, %v4412_v37 }
 0x207   : > { %v9619_v43 = vpack.c.bf16 %v5026_v55, %v5026_v55  ;;  %v9875_v44 = vpack.c.bf16 %v5282_v33, %v5282_v33  ;;  %v5027_v45 = vmax.f32 %v3397_v34, 0.0  ;;  %v5283_v46 = vmax.f32 %v4421_v35, 0.0  ;;  %10512 = vmatmul.mubr.msk.bf16.gmra.mrb[244].mxu0 %vm2031_vm2, %v11129_v25  ;;  %10768 = vmatmul.mubr.msk.bf16.gmra.mrb[244].mxu1 %vm2031_vm2, %v11130_v26  ;;  %v11137_v33 = vld [vmem:[%s11305_s9 + $0x3f8] sm:$0xff]  }
 0x208   : > { %v9617_v47 = vpack.c.bf16 %v5024_v39, %v5024_v39  ;;  %v9873_v48 = vpack.c.bf16 %v5280_v40, %v5280_v40  ;;  %v5025_v49 = vmax.f32 %v3389_v41, 0.0  ;;  %v5281_v50 = vmax.f32 %v4413_v42, 0.0  ;;  %10515 = vmatprep.mubr.msk.bf16.mxu0 %vm2031_vm2, %v11131_v31  ;;  %10771 = vmatprep.mubr.msk.bf16.mxu1 %vm2031_vm2, %v11132_v32  ;;  %v11138_v34 = vld [vmem:[%s11305_s9 + $0x7f8] sm:$0xff]  }
 0x209   : > { %7587 = vst.msk [vmem:[%s11552_s12 + $0x228] sm:$0xf] %vm7448_vm3, %v9619_v43  ;;  %7843 = vst.msk [vmem:[%s11552_s12 + $0x628] sm:$0xf] %vm7448_vm3, %v9875_v44  ;;  %v9620_v38 = vpack.c.bf16 %v5027_v45, %v5027_v45  ;;  %v9876_v51 = vpack.c.bf16 %v5283_v46, %v5283_v46 }
 0x20a   : > { %7585 = vst.msk [vmem:[%s11552_s12 + $0x220] sm:$0xf] %vm7448_vm3, %v9617_v47  ;;  %7841 = vst.msk [vmem:[%s11552_s12 + $0x620] sm:$0xf] %vm7448_vm3, %v9873_v48  ;;  %v9618_v52 = vpack.c.bf16 %v5025_v49, %v5025_v49  ;;  %v9874_v53 = vpack.c.bf16 %v5281_v50, %v5281_v50  ;;  %v10409_v54 = vpop.f32.mrb[140].mxu0  ;;  %v10665_v56 = vpop.f32.mrb[140].mxu1 }
 0x20b   : > { %7588 = vst.msk [vmem:[%s11552_s12 + $0x22c] sm:$0xf] %vm7448_vm3, %v9620_v38  ;;  %7844 = vst.msk [vmem:[%s11552_s12 + $0x62c] sm:$0xf] %vm7448_vm3, %v9876_v51  ;;  %v3410_v58 = vadd.f32 %v12571_v11, %v10409_v54  ;;  %v4434_v59 = vadd.f32 %v12571_v11, %v10665_v56  ;;  %v3401_v60 = vpop.f32.mrb[141].mxu0  ;;  %v4425_v61 = vpop.f32.mrb[141].mxu1 }
 0x20c   : > { %7586 = vst.msk [vmem:[%s11552_s12 + $0x224] sm:$0xf] %vm7448_vm3, %v9618_v52  ;;  %7842 = vst.msk [vmem:[%s11552_s12 + $0x624] sm:$0xf] %vm7448_vm3, %v9874_v53  ;;  %v3402_v0 = vadd.f32 %v12571_v11, %v3401_v60  ;;  %v4426_v1 = vadd.f32 %v12571_v11, %v4425_v61  ;;  %v10410_v2 = vpop.f32.mrb[142].mxu0  ;;  %v10666_v3 = vpop.f32.mrb[142].mxu1 }
 0x20d   : > { %v5030_v57 = vmax.f32 %v3410_v58, 0.0  ;;  %v5286_v6 = vmax.f32 %v4434_v59, 0.0  ;;  %v3413_v7 = vadd.f32 %v12571_v11, %v10410_v2  ;;  %v4437_v8 = vadd.f32 %v12571_v11, %v10666_v3  ;;  %v3404_v9 = vpop.f32.mrb[143].mxu0  ;;  %v4428_v10 = vpop.f32.mrb[143].mxu1 }
 0x20e   : > { %v5028_v12 = vmax.f32 %v3402_v0, 0.0  ;;  %v5284_v13 = vmax.f32 %v4426_v1, 0.0  ;;  %v3405_v14 = vadd.f32 %v12571_v11, %v3404_v9  ;;  %v4429_v15 = vadd.f32 %v12571_v11, %v4428_v10 }
 0x20f   : > { %v9623_v16 = vpack.c.bf16 %v5030_v57, %v5030_v57  ;;  %v9879_v17 = vpack.c.bf16 %v5286_v6, %v5286_v6  ;;  %v5031_v18 = vmax.f32 %v3413_v7, 0.0  ;;  %v5287_v19 = vmax.f32 %v4437_v8, 0.0  ;;  %10516 = vmatmul.mubr.msk.bf16.gmra.mrb[248].mxu0 %vm2031_vm2, %v11133_v62  ;;  %10772 = vmatmul.mubr.msk.bf16.gmra.mrb[248].mxu1 %vm2031_vm2, %v11134_v63 }
 0x210   : > { %v9621_v20 = vpack.c.bf16 %v5028_v12, %v5028_v12  ;;  %v9877_v21 = vpack.c.bf16 %v5284_v13, %v5284_v13  ;;  %v5029_v22 = vmax.f32 %v3405_v14, 0.0  ;;  %v5285_v23 = vmax.f32 %v4429_v15, 0.0  ;;  %10519 = vmatprep.mubr.msk.bf16.mxu0 %vm2031_vm2, %v11135_v4  ;;  %10775 = vmatprep.mubr.msk.bf16.mxu1 %vm2031_vm2, %v11136_v5 }
 0x211   : > { %7591 = vst.msk [vmem:[%s11552_s12 + $0x238] sm:$0xf] %vm7448_vm3, %v9623_v16  ;;  %7847 = vst.msk [vmem:[%s11552_s12 + $0x638] sm:$0xf] %vm7448_vm3, %v9879_v17  ;;  %v9624_v24 = vpack.c.bf16 %v5031_v18, %v5031_v18  ;;  %v9880_v25 = vpack.c.bf16 %v5287_v19, %v5287_v19 }
 0x212   : > { %7589 = vst.msk [vmem:[%s11552_s12 + $0x230] sm:$0xf] %vm7448_vm3, %v9621_v20  ;;  %7845 = vst.msk [vmem:[%s11552_s12 + $0x630] sm:$0xf] %vm7448_vm3, %v9877_v21  ;;  %v9622_v26 = vpack.c.bf16 %v5029_v22, %v5029_v22  ;;  %v9878_v27 = vpack.c.bf16 %v5285_v23, %v5285_v23  ;;  %v10413_v28 = vpop.f32.mrb[144].mxu0  ;;  %v10669_v29 = vpop.f32.mrb[144].mxu1 }
 0x213   : > { %7592 = vst.msk [vmem:[%s11552_s12 + $0x23c] sm:$0xf] %vm7448_vm3, %v9624_v24  ;;  %7848 = vst.msk [vmem:[%s11552_s12 + $0x63c] sm:$0xf] %vm7448_vm3, %v9880_v25  ;;  %v3426_v30 = vadd.f32 %v12571_v11, %v10413_v28  ;;  %v4450_v31 = vadd.f32 %v12571_v11, %v10669_v29  ;;  %v3417_v32 = vpop.f32.mrb[145].mxu0  ;;  %v4441_v55 = vpop.f32.mrb[145].mxu1 }
 0x214   : > { %7590 = vst.msk [vmem:[%s11552_s12 + $0x234] sm:$0xf] %vm7448_vm3, %v9622_v26  ;;  %7846 = vst.msk [vmem:[%s11552_s12 + $0x634] sm:$0xf] %vm7448_vm3, %v9878_v27  ;;  %v3418_v35 = vadd.f32 %v12571_v11, %v3417_v32  ;;  %v4442_v36 = vadd.f32 %v12571_v11, %v4441_v55  ;;  %v10414_v37 = vpop.f32.mrb[146].mxu0  ;;  %v10670_v39 = vpop.f32.mrb[146].mxu1 }
 0x215   : > { %v5034_v40 = vmax.f32 %v3426_v30, 0.0  ;;  %v5290_v41 = vmax.f32 %v4450_v31, 0.0  ;;  %v3429_v42 = vadd.f32 %v12571_v11, %v10414_v37  ;;  %v4453_v43 = vadd.f32 %v12571_v11, %v10670_v39  ;;  %v3420_v44 = vpop.f32.mrb[147].mxu0  ;;  %v4444_v45 = vpop.f32.mrb[147].mxu1 }
 0x216   : > { %v5032_v46 = vmax.f32 %v3418_v35, 0.0  ;;  %v5288_v47 = vmax.f32 %v4442_v36, 0.0  ;;  %v3421_v48 = vadd.f32 %v12571_v11, %v3420_v44  ;;  %v4445_v49 = vadd.f32 %v12571_v11, %v4444_v45 }
 0x217   : > { %v9627_v50 = vpack.c.bf16 %v5034_v40, %v5034_v40  ;;  %v9883_v38 = vpack.c.bf16 %v5290_v41, %v5290_v41  ;;  %v5035_v51 = vmax.f32 %v3429_v42, 0.0  ;;  %v5291_v52 = vmax.f32 %v4453_v43, 0.0  ;;  %10520 = vmatmul.mubr.msk.bf16.gmra.mrb[252].mxu0 %vm2031_vm2, %v11137_v33  ;;  %10776 = vmatmul.mubr.msk.bf16.gmra.mrb[252].mxu1 %vm2031_vm2, %v11138_v34 }
 0x218   : > { %v9625_v53 = vpack.c.bf16 %v5032_v46, %v5032_v46  ;;  %v9881_v54 = vpack.c.bf16 %v5288_v47, %v5288_v47  ;;  %v5033_v56 = vmax.f32 %v3421_v48, 0.0  ;;  %v5289_v58 = vmax.f32 %v4445_v49, 0.0 }
 0x219   : > { %7595 = vst.msk [vmem:[%s11552_s12 + $0x248] sm:$0xf] %vm7448_vm3, %v9627_v50  ;;  %7851 = vst.msk [vmem:[%s11552_s12 + $0x648] sm:$0xf] %vm7448_vm3, %v9883_v38  ;;  %v9628_v59 = vpack.c.bf16 %v5035_v51, %v5035_v51  ;;  %v9884_v60 = vpack.c.bf16 %v5291_v52, %v5291_v52 }
 0x21a   : > { %7593 = vst.msk [vmem:[%s11552_s12 + $0x240] sm:$0xf] %vm7448_vm3, %v9625_v53  ;;  %7849 = vst.msk [vmem:[%s11552_s12 + $0x640] sm:$0xf] %vm7448_vm3, %v9881_v54  ;;  %v9626_v61 = vpack.c.bf16 %v5033_v56, %v5033_v56  ;;  %v9882_v62 = vpack.c.bf16 %v5289_v58, %v5289_v58  ;;  %v10417_v63 = vpop.f32.mrb[148].mxu0  ;;  %v10673_v0 = vpop.f32.mrb[148].mxu1 }
 0x21b   : > { %7596 = vst.msk [vmem:[%s11552_s12 + $0x24c] sm:$0xf] %vm7448_vm3, %v9628_v59  ;;  %7852 = vst.msk [vmem:[%s11552_s12 + $0x64c] sm:$0xf] %vm7448_vm3, %v9884_v60  ;;  %v3442_v1 = vadd.f32 %v12571_v11, %v10417_v63  ;;  %v4466_v2 = vadd.f32 %v12571_v11, %v10673_v0  ;;  %v3433_v3 = vpop.f32.mrb[149].mxu0  ;;  %v4457_v4 = vpop.f32.mrb[149].mxu1 }
 0x21c   : > { %7594 = vst.msk [vmem:[%s11552_s12 + $0x244] sm:$0xf] %vm7448_vm3, %v9626_v61  ;;  %7850 = vst.msk [vmem:[%s11552_s12 + $0x644] sm:$0xf] %vm7448_vm3, %v9882_v62  ;;  %v3434_v5 = vadd.f32 %v12571_v11, %v3433_v3  ;;  %v4458_v57 = vadd.f32 %v12571_v11, %v4457_v4  ;;  %v10418_v6 = vpop.f32.mrb[150].mxu0  ;;  %v10674_v7 = vpop.f32.mrb[150].mxu1 }
 0x21d   : > { %v5038_v8 = vmax.f32 %v3442_v1, 0.0  ;;  %v5294_v9 = vmax.f32 %v4466_v2, 0.0  ;;  %v3445_v10 = vadd.f32 %v12571_v11, %v10418_v6  ;;  %v4469_v12 = vadd.f32 %v12571_v11, %v10674_v7  ;;  %v3436_v13 = vpop.f32.mrb[151].mxu0  ;;  %v4460_v14 = vpop.f32.mrb[151].mxu1 }
 0x21e   : > { %v5036_v15 = vmax.f32 %v3434_v5, 0.0  ;;  %v5292_v16 = vmax.f32 %v4458_v57, 0.0  ;;  %v3437_v17 = vadd.f32 %v12571_v11, %v3436_v13  ;;  %v4461_v18 = vadd.f32 %v12571_v11, %v4460_v14 }
 0x21f   : > { %v9631_v19 = vpack.c.bf16 %v5038_v8, %v5038_v8  ;;  %v9887_v20 = vpack.c.bf16 %v5294_v9, %v5294_v9  ;;  %v5039_v21 = vmax.f32 %v3445_v10, 0.0  ;;  %v5295_v22 = vmax.f32 %v4469_v12, 0.0 }
 0x220   : > { %v9629_v23 = vpack.c.bf16 %v5036_v15, %v5036_v15  ;;  %v9885_v24 = vpack.c.bf16 %v5292_v16, %v5292_v16  ;;  %v5037_v25 = vmax.f32 %v3437_v17, 0.0  ;;  %v5293_v26 = vmax.f32 %v4461_v18, 0.0 }
 0x221   : > { %7599 = vst.msk [vmem:[%s11552_s12 + $0x258] sm:$0xf] %vm7448_vm3, %v9631_v19  ;;  %7855 = vst.msk [vmem:[%s11552_s12 + $0x658] sm:$0xf] %vm7448_vm3, %v9887_v20  ;;  %v9632_v27 = vpack.c.bf16 %v5039_v21, %v5039_v21  ;;  %v9888_v28 = vpack.c.bf16 %v5295_v22, %v5295_v22 }
 0x222   : > { %7597 = vst.msk [vmem:[%s11552_s12 + $0x250] sm:$0xf] %vm7448_vm3, %v9629_v23  ;;  %7853 = vst.msk [vmem:[%s11552_s12 + $0x650] sm:$0xf] %vm7448_vm3, %v9885_v24  ;;  %v9630_v29 = vpack.c.bf16 %v5037_v25, %v5037_v25  ;;  %v9886_v30 = vpack.c.bf16 %v5293_v26, %v5293_v26  ;;  %v10421_v31 = vpop.f32.mrb[152].mxu0  ;;  %v10677_v32 = vpop.f32.mrb[152].mxu1 }
 0x223   : > { %7600 = vst.msk [vmem:[%s11552_s12 + $0x25c] sm:$0xf] %vm7448_vm3, %v9632_v27  ;;  %7856 = vst.msk [vmem:[%s11552_s12 + $0x65c] sm:$0xf] %vm7448_vm3, %v9888_v28  ;;  %v3458_v55 = vadd.f32 %v12571_v11, %v10421_v31  ;;  %v4482_v33 = vadd.f32 %v12571_v11, %v10677_v32  ;;  %v3449_v34 = vpop.f32.mrb[153].mxu0  ;;  %v4473_v35 = vpop.f32.mrb[153].mxu1 }
 0x224   : > { %7598 = vst.msk [vmem:[%s11552_s12 + $0x254] sm:$0xf] %vm7448_vm3, %v9630_v29  ;;  %7854 = vst.msk [vmem:[%s11552_s12 + $0x654] sm:$0xf] %vm7448_vm3, %v9886_v30  ;;  %v3450_v36 = vadd.f32 %v12571_v11, %v3449_v34  ;;  %v4474_v37 = vadd.f32 %v12571_v11, %v4473_v35  ;;  %v10422_v39 = vpop.f32.mrb[154].mxu0  ;;  %v10678_v40 = vpop.f32.mrb[154].mxu1 }
 0x225   : > { %v5042_v41 = vmax.f32 %v3458_v55, 0.0  ;;  %v5298_v42 = vmax.f32 %v4482_v33, 0.0  ;;  %v3461_v43 = vadd.f32 %v12571_v11, %v10422_v39  ;;  %v4485_v44 = vadd.f32 %v12571_v11, %v10678_v40  ;;  %v3452_v45 = vpop.f32.mrb[155].mxu0  ;;  %v4476_v46 = vpop.f32.mrb[155].mxu1 }
 0x226   : > { %v5040_v47 = vmax.f32 %v3450_v36, 0.0  ;;  %v5296_v48 = vmax.f32 %v4474_v37, 0.0  ;;  %v3453_v49 = vadd.f32 %v12571_v11, %v3452_v45  ;;  %v4477_v50 = vadd.f32 %v12571_v11, %v4476_v46 }
 0x227   : > { %v9635_v38 = vpack.c.bf16 %v5042_v41, %v5042_v41  ;;  %v9891_v51 = vpack.c.bf16 %v5298_v42, %v5298_v42  ;;  %v5043_v52 = vmax.f32 %v3461_v43, 0.0  ;;  %v5299_v53 = vmax.f32 %v4485_v44, 0.0 }
 0x228   : > { %v9633_v54 = vpack.c.bf16 %v5040_v47, %v5040_v47  ;;  %v9889_v56 = vpack.c.bf16 %v5296_v48, %v5296_v48  ;;  %v5041_v58 = vmax.f32 %v3453_v49, 0.0  ;;  %v5297_v59 = vmax.f32 %v4477_v50, 0.0 }
 0x229   : > { %7603 = vst.msk [vmem:[%s11552_s12 + $0x268] sm:$0xf] %vm7448_vm3, %v9635_v38  ;;  %7859 = vst.msk [vmem:[%s11552_s12 + $0x668] sm:$0xf] %vm7448_vm3, %v9891_v51  ;;  %v9636_v60 = vpack.c.bf16 %v5043_v52, %v5043_v52  ;;  %v9892_v61 = vpack.c.bf16 %v5299_v53, %v5299_v53 }
 0x22a   : > { %7601 = vst.msk [vmem:[%s11552_s12 + $0x260] sm:$0xf] %vm7448_vm3, %v9633_v54  ;;  %7857 = vst.msk [vmem:[%s11552_s12 + $0x660] sm:$0xf] %vm7448_vm3, %v9889_v56  ;;  %v9634_v62 = vpack.c.bf16 %v5041_v58, %v5041_v58  ;;  %v9890_v63 = vpack.c.bf16 %v5297_v59, %v5297_v59  ;;  %v10425_v0 = vpop.f32.mrb[156].mxu0  ;;  %v10681_v1 = vpop.f32.mrb[156].mxu1 }
 0x22b   : > { %7604 = vst.msk [vmem:[%s11552_s12 + $0x26c] sm:$0xf] %vm7448_vm3, %v9636_v60  ;;  %7860 = vst.msk [vmem:[%s11552_s12 + $0x66c] sm:$0xf] %vm7448_vm3, %v9892_v61  ;;  %v3474_v2 = vadd.f32 %v12571_v11, %v10425_v0  ;;  %v4498_v3 = vadd.f32 %v12571_v11, %v10681_v1  ;;  %v3465_v4 = vpop.f32.mrb[157].mxu0  ;;  %v4489_v5 = vpop.f32.mrb[157].mxu1 }
 0x22c   : > { %7602 = vst.msk [vmem:[%s11552_s12 + $0x264] sm:$0xf] %vm7448_vm3, %v9634_v62  ;;  %7858 = vst.msk [vmem:[%s11552_s12 + $0x664] sm:$0xf] %vm7448_vm3, %v9890_v63  ;;  %v3466_v57 = vadd.f32 %v12571_v11, %v3465_v4  ;;  %v4490_v6 = vadd.f32 %v12571_v11, %v4489_v5  ;;  %v10426_v7 = vpop.f32.mrb[158].mxu0  ;;  %v10682_v8 = vpop.f32.mrb[158].mxu1 }
 0x22d   : > { %v5046_v9 = vmax.f32 %v3474_v2, 0.0  ;;  %v5302_v10 = vmax.f32 %v4498_v3, 0.0  ;;  %v3477_v12 = vadd.f32 %v12571_v11, %v10426_v7  ;;  %v4501_v13 = vadd.f32 %v12571_v11, %v10682_v8  ;;  %v3468_v14 = vpop.f32.mrb[159].mxu0  ;;  %v4492_v15 = vpop.f32.mrb[159].mxu1 }
 0x22e   : > { %v5044_v16 = vmax.f32 %v3466_v57, 0.0  ;;  %v5300_v17 = vmax.f32 %v4490_v6, 0.0  ;;  %v3469_v18 = vadd.f32 %v12571_v11, %v3468_v14  ;;  %v4493_v19 = vadd.f32 %v12571_v11, %v4492_v15 }
 0x22f   : > { %v9639_v20 = vpack.c.bf16 %v5046_v9, %v5046_v9  ;;  %v9895_v21 = vpack.c.bf16 %v5302_v10, %v5302_v10  ;;  %v5047_v22 = vmax.f32 %v3477_v12, 0.0  ;;  %v5303_v23 = vmax.f32 %v4501_v13, 0.0 }
 0x230   : > { %v9637_v24 = vpack.c.bf16 %v5044_v16, %v5044_v16  ;;  %v9893_v25 = vpack.c.bf16 %v5300_v17, %v5300_v17  ;;  %v5045_v26 = vmax.f32 %v3469_v18, 0.0  ;;  %v5301_v27 = vmax.f32 %v4493_v19, 0.0 }
 0x231   : > { %7607 = vst.msk [vmem:[%s11552_s12 + $0x278] sm:$0xf] %vm7448_vm3, %v9639_v20  ;;  %7863 = vst.msk [vmem:[%s11552_s12 + $0x678] sm:$0xf] %vm7448_vm3, %v9895_v21  ;;  %v9640_v28 = vpack.c.bf16 %v5047_v22, %v5047_v22  ;;  %v9896_v29 = vpack.c.bf16 %v5303_v23, %v5303_v23 }
 0x232   : > { %7605 = vst.msk [vmem:[%s11552_s12 + $0x270] sm:$0xf] %vm7448_vm3, %v9637_v24  ;;  %7861 = vst.msk [vmem:[%s11552_s12 + $0x670] sm:$0xf] %vm7448_vm3, %v9893_v25  ;;  %v9638_v30 = vpack.c.bf16 %v5045_v26, %v5045_v26  ;;  %v9894_v31 = vpack.c.bf16 %v5301_v27, %v5301_v27  ;;  %v10429_v32 = vpop.f32.mrb[160].mxu0  ;;  %v10685_v55 = vpop.f32.mrb[160].mxu1 }
 0x233   : > { %7608 = vst.msk [vmem:[%s11552_s12 + $0x27c] sm:$0xf] %vm7448_vm3, %v9640_v28  ;;  %7864 = vst.msk [vmem:[%s11552_s12 + $0x67c] sm:$0xf] %vm7448_vm3, %v9896_v29  ;;  %v3490_v33 = vadd.f32 %v12571_v11, %v10429_v32  ;;  %v4514_v34 = vadd.f32 %v12571_v11, %v10685_v55  ;;  %v3481_v35 = vpop.f32.mrb[161].mxu0  ;;  %v4505_v36 = vpop.f32.mrb[161].mxu1 }
 0x234   : > { %7606 = vst.msk [vmem:[%s11552_s12 + $0x274] sm:$0xf] %vm7448_vm3, %v9638_v30  ;;  %7862 = vst.msk [vmem:[%s11552_s12 + $0x674] sm:$0xf] %vm7448_vm3, %v9894_v31  ;;  %v3482_v37 = vadd.f32 %v12571_v11, %v3481_v35  ;;  %v4506_v39 = vadd.f32 %v12571_v11, %v4505_v36  ;;  %v10430_v40 = vpop.f32.mrb[162].mxu0  ;;  %v10686_v41 = vpop.f32.mrb[162].mxu1 }
 0x235   : > { %v5050_v42 = vmax.f32 %v3490_v33, 0.0  ;;  %v5306_v43 = vmax.f32 %v4514_v34, 0.0  ;;  %v3493_v44 = vadd.f32 %v12571_v11, %v10430_v40  ;;  %v4517_v45 = vadd.f32 %v12571_v11, %v10686_v41  ;;  %v3484_v46 = vpop.f32.mrb[163].mxu0  ;;  %v4508_v47 = vpop.f32.mrb[163].mxu1 }
 0x236   : > { %v5048_v48 = vmax.f32 %v3482_v37, 0.0  ;;  %v5304_v49 = vmax.f32 %v4506_v39, 0.0  ;;  %v3485_v50 = vadd.f32 %v12571_v11, %v3484_v46  ;;  %v4509_v38 = vadd.f32 %v12571_v11, %v4508_v47 }
 0x237   : > { %v9643_v51 = vpack.c.bf16 %v5050_v42, %v5050_v42  ;;  %v9899_v52 = vpack.c.bf16 %v5306_v43, %v5306_v43  ;;  %v5051_v53 = vmax.f32 %v3493_v44, 0.0  ;;  %v5307_v54 = vmax.f32 %v4517_v45, 0.0 }
 0x238   : > { %v9641_v56 = vpack.c.bf16 %v5048_v48, %v5048_v48  ;;  %v9897_v58 = vpack.c.bf16 %v5304_v49, %v5304_v49  ;;  %v5049_v59 = vmax.f32 %v3485_v50, 0.0  ;;  %v5305_v60 = vmax.f32 %v4509_v38, 0.0 }
 0x239   : > { %7611 = vst.msk [vmem:[%s11552_s12 + $0x288] sm:$0xf] %vm7448_vm3, %v9643_v51  ;;  %7867 = vst.msk [vmem:[%s11552_s12 + $0x688] sm:$0xf] %vm7448_vm3, %v9899_v52  ;;  %v9644_v61 = vpack.c.bf16 %v5051_v53, %v5051_v53  ;;  %v9900_v62 = vpack.c.bf16 %v5307_v54, %v5307_v54 }
 0x23a   : > { %7609 = vst.msk [vmem:[%s11552_s12 + $0x280] sm:$0xf] %vm7448_vm3, %v9641_v56  ;;  %7865 = vst.msk [vmem:[%s11552_s12 + $0x680] sm:$0xf] %vm7448_vm3, %v9897_v58  ;;  %v9642_v63 = vpack.c.bf16 %v5049_v59, %v5049_v59  ;;  %v9898_v0 = vpack.c.bf16 %v5305_v60, %v5305_v60  ;;  %v10433_v1 = vpop.f32.mrb[164].mxu0  ;;  %v10689_v2 = vpop.f32.mrb[164].mxu1 }
 0x23b   : > { %7612 = vst.msk [vmem:[%s11552_s12 + $0x28c] sm:$0xf] %vm7448_vm3, %v9644_v61  ;;  %7868 = vst.msk [vmem:[%s11552_s12 + $0x68c] sm:$0xf] %vm7448_vm3, %v9900_v62  ;;  %v3506_v3 = vadd.f32 %v12571_v11, %v10433_v1  ;;  %v4530_v4 = vadd.f32 %v12571_v11, %v10689_v2  ;;  %v3497_v5 = vpop.f32.mrb[165].mxu0  ;;  %v4521_v57 = vpop.f32.mrb[165].mxu1 }
 0x23c   : > { %7610 = vst.msk [vmem:[%s11552_s12 + $0x284] sm:$0xf] %vm7448_vm3, %v9642_v63  ;;  %7866 = vst.msk [vmem:[%s11552_s12 + $0x684] sm:$0xf] %vm7448_vm3, %v9898_v0  ;;  %v3498_v6 = vadd.f32 %v12571_v11, %v3497_v5  ;;  %v4522_v7 = vadd.f32 %v12571_v11, %v4521_v57  ;;  %v10434_v8 = vpop.f32.mrb[166].mxu0  ;;  %v10690_v9 = vpop.f32.mrb[166].mxu1 }
 0x23d   : > { %v5054_v10 = vmax.f32 %v3506_v3, 0.0  ;;  %v5310_v12 = vmax.f32 %v4530_v4, 0.0  ;;  %v3509_v13 = vadd.f32 %v12571_v11, %v10434_v8  ;;  %v4533_v14 = vadd.f32 %v12571_v11, %v10690_v9  ;;  %v3500_v15 = vpop.f32.mrb[167].mxu0  ;;  %v4524_v16 = vpop.f32.mrb[167].mxu1 }
 0x23e   : > { %v5052_v17 = vmax.f32 %v3498_v6, 0.0  ;;  %v5308_v18 = vmax.f32 %v4522_v7, 0.0  ;;  %v3501_v19 = vadd.f32 %v12571_v11, %v3500_v15  ;;  %v4525_v20 = vadd.f32 %v12571_v11, %v4524_v16 }
 0x23f   : > { %v9647_v21 = vpack.c.bf16 %v5054_v10, %v5054_v10  ;;  %v9903_v22 = vpack.c.bf16 %v5310_v12, %v5310_v12  ;;  %v5055_v23 = vmax.f32 %v3509_v13, 0.0  ;;  %v5311_v24 = vmax.f32 %v4533_v14, 0.0 }
 0x240   : > { %v9645_v25 = vpack.c.bf16 %v5052_v17, %v5052_v17  ;;  %v9901_v26 = vpack.c.bf16 %v5308_v18, %v5308_v18  ;;  %v5053_v27 = vmax.f32 %v3501_v19, 0.0  ;;  %v5309_v28 = vmax.f32 %v4525_v20, 0.0 }
 0x241   : > { %7615 = vst.msk [vmem:[%s11552_s12 + $0x298] sm:$0xf] %vm7448_vm3, %v9647_v21  ;;  %7871 = vst.msk [vmem:[%s11552_s12 + $0x698] sm:$0xf] %vm7448_vm3, %v9903_v22  ;;  %v9648_v29 = vpack.c.bf16 %v5055_v23, %v5055_v23  ;;  %v9904_v30 = vpack.c.bf16 %v5311_v24, %v5311_v24 }
 0x242   : > { %7613 = vst.msk [vmem:[%s11552_s12 + $0x290] sm:$0xf] %vm7448_vm3, %v9645_v25  ;;  %7869 = vst.msk [vmem:[%s11552_s12 + $0x690] sm:$0xf] %vm7448_vm3, %v9901_v26  ;;  %v9646_v31 = vpack.c.bf16 %v5053_v27, %v5053_v27  ;;  %v9902_v32 = vpack.c.bf16 %v5309_v28, %v5309_v28  ;;  %v10437_v55 = vpop.f32.mrb[168].mxu0  ;;  %v10693_v33 = vpop.f32.mrb[168].mxu1 }
 0x243   : > { %7616 = vst.msk [vmem:[%s11552_s12 + $0x29c] sm:$0xf] %vm7448_vm3, %v9648_v29  ;;  %7872 = vst.msk [vmem:[%s11552_s12 + $0x69c] sm:$0xf] %vm7448_vm3, %v9904_v30  ;;  %v3522_v34 = vadd.f32 %v12571_v11, %v10437_v55  ;;  %v4546_v35 = vadd.f32 %v12571_v11, %v10693_v33  ;;  %v3513_v36 = vpop.f32.mrb[169].mxu0  ;;  %v4537_v37 = vpop.f32.mrb[169].mxu1 }
 0x244   : > { %7614 = vst.msk [vmem:[%s11552_s12 + $0x294] sm:$0xf] %vm7448_vm3, %v9646_v31  ;;  %7870 = vst.msk [vmem:[%s11552_s12 + $0x694] sm:$0xf] %vm7448_vm3, %v9902_v32  ;;  %v3514_v39 = vadd.f32 %v12571_v11, %v3513_v36  ;;  %v4538_v40 = vadd.f32 %v12571_v11, %v4537_v37  ;;  %v10438_v41 = vpop.f32.mrb[170].mxu0  ;;  %v10694_v42 = vpop.f32.mrb[170].mxu1 }
 0x245   : > { %v5058_v43 = vmax.f32 %v3522_v34, 0.0  ;;  %v5314_v44 = vmax.f32 %v4546_v35, 0.0  ;;  %v3525_v45 = vadd.f32 %v12571_v11, %v10438_v41  ;;  %v4549_v46 = vadd.f32 %v12571_v11, %v10694_v42  ;;  %v3516_v47 = vpop.f32.mrb[171].mxu0  ;;  %v4540_v48 = vpop.f32.mrb[171].mxu1  ;;  %v12900_v34 = vld [vmem:[%s13592_s2] ss:$0 sm:$0xff] }
 0x246   : > { %v5056_v49 = vmax.f32 %v3514_v39, 0.0  ;;  %v5312_v50 = vmax.f32 %v4538_v40, 0.0  ;;  %v3517_v38 = vadd.f32 %v12571_v11, %v3516_v47  ;;  %v4541_v51 = vadd.f32 %v12571_v11, %v4540_v48 }
 0x247   : > { %v9651_v52 = vpack.c.bf16 %v5058_v43, %v5058_v43  ;;  %v9907_v53 = vpack.c.bf16 %v5314_v44, %v5314_v44  ;;  %v5059_v54 = vmax.f32 %v3525_v45, 0.0  ;;  %v5315_v56 = vmax.f32 %v4549_v46, 0.0 }
 0x248   : > { %v9649_v58 = vpack.c.bf16 %v5056_v49, %v5056_v49  ;;  %v9905_v59 = vpack.c.bf16 %v5312_v50, %v5312_v50  ;;  %v5057_v60 = vmax.f32 %v3517_v38, 0.0  ;;  %v5313_v61 = vmax.f32 %v4541_v51, 0.0 }
 0x249   : > { %7619 = vst.msk [vmem:[%s11552_s12 + $0x2a8] sm:$0xf] %vm7448_vm3, %v9651_v52  ;;  %7875 = vst.msk [vmem:[%s11552_s12 + $0x6a8] sm:$0xf] %vm7448_vm3, %v9907_v53  ;;  %v9652_v62 = vpack.c.bf16 %v5059_v54, %v5059_v54  ;;  %v9908_v63 = vpack.c.bf16 %v5315_v56, %v5315_v56 }
 0x24a   : > { %7617 = vst.msk [vmem:[%s11552_s12 + $0x2a0] sm:$0xf] %vm7448_vm3, %v9649_v58  ;;  %7873 = vst.msk [vmem:[%s11552_s12 + $0x6a0] sm:$0xf] %vm7448_vm3, %v9905_v59  ;;  %v9650_v0 = vpack.c.bf16 %v5057_v60, %v5057_v60  ;;  %v9906_v1 = vpack.c.bf16 %v5313_v61, %v5313_v61  ;;  %v10441_v2 = vpop.f32.mrb[172].mxu0  ;;  %v10697_v3 = vpop.f32.mrb[172].mxu1 }
 0x24b   : > { %7620 = vst.msk [vmem:[%s11552_s12 + $0x2ac] sm:$0xf] %vm7448_vm3, %v9652_v62  ;;  %7876 = vst.msk [vmem:[%s11552_s12 + $0x6ac] sm:$0xf] %vm7448_vm3, %v9908_v63  ;;  %v3538_v4 = vadd.f32 %v12571_v11, %v10441_v2  ;;  %v4562_v5 = vadd.f32 %v12571_v11, %v10697_v3  ;;  %v3529_v57 = vpop.f32.mrb[173].mxu0  ;;  %v4553_v6 = vpop.f32.mrb[173].mxu1 }
 0x24c   : > { %7618 = vst.msk [vmem:[%s11552_s12 + $0x2a4] sm:$0xf] %vm7448_vm3, %v9650_v0  ;;  %7874 = vst.msk [vmem:[%s11552_s12 + $0x6a4] sm:$0xf] %vm7448_vm3, %v9906_v1  ;;  %v3530_v7 = vadd.f32 %v12571_v11, %v3529_v57  ;;  %v4554_v8 = vadd.f32 %v12571_v11, %v4553_v6  ;;  %v10442_v9 = vpop.f32.mrb[174].mxu0  ;;  %v10698_v10 = vpop.f32.mrb[174].mxu1 }
 0x24d   : > { %v5062_v12 = vmax.f32 %v3538_v4, 0.0  ;;  %v5318_v13 = vmax.f32 %v4562_v5, 0.0  ;;  %v3541_v14 = vadd.f32 %v12571_v11, %v10442_v9  ;;  %v4565_v15 = vadd.f32 %v12571_v11, %v10698_v10  ;;  %v3532_v16 = vpop.f32.mrb[175].mxu0  ;;  %v4556_v17 = vpop.f32.mrb[175].mxu1 }
 0x24e   : > { %v5060_v18 = vmax.f32 %v3530_v7, 0.0  ;;  %v5316_v19 = vmax.f32 %v4554_v8, 0.0  ;;  %v3533_v20 = vadd.f32 %v12571_v11, %v3532_v16  ;;  %v4557_v21 = vadd.f32 %v12571_v11, %v4556_v17 }
 0x24f   : > { %v9655_v22 = vpack.c.bf16 %v5062_v12, %v5062_v12  ;;  %v9911_v23 = vpack.c.bf16 %v5318_v13, %v5318_v13  ;;  %v5063_v24 = vmax.f32 %v3541_v14, 0.0  ;;  %v5319_v25 = vmax.f32 %v4565_v15, 0.0 }
 0x250   : > { %v9653_v26 = vpack.c.bf16 %v5060_v18, %v5060_v18  ;;  %v9909_v27 = vpack.c.bf16 %v5316_v19, %v5316_v19  ;;  %v5061_v28 = vmax.f32 %v3533_v20, 0.0  ;;  %v5317_v29 = vmax.f32 %v4557_v21, 0.0 }
 0x251   : > { %7623 = vst.msk [vmem:[%s11552_s12 + $0x2b8] sm:$0xf] %vm7448_vm3, %v9655_v22  ;;  %7879 = vst.msk [vmem:[%s11552_s12 + $0x6b8] sm:$0xf] %vm7448_vm3, %v9911_v23  ;;  %v9656_v30 = vpack.c.bf16 %v5063_v24, %v5063_v24  ;;  %v9912_v31 = vpack.c.bf16 %v5319_v25, %v5319_v25 }
 0x252   : > { %7621 = vst.msk [vmem:[%s11552_s12 + $0x2b0] sm:$0xf] %vm7448_vm3, %v9653_v26  ;;  %7877 = vst.msk [vmem:[%s11552_s12 + $0x6b0] sm:$0xf] %vm7448_vm3, %v9909_v27  ;;  %v9654_v11 = vpack.c.bf16 %v5061_v28, %v5061_v28  ;;  %v9910_v32 = vpack.c.bf16 %v5317_v29, %v5317_v29  ;;  %v10445_v55 = vpop.f32.mrb[176].mxu0  ;;  %v10701_v33 = vpop.f32.mrb[176].mxu1 }
 0x253   : > { %7624 = vst.msk [vmem:[%s11552_s12 + $0x2bc] sm:$0xf] %vm7448_vm3, %v9656_v30  ;;  %7880 = vst.msk [vmem:[%s11552_s12 + $0x6bc] sm:$0xf] %vm7448_vm3, %v9912_v31  ;;  %v3554_v35 = vadd.f32 %v12900_v34, %v10445_v55  ;;  %v4578_v36 = vadd.f32 %v12900_v34, %v10701_v33  ;;  %v3545_v37 = vpop.f32.mrb[177].mxu0  ;;  %v4569_v39 = vpop.f32.mrb[177].mxu1 }
 0x254   : > { %7622 = vst.msk [vmem:[%s11552_s12 + $0x2b4] sm:$0xf] %vm7448_vm3, %v9654_v11  ;;  %7878 = vst.msk [vmem:[%s11552_s12 + $0x6b4] sm:$0xf] %vm7448_vm3, %v9910_v32  ;;  %v3546_v40 = vadd.f32 %v12900_v34, %v3545_v37  ;;  %v4570_v41 = vadd.f32 %v12900_v34, %v4569_v39  ;;  %v10446_v42 = vpop.f32.mrb[178].mxu0  ;;  %v10702_v43 = vpop.f32.mrb[178].mxu1 }
 0x255   : > { %v5066_v44 = vmax.f32 %v3554_v35, 0.0  ;;  %v5322_v45 = vmax.f32 %v4578_v36, 0.0  ;;  %v3557_v46 = vadd.f32 %v12900_v34, %v10446_v42  ;;  %v4581_v47 = vadd.f32 %v12900_v34, %v10702_v43  ;;  %v3548_v48 = vpop.f32.mrb[179].mxu0  ;;  %v4572_v49 = vpop.f32.mrb[179].mxu1 }
 0x256   : > { %v5064_v50 = vmax.f32 %v3546_v40, 0.0  ;;  %v5320_v38 = vmax.f32 %v4570_v41, 0.0  ;;  %v3549_v51 = vadd.f32 %v12900_v34, %v3548_v48  ;;  %v4573_v52 = vadd.f32 %v12900_v34, %v4572_v49 }
 0x257   : > { %v9659_v53 = vpack.c.bf16 %v5066_v44, %v5066_v44  ;;  %v9915_v54 = vpack.c.bf16 %v5322_v45, %v5322_v45  ;;  %v5067_v56 = vmax.f32 %v3557_v46, 0.0  ;;  %v5323_v58 = vmax.f32 %v4581_v47, 0.0 }
 0x258   : > { %v9657_v59 = vpack.c.bf16 %v5064_v50, %v5064_v50  ;;  %v9913_v60 = vpack.c.bf16 %v5320_v38, %v5320_v38  ;;  %v5065_v61 = vmax.f32 %v3549_v51, 0.0  ;;  %v5321_v62 = vmax.f32 %v4573_v52, 0.0 }
 0x259   : > { %7627 = vst.msk [vmem:[%s11552_s12 + $0x2c8] sm:$0xf] %vm7448_vm3, %v9659_v53  ;;  %7883 = vst.msk [vmem:[%s11552_s12 + $0x6c8] sm:$0xf] %vm7448_vm3, %v9915_v54  ;;  %v9660_v63 = vpack.c.bf16 %v5067_v56, %v5067_v56  ;;  %v9916_v0 = vpack.c.bf16 %v5323_v58, %v5323_v58 }
 0x25a   : > { %7625 = vst.msk [vmem:[%s11552_s12 + $0x2c0] sm:$0xf] %vm7448_vm3, %v9657_v59  ;;  %7881 = vst.msk [vmem:[%s11552_s12 + $0x6c0] sm:$0xf] %vm7448_vm3, %v9913_v60  ;;  %v9658_v1 = vpack.c.bf16 %v5065_v61, %v5065_v61  ;;  %v9914_v2 = vpack.c.bf16 %v5321_v62, %v5321_v62  ;;  %v10449_v3 = vpop.f32.mrb[180].mxu0  ;;  %v10705_v4 = vpop.f32.mrb[180].mxu1 }
 0x25b   : > { %7628 = vst.msk [vmem:[%s11552_s12 + $0x2cc] sm:$0xf] %vm7448_vm3, %v9660_v63  ;;  %7884 = vst.msk [vmem:[%s11552_s12 + $0x6cc] sm:$0xf] %vm7448_vm3, %v9916_v0  ;;  %v3570_v5 = vadd.f32 %v12900_v34, %v10449_v3  ;;  %v4594_v57 = vadd.f32 %v12900_v34, %v10705_v4  ;;  %v3561_v6 = vpop.f32.mrb[181].mxu0  ;;  %v4585_v7 = vpop.f32.mrb[181].mxu1 }
 0x25c   : > { %7626 = vst.msk [vmem:[%s11552_s12 + $0x2c4] sm:$0xf] %vm7448_vm3, %v9658_v1  ;;  %7882 = vst.msk [vmem:[%s11552_s12 + $0x6c4] sm:$0xf] %vm7448_vm3, %v9914_v2  ;;  %v3562_v8 = vadd.f32 %v12900_v34, %v3561_v6  ;;  %v4586_v9 = vadd.f32 %v12900_v34, %v4585_v7  ;;  %v10450_v10 = vpop.f32.mrb[182].mxu0  ;;  %v10706_v12 = vpop.f32.mrb[182].mxu1 }
 0x25d   : > { %v5070_v13 = vmax.f32 %v3570_v5, 0.0  ;;  %v5326_v14 = vmax.f32 %v4594_v57, 0.0  ;;  %v3573_v15 = vadd.f32 %v12900_v34, %v10450_v10  ;;  %v4597_v16 = vadd.f32 %v12900_v34, %v10706_v12  ;;  %v3564_v17 = vpop.f32.mrb[183].mxu0  ;;  %v4588_v18 = vpop.f32.mrb[183].mxu1 }
 0x25e   : > { %v5068_v19 = vmax.f32 %v3562_v8, 0.0  ;;  %v5324_v20 = vmax.f32 %v4586_v9, 0.0  ;;  %v3565_v21 = vadd.f32 %v12900_v34, %v3564_v17  ;;  %v4589_v22 = vadd.f32 %v12900_v34, %v4588_v18 }
 0x25f   : > { %v9663_v23 = vpack.c.bf16 %v5070_v13, %v5070_v13  ;;  %v9919_v24 = vpack.c.bf16 %v5326_v14, %v5326_v14  ;;  %v5071_v25 = vmax.f32 %v3573_v15, 0.0  ;;  %v5327_v26 = vmax.f32 %v4597_v16, 0.0 }
 0x260   : > { %v9661_v27 = vpack.c.bf16 %v5068_v19, %v5068_v19  ;;  %v9917_v28 = vpack.c.bf16 %v5324_v20, %v5324_v20  ;;  %v5069_v29 = vmax.f32 %v3565_v21, 0.0  ;;  %v5325_v30 = vmax.f32 %v4589_v22, 0.0 }
 0x261   : > { %7631 = vst.msk [vmem:[%s11552_s12 + $0x2d8] sm:$0xf] %vm7448_vm3, %v9663_v23  ;;  %7887 = vst.msk [vmem:[%s11552_s12 + $0x6d8] sm:$0xf] %vm7448_vm3, %v9919_v24  ;;  %v9664_v31 = vpack.c.bf16 %v5071_v25, %v5071_v25  ;;  %v9920_v11 = vpack.c.bf16 %v5327_v26, %v5327_v26 }
 0x262   : > { %7629 = vst.msk [vmem:[%s11552_s12 + $0x2d0] sm:$0xf] %vm7448_vm3, %v9661_v27  ;;  %7885 = vst.msk [vmem:[%s11552_s12 + $0x6d0] sm:$0xf] %vm7448_vm3, %v9917_v28  ;;  %v9662_v32 = vpack.c.bf16 %v5069_v29, %v5069_v29  ;;  %v9918_v55 = vpack.c.bf16 %v5325_v30, %v5325_v30  ;;  %v10453_v33 = vpop.f32.mrb[184].mxu0  ;;  %v10709_v35 = vpop.f32.mrb[184].mxu1 }
 0x263   : > { %7632 = vst.msk [vmem:[%s11552_s12 + $0x2dc] sm:$0xf] %vm7448_vm3, %v9664_v31  ;;  %7888 = vst.msk [vmem:[%s11552_s12 + $0x6dc] sm:$0xf] %vm7448_vm3, %v9920_v11  ;;  %v3586_v36 = vadd.f32 %v12900_v34, %v10453_v33  ;;  %v4610_v37 = vadd.f32 %v12900_v34, %v10709_v35  ;;  %v3577_v39 = vpop.f32.mrb[185].mxu0  ;;  %v4601_v40 = vpop.f32.mrb[185].mxu1 }
 0x264   : > { %7630 = vst.msk [vmem:[%s11552_s12 + $0x2d4] sm:$0xf] %vm7448_vm3, %v9662_v32  ;;  %7886 = vst.msk [vmem:[%s11552_s12 + $0x6d4] sm:$0xf] %vm7448_vm3, %v9918_v55  ;;  %v3578_v41 = vadd.f32 %v12900_v34, %v3577_v39  ;;  %v4602_v42 = vadd.f32 %v12900_v34, %v4601_v40  ;;  %v10454_v43 = vpop.f32.mrb[186].mxu0  ;;  %v10710_v44 = vpop.f32.mrb[186].mxu1 }
 0x265   : > { %v5074_v45 = vmax.f32 %v3586_v36, 0.0  ;;  %v5330_v46 = vmax.f32 %v4610_v37, 0.0  ;;  %v3589_v47 = vadd.f32 %v12900_v34, %v10454_v43  ;;  %v4613_v48 = vadd.f32 %v12900_v34, %v10710_v44  ;;  %v3580_v49 = vpop.f32.mrb[187].mxu0  ;;  %v4604_v50 = vpop.f32.mrb[187].mxu1 }
 0x266   : > { %v5072_v38 = vmax.f32 %v3578_v41, 0.0  ;;  %v5328_v51 = vmax.f32 %v4602_v42, 0.0  ;;  %v3581_v52 = vadd.f32 %v12900_v34, %v3580_v49  ;;  %v4605_v53 = vadd.f32 %v12900_v34, %v4604_v50 }
 0x267   : > { %v9667_v54 = vpack.c.bf16 %v5074_v45, %v5074_v45  ;;  %v9923_v56 = vpack.c.bf16 %v5330_v46, %v5330_v46  ;;  %v5075_v58 = vmax.f32 %v3589_v47, 0.0  ;;  %v5331_v59 = vmax.f32 %v4613_v48, 0.0 }
 0x268   : > { %v9665_v60 = vpack.c.bf16 %v5072_v38, %v5072_v38  ;;  %v9921_v61 = vpack.c.bf16 %v5328_v51, %v5328_v51  ;;  %v5073_v62 = vmax.f32 %v3581_v52, 0.0  ;;  %v5329_v63 = vmax.f32 %v4605_v53, 0.0 }
 0x269   : > { %7635 = vst.msk [vmem:[%s11552_s12 + $0x2e8] sm:$0xf] %vm7448_vm3, %v9667_v54  ;;  %7891 = vst.msk [vmem:[%s11552_s12 + $0x6e8] sm:$0xf] %vm7448_vm3, %v9923_v56  ;;  %v9668_v0 = vpack.c.bf16 %v5075_v58, %v5075_v58  ;;  %v9924_v1 = vpack.c.bf16 %v5331_v59, %v5331_v59 }
 0x26a   : > { %7633 = vst.msk [vmem:[%s11552_s12 + $0x2e0] sm:$0xf] %vm7448_vm3, %v9665_v60  ;;  %7889 = vst.msk [vmem:[%s11552_s12 + $0x6e0] sm:$0xf] %vm7448_vm3, %v9921_v61  ;;  %v9666_v2 = vpack.c.bf16 %v5073_v62, %v5073_v62  ;;  %v9922_v3 = vpack.c.bf16 %v5329_v63, %v5329_v63  ;;  %v10457_v4 = vpop.f32.mrb[188].mxu0  ;;  %v10713_v5 = vpop.f32.mrb[188].mxu1 }
 0x26b   : > { %7636 = vst.msk [vmem:[%s11552_s12 + $0x2ec] sm:$0xf] %vm7448_vm3, %v9668_v0  ;;  %7892 = vst.msk [vmem:[%s11552_s12 + $0x6ec] sm:$0xf] %vm7448_vm3, %v9924_v1  ;;  %v3602_v57 = vadd.f32 %v12900_v34, %v10457_v4  ;;  %v4626_v6 = vadd.f32 %v12900_v34, %v10713_v5  ;;  %v3593_v7 = vpop.f32.mrb[189].mxu0  ;;  %v4617_v8 = vpop.f32.mrb[189].mxu1 }
 0x26c   : > { %7634 = vst.msk [vmem:[%s11552_s12 + $0x2e4] sm:$0xf] %vm7448_vm3, %v9666_v2  ;;  %7890 = vst.msk [vmem:[%s11552_s12 + $0x6e4] sm:$0xf] %vm7448_vm3, %v9922_v3  ;;  %v3594_v9 = vadd.f32 %v12900_v34, %v3593_v7  ;;  %v4618_v10 = vadd.f32 %v12900_v34, %v4617_v8  ;;  %v10458_v12 = vpop.f32.mrb[190].mxu0  ;;  %v10714_v13 = vpop.f32.mrb[190].mxu1 }
 0x26d   : > { %v5078_v14 = vmax.f32 %v3602_v57, 0.0  ;;  %v5334_v15 = vmax.f32 %v4626_v6, 0.0  ;;  %v3605_v16 = vadd.f32 %v12900_v34, %v10458_v12  ;;  %v4629_v17 = vadd.f32 %v12900_v34, %v10714_v13  ;;  %v3596_v18 = vpop.f32.mrb[191].mxu0  ;;  %v4620_v19 = vpop.f32.mrb[191].mxu1 }
 0x26e   : > { %v5076_v20 = vmax.f32 %v3594_v9, 0.0  ;;  %v5332_v21 = vmax.f32 %v4618_v10, 0.0  ;;  %v3597_v22 = vadd.f32 %v12900_v34, %v3596_v18  ;;  %v4621_v23 = vadd.f32 %v12900_v34, %v4620_v19 }
 0x26f   : > { %v9671_v24 = vpack.c.bf16 %v5078_v14, %v5078_v14  ;;  %v9927_v25 = vpack.c.bf16 %v5334_v15, %v5334_v15  ;;  %v5079_v26 = vmax.f32 %v3605_v16, 0.0  ;;  %v5335_v27 = vmax.f32 %v4629_v17, 0.0 }
 0x270   : > { %v9669_v28 = vpack.c.bf16 %v5076_v20, %v5076_v20  ;;  %v9925_v29 = vpack.c.bf16 %v5332_v21, %v5332_v21  ;;  %v5077_v30 = vmax.f32 %v3597_v22, 0.0  ;;  %v5333_v31 = vmax.f32 %v4621_v23, 0.0 }
 0x271   : > { %7639 = vst.msk [vmem:[%s11552_s12 + $0x2f8] sm:$0xf] %vm7448_vm3, %v9671_v24  ;;  %7895 = vst.msk [vmem:[%s11552_s12 + $0x6f8] sm:$0xf] %vm7448_vm3, %v9927_v25  ;;  %v9672_v11 = vpack.c.bf16 %v5079_v26, %v5079_v26  ;;  %v9928_v32 = vpack.c.bf16 %v5335_v27, %v5335_v27 }
 0x272   : > { %7637 = vst.msk [vmem:[%s11552_s12 + $0x2f0] sm:$0xf] %vm7448_vm3, %v9669_v28  ;;  %7893 = vst.msk [vmem:[%s11552_s12 + $0x6f0] sm:$0xf] %vm7448_vm3, %v9925_v29  ;;  %v9670_v55 = vpack.c.bf16 %v5077_v30, %v5077_v30  ;;  %v9926_v33 = vpack.c.bf16 %v5333_v31, %v5333_v31  ;;  %v10461_v35 = vpop.f32.mrb[192].mxu0  ;;  %v10717_v36 = vpop.f32.mrb[192].mxu1 }
 0x273   : > { %7640 = vst.msk [vmem:[%s11552_s12 + $0x2fc] sm:$0xf] %vm7448_vm3, %v9672_v11  ;;  %7896 = vst.msk [vmem:[%s11552_s12 + $0x6fc] sm:$0xf] %vm7448_vm3, %v9928_v32  ;;  %v3618_v37 = vadd.f32 %v12900_v34, %v10461_v35  ;;  %v4642_v39 = vadd.f32 %v12900_v34, %v10717_v36  ;;  %v3609_v40 = vpop.f32.mrb[193].mxu0  ;;  %v4633_v41 = vpop.f32.mrb[193].mxu1 }
 0x274   : > { %7638 = vst.msk [vmem:[%s11552_s12 + $0x2f4] sm:$0xf] %vm7448_vm3, %v9670_v55  ;;  %7894 = vst.msk [vmem:[%s11552_s12 + $0x6f4] sm:$0xf] %vm7448_vm3, %v9926_v33  ;;  %v3610_v42 = vadd.f32 %v12900_v34, %v3609_v40  ;;  %v4634_v43 = vadd.f32 %v12900_v34, %v4633_v41  ;;  %v10462_v44 = vpop.f32.mrb[194].mxu0  ;;  %v10718_v45 = vpop.f32.mrb[194].mxu1 }
 0x275   : > { %v5082_v46 = vmax.f32 %v3618_v37, 0.0  ;;  %v5338_v47 = vmax.f32 %v4642_v39, 0.0  ;;  %v3621_v48 = vadd.f32 %v12900_v34, %v10462_v44  ;;  %v4645_v49 = vadd.f32 %v12900_v34, %v10718_v45  ;;  %v3612_v50 = vpop.f32.mrb[195].mxu0  ;;  %v4636_v38 = vpop.f32.mrb[195].mxu1 }
 0x276   : > { %v5080_v51 = vmax.f32 %v3610_v42, 0.0  ;;  %v5336_v52 = vmax.f32 %v4634_v43, 0.0  ;;  %v3613_v53 = vadd.f32 %v12900_v34, %v3612_v50  ;;  %v4637_v54 = vadd.f32 %v12900_v34, %v4636_v38 }
 0x277   : > { %v9675_v56 = vpack.c.bf16 %v5082_v46, %v5082_v46  ;;  %v9931_v58 = vpack.c.bf16 %v5338_v47, %v5338_v47  ;;  %v5083_v59 = vmax.f32 %v3621_v48, 0.0  ;;  %v5339_v60 = vmax.f32 %v4645_v49, 0.0 }
 0x278   : > { %v9673_v61 = vpack.c.bf16 %v5080_v51, %v5080_v51  ;;  %v9929_v62 = vpack.c.bf16 %v5336_v52, %v5336_v52  ;;  %v5081_v63 = vmax.f32 %v3613_v53, 0.0  ;;  %v5337_v0 = vmax.f32 %v4637_v54, 0.0 }
 0x279   : > { %7643 = vst.msk [vmem:[%s11552_s12 + $0x308] sm:$0xf] %vm7448_vm3, %v9675_v56  ;;  %7899 = vst.msk [vmem:[%s11552_s12 + $0x708] sm:$0xf] %vm7448_vm3, %v9931_v58  ;;  %v9676_v1 = vpack.c.bf16 %v5083_v59, %v5083_v59  ;;  %v9932_v2 = vpack.c.bf16 %v5339_v60, %v5339_v60 }
 0x27a   : > { %7641 = vst.msk [vmem:[%s11552_s12 + $0x300] sm:$0xf] %vm7448_vm3, %v9673_v61  ;;  %7897 = vst.msk [vmem:[%s11552_s12 + $0x700] sm:$0xf] %vm7448_vm3, %v9929_v62  ;;  %v9674_v3 = vpack.c.bf16 %v5081_v63, %v5081_v63  ;;  %v9930_v4 = vpack.c.bf16 %v5337_v0, %v5337_v0  ;;  %v10465_v5 = vpop.f32.mrb[196].mxu0  ;;  %v10721_v57 = vpop.f32.mrb[196].mxu1 }
 0x27b   : > { %7644 = vst.msk [vmem:[%s11552_s12 + $0x30c] sm:$0xf] %vm7448_vm3, %v9676_v1  ;;  %7900 = vst.msk [vmem:[%s11552_s12 + $0x70c] sm:$0xf] %vm7448_vm3, %v9932_v2  ;;  %v3634_v6 = vadd.f32 %v12900_v34, %v10465_v5  ;;  %v4658_v7 = vadd.f32 %v12900_v34, %v10721_v57  ;;  %v3625_v8 = vpop.f32.mrb[197].mxu0  ;;  %v4649_v9 = vpop.f32.mrb[197].mxu1 }
 0x27c   : > { %7642 = vst.msk [vmem:[%s11552_s12 + $0x304] sm:$0xf] %vm7448_vm3, %v9674_v3  ;;  %7898 = vst.msk [vmem:[%s11552_s12 + $0x704] sm:$0xf] %vm7448_vm3, %v9930_v4  ;;  %v3626_v10 = vadd.f32 %v12900_v34, %v3625_v8  ;;  %v4650_v12 = vadd.f32 %v12900_v34, %v4649_v9  ;;  %v10466_v13 = vpop.f32.mrb[198].mxu0  ;;  %v10722_v14 = vpop.f32.mrb[198].mxu1 }
 0x27d   : > { %v5086_v15 = vmax.f32 %v3634_v6, 0.0  ;;  %v5342_v16 = vmax.f32 %v4658_v7, 0.0  ;;  %v3637_v17 = vadd.f32 %v12900_v34, %v10466_v13  ;;  %v4661_v18 = vadd.f32 %v12900_v34, %v10722_v14  ;;  %v3628_v19 = vpop.f32.mrb[199].mxu0  ;;  %v4652_v20 = vpop.f32.mrb[199].mxu1 }
 0x27e   : > { %v5084_v21 = vmax.f32 %v3626_v10, 0.0  ;;  %v5340_v22 = vmax.f32 %v4650_v12, 0.0  ;;  %v3629_v23 = vadd.f32 %v12900_v34, %v3628_v19  ;;  %v4653_v24 = vadd.f32 %v12900_v34, %v4652_v20 }
 0x27f   : > { %v9679_v25 = vpack.c.bf16 %v5086_v15, %v5086_v15  ;;  %v9935_v26 = vpack.c.bf16 %v5342_v16, %v5342_v16  ;;  %v5087_v27 = vmax.f32 %v3637_v17, 0.0  ;;  %v5343_v28 = vmax.f32 %v4661_v18, 0.0 }
 0x280   : > { %v9677_v29 = vpack.c.bf16 %v5084_v21, %v5084_v21  ;;  %v9933_v30 = vpack.c.bf16 %v5340_v22, %v5340_v22  ;;  %v5085_v31 = vmax.f32 %v3629_v23, 0.0  ;;  %v5341_v11 = vmax.f32 %v4653_v24, 0.0 }
 0x281   : > { %7647 = vst.msk [vmem:[%s11552_s12 + $0x318] sm:$0xf] %vm7448_vm3, %v9679_v25  ;;  %7903 = vst.msk [vmem:[%s11552_s12 + $0x718] sm:$0xf] %vm7448_vm3, %v9935_v26  ;;  %v9680_v32 = vpack.c.bf16 %v5087_v27, %v5087_v27  ;;  %v9936_v55 = vpack.c.bf16 %v5343_v28, %v5343_v28 }
 0x282   : > { %7645 = vst.msk [vmem:[%s11552_s12 + $0x310] sm:$0xf] %vm7448_vm3, %v9677_v29  ;;  %7901 = vst.msk [vmem:[%s11552_s12 + $0x710] sm:$0xf] %vm7448_vm3, %v9933_v30  ;;  %v9678_v33 = vpack.c.bf16 %v5085_v31, %v5085_v31  ;;  %v9934_v35 = vpack.c.bf16 %v5341_v11, %v5341_v11  ;;  %v10469_v36 = vpop.f32.mrb[200].mxu0  ;;  %v10725_v37 = vpop.f32.mrb[200].mxu1 }
 0x283   : > { %7648 = vst.msk [vmem:[%s11552_s12 + $0x31c] sm:$0xf] %vm7448_vm3, %v9680_v32  ;;  %7904 = vst.msk [vmem:[%s11552_s12 + $0x71c] sm:$0xf] %vm7448_vm3, %v9936_v55  ;;  %v3650_v39 = vadd.f32 %v12900_v34, %v10469_v36  ;;  %v4674_v40 = vadd.f32 %v12900_v34, %v10725_v37  ;;  %v3641_v41 = vpop.f32.mrb[201].mxu0  ;;  %v4665_v42 = vpop.f32.mrb[201].mxu1 }
 0x284   : > { %7646 = vst.msk [vmem:[%s11552_s12 + $0x314] sm:$0xf] %vm7448_vm3, %v9678_v33  ;;  %7902 = vst.msk [vmem:[%s11552_s12 + $0x714] sm:$0xf] %vm7448_vm3, %v9934_v35  ;;  %v3642_v43 = vadd.f32 %v12900_v34, %v3641_v41  ;;  %v4666_v44 = vadd.f32 %v12900_v34, %v4665_v42  ;;  %v10470_v45 = vpop.f32.mrb[202].mxu0  ;;  %v10726_v46 = vpop.f32.mrb[202].mxu1 }
 0x285   : > { %v5090_v47 = vmax.f32 %v3650_v39, 0.0  ;;  %v5346_v48 = vmax.f32 %v4674_v40, 0.0  ;;  %v3653_v49 = vadd.f32 %v12900_v34, %v10470_v45  ;;  %v4677_v50 = vadd.f32 %v12900_v34, %v10726_v46  ;;  %v3644_v38 = vpop.f32.mrb[203].mxu0  ;;  %v4668_v51 = vpop.f32.mrb[203].mxu1 }
 0x286   : > { %v5088_v52 = vmax.f32 %v3642_v43, 0.0  ;;  %v5344_v53 = vmax.f32 %v4666_v44, 0.0  ;;  %v3645_v54 = vadd.f32 %v12900_v34, %v3644_v38  ;;  %v4669_v56 = vadd.f32 %v12900_v34, %v4668_v51 }
 0x287   : > { %v9683_v58 = vpack.c.bf16 %v5090_v47, %v5090_v47  ;;  %v9939_v59 = vpack.c.bf16 %v5346_v48, %v5346_v48  ;;  %v5091_v60 = vmax.f32 %v3653_v49, 0.0  ;;  %v5347_v61 = vmax.f32 %v4677_v50, 0.0 }
 0x288   : > { %v9681_v62 = vpack.c.bf16 %v5088_v52, %v5088_v52  ;;  %v9937_v63 = vpack.c.bf16 %v5344_v53, %v5344_v53  ;;  %v5089_v0 = vmax.f32 %v3645_v54, 0.0  ;;  %v5345_v1 = vmax.f32 %v4669_v56, 0.0 }
 0x289   : > { %7651 = vst.msk [vmem:[%s11552_s12 + $0x328] sm:$0xf] %vm7448_vm3, %v9683_v58  ;;  %7907 = vst.msk [vmem:[%s11552_s12 + $0x728] sm:$0xf] %vm7448_vm3, %v9939_v59  ;;  %v9684_v2 = vpack.c.bf16 %v5091_v60, %v5091_v60  ;;  %v9940_v3 = vpack.c.bf16 %v5347_v61, %v5347_v61 }
 0x28a   : > { %7649 = vst.msk [vmem:[%s11552_s12 + $0x320] sm:$0xf] %vm7448_vm3, %v9681_v62  ;;  %7905 = vst.msk [vmem:[%s11552_s12 + $0x720] sm:$0xf] %vm7448_vm3, %v9937_v63  ;;  %v9682_v4 = vpack.c.bf16 %v5089_v0, %v5089_v0  ;;  %v9938_v5 = vpack.c.bf16 %v5345_v1, %v5345_v1  ;;  %v10473_v57 = vpop.f32.mrb[204].mxu0  ;;  %v10729_v6 = vpop.f32.mrb[204].mxu1 }
 0x28b   : > { %7652 = vst.msk [vmem:[%s11552_s12 + $0x32c] sm:$0xf] %vm7448_vm3, %v9684_v2  ;;  %7908 = vst.msk [vmem:[%s11552_s12 + $0x72c] sm:$0xf] %vm7448_vm3, %v9940_v3  ;;  %v3666_v7 = vadd.f32 %v12900_v34, %v10473_v57  ;;  %v4690_v8 = vadd.f32 %v12900_v34, %v10729_v6  ;;  %v3657_v9 = vpop.f32.mrb[205].mxu0  ;;  %v4681_v10 = vpop.f32.mrb[205].mxu1 }
 0x28c   : > { %7650 = vst.msk [vmem:[%s11552_s12 + $0x324] sm:$0xf] %vm7448_vm3, %v9682_v4  ;;  %7906 = vst.msk [vmem:[%s11552_s12 + $0x724] sm:$0xf] %vm7448_vm3, %v9938_v5  ;;  %v3658_v12 = vadd.f32 %v12900_v34, %v3657_v9  ;;  %v4682_v13 = vadd.f32 %v12900_v34, %v4681_v10  ;;  %v10474_v14 = vpop.f32.mrb[206].mxu0  ;;  %v10730_v15 = vpop.f32.mrb[206].mxu1 }
 0x28d   : > { %v5094_v16 = vmax.f32 %v3666_v7, 0.0  ;;  %v5350_v17 = vmax.f32 %v4690_v8, 0.0  ;;  %v3669_v18 = vadd.f32 %v12900_v34, %v10474_v14  ;;  %v4693_v19 = vadd.f32 %v12900_v34, %v10730_v15  ;;  %v3660_v20 = vpop.f32.mrb[207].mxu0  ;;  %v4684_v21 = vpop.f32.mrb[207].mxu1 }
 0x28e   : > { %v5092_v22 = vmax.f32 %v3658_v12, 0.0  ;;  %v5348_v23 = vmax.f32 %v4682_v13, 0.0  ;;  %v3661_v24 = vadd.f32 %v12900_v34, %v3660_v20  ;;  %v4685_v25 = vadd.f32 %v12900_v34, %v4684_v21 }
 0x28f   : > { %v9687_v26 = vpack.c.bf16 %v5094_v16, %v5094_v16  ;;  %v9943_v27 = vpack.c.bf16 %v5350_v17, %v5350_v17  ;;  %v5095_v28 = vmax.f32 %v3669_v18, 0.0  ;;  %v5351_v29 = vmax.f32 %v4693_v19, 0.0 }
 0x290   : > { %v9685_v30 = vpack.c.bf16 %v5092_v22, %v5092_v22  ;;  %v9941_v31 = vpack.c.bf16 %v5348_v23, %v5348_v23  ;;  %v5093_v11 = vmax.f32 %v3661_v24, 0.0  ;;  %v5349_v32 = vmax.f32 %v4685_v25, 0.0 }
 0x291   : > { %7655 = vst.msk [vmem:[%s11552_s12 + $0x338] sm:$0xf] %vm7448_vm3, %v9687_v26  ;;  %7911 = vst.msk [vmem:[%s11552_s12 + $0x738] sm:$0xf] %vm7448_vm3, %v9943_v27  ;;  %v9688_v55 = vpack.c.bf16 %v5095_v28, %v5095_v28  ;;  %v9944_v33 = vpack.c.bf16 %v5351_v29, %v5351_v29 }
 0x292   : > { %7653 = vst.msk [vmem:[%s11552_s12 + $0x330] sm:$0xf] %vm7448_vm3, %v9685_v30  ;;  %7909 = vst.msk [vmem:[%s11552_s12 + $0x730] sm:$0xf] %vm7448_vm3, %v9941_v31  ;;  %v9686_v35 = vpack.c.bf16 %v5093_v11, %v5093_v11  ;;  %v9942_v36 = vpack.c.bf16 %v5349_v32, %v5349_v32  ;;  %v10477_v37 = vpop.f32.mrb[208].mxu0  ;;  %v10733_v39 = vpop.f32.mrb[208].mxu1 }
 0x293   : > { %7656 = vst.msk [vmem:[%s11552_s12 + $0x33c] sm:$0xf] %vm7448_vm3, %v9688_v55  ;;  %7912 = vst.msk [vmem:[%s11552_s12 + $0x73c] sm:$0xf] %vm7448_vm3, %v9944_v33  ;;  %v3682_v40 = vadd.f32 %v12900_v34, %v10477_v37  ;;  %v4706_v41 = vadd.f32 %v12900_v34, %v10733_v39  ;;  %v3673_v42 = vpop.f32.mrb[209].mxu0  ;;  %v4697_v43 = vpop.f32.mrb[209].mxu1 }
 0x294   : > { %7654 = vst.msk [vmem:[%s11552_s12 + $0x334] sm:$0xf] %vm7448_vm3, %v9686_v35  ;;  %7910 = vst.msk [vmem:[%s11552_s12 + $0x734] sm:$0xf] %vm7448_vm3, %v9942_v36  ;;  %v3674_v44 = vadd.f32 %v12900_v34, %v3673_v42  ;;  %v4698_v45 = vadd.f32 %v12900_v34, %v4697_v43  ;;  %v10478_v46 = vpop.f32.mrb[210].mxu0  ;;  %v10734_v47 = vpop.f32.mrb[210].mxu1 }
 0x295   : > { %v5098_v48 = vmax.f32 %v3682_v40, 0.0  ;;  %v5354_v49 = vmax.f32 %v4706_v41, 0.0  ;;  %v3685_v50 = vadd.f32 %v12900_v34, %v10478_v46  ;;  %v4709_v38 = vadd.f32 %v12900_v34, %v10734_v47  ;;  %v3676_v51 = vpop.f32.mrb[211].mxu0  ;;  %v4700_v52 = vpop.f32.mrb[211].mxu1 }
 0x296   : > { %v5096_v53 = vmax.f32 %v3674_v44, 0.0  ;;  %v5352_v54 = vmax.f32 %v4698_v45, 0.0  ;;  %v3677_v56 = vadd.f32 %v12900_v34, %v3676_v51  ;;  %v4701_v58 = vadd.f32 %v12900_v34, %v4700_v52 }
 0x297   : > { %v9691_v59 = vpack.c.bf16 %v5098_v48, %v5098_v48  ;;  %v9947_v60 = vpack.c.bf16 %v5354_v49, %v5354_v49  ;;  %v5099_v61 = vmax.f32 %v3685_v50, 0.0  ;;  %v5355_v62 = vmax.f32 %v4709_v38, 0.0 }
 0x298   : > { %v9689_v63 = vpack.c.bf16 %v5096_v53, %v5096_v53  ;;  %v9945_v0 = vpack.c.bf16 %v5352_v54, %v5352_v54  ;;  %v5097_v1 = vmax.f32 %v3677_v56, 0.0  ;;  %v5353_v2 = vmax.f32 %v4701_v58, 0.0 }
 0x299   : > { %7659 = vst.msk [vmem:[%s11552_s12 + $0x348] sm:$0xf] %vm7448_vm3, %v9691_v59  ;;  %7915 = vst.msk [vmem:[%s11552_s12 + $0x748] sm:$0xf] %vm7448_vm3, %v9947_v60  ;;  %v9692_v3 = vpack.c.bf16 %v5099_v61, %v5099_v61  ;;  %v9948_v4 = vpack.c.bf16 %v5355_v62, %v5355_v62 }
 0x29a   : > { %7657 = vst.msk [vmem:[%s11552_s12 + $0x340] sm:$0xf] %vm7448_vm3, %v9689_v63  ;;  %7913 = vst.msk [vmem:[%s11552_s12 + $0x740] sm:$0xf] %vm7448_vm3, %v9945_v0  ;;  %v9690_v5 = vpack.c.bf16 %v5097_v1, %v5097_v1  ;;  %v9946_v57 = vpack.c.bf16 %v5353_v2, %v5353_v2  ;;  %v10481_v6 = vpop.f32.mrb[212].mxu0  ;;  %v10737_v7 = vpop.f32.mrb[212].mxu1 }
 0x29b   : > { %7660 = vst.msk [vmem:[%s11552_s12 + $0x34c] sm:$0xf] %vm7448_vm3, %v9692_v3  ;;  %7916 = vst.msk [vmem:[%s11552_s12 + $0x74c] sm:$0xf] %vm7448_vm3, %v9948_v4  ;;  %v3698_v8 = vadd.f32 %v12900_v34, %v10481_v6  ;;  %v4722_v9 = vadd.f32 %v12900_v34, %v10737_v7  ;;  %v3689_v10 = vpop.f32.mrb[213].mxu0  ;;  %v4713_v12 = vpop.f32.mrb[213].mxu1 }
 0x29c   : > { %7658 = vst.msk [vmem:[%s11552_s12 + $0x344] sm:$0xf] %vm7448_vm3, %v9690_v5  ;;  %7914 = vst.msk [vmem:[%s11552_s12 + $0x744] sm:$0xf] %vm7448_vm3, %v9946_v57  ;;  %v3690_v13 = vadd.f32 %v12900_v34, %v3689_v10  ;;  %v4714_v14 = vadd.f32 %v12900_v34, %v4713_v12  ;;  %v10482_v15 = vpop.f32.mrb[214].mxu0  ;;  %v10738_v16 = vpop.f32.mrb[214].mxu1 }
 0x29d   : > { %v5102_v17 = vmax.f32 %v3698_v8, 0.0  ;;  %v5358_v18 = vmax.f32 %v4722_v9, 0.0  ;;  %v3701_v19 = vadd.f32 %v12900_v34, %v10482_v15  ;;  %v4725_v20 = vadd.f32 %v12900_v34, %v10738_v16  ;;  %v3692_v21 = vpop.f32.mrb[215].mxu0  ;;  %v4716_v22 = vpop.f32.mrb[215].mxu1 }
 0x29e   : > { %v5100_v23 = vmax.f32 %v3690_v13, 0.0  ;;  %v5356_v24 = vmax.f32 %v4714_v14, 0.0  ;;  %v3693_v25 = vadd.f32 %v12900_v34, %v3692_v21  ;;  %v4717_v26 = vadd.f32 %v12900_v34, %v4716_v22 }
 0x29f   : > { %v9695_v27 = vpack.c.bf16 %v5102_v17, %v5102_v17  ;;  %v9951_v28 = vpack.c.bf16 %v5358_v18, %v5358_v18  ;;  %v5103_v29 = vmax.f32 %v3701_v19, 0.0  ;;  %v5359_v30 = vmax.f32 %v4725_v20, 0.0 }
 0x2a0   : > { %v9693_v31 = vpack.c.bf16 %v5100_v23, %v5100_v23  ;;  %v9949_v11 = vpack.c.bf16 %v5356_v24, %v5356_v24  ;;  %v5101_v32 = vmax.f32 %v3693_v25, 0.0  ;;  %v5357_v55 = vmax.f32 %v4717_v26, 0.0 }
 0x2a1   : > { %7663 = vst.msk [vmem:[%s11552_s12 + $0x358] sm:$0xf] %vm7448_vm3, %v9695_v27  ;;  %7919 = vst.msk [vmem:[%s11552_s12 + $0x758] sm:$0xf] %vm7448_vm3, %v9951_v28  ;;  %v9696_v33 = vpack.c.bf16 %v5103_v29, %v5103_v29  ;;  %v9952_v35 = vpack.c.bf16 %v5359_v30, %v5359_v30 }
 0x2a2   : > { %7661 = vst.msk [vmem:[%s11552_s12 + $0x350] sm:$0xf] %vm7448_vm3, %v9693_v31  ;;  %7917 = vst.msk [vmem:[%s11552_s12 + $0x750] sm:$0xf] %vm7448_vm3, %v9949_v11  ;;  %v9694_v36 = vpack.c.bf16 %v5101_v32, %v5101_v32  ;;  %v9950_v37 = vpack.c.bf16 %v5357_v55, %v5357_v55  ;;  %v10485_v39 = vpop.f32.mrb[216].mxu0  ;;  %v10741_v40 = vpop.f32.mrb[216].mxu1 }
 0x2a3   : > { %7664 = vst.msk [vmem:[%s11552_s12 + $0x35c] sm:$0xf] %vm7448_vm3, %v9696_v33  ;;  %7920 = vst.msk [vmem:[%s11552_s12 + $0x75c] sm:$0xf] %vm7448_vm3, %v9952_v35  ;;  %v3714_v41 = vadd.f32 %v12900_v34, %v10485_v39  ;;  %v4738_v42 = vadd.f32 %v12900_v34, %v10741_v40  ;;  %v3705_v43 = vpop.f32.mrb[217].mxu0  ;;  %v4729_v44 = vpop.f32.mrb[217].mxu1 }
 0x2a4   : > { %7662 = vst.msk [vmem:[%s11552_s12 + $0x354] sm:$0xf] %vm7448_vm3, %v9694_v36  ;;  %7918 = vst.msk [vmem:[%s11552_s12 + $0x754] sm:$0xf] %vm7448_vm3, %v9950_v37  ;;  %v3706_v45 = vadd.f32 %v12900_v34, %v3705_v43  ;;  %v4730_v46 = vadd.f32 %v12900_v34, %v4729_v44  ;;  %v10486_v47 = vpop.f32.mrb[218].mxu0  ;;  %v10742_v48 = vpop.f32.mrb[218].mxu1 }
 0x2a5   : > { %v5106_v49 = vmax.f32 %v3714_v41, 0.0  ;;  %v5362_v50 = vmax.f32 %v4738_v42, 0.0  ;;  %v3717_v38 = vadd.f32 %v12900_v34, %v10486_v47  ;;  %v4741_v51 = vadd.f32 %v12900_v34, %v10742_v48  ;;  %v3708_v52 = vpop.f32.mrb[219].mxu0  ;;  %v4732_v53 = vpop.f32.mrb[219].mxu1 }
 0x2a6   : > { %v5104_v54 = vmax.f32 %v3706_v45, 0.0  ;;  %v5360_v56 = vmax.f32 %v4730_v46, 0.0  ;;  %v3709_v58 = vadd.f32 %v12900_v34, %v3708_v52  ;;  %v4733_v59 = vadd.f32 %v12900_v34, %v4732_v53 }
 0x2a7   : > { %v9699_v60 = vpack.c.bf16 %v5106_v49, %v5106_v49  ;;  %v9955_v61 = vpack.c.bf16 %v5362_v50, %v5362_v50  ;;  %v5107_v62 = vmax.f32 %v3717_v38, 0.0  ;;  %v5363_v63 = vmax.f32 %v4741_v51, 0.0 }
 0x2a8   : > { %v9697_v0 = vpack.c.bf16 %v5104_v54, %v5104_v54  ;;  %v9953_v1 = vpack.c.bf16 %v5360_v56, %v5360_v56  ;;  %v5105_v2 = vmax.f32 %v3709_v58, 0.0  ;;  %v5361_v3 = vmax.f32 %v4733_v59, 0.0 }
 0x2a9   : > { %7667 = vst.msk [vmem:[%s11552_s12 + $0x368] sm:$0xf] %vm7448_vm3, %v9699_v60  ;;  %7923 = vst.msk [vmem:[%s11552_s12 + $0x768] sm:$0xf] %vm7448_vm3, %v9955_v61  ;;  %v9700_v4 = vpack.c.bf16 %v5107_v62, %v5107_v62  ;;  %v9956_v5 = vpack.c.bf16 %v5363_v63, %v5363_v63 }
 0x2aa   : > { %7665 = vst.msk [vmem:[%s11552_s12 + $0x360] sm:$0xf] %vm7448_vm3, %v9697_v0  ;;  %7921 = vst.msk [vmem:[%s11552_s12 + $0x760] sm:$0xf] %vm7448_vm3, %v9953_v1  ;;  %v9698_v57 = vpack.c.bf16 %v5105_v2, %v5105_v2  ;;  %v9954_v6 = vpack.c.bf16 %v5361_v3, %v5361_v3  ;;  %v10489_v7 = vpop.f32.mrb[220].mxu0  ;;  %v10745_v8 = vpop.f32.mrb[220].mxu1 }
 0x2ab   : > { %7668 = vst.msk [vmem:[%s11552_s12 + $0x36c] sm:$0xf] %vm7448_vm3, %v9700_v4  ;;  %7924 = vst.msk [vmem:[%s11552_s12 + $0x76c] sm:$0xf] %vm7448_vm3, %v9956_v5  ;;  %v3730_v9 = vadd.f32 %v12900_v34, %v10489_v7  ;;  %v4754_v10 = vadd.f32 %v12900_v34, %v10745_v8  ;;  %v3721_v12 = vpop.f32.mrb[221].mxu0  ;;  %v4745_v13 = vpop.f32.mrb[221].mxu1 }
 0x2ac   : > { %7666 = vst.msk [vmem:[%s11552_s12 + $0x364] sm:$0xf] %vm7448_vm3, %v9698_v57  ;;  %7922 = vst.msk [vmem:[%s11552_s12 + $0x764] sm:$0xf] %vm7448_vm3, %v9954_v6  ;;  %v3722_v14 = vadd.f32 %v12900_v34, %v3721_v12  ;;  %v4746_v15 = vadd.f32 %v12900_v34, %v4745_v13  ;;  %v10490_v16 = vpop.f32.mrb[222].mxu0  ;;  %v10746_v17 = vpop.f32.mrb[222].mxu1 }
 0x2ad   : > { %v5110_v18 = vmax.f32 %v3730_v9, 0.0  ;;  %v5366_v19 = vmax.f32 %v4754_v10, 0.0  ;;  %v3733_v20 = vadd.f32 %v12900_v34, %v10490_v16  ;;  %v4757_v21 = vadd.f32 %v12900_v34, %v10746_v17  ;;  %v3724_v22 = vpop.f32.mrb[223].mxu0  ;;  %v4748_v23 = vpop.f32.mrb[223].mxu1  ;;  %v13217_v9 = vld [vmem:[%s13592_s2] ss:$0 sm:$0xff] }
 0x2ae   : > { %v5108_v24 = vmax.f32 %v3722_v14, 0.0  ;;  %v5364_v25 = vmax.f32 %v4746_v15, 0.0  ;;  %v3725_v26 = vadd.f32 %v12900_v34, %v3724_v22  ;;  %v4749_v27 = vadd.f32 %v12900_v34, %v4748_v23 }
 0x2af   : > { %v9703_v28 = vpack.c.bf16 %v5110_v18, %v5110_v18  ;;  %v9959_v29 = vpack.c.bf16 %v5366_v19, %v5366_v19  ;;  %v5111_v30 = vmax.f32 %v3733_v20, 0.0  ;;  %v5367_v31 = vmax.f32 %v4757_v21, 0.0 }
 0x2b0   : > { %v9701_v11 = vpack.c.bf16 %v5108_v24, %v5108_v24  ;;  %v9957_v32 = vpack.c.bf16 %v5364_v25, %v5364_v25  ;;  %v5109_v55 = vmax.f32 %v3725_v26, 0.0  ;;  %v5365_v33 = vmax.f32 %v4749_v27, 0.0 }
 0x2b1   : > { %7671 = vst.msk [vmem:[%s11552_s12 + $0x378] sm:$0xf] %vm7448_vm3, %v9703_v28  ;;  %7927 = vst.msk [vmem:[%s11552_s12 + $0x778] sm:$0xf] %vm7448_vm3, %v9959_v29  ;;  %v9704_v35 = vpack.c.bf16 %v5111_v30, %v5111_v30  ;;  %v9960_v36 = vpack.c.bf16 %v5367_v31, %v5367_v31 }
 0x2b2   : > { %7669 = vst.msk [vmem:[%s11552_s12 + $0x370] sm:$0xf] %vm7448_vm3, %v9701_v11  ;;  %7925 = vst.msk [vmem:[%s11552_s12 + $0x770] sm:$0xf] %vm7448_vm3, %v9957_v32  ;;  %v9702_v37 = vpack.c.bf16 %v5109_v55, %v5109_v55  ;;  %v9958_v39 = vpack.c.bf16 %v5365_v33, %v5365_v33  ;;  %v10493_v40 = vpop.f32.mrb[224].mxu0  ;;  %v10749_v41 = vpop.f32.mrb[224].mxu1 }
 0x2b3   : > { %7672 = vst.msk [vmem:[%s11552_s12 + $0x37c] sm:$0xf] %vm7448_vm3, %v9704_v35  ;;  %7928 = vst.msk [vmem:[%s11552_s12 + $0x77c] sm:$0xf] %vm7448_vm3, %v9960_v36  ;;  %v3746_v42 = vadd.f32 %v12900_v34, %v10493_v40  ;;  %v4770_v43 = vadd.f32 %v12900_v34, %v10749_v41  ;;  %v3737_v44 = vpop.f32.mrb[225].mxu0  ;;  %v4761_v45 = vpop.f32.mrb[225].mxu1 }
 0x2b4   : > { %7670 = vst.msk [vmem:[%s11552_s12 + $0x374] sm:$0xf] %vm7448_vm3, %v9702_v37  ;;  %7926 = vst.msk [vmem:[%s11552_s12 + $0x774] sm:$0xf] %vm7448_vm3, %v9958_v39  ;;  %v3738_v46 = vadd.f32 %v12900_v34, %v3737_v44  ;;  %v4762_v47 = vadd.f32 %v12900_v34, %v4761_v45  ;;  %v10494_v48 = vpop.f32.mrb[226].mxu0  ;;  %v10750_v49 = vpop.f32.mrb[226].mxu1 }
 0x2b5   : > { %v5114_v50 = vmax.f32 %v3746_v42, 0.0  ;;  %v5370_v38 = vmax.f32 %v4770_v43, 0.0  ;;  %v3749_v51 = vadd.f32 %v12900_v34, %v10494_v48  ;;  %v4773_v52 = vadd.f32 %v12900_v34, %v10750_v49  ;;  %v3740_v53 = vpop.f32.mrb[227].mxu0  ;;  %v4764_v54 = vpop.f32.mrb[227].mxu1 }
 0x2b6   : > { %v5112_v56 = vmax.f32 %v3738_v46, 0.0  ;;  %v5368_v58 = vmax.f32 %v4762_v47, 0.0  ;;  %v3741_v59 = vadd.f32 %v12900_v34, %v3740_v53  ;;  %v4765_v60 = vadd.f32 %v12900_v34, %v4764_v54 }
 0x2b7   : > { %v9707_v61 = vpack.c.bf16 %v5114_v50, %v5114_v50  ;;  %v9963_v62 = vpack.c.bf16 %v5370_v38, %v5370_v38  ;;  %v5115_v63 = vmax.f32 %v3749_v51, 0.0  ;;  %v5371_v0 = vmax.f32 %v4773_v52, 0.0 }
 0x2b8   : > { %v9705_v1 = vpack.c.bf16 %v5112_v56, %v5112_v56  ;;  %v9961_v2 = vpack.c.bf16 %v5368_v58, %v5368_v58  ;;  %v5113_v3 = vmax.f32 %v3741_v59, 0.0  ;;  %v5369_v4 = vmax.f32 %v4765_v60, 0.0 }
 0x2b9   : > { %7675 = vst.msk [vmem:[%s11552_s12 + $0x388] sm:$0xf] %vm7448_vm3, %v9707_v61  ;;  %7931 = vst.msk [vmem:[%s11552_s12 + $0x788] sm:$0xf] %vm7448_vm3, %v9963_v62  ;;  %v9708_v5 = vpack.c.bf16 %v5115_v63, %v5115_v63  ;;  %v9964_v57 = vpack.c.bf16 %v5371_v0, %v5371_v0 }
 0x2ba   : > { %7673 = vst.msk [vmem:[%s11552_s12 + $0x380] sm:$0xf] %vm7448_vm3, %v9705_v1  ;;  %7929 = vst.msk [vmem:[%s11552_s12 + $0x780] sm:$0xf] %vm7448_vm3, %v9961_v2  ;;  %v9706_v34 = vpack.c.bf16 %v5113_v3, %v5113_v3  ;;  %v9962_v6 = vpack.c.bf16 %v5369_v4, %v5369_v4  ;;  %v10497_v7 = vpop.f32.mrb[228].mxu0  ;;  %v10753_v8 = vpop.f32.mrb[228].mxu1 }
 0x2bb   : > { %7676 = vst.msk [vmem:[%s11552_s12 + $0x38c] sm:$0xf] %vm7448_vm3, %v9708_v5  ;;  %7932 = vst.msk [vmem:[%s11552_s12 + $0x78c] sm:$0xf] %vm7448_vm3, %v9964_v57  ;;  %v3762_v10 = vadd.f32 %v13217_v9, %v10497_v7  ;;  %v4786_v12 = vadd.f32 %v13217_v9, %v10753_v8  ;;  %v3753_v13 = vpop.f32.mrb[229].mxu0  ;;  %v4777_v14 = vpop.f32.mrb[229].mxu1 }
 0x2bc   : > { %7674 = vst.msk [vmem:[%s11552_s12 + $0x384] sm:$0xf] %vm7448_vm3, %v9706_v34  ;;  %7930 = vst.msk [vmem:[%s11552_s12 + $0x784] sm:$0xf] %vm7448_vm3, %v9962_v6  ;;  %v3754_v15 = vadd.f32 %v13217_v9, %v3753_v13  ;;  %v4778_v16 = vadd.f32 %v13217_v9, %v4777_v14  ;;  %v10498_v17 = vpop.f32.mrb[230].mxu0  ;;  %v10754_v18 = vpop.f32.mrb[230].mxu1 }
 0x2bd   : > { %v5118_v19 = vmax.f32 %v3762_v10, 0.0  ;;  %v5374_v20 = vmax.f32 %v4786_v12, 0.0  ;;  %v3765_v21 = vadd.f32 %v13217_v9, %v10498_v17  ;;  %v4789_v22 = vadd.f32 %v13217_v9, %v10754_v18  ;;  %v3756_v23 = vpop.f32.mrb[231].mxu0  ;;  %v4780_v24 = vpop.f32.mrb[231].mxu1 }
 0x2be   : > { %v5116_v25 = vmax.f32 %v3754_v15, 0.0  ;;  %v5372_v26 = vmax.f32 %v4778_v16, 0.0  ;;  %v3757_v27 = vadd.f32 %v13217_v9, %v3756_v23  ;;  %v4781_v28 = vadd.f32 %v13217_v9, %v4780_v24 }
 0x2bf   : > { %v9711_v29 = vpack.c.bf16 %v5118_v19, %v5118_v19  ;;  %v9967_v30 = vpack.c.bf16 %v5374_v20, %v5374_v20  ;;  %v5119_v31 = vmax.f32 %v3765_v21, 0.0  ;;  %v5375_v11 = vmax.f32 %v4789_v22, 0.0 }
 0x2c0   : > { %v9709_v32 = vpack.c.bf16 %v5116_v25, %v5116_v25  ;;  %v9965_v55 = vpack.c.bf16 %v5372_v26, %v5372_v26  ;;  %v5117_v33 = vmax.f32 %v3757_v27, 0.0  ;;  %v5373_v35 = vmax.f32 %v4781_v28, 0.0 }
 0x2c1   : > { %7679 = vst.msk [vmem:[%s11552_s12 + $0x398] sm:$0xf] %vm7448_vm3, %v9711_v29  ;;  %7935 = vst.msk [vmem:[%s11552_s12 + $0x798] sm:$0xf] %vm7448_vm3, %v9967_v30  ;;  %v9712_v36 = vpack.c.bf16 %v5119_v31, %v5119_v31  ;;  %v9968_v37 = vpack.c.bf16 %v5375_v11, %v5375_v11 }
 0x2c2   : > { %7677 = vst.msk [vmem:[%s11552_s12 + $0x390] sm:$0xf] %vm7448_vm3, %v9709_v32  ;;  %7933 = vst.msk [vmem:[%s11552_s12 + $0x790] sm:$0xf] %vm7448_vm3, %v9965_v55  ;;  %v9710_v39 = vpack.c.bf16 %v5117_v33, %v5117_v33  ;;  %v9966_v40 = vpack.c.bf16 %v5373_v35, %v5373_v35  ;;  %v10501_v41 = vpop.f32.mrb[232].mxu0  ;;  %v10757_v42 = vpop.f32.mrb[232].mxu1 }
 0x2c3   : > { %7680 = vst.msk [vmem:[%s11552_s12 + $0x39c] sm:$0xf] %vm7448_vm3, %v9712_v36  ;;  %7936 = vst.msk [vmem:[%s11552_s12 + $0x79c] sm:$0xf] %vm7448_vm3, %v9968_v37  ;;  %v3778_v43 = vadd.f32 %v13217_v9, %v10501_v41  ;;  %v4802_v44 = vadd.f32 %v13217_v9, %v10757_v42  ;;  %v3769_v45 = vpop.f32.mrb[233].mxu0  ;;  %v4793_v46 = vpop.f32.mrb[233].mxu1 }
 0x2c4   : > { %7678 = vst.msk [vmem:[%s11552_s12 + $0x394] sm:$0xf] %vm7448_vm3, %v9710_v39  ;;  %7934 = vst.msk [vmem:[%s11552_s12 + $0x794] sm:$0xf] %vm7448_vm3, %v9966_v40  ;;  %v3770_v47 = vadd.f32 %v13217_v9, %v3769_v45  ;;  %v4794_v48 = vadd.f32 %v13217_v9, %v4793_v46  ;;  %v10502_v49 = vpop.f32.mrb[234].mxu0  ;;  %v10758_v50 = vpop.f32.mrb[234].mxu1 }
 0x2c5   : > { %v5122_v38 = vmax.f32 %v3778_v43, 0.0  ;;  %v5378_v51 = vmax.f32 %v4802_v44, 0.0  ;;  %v3781_v52 = vadd.f32 %v13217_v9, %v10502_v49  ;;  %v4805_v53 = vadd.f32 %v13217_v9, %v10758_v50  ;;  %v3772_v54 = vpop.f32.mrb[235].mxu0  ;;  %v4796_v56 = vpop.f32.mrb[235].mxu1 }
 0x2c6   : > { %v5120_v58 = vmax.f32 %v3770_v47, 0.0  ;;  %v5376_v59 = vmax.f32 %v4794_v48, 0.0  ;;  %v3773_v60 = vadd.f32 %v13217_v9, %v3772_v54  ;;  %v4797_v61 = vadd.f32 %v13217_v9, %v4796_v56 }
 0x2c7   : > { %v9715_v62 = vpack.c.bf16 %v5122_v38, %v5122_v38  ;;  %v9971_v63 = vpack.c.bf16 %v5378_v51, %v5378_v51  ;;  %v5123_v0 = vmax.f32 %v3781_v52, 0.0  ;;  %v5379_v1 = vmax.f32 %v4805_v53, 0.0 }
 0x2c8   : > { %v9713_v2 = vpack.c.bf16 %v5120_v58, %v5120_v58  ;;  %v9969_v3 = vpack.c.bf16 %v5376_v59, %v5376_v59  ;;  %v5121_v4 = vmax.f32 %v3773_v60, 0.0  ;;  %v5377_v5 = vmax.f32 %v4797_v61, 0.0 }
 0x2c9   : > { %7683 = vst.msk [vmem:[%s11552_s12 + $0x3a8] sm:$0xf] %vm7448_vm3, %v9715_v62  ;;  %7939 = vst.msk [vmem:[%s11552_s12 + $0x7a8] sm:$0xf] %vm7448_vm3, %v9971_v63  ;;  %v9716_v57 = vpack.c.bf16 %v5123_v0, %v5123_v0  ;;  %v9972_v34 = vpack.c.bf16 %v5379_v1, %v5379_v1 }
 0x2ca   : > { %7681 = vst.msk [vmem:[%s11552_s12 + $0x3a0] sm:$0xf] %vm7448_vm3, %v9713_v2  ;;  %7937 = vst.msk [vmem:[%s11552_s12 + $0x7a0] sm:$0xf] %vm7448_vm3, %v9969_v3  ;;  %v9714_v6 = vpack.c.bf16 %v5121_v4, %v5121_v4  ;;  %v9970_v7 = vpack.c.bf16 %v5377_v5, %v5377_v5  ;;  %v10505_v8 = vpop.f32.mrb[236].mxu0  ;;  %v10761_v10 = vpop.f32.mrb[236].mxu1 }
 0x2cb   : > { %7684 = vst.msk [vmem:[%s11552_s12 + $0x3ac] sm:$0xf] %vm7448_vm3, %v9716_v57  ;;  %7940 = vst.msk [vmem:[%s11552_s12 + $0x7ac] sm:$0xf] %vm7448_vm3, %v9972_v34  ;;  %v3794_v12 = vadd.f32 %v13217_v9, %v10505_v8  ;;  %v4818_v13 = vadd.f32 %v13217_v9, %v10761_v10  ;;  %v3785_v14 = vpop.f32.mrb[237].mxu0  ;;  %v4809_v15 = vpop.f32.mrb[237].mxu1 }
 0x2cc   : > { %7682 = vst.msk [vmem:[%s11552_s12 + $0x3a4] sm:$0xf] %vm7448_vm3, %v9714_v6  ;;  %7938 = vst.msk [vmem:[%s11552_s12 + $0x7a4] sm:$0xf] %vm7448_vm3, %v9970_v7  ;;  %v3786_v16 = vadd.f32 %v13217_v9, %v3785_v14  ;;  %v4810_v17 = vadd.f32 %v13217_v9, %v4809_v15  ;;  %v10506_v18 = vpop.f32.mrb[238].mxu0  ;;  %v10762_v19 = vpop.f32.mrb[238].mxu1 }
 0x2cd   : > { %v5126_v20 = vmax.f32 %v3794_v12, 0.0  ;;  %v5382_v21 = vmax.f32 %v4818_v13, 0.0  ;;  %v3797_v22 = vadd.f32 %v13217_v9, %v10506_v18  ;;  %v4821_v23 = vadd.f32 %v13217_v9, %v10762_v19  ;;  %v3788_v24 = vpop.f32.mrb[239].mxu0  ;;  %v4812_v25 = vpop.f32.mrb[239].mxu1 }
 0x2ce   : > { %v5124_v26 = vmax.f32 %v3786_v16, 0.0  ;;  %v5380_v27 = vmax.f32 %v4810_v17, 0.0  ;;  %v3789_v28 = vadd.f32 %v13217_v9, %v3788_v24  ;;  %v4813_v29 = vadd.f32 %v13217_v9, %v4812_v25 }
 0x2cf   : > { %v9719_v30 = vpack.c.bf16 %v5126_v20, %v5126_v20  ;;  %v9975_v31 = vpack.c.bf16 %v5382_v21, %v5382_v21  ;;  %v5127_v11 = vmax.f32 %v3797_v22, 0.0  ;;  %v5383_v32 = vmax.f32 %v4821_v23, 0.0 }
 0x2d0   : > { %v9717_v55 = vpack.c.bf16 %v5124_v26, %v5124_v26  ;;  %v9973_v33 = vpack.c.bf16 %v5380_v27, %v5380_v27  ;;  %v5125_v35 = vmax.f32 %v3789_v28, 0.0  ;;  %v5381_v36 = vmax.f32 %v4813_v29, 0.0 }
 0x2d1   : > { %7687 = vst.msk [vmem:[%s11552_s12 + $0x3b8] sm:$0xf] %vm7448_vm3, %v9719_v30  ;;  %7943 = vst.msk [vmem:[%s11552_s12 + $0x7b8] sm:$0xf] %vm7448_vm3, %v9975_v31  ;;  %v9720_v37 = vpack.c.bf16 %v5127_v11, %v5127_v11  ;;  %v9976_v39 = vpack.c.bf16 %v5383_v32, %v5383_v32 }
 0x2d2   : > { %7685 = vst.msk [vmem:[%s11552_s12 + $0x3b0] sm:$0xf] %vm7448_vm3, %v9717_v55  ;;  %7941 = vst.msk [vmem:[%s11552_s12 + $0x7b0] sm:$0xf] %vm7448_vm3, %v9973_v33  ;;  %v9718_v40 = vpack.c.bf16 %v5125_v35, %v5125_v35  ;;  %v9974_v41 = vpack.c.bf16 %v5381_v36, %v5381_v36  ;;  %v10509_v42 = vpop.f32.mrb[240].mxu0  ;;  %v10765_v43 = vpop.f32.mrb[240].mxu1 }
 0x2d3   : > { %7688 = vst.msk [vmem:[%s11552_s12 + $0x3bc] sm:$0xf] %vm7448_vm3, %v9720_v37  ;;  %7944 = vst.msk [vmem:[%s11552_s12 + $0x7bc] sm:$0xf] %vm7448_vm3, %v9976_v39  ;;  %v3810_v44 = vadd.f32 %v13217_v9, %v10509_v42  ;;  %v4834_v45 = vadd.f32 %v13217_v9, %v10765_v43  ;;  %v3801_v46 = vpop.f32.mrb[241].mxu0  ;;  %v4825_v47 = vpop.f32.mrb[241].mxu1 }
 0x2d4   : > { %7686 = vst.msk [vmem:[%s11552_s12 + $0x3b4] sm:$0xf] %vm7448_vm3, %v9718_v40  ;;  %7942 = vst.msk [vmem:[%s11552_s12 + $0x7b4] sm:$0xf] %vm7448_vm3, %v9974_v41  ;;  %v3802_v48 = vadd.f32 %v13217_v9, %v3801_v46  ;;  %v4826_v49 = vadd.f32 %v13217_v9, %v4825_v47  ;;  %v10510_v50 = vpop.f32.mrb[242].mxu0  ;;  %v10766_v38 = vpop.f32.mrb[242].mxu1 }
 0x2d5   : > { %v5130_v51 = vmax.f32 %v3810_v44, 0.0  ;;  %v5386_v52 = vmax.f32 %v4834_v45, 0.0  ;;  %v3813_v53 = vadd.f32 %v13217_v9, %v10510_v50  ;;  %v4837_v54 = vadd.f32 %v13217_v9, %v10766_v38  ;;  %v3804_v56 = vpop.f32.mrb[243].mxu0  ;;  %v4828_v58 = vpop.f32.mrb[243].mxu1 }
 0x2d6   : > { %v5128_v59 = vmax.f32 %v3802_v48, 0.0  ;;  %v5384_v60 = vmax.f32 %v4826_v49, 0.0  ;;  %v3805_v61 = vadd.f32 %v13217_v9, %v3804_v56  ;;  %v4829_v62 = vadd.f32 %v13217_v9, %v4828_v58 }
 0x2d7   : > { %v9723_v63 = vpack.c.bf16 %v5130_v51, %v5130_v51  ;;  %v9979_v0 = vpack.c.bf16 %v5386_v52, %v5386_v52  ;;  %v5131_v1 = vmax.f32 %v3813_v53, 0.0  ;;  %v5387_v2 = vmax.f32 %v4837_v54, 0.0 }
 0x2d8   : > { %v9721_v3 = vpack.c.bf16 %v5128_v59, %v5128_v59  ;;  %v9977_v4 = vpack.c.bf16 %v5384_v60, %v5384_v60  ;;  %v5129_v5 = vmax.f32 %v3805_v61, 0.0  ;;  %v5385_v57 = vmax.f32 %v4829_v62, 0.0 }
 0x2d9   : > { %7691 = vst.msk [vmem:[%s11552_s12 + $0x3c8] sm:$0xf] %vm7448_vm3, %v9723_v63  ;;  %7947 = vst.msk [vmem:[%s11552_s12 + $0x7c8] sm:$0xf] %vm7448_vm3, %v9979_v0  ;;  %v9724_v34 = vpack.c.bf16 %v5131_v1, %v5131_v1  ;;  %v9980_v6 = vpack.c.bf16 %v5387_v2, %v5387_v2 }
 0x2da   : > { %7689 = vst.msk [vmem:[%s11552_s12 + $0x3c0] sm:$0xf] %vm7448_vm3, %v9721_v3  ;;  %7945 = vst.msk [vmem:[%s11552_s12 + $0x7c0] sm:$0xf] %vm7448_vm3, %v9977_v4  ;;  %v9722_v7 = vpack.c.bf16 %v5129_v5, %v5129_v5  ;;  %v9978_v8 = vpack.c.bf16 %v5385_v57, %v5385_v57  ;;  %v10513_v10 = vpop.f32.mrb[244].mxu0  ;;  %v10769_v12 = vpop.f32.mrb[244].mxu1 }
 0x2db   : > { %7692 = vst.msk [vmem:[%s11552_s12 + $0x3cc] sm:$0xf] %vm7448_vm3, %v9724_v34  ;;  %7948 = vst.msk [vmem:[%s11552_s12 + $0x7cc] sm:$0xf] %vm7448_vm3, %v9980_v6  ;;  %v3826_v13 = vadd.f32 %v13217_v9, %v10513_v10  ;;  %v4850_v14 = vadd.f32 %v13217_v9, %v10769_v12  ;;  %v3817_v15 = vpop.f32.mrb[245].mxu0  ;;  %v4841_v16 = vpop.f32.mrb[245].mxu1 }
 0x2dc   : > { %7690 = vst.msk [vmem:[%s11552_s12 + $0x3c4] sm:$0xf] %vm7448_vm3, %v9722_v7  ;;  %7946 = vst.msk [vmem:[%s11552_s12 + $0x7c4] sm:$0xf] %vm7448_vm3, %v9978_v8  ;;  %v3818_v17 = vadd.f32 %v13217_v9, %v3817_v15  ;;  %v4842_v18 = vadd.f32 %v13217_v9, %v4841_v16  ;;  %v10514_v19 = vpop.f32.mrb[246].mxu0  ;;  %v10770_v20 = vpop.f32.mrb[246].mxu1 }
 0x2dd   : > { %v5134_v21 = vmax.f32 %v3826_v13, 0.0  ;;  %v5390_v22 = vmax.f32 %v4850_v14, 0.0  ;;  %v3829_v23 = vadd.f32 %v13217_v9, %v10514_v19  ;;  %v4853_v24 = vadd.f32 %v13217_v9, %v10770_v20  ;;  %v3820_v25 = vpop.f32.mrb[247].mxu0  ;;  %v4844_v26 = vpop.f32.mrb[247].mxu1 }
 0x2de   : > { %v5132_v27 = vmax.f32 %v3818_v17, 0.0  ;;  %v5388_v28 = vmax.f32 %v4842_v18, 0.0  ;;  %v3821_v29 = vadd.f32 %v13217_v9, %v3820_v25  ;;  %v4845_v30 = vadd.f32 %v13217_v9, %v4844_v26 }
 0x2df   : > { %v9727_v31 = vpack.c.bf16 %v5134_v21, %v5134_v21  ;;  %v9983_v11 = vpack.c.bf16 %v5390_v22, %v5390_v22  ;;  %v5135_v32 = vmax.f32 %v3829_v23, 0.0  ;;  %v5391_v55 = vmax.f32 %v4853_v24, 0.0 }
 0x2e0   : > { %v9725_v33 = vpack.c.bf16 %v5132_v27, %v5132_v27  ;;  %v9981_v35 = vpack.c.bf16 %v5388_v28, %v5388_v28  ;;  %v5133_v36 = vmax.f32 %v3821_v29, 0.0  ;;  %v5389_v37 = vmax.f32 %v4845_v30, 0.0 }
 0x2e1   : > { %7695 = vst.msk [vmem:[%s11552_s12 + $0x3d8] sm:$0xf] %vm7448_vm3, %v9727_v31  ;;  %7951 = vst.msk [vmem:[%s11552_s12 + $0x7d8] sm:$0xf] %vm7448_vm3, %v9983_v11  ;;  %v9728_v39 = vpack.c.bf16 %v5135_v32, %v5135_v32  ;;  %v9984_v40 = vpack.c.bf16 %v5391_v55, %v5391_v55 }
 0x2e2   : > { %7693 = vst.msk [vmem:[%s11552_s12 + $0x3d0] sm:$0xf] %vm7448_vm3, %v9725_v33  ;;  %7949 = vst.msk [vmem:[%s11552_s12 + $0x7d0] sm:$0xf] %vm7448_vm3, %v9981_v35  ;;  %v9726_v41 = vpack.c.bf16 %v5133_v36, %v5133_v36  ;;  %v9982_v42 = vpack.c.bf16 %v5389_v37, %v5389_v37  ;;  %v10517_v43 = vpop.f32.mrb[248].mxu0  ;;  %v10773_v44 = vpop.f32.mrb[248].mxu1 }
 0x2e3   : > { %7696 = vst.msk [vmem:[%s11552_s12 + $0x3dc] sm:$0xf] %vm7448_vm3, %v9728_v39  ;;  %7952 = vst.msk [vmem:[%s11552_s12 + $0x7dc] sm:$0xf] %vm7448_vm3, %v9984_v40  ;;  %v3842_v45 = vadd.f32 %v13217_v9, %v10517_v43  ;;  %v4866_v46 = vadd.f32 %v13217_v9, %v10773_v44  ;;  %v3833_v47 = vpop.f32.mrb[249].mxu0  ;;  %v4857_v48 = vpop.f32.mrb[249].mxu1 }
 0x2e4   : > { %7694 = vst.msk [vmem:[%s11552_s12 + $0x3d4] sm:$0xf] %vm7448_vm3, %v9726_v41  ;;  %7950 = vst.msk [vmem:[%s11552_s12 + $0x7d4] sm:$0xf] %vm7448_vm3, %v9982_v42  ;;  %v3834_v49 = vadd.f32 %v13217_v9, %v3833_v47  ;;  %v4858_v50 = vadd.f32 %v13217_v9, %v4857_v48  ;;  %v10518_v38 = vpop.f32.mrb[250].mxu0  ;;  %v10774_v51 = vpop.f32.mrb[250].mxu1 }
 0x2e5   : > { %v5138_v52 = vmax.f32 %v3842_v45, 0.0  ;;  %v5394_v53 = vmax.f32 %v4866_v46, 0.0  ;;  %v3845_v54 = vadd.f32 %v13217_v9, %v10518_v38  ;;  %v4869_v56 = vadd.f32 %v13217_v9, %v10774_v51  ;;  %v3836_v58 = vpop.f32.mrb[251].mxu0  ;;  %v4860_v59 = vpop.f32.mrb[251].mxu1 }
 0x2e6   : > { %v5136_v60 = vmax.f32 %v3834_v49, 0.0  ;;  %v5392_v61 = vmax.f32 %v4858_v50, 0.0  ;;  %v3837_v62 = vadd.f32 %v13217_v9, %v3836_v58  ;;  %v4861_v63 = vadd.f32 %v13217_v9, %v4860_v59 }
 0x2e7   : > { %v9731_v0 = vpack.c.bf16 %v5138_v52, %v5138_v52  ;;  %v9987_v1 = vpack.c.bf16 %v5394_v53, %v5394_v53  ;;  %v5139_v2 = vmax.f32 %v3845_v54, 0.0  ;;  %v5395_v3 = vmax.f32 %v4869_v56, 0.0 }
 0x2e8   : > { %v9729_v4 = vpack.c.bf16 %v5136_v60, %v5136_v60  ;;  %v9985_v5 = vpack.c.bf16 %v5392_v61, %v5392_v61  ;;  %v5137_v57 = vmax.f32 %v3837_v62, 0.0  ;;  %v5393_v34 = vmax.f32 %v4861_v63, 0.0 }
 0x2e9   : > { %7699 = vst.msk [vmem:[%s11552_s12 + $0x3e8] sm:$0xf] %vm7448_vm3, %v9731_v0  ;;  %7955 = vst.msk [vmem:[%s11552_s12 + $0x7e8] sm:$0xf] %vm7448_vm3, %v9987_v1  ;;  %v9732_v6 = vpack.c.bf16 %v5139_v2, %v5139_v2  ;;  %v9988_v7 = vpack.c.bf16 %v5395_v3, %v5395_v3 }
 0x2ea   : > { %7697 = vst.msk [vmem:[%s11552_s12 + $0x3e0] sm:$0xf] %vm7448_vm3, %v9729_v4  ;;  %7953 = vst.msk [vmem:[%s11552_s12 + $0x7e0] sm:$0xf] %vm7448_vm3, %v9985_v5  ;;  %v9730_v8 = vpack.c.bf16 %v5137_v57, %v5137_v57  ;;  %v9986_v10 = vpack.c.bf16 %v5393_v34, %v5393_v34  ;;  %v10521_v12 = vpop.f32.mrb[252].mxu0  ;;  %v10777_v13 = vpop.f32.mrb[252].mxu1 }
 0x2eb   : > { %7700 = vst.msk [vmem:[%s11552_s12 + $0x3ec] sm:$0xf] %vm7448_vm3, %v9732_v6  ;;  %7956 = vst.msk [vmem:[%s11552_s12 + $0x7ec] sm:$0xf] %vm7448_vm3, %v9988_v7  ;;  %v3858_v14 = vadd.f32 %v13217_v9, %v10521_v12  ;;  %v4882_v15 = vadd.f32 %v13217_v9, %v10777_v13  ;;  %v3849_v16 = vpop.f32.mrb[253].mxu0  ;;  %v4873_v17 = vpop.f32.mrb[253].mxu1 }
 0x2ec   : > { %7698 = vst.msk [vmem:[%s11552_s12 + $0x3e4] sm:$0xf] %vm7448_vm3, %v9730_v8  ;;  %7954 = vst.msk [vmem:[%s11552_s12 + $0x7e4] sm:$0xf] %vm7448_vm3, %v9986_v10  ;;  %v3850_v18 = vadd.f32 %v13217_v9, %v3849_v16  ;;  %v4874_v19 = vadd.f32 %v13217_v9, %v4873_v17  ;;  %v10522_v20 = vpop.f32.mrb[254].mxu0  ;;  %v10778_v21 = vpop.f32.mrb[254].mxu1 }
 0x2ed   : > { %v5142_v22 = vmax.f32 %v3858_v14, 0.0  ;;  %v5398_v23 = vmax.f32 %v4882_v15, 0.0  ;;  %v3861_v24 = vadd.f32 %v13217_v9, %v10522_v20  ;;  %v4885_v25 = vadd.f32 %v13217_v9, %v10778_v21  ;;  %v3852_v26 = vpop.f32.mrb[255].mxu0  ;;  %v4876_v27 = vpop.f32.mrb[255].mxu1 }
 0x2ee   : > { %v5140_v28 = vmax.f32 %v3850_v18, 0.0  ;;  %v5396_v29 = vmax.f32 %v4874_v19, 0.0  ;;  %v3853_v30 = vadd.f32 %v13217_v9, %v3852_v26  ;;  %v4877_v31 = vadd.f32 %v13217_v9, %v4876_v27  ;;  %7967 = sbr.rel (!%p11278_p4) target bundleno = 848 (0x350), region = 36 }
 0x2ef   : > { %v9735_v11 = vpack.c.bf16 %v5142_v22, %v5142_v22  ;;  %v9991_v32 = vpack.c.bf16 %v5398_v23, %v5398_v23  ;;  %v5143_v55 = vmax.f32 %v3861_v24, 0.0  ;;  %v5399_v33 = vmax.f32 %v4885_v25, 0.0 }
 0x2f0   : > { %v9733_v35 = vpack.c.bf16 %v5140_v28, %v5140_v28  ;;  %v9989_v36 = vpack.c.bf16 %v5396_v29, %v5396_v29  ;;  %v5141_v37 = vmax.f32 %v3853_v30, 0.0  ;;  %v5397_v39 = vmax.f32 %v4877_v31, 0.0 }
 0x2f1   : > { %7703 = vst.msk [vmem:[%s11552_s12 + $0x3f8] sm:$0xf] %vm7448_vm3, %v9735_v11  ;;  %7959 = vst.msk [vmem:[%s11552_s12 + $0x7f8] sm:$0xf] %vm7448_vm3, %v9991_v32  ;;  %v9736_v40 = vpack.c.bf16 %v5143_v55, %v5143_v55  ;;  %v9992_v41 = vpack.c.bf16 %v5399_v33, %v5399_v33 }
 0x2f2   : > { %7701 = vst.msk [vmem:[%s11552_s12 + $0x3f0] sm:$0xf] %vm7448_vm3, %v9733_v35  ;;  %7957 = vst.msk [vmem:[%s11552_s12 + $0x7f0] sm:$0xf] %vm7448_vm3, %v9989_v36  ;;  %v9734_v9 = vpack.c.bf16 %v5141_v37, %v5141_v37  ;;  %v9990_v42 = vpack.c.bf16 %v5397_v39, %v5397_v39 }
 0x2f3   : > { %7704 = vst.msk [vmem:[%s11552_s12 + $0x3fc] sm:$0xf] %vm7448_vm3, %v9736_v40  ;;  %7960 = vst.msk [vmem:[%s11552_s12 + $0x7fc] sm:$0xf] %vm7448_vm3, %v9992_v41 }
 0x2f4   : > { %7702 = vst.msk [vmem:[%s11552_s12 + $0x3f4] sm:$0xf] %vm7448_vm3, %v9734_v9  ;;  %7958 = vst.msk [vmem:[%s11552_s12 + $0x7f4] sm:$0xf] %vm7448_vm3, %v9990_v42 }
 0x2f5   : > { %s13602_s4 = smov (!%p7970_p8, %s7969_s4), 512 }
 0x2f6   : > { %s9466_s9 = sshll.u32 %s13602_s4, 6 }
 0x2f7   : > { %p9469_p9 = scmp.eq.s32.totalorder %s9466_s9, 0 }
 0x2f8   : > { %s13404_s10 = sshrl.u32 (!%p9469_p9), %s13602_s4, 6 }
 0x2f9   : > { %7978 = sbr.rel (%p9469_p9) target bundleno = 848 (0x350), region = 40  ;;  %p9470_p10 = scmp.le.s32.totalorder (!%p9469_p9), %s13404_s10, 0 }
 0x300   : > { %8383 = sbr.rel (%p9470_p10) target bundleno = 827 (0x33b), region = 112  ;;  %s13595_s15 = smov (!%p9470_p10), %s13398_s8 }
 0x301   : > { %s13596_s20 = smov (!%p9470_p10), %s11552_s12  ;;  %s13413_s27 = smov (!%p9470_p10), 0  }
 0x302   : > { %s13415_s11 = smov (!%p9470_p10), 0  }
 0x307 LB: >> { %v7994_v43 = vld [vmem:[%s11206_s20] sm:$0xf]  ;;  %v7996_v44 = vld [vmem:[%s11206_s20 + $0x4] sm:$0xf]  ;;  %v7998_v45 = vld [vmem:[%s11206_s20 + $0x8] sm:$0xf]  ;;  %s11214_s11 = sphi %s13415_s11, %s7988_s11   ;;  %s11210_s27 = sphi %s13413_s27, %s13597_s27   ;;  %s11206_s20 = sphi %s13596_s20, %s8127_s20   ;;  %s11202_s15 = sphi %s13595_s15, %s8128_s15  }
 0x308   : >> { %7995 = vst [vmem:[%s11202_s15] sm:$0xf] %v7994_v43  ;;  %7997 = vst [vmem:[%s11202_s15 + $0x4] sm:$0xf] %v7996_v44  ;;  %v8000_v46 = vld [vmem:[%s11206_s20 + $0xc] sm:$0xf]  ;;  %s8122_s14 = sadd.s32 1, %s11210_s27 }
 0x309   : >> { %7999 = vst [vmem:[%s11202_s15 + $0x8] sm:$0xf] %v7998_v45  ;;  %v8002_v47 = vld [vmem:[%s11206_s20 + $0x10] sm:$0xf]  ;;  %v8004_v48 = vld [vmem:[%s11206_s20 + $0x14] sm:$0xf]  ;;  %p8123_p11 = scmp.ge.s32.totalorder %s8122_s14, %s13404_s10 }
 0x30a   : >> { %8001 = vst [vmem:[%s11202_s15 + $0xc] sm:$0xf] %v8000_v46  ;;  %8003 = vst [vmem:[%s11202_s15 + $0x10] sm:$0xf] %v8002_v47  ;;  %v8006_v49 = vld [vmem:[%s11206_s20 + $0x18] sm:$0xf] }
 0x30b   : >> { %8005 = vst [vmem:[%s11202_s15 + $0x14] sm:$0xf] %v8004_v48  ;;  %v8008_v50 = vld [vmem:[%s11206_s20 + $0x1c] sm:$0xf]  ;;  %v8010_v38 = vld [vmem:[%s11206_s20 + $0x20] sm:$0xf] }
 0x30c   : >> { %8007 = vst [vmem:[%s11202_s15 + $0x18] sm:$0xf] %v8006_v49  ;;  %8009 = vst [vmem:[%s11202_s15 + $0x1c] sm:$0xf] %v8008_v50  ;;  %v8012_v51 = vld [vmem:[%s11206_s20 + $0x24] sm:$0xf] }
 0x30d   : >> { %8011 = vst [vmem:[%s11202_s15 + $0x20] sm:$0xf] %v8010_v38  ;;  %v8014_v52 = vld [vmem:[%s11206_s20 + $0x28] sm:$0xf]  ;;  %v8016_v53 = vld [vmem:[%s11206_s20 + $0x2c] sm:$0xf] }
 0x30e   : >> { %8013 = vst [vmem:[%s11202_s15 + $0x24] sm:$0xf] %v8012_v51  ;;  %8015 = vst [vmem:[%s11202_s15 + $0x28] sm:$0xf] %v8014_v52  ;;  %v8018_v54 = vld [vmem:[%s11206_s20 + $0x30] sm:$0xf] }
 0x30f   : >> { %8017 = vst [vmem:[%s11202_s15 + $0x2c] sm:$0xf] %v8016_v53  ;;  %v8020_v56 = vld [vmem:[%s11206_s20 + $0x34] sm:$0xf]  ;;  %v8022_v58 = vld [vmem:[%s11206_s20 + $0x38] sm:$0xf] }
 0x310   : >> { %8019 = vst [vmem:[%s11202_s15 + $0x30] sm:$0xf] %v8018_v54  ;;  %8021 = vst [vmem:[%s11202_s15 + $0x34] sm:$0xf] %v8020_v56  ;;  %v8024_v59 = vld [vmem:[%s11206_s20 + $0x3c] sm:$0xf] }
 0x311   : >> { %8023 = vst [vmem:[%s11202_s15 + $0x38] sm:$0xf] %v8022_v58  ;;  %v8026_v60 = vld [vmem:[%s11206_s20 + $0x40] sm:$0xf]  ;;  %v8028_v61 = vld [vmem:[%s11206_s20 + $0x44] sm:$0xf] }
 0x312   : >> { %8025 = vst [vmem:[%s11202_s15 + $0x3c] sm:$0xf] %v8024_v59  ;;  %8027 = vst [vmem:[%s11202_s15 + $0x40] sm:$0xf] %v8026_v60  ;;  %v8030_v62 = vld [vmem:[%s11206_s20 + $0x48] sm:$0xf] }
 0x313   : >> { %8029 = vst [vmem:[%s11202_s15 + $0x44] sm:$0xf] %v8028_v61  ;;  %v8032_v63 = vld [vmem:[%s11206_s20 + $0x4c] sm:$0xf]  ;;  %v8034_v0 = vld [vmem:[%s11206_s20 + $0x50] sm:$0xf] }
 0x314   : >> { %8031 = vst [vmem:[%s11202_s15 + $0x48] sm:$0xf] %v8030_v62  ;;  %8033 = vst [vmem:[%s11202_s15 + $0x4c] sm:$0xf] %v8032_v63  ;;  %v8036_v1 = vld [vmem:[%s11206_s20 + $0x54] sm:$0xf] }
 0x315   : >> { %8035 = vst [vmem:[%s11202_s15 + $0x50] sm:$0xf] %v8034_v0  ;;  %v8038_v2 = vld [vmem:[%s11206_s20 + $0x58] sm:$0xf]  ;;  %v8040_v3 = vld [vmem:[%s11206_s20 + $0x5c] sm:$0xf] }
 0x316   : >> { %8037 = vst [vmem:[%s11202_s15 + $0x54] sm:$0xf] %v8036_v1  ;;  %8039 = vst [vmem:[%s11202_s15 + $0x58] sm:$0xf] %v8038_v2  ;;  %v8042_v4 = vld [vmem:[%s11206_s20 + $0x60] sm:$0xf] }
 0x317   : >> { %8041 = vst [vmem:[%s11202_s15 + $0x5c] sm:$0xf] %v8040_v3  ;;  %v8044_v5 = vld [vmem:[%s11206_s20 + $0x64] sm:$0xf]  ;;  %v8046_v57 = vld [vmem:[%s11206_s20 + $0x68] sm:$0xf] }
 0x318   : >> { %8043 = vst [vmem:[%s11202_s15 + $0x60] sm:$0xf] %v8042_v4  ;;  %8045 = vst [vmem:[%s11202_s15 + $0x64] sm:$0xf] %v8044_v5  ;;  %v8048_v34 = vld [vmem:[%s11206_s20 + $0x6c] sm:$0xf] }
 0x319   : >> { %8047 = vst [vmem:[%s11202_s15 + $0x68] sm:$0xf] %v8046_v57  ;;  %v8050_v6 = vld [vmem:[%s11206_s20 + $0x70] sm:$0xf]  ;;  %v8052_v7 = vld [vmem:[%s11206_s20 + $0x74] sm:$0xf] }
 0x31a   : >> { %8049 = vst [vmem:[%s11202_s15 + $0x6c] sm:$0xf] %v8048_v34  ;;  %8051 = vst [vmem:[%s11202_s15 + $0x70] sm:$0xf] %v8050_v6  ;;  %v8054_v8 = vld [vmem:[%s11206_s20 + $0x78] sm:$0xf] }
 0x31b   : >> { %8053 = vst [vmem:[%s11202_s15 + $0x74] sm:$0xf] %v8052_v7  ;;  %v8056_v10 = vld [vmem:[%s11206_s20 + $0x7c] sm:$0xf]  ;;  %v8058_v12 = vld [vmem:[%s11206_s20 + $0x80] sm:$0xf] }
 0x31c   : >> { %8055 = vst [vmem:[%s11202_s15 + $0x78] sm:$0xf] %v8054_v8  ;;  %8057 = vst [vmem:[%s11202_s15 + $0x7c] sm:$0xf] %v8056_v10  ;;  %v8060_v13 = vld [vmem:[%s11206_s20 + $0x84] sm:$0xf] }
 0x31d   : >> { %8059 = vst [vmem:[%s11202_s15 + $0x80] sm:$0xf] %v8058_v12  ;;  %v8062_v14 = vld [vmem:[%s11206_s20 + $0x88] sm:$0xf]  ;;  %v8064_v15 = vld [vmem:[%s11206_s20 + $0x8c] sm:$0xf] }
 0x31e   : >> { %8061 = vst [vmem:[%s11202_s15 + $0x84] sm:$0xf] %v8060_v13  ;;  %8063 = vst [vmem:[%s11202_s15 + $0x88] sm:$0xf] %v8062_v14  ;;  %v8066_v16 = vld [vmem:[%s11206_s20 + $0x90] sm:$0xf] }
 0x31f   : >> { %8065 = vst [vmem:[%s11202_s15 + $0x8c] sm:$0xf] %v8064_v15  ;;  %v8068_v17 = vld [vmem:[%s11206_s20 + $0x94] sm:$0xf]  ;;  %v8070_v18 = vld [vmem:[%s11206_s20 + $0x98] sm:$0xf] }
 0x320   : >> { %8067 = vst [vmem:[%s11202_s15 + $0x90] sm:$0xf] %v8066_v16  ;;  %8069 = vst [vmem:[%s11202_s15 + $0x94] sm:$0xf] %v8068_v17  ;;  %v8072_v19 = vld [vmem:[%s11206_s20 + $0x9c] sm:$0xf] }
 0x321   : >> { %8071 = vst [vmem:[%s11202_s15 + $0x98] sm:$0xf] %v8070_v18  ;;  %v8074_v20 = vld [vmem:[%s11206_s20 + $0xa0] sm:$0xf]  ;;  %v8076_v21 = vld [vmem:[%s11206_s20 + $0xa4] sm:$0xf] }
 0x322   : >> { %8073 = vst [vmem:[%s11202_s15 + $0x9c] sm:$0xf] %v8072_v19  ;;  %8075 = vst [vmem:[%s11202_s15 + $0xa0] sm:$0xf] %v8074_v20  ;;  %v8078_v22 = vld [vmem:[%s11206_s20 + $0xa8] sm:$0xf] }
 0x323   : >> { %8077 = vst [vmem:[%s11202_s15 + $0xa4] sm:$0xf] %v8076_v21  ;;  %v8080_v23 = vld [vmem:[%s11206_s20 + $0xac] sm:$0xf]  ;;  %v8082_v24 = vld [vmem:[%s11206_s20 + $0xb0] sm:$0xf] }
 0x324   : >> { %8079 = vst [vmem:[%s11202_s15 + $0xa8] sm:$0xf] %v8078_v22  ;;  %8081 = vst [vmem:[%s11202_s15 + $0xac] sm:$0xf] %v8080_v23  ;;  %v8084_v25 = vld [vmem:[%s11206_s20 + $0xb4] sm:$0xf] }
 0x325   : >> { %8083 = vst [vmem:[%s11202_s15 + $0xb0] sm:$0xf] %v8082_v24  ;;  %v8086_v26 = vld [vmem:[%s11206_s20 + $0xb8] sm:$0xf]  ;;  %v8088_v27 = vld [vmem:[%s11206_s20 + $0xbc] sm:$0xf] }
 0x326   : >> { %8085 = vst [vmem:[%s11202_s15 + $0xb4] sm:$0xf] %v8084_v25  ;;  %8087 = vst [vmem:[%s11202_s15 + $0xb8] sm:$0xf] %v8086_v26  ;;  %v8090_v28 = vld [vmem:[%s11206_s20 + $0xc0] sm:$0xf] }
 0x327   : >> { %8089 = vst [vmem:[%s11202_s15 + $0xbc] sm:$0xf] %v8088_v27  ;;  %v8092_v29 = vld [vmem:[%s11206_s20 + $0xc4] sm:$0xf]  ;;  %v8094_v30 = vld [vmem:[%s11206_s20 + $0xc8] sm:$0xf] }
 0x328   : >> { %8091 = vst [vmem:[%s11202_s15 + $0xc0] sm:$0xf] %v8090_v28  ;;  %8093 = vst [vmem:[%s11202_s15 + $0xc4] sm:$0xf] %v8092_v29  ;;  %v8096_v31 = vld [vmem:[%s11206_s20 + $0xcc] sm:$0xf] }
 0x329   : >> { %8095 = vst [vmem:[%s11202_s15 + $0xc8] sm:$0xf] %v8094_v30  ;;  %v8098_v11 = vld [vmem:[%s11206_s20 + $0xd0] sm:$0xf]  ;;  %v8100_v32 = vld [vmem:[%s11206_s20 + $0xd4] sm:$0xf] }
 0x32a   : >> { %8097 = vst [vmem:[%s11202_s15 + $0xcc] sm:$0xf] %v8096_v31  ;;  %8099 = vst [vmem:[%s11202_s15 + $0xd0] sm:$0xf] %v8098_v11  ;;  %v8102_v55 = vld [vmem:[%s11206_s20 + $0xd8] sm:$0xf] }
 0x32b   : >> { %8101 = vst [vmem:[%s11202_s15 + $0xd4] sm:$0xf] %v8100_v32  ;;  %v8104_v33 = vld [vmem:[%s11206_s20 + $0xdc] sm:$0xf]  ;;  %v8106_v35 = vld [vmem:[%s11206_s20 + $0xe0] sm:$0xf] }
 0x32c   : >> { %8103 = vst [vmem:[%s11202_s15 + $0xd8] sm:$0xf] %v8102_v55  ;;  %8105 = vst [vmem:[%s11202_s15 + $0xdc] sm:$0xf] %v8104_v33  ;;  %v8108_v36 = vld [vmem:[%s11206_s20 + $0xe4] sm:$0xf] }
 0x32d   : >> { %8107 = vst [vmem:[%s11202_s15 + $0xe0] sm:$0xf] %v8106_v35  ;;  %v8110_v37 = vld [vmem:[%s11206_s20 + $0xe8] sm:$0xf]  ;;  %v8112_v39 = vld [vmem:[%s11206_s20 + $0xec] sm:$0xf] }
 0x32e   : >> { %8109 = vst [vmem:[%s11202_s15 + $0xe4] sm:$0xf] %v8108_v36  ;;  %8111 = vst [vmem:[%s11202_s15 + $0xe8] sm:$0xf] %v8110_v37  ;;  %v8114_v40 = vld [vmem:[%s11206_s20 + $0xf0] sm:$0xf] }
 0x32f   : >> { %8113 = vst [vmem:[%s11202_s15 + $0xec] sm:$0xf] %v8112_v39  ;;  %v8116_v41 = vld [vmem:[%s11206_s20 + $0xf4] sm:$0xf]  ;;  %v8118_v9 = vld [vmem:[%s11206_s20 + $0xf8] sm:$0xf] }
 0x330   : >> { %8115 = vst [vmem:[%s11202_s15 + $0xf0] sm:$0xf] %v8114_v40  ;;  %8117 = vst [vmem:[%s11202_s15 + $0xf4] sm:$0xf] %v8116_v41  ;;  %v8120_v42 = vld [vmem:[%s11206_s20 + $0xfc] sm:$0xf] }
 0x331   : >> { %8119 = vst [vmem:[%s11202_s15 + $0xf8] sm:$0xf] %v8118_v9  ;;  %8121 = vst [vmem:[%s11202_s15 + $0xfc] sm:$0xf] %v8120_v42  ;;  %s13604_s14 = smov (%p8123_p11, %s8122_s14), 0  ;;  %s7988_s11 = sadd.s32 1, %s11214_s11  }
 0x332   : >> { %s9471_s17 = sshll.u32 %s13604_s14, 8  ;;  %p7987_p12 = scmp.ge.s32.totalorder %s7988_s11, %s13404_s10 }
 0x333   : >> { %s8127_s20 = scalar_lea.vmem %s11552_s12, %s9471_s17 [#allocation2]   ;;  %s8128_s15 = scalar_lea.vmem %s13398_s8, %s9471_s17  }
 0x334   : >> { %s13597_s27 = smov %s13604_s14  ;;  %7990 = sbr.rel (!%p7987_p12) target bundleno = 775 (0x307), region = 118 }
 0x33b PF: > { %s13572_s18 = sand.u32 63, %s13602_s4   ;;  %s9994_s21 = sshll.u32 %s13404_s10, 8 }
 0x33c   : > { %s8133_s22 = scalar_lea.vmem %s11552_s12, %s9994_s21 [#allocation2]   ;;  %s8135_s23 = scalar_lea.vmem %s13398_s8, %s9994_s21  }
 0x33d   : > { %p9476_p13 = scmp.le.s32.totalorder %s13572_s18, 0 }
 0x33e   : > { %s11216_s24 = smov (!%p9476_p13), %s8135_s23   ;;  %s11220_s25 = smov (!%p9476_p13), %s8133_s22  }
 0x33f   : > { %8397 = sbr.rel (%p9476_p13) target bundleno = 848 (0x350), region = 123  ;;  %s11224_s26 = smov (!%p9476_p13), 0  }
 0x340   : > { %s11228_s28 = smov (!%p9476_p13), 0  }
 0x346 LB: >> { %v8145_v43 = vld [vmem:[%s11222_s25] sm:$0xf]  ;;  %s8147_s29 = sadd.s32 1, %s11226_s26  ;;  %s8139_s28 = sadd.s32 1, %s11230_s28   ;;  %s11230_s28 = sphi %s11228_s28, %s8139_s28   ;;  %s11226_s26 = sphi %s11224_s26, %s11225_s26   ;;  %s11222_s25 = sphi %s11220_s25, %s8152_s25   ;;  %s11218_s24 = sphi %s11216_s24, %s8153_s24  }
 0x347   : >> { %8146 = vst [vmem:[%s11218_s24] sm:$0xf] %v8145_v43  ;;  %p8148_p0 = scmp.ge.s32.totalorder %s8147_s29, %s13572_s18  ;;  %p8138_p1 = scmp.ge.s32.totalorder %s8139_s28, %s13572_s18 }
 0x349   : >> { %s13606_s29 = smov (%p8148_p0, %s8147_s29), 0  ;;  %8141 = sbr.rel (!%p8138_p1) target bundleno = 838 (0x346), region = 129 }
 0x34a   : >> { %s9477_s12 = sshll.u32 %s13606_s29, 2  ;;  %s11225_s26 = smov %s13606_s29  }
 0x34b   : >> { %s8152_s25 = scalar_lea.vmem %s8133_s22, %s9477_s12 [#allocation2]   ;;  %s8153_s24 = scalar_lea.vmem %s8135_s23, %s9477_s12  }
 0x350 PF: > { %p10_p2 = scmp.ge.s32.totalorder %s11268_s16, 5   ;;  %s13598_s12 = smov %s11194_s13 }
 0x351   : > { %s13599_s13 = smov %s11276_s19  ;;  %s13600_s14 = smov %s11268_s16 }
 0x352   :  { %12 = sbr.rel (!%p10_p2) target bundleno = 2 (0x2), region = 140 }

// kernel: simple_cnn_forward.4
= control target key start
LH: loop header
LB: loop body
LE: loop exit
PB: predicated region body
PF: predicated region fallthrough
CT: control target
= control target key end

     0   :  { %v1850_v0 = vmov 0.0   ;;  %vm1851_vm0 = vmmov 0   ;;  %vm466_vm1 = vcmask 1043456   ;;  %vm342_vm2 = vcmask 588800   ;;  %s2553_s1 = inlined_call_operand.vmem [shape: bf16[72,16], index: 1, kind: input, shape index: {}]   ;;  %s2554_s0 = inlined_call_operand.vmem [shape: bf16[648,72], index: 0, kind: input, shape index: {}]   ;;  %s2555_s2 = inlined_call_operand.vmem [shape: f32[1,16], index: 2, kind: input, shape index: {}]   ;;  %s2556_s3 = inlined_call_operand.vmem [shape: bf16[648,16], index: 3, kind: output, shape index: {}]  }
   0x1   :  { %1618 = vmatprep.subr.bf16.mxu0 %v1850_v0  ;;  %v1804_v1 = vld [vmem:[%s2553_s1] sm:$0xff]   ;;  %1792 = vmatprep.subr.bf16.mxu1 %v1850_v0  ;;  %v1805_v2 = vld [vmem:[%s2553_s1 + $0x8] sm:$0xff]   ;;  %v1806_v3 = vld [vmem:[%s2553_s1 + $0x10] sm:$0xff]   ;;  %vm1236_vm3 = vcmask 125952  }
   0x2   :  { %1628 = vmatprep.mubr.msk.bf16.mxu0 %vm1851_vm0, %v1850_v0  ;;  %1712 = vmatprep.mubr.msk.bf16.mxu1 %vm1851_vm0, %v1850_v0  ;;  %v1807_v4 = vld [vmem:[%s2553_s1 + $0x18] sm:$0xff]   ;;  %v1808_v5 = vld [vmem:[%s2553_s1 + $0x20] ss:$0 sps:$4 sm:$0xff]   ;;  %v1810_v8 = vld [vmem:[%s2554_s0 + $0xa8] sm:$0xff]  }
   0x3   :  { %1619 = vmatpush3.bf16.msra.mxu0 %v1804_v1  ;;  %1797 = vmatpush3.bf16.msra.mxu1 %v1804_v1  ;;  %v468_v6 = vsel %vm466_vm1, %v1808_v5, 0  ;;  %v1809_v7 = vld [vmem:[%s2554_s0] sm:$0xff]   ;;  %v1811_v9 = vld [vmem:[%s2554_s0 + $0x8] sm:$0xff]   ;;  %v1812_v10 = vld [vmem:[%s2554_s0 + $0xb0] sm:$0xff]  }
   0x4   :  { %1620 = vmatprep.subr.bf16.mxu0 %v1850_v0  ;;  %1793 = vmatprep.subr.bf16.mxu1 %v1850_v0  ;;  %v1813_v11 = vld [vmem:[%s2554_s0 + $0x10] sm:$0xff]   ;;  %v1814_v12 = vld [vmem:[%s2554_s0 + $0xb8] sm:$0xff]   ;;  %v1816_v14 = vld [vmem:[%s2554_s0 + $0xc0] sm:$0xff]  }
   0x5   :  { %v1815_v13 = vld [vmem:[%s2554_s0 + $0x18] sm:$0xff]   ;;  %v1817_v15 = vld [vmem:[%s2554_s0 + $0x20] sm:$0xff]   ;;  %v1818_v16 = vld [vmem:[%s2554_s0 + $0xc8] sm:$0xff]  }
   0x6   :  { %v1819_v17 = vld [vmem:[%s2554_s0 + $0x28] sm:$0xff]   ;;  %v1820_v18 = vld [vmem:[%s2554_s0 + $0xd0] sm:$0xff]   ;;  %v1822_v20 = vld [vmem:[%s2554_s0 + $0xd8] sm:$0xff]  }
   0x7   :  { %1621 = vmatpush3.bf16.msra.mxu0 %v1805_v2  ;;  %1798 = vmatpush3.bf16.msra.mxu1 %v1805_v2  ;;  %v1821_v19 = vld [vmem:[%s2554_s0 + $0x30] sm:$0xff]   ;;  %v1823_v21 = vld [vmem:[%s2554_s0 + $0x38] sm:$0xff]   ;;  %v1824_v22 = vld [vmem:[%s2554_s0 + $0xe0] sm:$0xff]  }
   0x8   :  { %1622 = vmatprep.subr.bf16.mxu0 %v1850_v0  ;;  %1794 = vmatprep.subr.bf16.mxu1 %v1850_v0  ;;  %v1825_v23 = vld [vmem:[%s2554_s0 + $0x40] sm:$0xff]   ;;  %v1826_v24 = vld [vmem:[%s2554_s0 + $0xe8] sm:$0xff]   ;;  %v1828_v26 = vld [vmem:[%s2554_s0 + $0xf0] sm:$0xff]  }
   0x9   :  { %v1827_v25 = vld [vmem:[%s2554_s0 + $0x48] sm:$0xff]   ;;  %v1829_v27 = vld [vmem:[%s2554_s0 + $0x50] sm:$0xff]   ;;  %v1830_v28 = vld [vmem:[%s2554_s0 + $0xf8] sm:$0xff]  }
   0xa   :  { %v1831_v29 = vld [vmem:[%s2554_s0 + $0x58] sm:$0xff]   ;;  %v1832_v30 = vld [vmem:[%s2554_s0 + $0x100] sm:$0xff]   ;;  %v1834_v32 = vld [vmem:[%s2554_s0 + $0x108] sm:$0xff]  }
   0xb   :  { %1623 = vmatpush3.bf16.msra.mxu0 %v1806_v3  ;;  %1799 = vmatpush3.bf16.msra.mxu1 %v1806_v3  ;;  %v1833_v31 = vld [vmem:[%s2554_s0 + $0x60] sm:$0xff]   ;;  %v1835_v33 = vld [vmem:[%s2554_s0 + $0x68] sm:$0xff]   ;;  %v1836_v34 = vld [vmem:[%s2554_s0 + $0x110] sm:$0xff]  }
   0xc   :  { %1624 = vmatprep.subr.bf16.mxu0 %v1850_v0  ;;  %1795 = vmatprep.subr.bf16.mxu1 %v1850_v0  ;;  %v1837_v35 = vld [vmem:[%s2554_s0 + $0x70] sm:$0xff]   ;;  %v1838_v36 = vld [vmem:[%s2554_s0 + $0x118] sm:$0xff]   ;;  %v1840_v38 = vld [vmem:[%s2554_s0 + $0x120] sm:$0xff]  }
   0xd   :  { %v1839_v37 = vld [vmem:[%s2554_s0 + $0x78] sm:$0xff]   ;;  %v1841_v39 = vld [vmem:[%s2554_s0 + $0x80] sm:$0xff]   ;;  %v1842_v40 = vld [vmem:[%s2554_s0 + $0x128] sm:$0xff]  }
   0xe   :  { %v1843_v41 = vld [vmem:[%s2554_s0 + $0x88] sm:$0xff]   ;;  %v1844_v42 = vld [vmem:[%s2554_s0 + $0x130] sm:$0xff]   ;;  %v1846_v44 = vld [vmem:[%s2554_s0 + $0x138] sm:$0xff]  }
   0xf   :  { %1625 = vmatpush3.bf16.msra.mxu0 %v1807_v4  ;;  %1800 = vmatpush3.bf16.msra.mxu1 %v1807_v4  ;;  %v1845_v43 = vld [vmem:[%s2554_s0 + $0x90] sm:$0xff]   ;;  %v1847_v45 = vld [vmem:[%s2554_s0 + $0x98] sm:$0xff]   ;;  %v1848_v46 = vld [vmem:[%s2554_s0 + $0x140] ss:$0 sps:$4 sm:$0xff]  }
  0x10   :  { %1626 = vmatprep.subr.bf16.mxu0 %v1850_v0  ;;  %1796 = vmatprep.subr.bf16.mxu1 %v1850_v0  ;;  %v1849_v47 = vld [vmem:[%s2554_s0 + $0xa0] sm:$0xff]  }
  0x11   :  { %v2146_v48 = vld [vmem:[%s2555_s2] ss:$0 sm:$0xff] }
  0x13   :  { %1627 = vmatpush3.bf16.msra.mxu0 %v468_v6  ;;  %1801 = vmatpush3.bf16.msra.mxu1 %v468_v6 }
  0x16   :  { %1629 = vmatmul.mubr.msk.bf16.vlgmr.msra.gmra.mrb[0].mxu0 %vm342_vm2, %v1809_v7  ;;  %1713 = vmatmul.mubr.msk.bf16.vlgmr.msra.gmra.mrb[0].mxu1 %vm342_vm2, %v1810_v8 }
  0x17   :  { %1632 = vmatprep.mubr.msk.bf16.mxu0 %vm1851_vm0, %v1850_v0  ;;  %1716 = vmatprep.mubr.msk.bf16.mxu1 %vm1851_vm0, %v1850_v0 }
  0x1e   :  { %1633 = vmatmul.mubr.msk.bf16.gmra.mrb[4].mxu0 %vm342_vm2, %v1811_v9  ;;  %1717 = vmatmul.mubr.msk.bf16.gmra.mrb[4].mxu1 %vm342_vm2, %v1812_v10 }
  0x1f   :  { %1636 = vmatprep.mubr.msk.bf16.mxu0 %vm1851_vm0, %v1850_v0  ;;  %1720 = vmatprep.mubr.msk.bf16.mxu1 %vm1851_vm0, %v1850_v0 }
  0x26   :  { %1637 = vmatmul.mubr.msk.bf16.gmra.mrb[8].mxu0 %vm342_vm2, %v1813_v11  ;;  %1721 = vmatmul.mubr.msk.bf16.gmra.mrb[8].mxu1 %vm342_vm2, %v1814_v12 }
  0x27   :  { %1640 = vmatprep.mubr.msk.bf16.mxu0 %vm1851_vm0, %v1850_v0  ;;  %1724 = vmatprep.mubr.msk.bf16.mxu1 %vm1851_vm0, %v1850_v0 }
  0x2e   :  { %1641 = vmatmul.mubr.msk.bf16.gmra.mrb[12].mxu0 %vm342_vm2, %v1815_v13  ;;  %1725 = vmatmul.mubr.msk.bf16.gmra.mrb[12].mxu1 %vm342_vm2, %v1816_v14 }
  0x2f   :  { %1644 = vmatprep.mubr.msk.bf16.mxu0 %vm1851_vm0, %v1850_v0  ;;  %1728 = vmatprep.mubr.msk.bf16.mxu1 %vm1851_vm0, %v1850_v0 }
  0x36   :  { %1645 = vmatmul.mubr.msk.bf16.gmra.mrb[16].mxu0 %vm342_vm2, %v1817_v15  ;;  %1729 = vmatmul.mubr.msk.bf16.gmra.mrb[16].mxu1 %vm342_vm2, %v1818_v16 }
  0x37   :  { %1648 = vmatprep.mubr.msk.bf16.mxu0 %vm1851_vm0, %v1850_v0  ;;  %1732 = vmatprep.mubr.msk.bf16.mxu1 %vm1851_vm0, %v1850_v0 }
  0x3e   :  { %1649 = vmatmul.mubr.msk.bf16.gmra.mrb[20].mxu0 %vm342_vm2, %v1819_v17  ;;  %1733 = vmatmul.mubr.msk.bf16.gmra.mrb[20].mxu1 %vm342_vm2, %v1820_v18 }
  0x3f   :  { %1652 = vmatprep.mubr.msk.bf16.mxu0 %vm1851_vm0, %v1850_v0  ;;  %1736 = vmatprep.mubr.msk.bf16.mxu1 %vm1851_vm0, %v1850_v0 }
  0x46   :  { %1653 = vmatmul.mubr.msk.bf16.gmra.mrb[24].mxu0 %vm342_vm2, %v1821_v19  ;;  %1737 = vmatmul.mubr.msk.bf16.gmra.mrb[24].mxu1 %vm342_vm2, %v1822_v20 }
  0x47   :  { %1656 = vmatprep.mubr.msk.bf16.mxu0 %vm1851_vm0, %v1850_v0  ;;  %1740 = vmatprep.mubr.msk.bf16.mxu1 %vm1851_vm0, %v1850_v0 }
  0x4e   :  { %1657 = vmatmul.mubr.msk.bf16.gmra.mrb[28].mxu0 %vm342_vm2, %v1823_v21  ;;  %1741 = vmatmul.mubr.msk.bf16.gmra.mrb[28].mxu1 %vm342_vm2, %v1824_v22 }
  0x4f   :  { %1660 = vmatprep.mubr.msk.bf16.mxu0 %vm1851_vm0, %v1850_v0  ;;  %1744 = vmatprep.mubr.msk.bf16.mxu1 %vm1851_vm0, %v1850_v0 }
  0x56   :  { %1661 = vmatmul.mubr.msk.bf16.gmra.mrb[32].mxu0 %vm342_vm2, %v1825_v23  ;;  %1745 = vmatmul.mubr.msk.bf16.gmra.mrb[32].mxu1 %vm342_vm2, %v1826_v24 }
  0x57   :  { %1664 = vmatprep.mubr.msk.bf16.mxu0 %vm1851_vm0, %v1850_v0  ;;  %1748 = vmatprep.mubr.msk.bf16.mxu1 %vm1851_vm0, %v1850_v0 }
  0x5e   :  { %1665 = vmatmul.mubr.msk.bf16.gmra.mrb[36].mxu0 %vm342_vm2, %v1827_v25  ;;  %1749 = vmatmul.mubr.msk.bf16.gmra.mrb[36].mxu1 %vm342_vm2, %v1828_v26 }
  0x5f   :  { %1668 = vmatprep.mubr.msk.bf16.mxu0 %vm1851_vm0, %v1850_v0  ;;  %1752 = vmatprep.mubr.msk.bf16.mxu1 %vm1851_vm0, %v1850_v0 }
  0x66   :  { %1669 = vmatmul.mubr.msk.bf16.gmra.mrb[40].mxu0 %vm342_vm2, %v1829_v27  ;;  %1753 = vmatmul.mubr.msk.bf16.gmra.mrb[40].mxu1 %vm342_vm2, %v1830_v28 }
  0x67   :  { %1672 = vmatprep.mubr.msk.bf16.mxu0 %vm1851_vm0, %v1850_v0  ;;  %1756 = vmatprep.mubr.msk.bf16.mxu1 %vm1851_vm0, %v1850_v0 }
  0x6e   :  { %1673 = vmatmul.mubr.msk.bf16.gmra.mrb[44].mxu0 %vm342_vm2, %v1831_v29  ;;  %1757 = vmatmul.mubr.msk.bf16.gmra.mrb[44].mxu1 %vm342_vm2, %v1832_v30 }
  0x6f   :  { %1676 = vmatprep.mubr.msk.bf16.mxu0 %vm1851_vm0, %v1850_v0  ;;  %1760 = vmatprep.mubr.msk.bf16.mxu1 %vm1851_vm0, %v1850_v0 }
  0x76   :  { %1677 = vmatmul.mubr.msk.bf16.gmra.mrb[48].mxu0 %vm342_vm2, %v1833_v31  ;;  %1761 = vmatmul.mubr.msk.bf16.gmra.mrb[48].mxu1 %vm342_vm2, %v1834_v32 }
  0x77   :  { %1680 = vmatprep.mubr.msk.bf16.mxu0 %vm1851_vm0, %v1850_v0  ;;  %1764 = vmatprep.mubr.msk.bf16.mxu1 %vm1851_vm0, %v1850_v0 }
  0x7e   :  { %1681 = vmatmul.mubr.msk.bf16.gmra.mrb[52].mxu0 %vm342_vm2, %v1835_v33  ;;  %1765 = vmatmul.mubr.msk.bf16.gmra.mrb[52].mxu1 %vm342_vm2, %v1836_v34 }
  0x7f   :  { %1684 = vmatprep.mubr.msk.bf16.mxu0 %vm1851_vm0, %v1850_v0  ;;  %1768 = vmatprep.mubr.msk.bf16.mxu1 %vm1851_vm0, %v1850_v0 }
  0x86   :  { %1685 = vmatmul.mubr.msk.bf16.gmra.mrb[56].mxu0 %vm342_vm2, %v1837_v35  ;;  %1769 = vmatmul.mubr.msk.bf16.gmra.mrb[56].mxu1 %vm342_vm2, %v1838_v36 }
  0x87   :  { %1688 = vmatprep.mubr.msk.bf16.mxu0 %vm1851_vm0, %v1850_v0  ;;  %1772 = vmatprep.mubr.msk.bf16.mxu1 %vm1851_vm0, %v1850_v0 }
  0x8e   :  { %1689 = vmatmul.mubr.msk.bf16.gmra.mrb[60].mxu0 %vm342_vm2, %v1839_v37  ;;  %1773 = vmatmul.mubr.msk.bf16.gmra.mrb[60].mxu1 %vm342_vm2, %v1840_v38 }
  0x8f   :  { %1692 = vmatprep.mubr.msk.bf16.mxu0 %vm1851_vm0, %v1850_v0  ;;  %1776 = vmatprep.mubr.msk.bf16.mxu1 %vm1851_vm0, %v1850_v0 }
  0x96   :  { %1693 = vmatmul.mubr.msk.bf16.gmra.mrb[64].mxu0 %vm342_vm2, %v1841_v39  ;;  %1777 = vmatmul.mubr.msk.bf16.gmra.mrb[64].mxu1 %vm342_vm2, %v1842_v40 }
  0x97   :  { %1696 = vmatprep.mubr.msk.bf16.mxu0 %vm1851_vm0, %v1850_v0  ;;  %1780 = vmatprep.mubr.msk.bf16.mxu1 %vm1851_vm0, %v1850_v0 }
  0x9e   :  { %1697 = vmatmul.mubr.msk.bf16.gmra.mrb[68].mxu0 %vm342_vm2, %v1843_v41  ;;  %1781 = vmatmul.mubr.msk.bf16.gmra.mrb[68].mxu1 %vm342_vm2, %v1844_v42 }
  0x9f   :  { %1700 = vmatprep.mubr.msk.bf16.mxu0 %vm1851_vm0, %v1850_v0  ;;  %1784 = vmatprep.mubr.msk.bf16.mxu1 %vm1851_vm0, %v1850_v0 }
  0xa6   :  { %1701 = vmatmul.mubr.msk.bf16.gmra.mrb[72].mxu0 %vm342_vm2, %v1845_v43  ;;  %1785 = vmatmul.mubr.msk.bf16.gmra.mrb[72].mxu1 %vm342_vm2, %v1846_v44 }
  0xa7   :  { %1704 = vmatprep.mubr.msk.bf16.mxu0 %vm1851_vm0, %v1850_v0  ;;  %1788 = vmatprep.mubr.msk.bf16.mxu1 %vm1851_vm0, %v1850_v0 }
  0xae   :  { %1705 = vmatmul.mubr.msk.bf16.gmra.mrb[76].mxu0 %vm342_vm2, %v1847_v45  ;;  %1789 = vmatmul.mubr.msk.bf16.gmra.mrb[76].mxu1 %vm342_vm2, %v1848_v46 }
  0xaf   :  { %1708 = vmatprep.mubr.msk.bf16.mxu0 %vm1851_vm0, %v1850_v0 }
  0xb6   :  { %1709 = vmatmul.mubr.msk.bf16.gmra.mrb[80].mxu0 %vm342_vm2, %v1849_v47 }
  0xe9   :  { %v504_v49 = vpop.f32.mrb[0].mxu0  ;;  %v672_v50 = vpop.f32.mrb[0].mxu1 }
  0xea   :  { %v505_v51 = vadd.f32 %v2146_v48, %v504_v49  ;;  %v1630_v52 = vpop.f32.mrb[1].mxu0  ;;  %v673_v53 = vadd.f32 %v2146_v48, %v672_v50  ;;  %v1714_v54 = vpop.f32.mrb[1].mxu1 }
  0xeb   :  { %v507_v55 = vpop.f32.mrb[2].mxu0  ;;  %v675_v56 = vpop.f32.mrb[2].mxu1 }
  0xec   :  { %v830_v57 = vmax.f32 %v505_v51, 0.0  ;;  %v508_v58 = vadd.f32 %v2146_v48, %v507_v55  ;;  %v1631_v59 = vpop.f32.mrb[3].mxu0  ;;  %v872_v60 = vmax.f32 %v673_v53, 0.0  ;;  %v676_v61 = vadd.f32 %v2146_v48, %v675_v56  ;;  %v1715_v62 = vpop.f32.mrb[3].mxu1 }
  0xee   :  { %v1491_v63 = vpack.c.bf16 %v830_v57, %v830_v57  ;;  %v831_v0 = vmax.f32 %v508_v58, 0.0  ;;  %v1533_v1 = vpack.c.bf16 %v872_v60, %v872_v60  ;;  %v873_v2 = vmax.f32 %v676_v61, 0.0 }
  0xf0   :  { %1237 = vst.msk [vmem:[%s2556_s3] sm:$0xf] %vm1236_vm3, %v1491_v63  ;;  %v1492_v3 = vpack.c.bf16 %v831_v0, %v831_v0  ;;  %1279 = vst.msk [vmem:[%s2556_s3 + $0xa8] sm:$0xf] %vm1236_vm3, %v1533_v1  ;;  %v1534_v4 = vpack.c.bf16 %v873_v2, %v873_v2 }
  0xf1   :  { %v512_v5 = vpop.f32.mrb[4].mxu0  ;;  %v680_v6 = vpop.f32.mrb[4].mxu1 }
  0xf2   :  { %1238 = vst.msk [vmem:[%s2556_s3 + $0x4] sm:$0xf] %vm1236_vm3, %v1492_v3  ;;  %v513_v7 = vadd.f32 %v2146_v48, %v512_v5  ;;  %v1634_v8 = vpop.f32.mrb[5].mxu0  ;;  %1280 = vst.msk [vmem:[%s2556_s3 + $0xac] sm:$0xf] %vm1236_vm3, %v1534_v4  ;;  %v681_v9 = vadd.f32 %v2146_v48, %v680_v6  ;;  %v1718_v10 = vpop.f32.mrb[5].mxu1 }
  0xf3   :  { %v515_v11 = vpop.f32.mrb[6].mxu0  ;;  %v683_v12 = vpop.f32.mrb[6].mxu1 }
  0xf4   :  { %v832_v13 = vmax.f32 %v513_v7, 0.0  ;;  %v516_v14 = vadd.f32 %v2146_v48, %v515_v11  ;;  %v1635_v15 = vpop.f32.mrb[7].mxu0  ;;  %v874_v16 = vmax.f32 %v681_v9, 0.0  ;;  %v684_v17 = vadd.f32 %v2146_v48, %v683_v12  ;;  %v1719_v18 = vpop.f32.mrb[7].mxu1 }
  0xf6   :  { %v1493_v19 = vpack.c.bf16 %v832_v13, %v832_v13  ;;  %v833_v20 = vmax.f32 %v516_v14, 0.0  ;;  %v1535_v21 = vpack.c.bf16 %v874_v16, %v874_v16  ;;  %v875_v22 = vmax.f32 %v684_v17, 0.0 }
  0xf8   :  { %1239 = vst.msk [vmem:[%s2556_s3 + $0x8] sm:$0xf] %vm1236_vm3, %v1493_v19  ;;  %v1494_v23 = vpack.c.bf16 %v833_v20, %v833_v20  ;;  %1281 = vst.msk [vmem:[%s2556_s3 + $0xb0] sm:$0xf] %vm1236_vm3, %v1535_v21  ;;  %v1536_v24 = vpack.c.bf16 %v875_v22, %v875_v22 }
  0xf9   :  { %v520_v25 = vpop.f32.mrb[8].mxu0  ;;  %v688_v26 = vpop.f32.mrb[8].mxu1 }
  0xfa   :  { %1240 = vst.msk [vmem:[%s2556_s3 + $0xc] sm:$0xf] %vm1236_vm3, %v1494_v23  ;;  %v521_v27 = vadd.f32 %v2146_v48, %v520_v25  ;;  %v1638_v28 = vpop.f32.mrb[9].mxu0  ;;  %1282 = vst.msk [vmem:[%s2556_s3 + $0xb4] sm:$0xf] %vm1236_vm3, %v1536_v24  ;;  %v689_v29 = vadd.f32 %v2146_v48, %v688_v26  ;;  %v1722_v30 = vpop.f32.mrb[9].mxu1 }
  0xfb   :  { %v523_v31 = vpop.f32.mrb[10].mxu0  ;;  %v691_v32 = vpop.f32.mrb[10].mxu1 }
  0xfc   :  { %v834_v33 = vmax.f32 %v521_v27, 0.0  ;;  %v524_v34 = vadd.f32 %v2146_v48, %v523_v31  ;;  %v1639_v35 = vpop.f32.mrb[11].mxu0  ;;  %v876_v36 = vmax.f32 %v689_v29, 0.0  ;;  %v692_v37 = vadd.f32 %v2146_v48, %v691_v32  ;;  %v1723_v38 = vpop.f32.mrb[11].mxu1 }
  0xfe   :  { %v1495_v39 = vpack.c.bf16 %v834_v33, %v834_v33  ;;  %v835_v40 = vmax.f32 %v524_v34, 0.0  ;;  %v1537_v41 = vpack.c.bf16 %v876_v36, %v876_v36  ;;  %v877_v42 = vmax.f32 %v692_v37, 0.0 }
 0x100   :  { %1241 = vst.msk [vmem:[%s2556_s3 + $0x10] sm:$0xf] %vm1236_vm3, %v1495_v39  ;;  %v1496_v43 = vpack.c.bf16 %v835_v40, %v835_v40  ;;  %1283 = vst.msk [vmem:[%s2556_s3 + $0xb8] sm:$0xf] %vm1236_vm3, %v1537_v41  ;;  %v1538_v44 = vpack.c.bf16 %v877_v42, %v877_v42 }
 0x101   :  { %v528_v45 = vpop.f32.mrb[12].mxu0  ;;  %v696_v46 = vpop.f32.mrb[12].mxu1 }
 0x102   :  { %1242 = vst.msk [vmem:[%s2556_s3 + $0x14] sm:$0xf] %vm1236_vm3, %v1496_v43  ;;  %v529_v47 = vadd.f32 %v2146_v48, %v528_v45  ;;  %v1642_v49 = vpop.f32.mrb[13].mxu0  ;;  %1284 = vst.msk [vmem:[%s2556_s3 + $0xbc] sm:$0xf] %vm1236_vm3, %v1538_v44  ;;  %v697_v50 = vadd.f32 %v2146_v48, %v696_v46  ;;  %v1726_v51 = vpop.f32.mrb[13].mxu1 }
 0x103   :  { %v531_v52 = vpop.f32.mrb[14].mxu0  ;;  %v699_v53 = vpop.f32.mrb[14].mxu1 }
 0x104   :  { %v836_v54 = vmax.f32 %v529_v47, 0.0  ;;  %v532_v55 = vadd.f32 %v2146_v48, %v531_v52  ;;  %v1643_v56 = vpop.f32.mrb[15].mxu0  ;;  %v878_v57 = vmax.f32 %v697_v50, 0.0  ;;  %v700_v58 = vadd.f32 %v2146_v48, %v699_v53  ;;  %v1727_v59 = vpop.f32.mrb[15].mxu1 }
 0x106   :  { %v1497_v60 = vpack.c.bf16 %v836_v54, %v836_v54  ;;  %v837_v61 = vmax.f32 %v532_v55, 0.0  ;;  %v1539_v62 = vpack.c.bf16 %v878_v57, %v878_v57  ;;  %v879_v63 = vmax.f32 %v700_v58, 0.0 }
 0x108   :  { %1243 = vst.msk [vmem:[%s2556_s3 + $0x18] sm:$0xf] %vm1236_vm3, %v1497_v60  ;;  %v1498_v0 = vpack.c.bf16 %v837_v61, %v837_v61  ;;  %1285 = vst.msk [vmem:[%s2556_s3 + $0xc0] sm:$0xf] %vm1236_vm3, %v1539_v62  ;;  %v1540_v1 = vpack.c.bf16 %v879_v63, %v879_v63 }
 0x109   :  { %v536_v2 = vpop.f32.mrb[16].mxu0  ;;  %v704_v3 = vpop.f32.mrb[16].mxu1 }
 0x10a   :  { %1244 = vst.msk [vmem:[%s2556_s3 + $0x1c] sm:$0xf] %vm1236_vm3, %v1498_v0  ;;  %v537_v4 = vadd.f32 %v2146_v48, %v536_v2  ;;  %v1646_v5 = vpop.f32.mrb[17].mxu0  ;;  %1286 = vst.msk [vmem:[%s2556_s3 + $0xc4] sm:$0xf] %vm1236_vm3, %v1540_v1  ;;  %v705_v6 = vadd.f32 %v2146_v48, %v704_v3  ;;  %v1730_v7 = vpop.f32.mrb[17].mxu1 }
 0x10b   :  { %v539_v8 = vpop.f32.mrb[18].mxu0  ;;  %v707_v9 = vpop.f32.mrb[18].mxu1 }
 0x10c   :  { %v838_v10 = vmax.f32 %v537_v4, 0.0  ;;  %v540_v11 = vadd.f32 %v2146_v48, %v539_v8  ;;  %v1647_v12 = vpop.f32.mrb[19].mxu0  ;;  %v880_v13 = vmax.f32 %v705_v6, 0.0  ;;  %v708_v14 = vadd.f32 %v2146_v48, %v707_v9  ;;  %v1731_v15 = vpop.f32.mrb[19].mxu1 }
 0x10e   :  { %v1499_v16 = vpack.c.bf16 %v838_v10, %v838_v10  ;;  %v839_v17 = vmax.f32 %v540_v11, 0.0  ;;  %v1541_v18 = vpack.c.bf16 %v880_v13, %v880_v13  ;;  %v881_v19 = vmax.f32 %v708_v14, 0.0 }
 0x110   :  { %1245 = vst.msk [vmem:[%s2556_s3 + $0x20] sm:$0xf] %vm1236_vm3, %v1499_v16  ;;  %v1500_v20 = vpack.c.bf16 %v839_v17, %v839_v17  ;;  %1287 = vst.msk [vmem:[%s2556_s3 + $0xc8] sm:$0xf] %vm1236_vm3, %v1541_v18  ;;  %v1542_v21 = vpack.c.bf16 %v881_v19, %v881_v19 }
 0x111   :  { %v544_v22 = vpop.f32.mrb[20].mxu0  ;;  %v712_v23 = vpop.f32.mrb[20].mxu1 }
 0x112   :  { %1246 = vst.msk [vmem:[%s2556_s3 + $0x24] sm:$0xf] %vm1236_vm3, %v1500_v20  ;;  %v545_v24 = vadd.f32 %v2146_v48, %v544_v22  ;;  %v1650_v25 = vpop.f32.mrb[21].mxu0  ;;  %1288 = vst.msk [vmem:[%s2556_s3 + $0xcc] sm:$0xf] %vm1236_vm3, %v1542_v21  ;;  %v713_v26 = vadd.f32 %v2146_v48, %v712_v23  ;;  %v1734_v27 = vpop.f32.mrb[21].mxu1 }
 0x113   :  { %v547_v28 = vpop.f32.mrb[22].mxu0  ;;  %v715_v29 = vpop.f32.mrb[22].mxu1 }
 0x114   :  { %v840_v30 = vmax.f32 %v545_v24, 0.0  ;;  %v548_v31 = vadd.f32 %v2146_v48, %v547_v28  ;;  %v1651_v32 = vpop.f32.mrb[23].mxu0  ;;  %v882_v33 = vmax.f32 %v713_v26, 0.0  ;;  %v716_v34 = vadd.f32 %v2146_v48, %v715_v29  ;;  %v1735_v35 = vpop.f32.mrb[23].mxu1 }
 0x116   :  { %v1501_v36 = vpack.c.bf16 %v840_v30, %v840_v30  ;;  %v841_v37 = vmax.f32 %v548_v31, 0.0  ;;  %v1543_v38 = vpack.c.bf16 %v882_v33, %v882_v33  ;;  %v883_v39 = vmax.f32 %v716_v34, 0.0 }
 0x118   :  { %1247 = vst.msk [vmem:[%s2556_s3 + $0x28] sm:$0xf] %vm1236_vm3, %v1501_v36  ;;  %v1502_v40 = vpack.c.bf16 %v841_v37, %v841_v37  ;;  %1289 = vst.msk [vmem:[%s2556_s3 + $0xd0] sm:$0xf] %vm1236_vm3, %v1543_v38  ;;  %v1544_v41 = vpack.c.bf16 %v883_v39, %v883_v39 }
 0x119   :  { %v552_v42 = vpop.f32.mrb[24].mxu0  ;;  %v720_v43 = vpop.f32.mrb[24].mxu1 }
 0x11a   :  { %1248 = vst.msk [vmem:[%s2556_s3 + $0x2c] sm:$0xf] %vm1236_vm3, %v1502_v40  ;;  %v553_v44 = vadd.f32 %v2146_v48, %v552_v42  ;;  %v1654_v45 = vpop.f32.mrb[25].mxu0  ;;  %1290 = vst.msk [vmem:[%s2556_s3 + $0xd4] sm:$0xf] %vm1236_vm3, %v1544_v41  ;;  %v721_v46 = vadd.f32 %v2146_v48, %v720_v43  ;;  %v1738_v47 = vpop.f32.mrb[25].mxu1 }
 0x11b   :  { %v555_v49 = vpop.f32.mrb[26].mxu0  ;;  %v723_v50 = vpop.f32.mrb[26].mxu1 }
 0x11c   :  { %v842_v51 = vmax.f32 %v553_v44, 0.0  ;;  %v556_v52 = vadd.f32 %v2146_v48, %v555_v49  ;;  %v1655_v53 = vpop.f32.mrb[27].mxu0  ;;  %v884_v54 = vmax.f32 %v721_v46, 0.0  ;;  %v724_v55 = vadd.f32 %v2146_v48, %v723_v50  ;;  %v1739_v56 = vpop.f32.mrb[27].mxu1 }
 0x11e   :  { %v1503_v57 = vpack.c.bf16 %v842_v51, %v842_v51  ;;  %v843_v58 = vmax.f32 %v556_v52, 0.0  ;;  %v1545_v59 = vpack.c.bf16 %v884_v54, %v884_v54  ;;  %v885_v60 = vmax.f32 %v724_v55, 0.0 }
 0x120   :  { %1249 = vst.msk [vmem:[%s2556_s3 + $0x30] sm:$0xf] %vm1236_vm3, %v1503_v57  ;;  %v1504_v61 = vpack.c.bf16 %v843_v58, %v843_v58  ;;  %1291 = vst.msk [vmem:[%s2556_s3 + $0xd8] sm:$0xf] %vm1236_vm3, %v1545_v59  ;;  %v1546_v62 = vpack.c.bf16 %v885_v60, %v885_v60 }
 0x121   :  { %v560_v63 = vpop.f32.mrb[28].mxu0  ;;  %v728_v0 = vpop.f32.mrb[28].mxu1 }
 0x122   :  { %1250 = vst.msk [vmem:[%s2556_s3 + $0x34] sm:$0xf] %vm1236_vm3, %v1504_v61  ;;  %v561_v1 = vadd.f32 %v2146_v48, %v560_v63  ;;  %v1658_v2 = vpop.f32.mrb[29].mxu0  ;;  %1292 = vst.msk [vmem:[%s2556_s3 + $0xdc] sm:$0xf] %vm1236_vm3, %v1546_v62  ;;  %v729_v3 = vadd.f32 %v2146_v48, %v728_v0  ;;  %v1742_v4 = vpop.f32.mrb[29].mxu1 }
 0x123   :  { %v563_v5 = vpop.f32.mrb[30].mxu0  ;;  %v731_v6 = vpop.f32.mrb[30].mxu1 }
 0x124   :  { %v844_v7 = vmax.f32 %v561_v1, 0.0  ;;  %v564_v8 = vadd.f32 %v2146_v48, %v563_v5  ;;  %v1659_v9 = vpop.f32.mrb[31].mxu0  ;;  %v886_v10 = vmax.f32 %v729_v3, 0.0  ;;  %v732_v11 = vadd.f32 %v2146_v48, %v731_v6  ;;  %v1743_v12 = vpop.f32.mrb[31].mxu1 }
 0x126   :  { %v1505_v13 = vpack.c.bf16 %v844_v7, %v844_v7  ;;  %v845_v14 = vmax.f32 %v564_v8, 0.0  ;;  %v1547_v15 = vpack.c.bf16 %v886_v10, %v886_v10  ;;  %v887_v16 = vmax.f32 %v732_v11, 0.0 }
 0x128   :  { %1251 = vst.msk [vmem:[%s2556_s3 + $0x38] sm:$0xf] %vm1236_vm3, %v1505_v13  ;;  %v1506_v17 = vpack.c.bf16 %v845_v14, %v845_v14  ;;  %1293 = vst.msk [vmem:[%s2556_s3 + $0xe0] sm:$0xf] %vm1236_vm3, %v1547_v15  ;;  %v1548_v18 = vpack.c.bf16 %v887_v16, %v887_v16 }
 0x129   :  { %v568_v19 = vpop.f32.mrb[32].mxu0  ;;  %v736_v20 = vpop.f32.mrb[32].mxu1 }
 0x12a   :  { %1252 = vst.msk [vmem:[%s2556_s3 + $0x3c] sm:$0xf] %vm1236_vm3, %v1506_v17  ;;  %v569_v21 = vadd.f32 %v2146_v48, %v568_v19  ;;  %v1662_v22 = vpop.f32.mrb[33].mxu0  ;;  %1294 = vst.msk [vmem:[%s2556_s3 + $0xe4] sm:$0xf] %vm1236_vm3, %v1548_v18  ;;  %v737_v23 = vadd.f32 %v2146_v48, %v736_v20  ;;  %v1746_v24 = vpop.f32.mrb[33].mxu1 }
 0x12b   :  { %v571_v25 = vpop.f32.mrb[34].mxu0  ;;  %v739_v26 = vpop.f32.mrb[34].mxu1 }
 0x12c   :  { %v846_v27 = vmax.f32 %v569_v21, 0.0  ;;  %v572_v28 = vadd.f32 %v2146_v48, %v571_v25  ;;  %v1663_v29 = vpop.f32.mrb[35].mxu0  ;;  %v888_v30 = vmax.f32 %v737_v23, 0.0  ;;  %v740_v31 = vadd.f32 %v2146_v48, %v739_v26  ;;  %v1747_v32 = vpop.f32.mrb[35].mxu1 }
 0x12e   :  { %v1507_v33 = vpack.c.bf16 %v846_v27, %v846_v27  ;;  %v847_v34 = vmax.f32 %v572_v28, 0.0  ;;  %v1549_v35 = vpack.c.bf16 %v888_v30, %v888_v30  ;;  %v889_v36 = vmax.f32 %v740_v31, 0.0 }
 0x130   :  { %1253 = vst.msk [vmem:[%s2556_s3 + $0x40] sm:$0xf] %vm1236_vm3, %v1507_v33  ;;  %v1508_v37 = vpack.c.bf16 %v847_v34, %v847_v34  ;;  %1295 = vst.msk [vmem:[%s2556_s3 + $0xe8] sm:$0xf] %vm1236_vm3, %v1549_v35  ;;  %v1550_v38 = vpack.c.bf16 %v889_v36, %v889_v36 }
 0x131   :  { %v576_v39 = vpop.f32.mrb[36].mxu0  ;;  %v744_v40 = vpop.f32.mrb[36].mxu1 }
 0x132   :  { %1254 = vst.msk [vmem:[%s2556_s3 + $0x44] sm:$0xf] %vm1236_vm3, %v1508_v37  ;;  %v577_v41 = vadd.f32 %v2146_v48, %v576_v39  ;;  %v1666_v42 = vpop.f32.mrb[37].mxu0  ;;  %1296 = vst.msk [vmem:[%s2556_s3 + $0xec] sm:$0xf] %vm1236_vm3, %v1550_v38  ;;  %v745_v43 = vadd.f32 %v2146_v48, %v744_v40  ;;  %v1750_v44 = vpop.f32.mrb[37].mxu1 }
 0x133   :  { %v579_v45 = vpop.f32.mrb[38].mxu0  ;;  %v747_v46 = vpop.f32.mrb[38].mxu1 }
 0x134   :  { %v848_v47 = vmax.f32 %v577_v41, 0.0  ;;  %v580_v49 = vadd.f32 %v2146_v48, %v579_v45  ;;  %v1667_v50 = vpop.f32.mrb[39].mxu0  ;;  %v890_v51 = vmax.f32 %v745_v43, 0.0  ;;  %v748_v52 = vadd.f32 %v2146_v48, %v747_v46  ;;  %v1751_v53 = vpop.f32.mrb[39].mxu1 }
 0x136   :  { %v1509_v54 = vpack.c.bf16 %v848_v47, %v848_v47  ;;  %v849_v55 = vmax.f32 %v580_v49, 0.0  ;;  %v1551_v56 = vpack.c.bf16 %v890_v51, %v890_v51  ;;  %v891_v57 = vmax.f32 %v748_v52, 0.0 }
 0x138   :  { %1255 = vst.msk [vmem:[%s2556_s3 + $0x48] sm:$0xf] %vm1236_vm3, %v1509_v54  ;;  %v1510_v58 = vpack.c.bf16 %v849_v55, %v849_v55  ;;  %1297 = vst.msk [vmem:[%s2556_s3 + $0xf0] sm:$0xf] %vm1236_vm3, %v1551_v56  ;;  %v1552_v59 = vpack.c.bf16 %v891_v57, %v891_v57 }
 0x139   :  { %v584_v60 = vpop.f32.mrb[40].mxu0  ;;  %v752_v61 = vpop.f32.mrb[40].mxu1 }
 0x13a   :  { %1256 = vst.msk [vmem:[%s2556_s3 + $0x4c] sm:$0xf] %vm1236_vm3, %v1510_v58  ;;  %v585_v62 = vadd.f32 %v2146_v48, %v584_v60  ;;  %v1670_v63 = vpop.f32.mrb[41].mxu0  ;;  %1298 = vst.msk [vmem:[%s2556_s3 + $0xf4] sm:$0xf] %vm1236_vm3, %v1552_v59  ;;  %v753_v0 = vadd.f32 %v2146_v48, %v752_v61  ;;  %v1754_v1 = vpop.f32.mrb[41].mxu1 }
 0x13b   :  { %v587_v2 = vpop.f32.mrb[42].mxu0  ;;  %v755_v3 = vpop.f32.mrb[42].mxu1 }
 0x13c   :  { %v850_v4 = vmax.f32 %v585_v62, 0.0  ;;  %v588_v5 = vadd.f32 %v2146_v48, %v587_v2  ;;  %v1671_v6 = vpop.f32.mrb[43].mxu0  ;;  %v892_v7 = vmax.f32 %v753_v0, 0.0  ;;  %v756_v8 = vadd.f32 %v2146_v48, %v755_v3  ;;  %v1755_v9 = vpop.f32.mrb[43].mxu1 }
 0x13e   :  { %v1511_v10 = vpack.c.bf16 %v850_v4, %v850_v4  ;;  %v851_v11 = vmax.f32 %v588_v5, 0.0  ;;  %v1553_v12 = vpack.c.bf16 %v892_v7, %v892_v7  ;;  %v893_v13 = vmax.f32 %v756_v8, 0.0 }
 0x140   :  { %1257 = vst.msk [vmem:[%s2556_s3 + $0x50] sm:$0xf] %vm1236_vm3, %v1511_v10  ;;  %v1512_v14 = vpack.c.bf16 %v851_v11, %v851_v11  ;;  %1299 = vst.msk [vmem:[%s2556_s3 + $0xf8] sm:$0xf] %vm1236_vm3, %v1553_v12  ;;  %v1554_v15 = vpack.c.bf16 %v893_v13, %v893_v13 }
 0x141   :  { %v592_v16 = vpop.f32.mrb[44].mxu0  ;;  %v760_v17 = vpop.f32.mrb[44].mxu1 }
 0x142   :  { %1258 = vst.msk [vmem:[%s2556_s3 + $0x54] sm:$0xf] %vm1236_vm3, %v1512_v14  ;;  %v593_v18 = vadd.f32 %v2146_v48, %v592_v16  ;;  %v1674_v19 = vpop.f32.mrb[45].mxu0  ;;  %1300 = vst.msk [vmem:[%s2556_s3 + $0xfc] sm:$0xf] %vm1236_vm3, %v1554_v15  ;;  %v761_v20 = vadd.f32 %v2146_v48, %v760_v17  ;;  %v1758_v21 = vpop.f32.mrb[45].mxu1 }
 0x143   :  { %v595_v22 = vpop.f32.mrb[46].mxu0  ;;  %v763_v23 = vpop.f32.mrb[46].mxu1 }
 0x144   :  { %v852_v24 = vmax.f32 %v593_v18, 0.0  ;;  %v596_v25 = vadd.f32 %v2146_v48, %v595_v22  ;;  %v1675_v26 = vpop.f32.mrb[47].mxu0  ;;  %v894_v27 = vmax.f32 %v761_v20, 0.0  ;;  %v764_v28 = vadd.f32 %v2146_v48, %v763_v23  ;;  %v1759_v29 = vpop.f32.mrb[47].mxu1 }
 0x146   :  { %v1513_v30 = vpack.c.bf16 %v852_v24, %v852_v24  ;;  %v853_v31 = vmax.f32 %v596_v25, 0.0  ;;  %v1555_v32 = vpack.c.bf16 %v894_v27, %v894_v27  ;;  %v895_v33 = vmax.f32 %v764_v28, 0.0 }
 0x148   :  { %1259 = vst.msk [vmem:[%s2556_s3 + $0x58] sm:$0xf] %vm1236_vm3, %v1513_v30  ;;  %v1514_v34 = vpack.c.bf16 %v853_v31, %v853_v31  ;;  %1301 = vst.msk [vmem:[%s2556_s3 + $0x100] sm:$0xf] %vm1236_vm3, %v1555_v32  ;;  %v1556_v35 = vpack.c.bf16 %v895_v33, %v895_v33 }
 0x149   :  { %v600_v36 = vpop.f32.mrb[48].mxu0  ;;  %v768_v37 = vpop.f32.mrb[48].mxu1 }
 0x14a   :  { %1260 = vst.msk [vmem:[%s2556_s3 + $0x5c] sm:$0xf] %vm1236_vm3, %v1514_v34  ;;  %v601_v38 = vadd.f32 %v2146_v48, %v600_v36  ;;  %v1678_v39 = vpop.f32.mrb[49].mxu0  ;;  %1302 = vst.msk [vmem:[%s2556_s3 + $0x104] sm:$0xf] %vm1236_vm3, %v1556_v35  ;;  %v769_v40 = vadd.f32 %v2146_v48, %v768_v37  ;;  %v1762_v41 = vpop.f32.mrb[49].mxu1 }
 0x14b   :  { %v603_v42 = vpop.f32.mrb[50].mxu0  ;;  %v771_v43 = vpop.f32.mrb[50].mxu1 }
 0x14c   :  { %v854_v44 = vmax.f32 %v601_v38, 0.0  ;;  %v604_v45 = vadd.f32 %v2146_v48, %v603_v42  ;;  %v1679_v46 = vpop.f32.mrb[51].mxu0  ;;  %v896_v47 = vmax.f32 %v769_v40, 0.0  ;;  %v772_v49 = vadd.f32 %v2146_v48, %v771_v43  ;;  %v1763_v50 = vpop.f32.mrb[51].mxu1 }
 0x14e   :  { %v1515_v51 = vpack.c.bf16 %v854_v44, %v854_v44  ;;  %v855_v52 = vmax.f32 %v604_v45, 0.0  ;;  %v1557_v53 = vpack.c.bf16 %v896_v47, %v896_v47  ;;  %v897_v54 = vmax.f32 %v772_v49, 0.0 }
 0x150   :  { %1261 = vst.msk [vmem:[%s2556_s3 + $0x60] sm:$0xf] %vm1236_vm3, %v1515_v51  ;;  %v1516_v55 = vpack.c.bf16 %v855_v52, %v855_v52  ;;  %1303 = vst.msk [vmem:[%s2556_s3 + $0x108] sm:$0xf] %vm1236_vm3, %v1557_v53  ;;  %v1558_v56 = vpack.c.bf16 %v897_v54, %v897_v54 }
 0x151   :  { %v608_v57 = vpop.f32.mrb[52].mxu0  ;;  %v776_v58 = vpop.f32.mrb[52].mxu1 }
 0x152   :  { %1262 = vst.msk [vmem:[%s2556_s3 + $0x64] sm:$0xf] %vm1236_vm3, %v1516_v55  ;;  %v609_v59 = vadd.f32 %v2146_v48, %v608_v57  ;;  %v1682_v60 = vpop.f32.mrb[53].mxu0  ;;  %1304 = vst.msk [vmem:[%s2556_s3 + $0x10c] sm:$0xf] %vm1236_vm3, %v1558_v56  ;;  %v777_v61 = vadd.f32 %v2146_v48, %v776_v58  ;;  %v1766_v62 = vpop.f32.mrb[53].mxu1 }
 0x153   :  { %v611_v63 = vpop.f32.mrb[54].mxu0  ;;  %v779_v0 = vpop.f32.mrb[54].mxu1 }
 0x154   :  { %v856_v1 = vmax.f32 %v609_v59, 0.0  ;;  %v612_v2 = vadd.f32 %v2146_v48, %v611_v63  ;;  %v1683_v3 = vpop.f32.mrb[55].mxu0  ;;  %v898_v4 = vmax.f32 %v777_v61, 0.0  ;;  %v780_v5 = vadd.f32 %v2146_v48, %v779_v0  ;;  %v1767_v6 = vpop.f32.mrb[55].mxu1 }
 0x156   :  { %v1517_v7 = vpack.c.bf16 %v856_v1, %v856_v1  ;;  %v857_v8 = vmax.f32 %v612_v2, 0.0  ;;  %v1559_v9 = vpack.c.bf16 %v898_v4, %v898_v4  ;;  %v899_v10 = vmax.f32 %v780_v5, 0.0 }
 0x158   :  { %1263 = vst.msk [vmem:[%s2556_s3 + $0x68] sm:$0xf] %vm1236_vm3, %v1517_v7  ;;  %v1518_v11 = vpack.c.bf16 %v857_v8, %v857_v8  ;;  %1305 = vst.msk [vmem:[%s2556_s3 + $0x110] sm:$0xf] %vm1236_vm3, %v1559_v9  ;;  %v1560_v12 = vpack.c.bf16 %v899_v10, %v899_v10 }
 0x159   :  { %v616_v13 = vpop.f32.mrb[56].mxu0  ;;  %v784_v14 = vpop.f32.mrb[56].mxu1 }
 0x15a   :  { %1264 = vst.msk [vmem:[%s2556_s3 + $0x6c] sm:$0xf] %vm1236_vm3, %v1518_v11  ;;  %v617_v15 = vadd.f32 %v2146_v48, %v616_v13  ;;  %v1686_v16 = vpop.f32.mrb[57].mxu0  ;;  %1306 = vst.msk [vmem:[%s2556_s3 + $0x114] sm:$0xf] %vm1236_vm3, %v1560_v12  ;;  %v785_v17 = vadd.f32 %v2146_v48, %v784_v14  ;;  %v1770_v18 = vpop.f32.mrb[57].mxu1 }
 0x15b   :  { %v619_v19 = vpop.f32.mrb[58].mxu0  ;;  %v787_v20 = vpop.f32.mrb[58].mxu1 }
 0x15c   :  { %v858_v21 = vmax.f32 %v617_v15, 0.0  ;;  %v620_v22 = vadd.f32 %v2146_v48, %v619_v19  ;;  %v1687_v23 = vpop.f32.mrb[59].mxu0  ;;  %v900_v24 = vmax.f32 %v785_v17, 0.0  ;;  %v788_v25 = vadd.f32 %v2146_v48, %v787_v20  ;;  %v1771_v26 = vpop.f32.mrb[59].mxu1 }
 0x15e   :  { %v1519_v27 = vpack.c.bf16 %v858_v21, %v858_v21  ;;  %v859_v28 = vmax.f32 %v620_v22, 0.0  ;;  %v1561_v29 = vpack.c.bf16 %v900_v24, %v900_v24  ;;  %v901_v30 = vmax.f32 %v788_v25, 0.0 }
 0x160   :  { %1265 = vst.msk [vmem:[%s2556_s3 + $0x70] sm:$0xf] %vm1236_vm3, %v1519_v27  ;;  %v1520_v31 = vpack.c.bf16 %v859_v28, %v859_v28  ;;  %1307 = vst.msk [vmem:[%s2556_s3 + $0x118] sm:$0xf] %vm1236_vm3, %v1561_v29  ;;  %v1562_v32 = vpack.c.bf16 %v901_v30, %v901_v30 }
 0x161   :  { %v624_v33 = vpop.f32.mrb[60].mxu0  ;;  %v792_v34 = vpop.f32.mrb[60].mxu1 }
 0x162   :  { %1266 = vst.msk [vmem:[%s2556_s3 + $0x74] sm:$0xf] %vm1236_vm3, %v1520_v31  ;;  %v625_v35 = vadd.f32 %v2146_v48, %v624_v33  ;;  %v1690_v36 = vpop.f32.mrb[61].mxu0  ;;  %1308 = vst.msk [vmem:[%s2556_s3 + $0x11c] sm:$0xf] %vm1236_vm3, %v1562_v32  ;;  %v793_v37 = vadd.f32 %v2146_v48, %v792_v34  ;;  %v1774_v38 = vpop.f32.mrb[61].mxu1 }
 0x163   :  { %v627_v39 = vpop.f32.mrb[62].mxu0  ;;  %v795_v40 = vpop.f32.mrb[62].mxu1 }
 0x164   :  { %v860_v41 = vmax.f32 %v625_v35, 0.0  ;;  %v628_v42 = vadd.f32 %v2146_v48, %v627_v39  ;;  %v1691_v43 = vpop.f32.mrb[63].mxu0  ;;  %v902_v44 = vmax.f32 %v793_v37, 0.0  ;;  %v796_v45 = vadd.f32 %v2146_v48, %v795_v40  ;;  %v1775_v46 = vpop.f32.mrb[63].mxu1 }
 0x166   :  { %v1521_v47 = vpack.c.bf16 %v860_v41, %v860_v41  ;;  %v861_v49 = vmax.f32 %v628_v42, 0.0  ;;  %v1563_v50 = vpack.c.bf16 %v902_v44, %v902_v44  ;;  %v903_v51 = vmax.f32 %v796_v45, 0.0 }
 0x168   :  { %1267 = vst.msk [vmem:[%s2556_s3 + $0x78] sm:$0xf] %vm1236_vm3, %v1521_v47  ;;  %v1522_v52 = vpack.c.bf16 %v861_v49, %v861_v49  ;;  %1309 = vst.msk [vmem:[%s2556_s3 + $0x120] sm:$0xf] %vm1236_vm3, %v1563_v50  ;;  %v1564_v53 = vpack.c.bf16 %v903_v51, %v903_v51 }
 0x169   :  { %v632_v54 = vpop.f32.mrb[64].mxu0  ;;  %v800_v55 = vpop.f32.mrb[64].mxu1 }
 0x16a   :  { %1268 = vst.msk [vmem:[%s2556_s3 + $0x7c] sm:$0xf] %vm1236_vm3, %v1522_v52  ;;  %v633_v56 = vadd.f32 %v2146_v48, %v632_v54  ;;  %v1694_v57 = vpop.f32.mrb[65].mxu0  ;;  %1310 = vst.msk [vmem:[%s2556_s3 + $0x124] sm:$0xf] %vm1236_vm3, %v1564_v53  ;;  %v801_v58 = vadd.f32 %v2146_v48, %v800_v55  ;;  %v1778_v59 = vpop.f32.mrb[65].mxu1 }
 0x16b   :  { %v635_v60 = vpop.f32.mrb[66].mxu0  ;;  %v803_v61 = vpop.f32.mrb[66].mxu1 }
 0x16c   :  { %v862_v62 = vmax.f32 %v633_v56, 0.0  ;;  %v636_v63 = vadd.f32 %v2146_v48, %v635_v60  ;;  %v1695_v0 = vpop.f32.mrb[67].mxu0  ;;  %v904_v1 = vmax.f32 %v801_v58, 0.0  ;;  %v804_v2 = vadd.f32 %v2146_v48, %v803_v61  ;;  %v1779_v3 = vpop.f32.mrb[67].mxu1 }
 0x16e   :  { %v1523_v4 = vpack.c.bf16 %v862_v62, %v862_v62  ;;  %v863_v5 = vmax.f32 %v636_v63, 0.0  ;;  %v1565_v6 = vpack.c.bf16 %v904_v1, %v904_v1  ;;  %v905_v7 = vmax.f32 %v804_v2, 0.0 }
 0x170   :  { %1269 = vst.msk [vmem:[%s2556_s3 + $0x80] sm:$0xf] %vm1236_vm3, %v1523_v4  ;;  %v1524_v8 = vpack.c.bf16 %v863_v5, %v863_v5  ;;  %1311 = vst.msk [vmem:[%s2556_s3 + $0x128] sm:$0xf] %vm1236_vm3, %v1565_v6  ;;  %v1566_v9 = vpack.c.bf16 %v905_v7, %v905_v7 }
 0x171   :  { %v640_v10 = vpop.f32.mrb[68].mxu0  ;;  %v808_v11 = vpop.f32.mrb[68].mxu1 }
 0x172   :  { %1270 = vst.msk [vmem:[%s2556_s3 + $0x84] sm:$0xf] %vm1236_vm3, %v1524_v8  ;;  %v641_v12 = vadd.f32 %v2146_v48, %v640_v10  ;;  %v1698_v13 = vpop.f32.mrb[69].mxu0  ;;  %1312 = vst.msk [vmem:[%s2556_s3 + $0x12c] sm:$0xf] %vm1236_vm3, %v1566_v9  ;;  %v809_v14 = vadd.f32 %v2146_v48, %v808_v11  ;;  %v1782_v15 = vpop.f32.mrb[69].mxu1 }
 0x173   :  { %v643_v16 = vpop.f32.mrb[70].mxu0  ;;  %v811_v17 = vpop.f32.mrb[70].mxu1 }
 0x174   :  { %v864_v18 = vmax.f32 %v641_v12, 0.0  ;;  %v644_v19 = vadd.f32 %v2146_v48, %v643_v16  ;;  %v1699_v20 = vpop.f32.mrb[71].mxu0  ;;  %v906_v21 = vmax.f32 %v809_v14, 0.0  ;;  %v812_v22 = vadd.f32 %v2146_v48, %v811_v17  ;;  %v1783_v23 = vpop.f32.mrb[71].mxu1 }
 0x176   :  { %v1525_v24 = vpack.c.bf16 %v864_v18, %v864_v18  ;;  %v865_v25 = vmax.f32 %v644_v19, 0.0  ;;  %v1567_v26 = vpack.c.bf16 %v906_v21, %v906_v21  ;;  %v907_v27 = vmax.f32 %v812_v22, 0.0 }
 0x178   :  { %1271 = vst.msk [vmem:[%s2556_s3 + $0x88] sm:$0xf] %vm1236_vm3, %v1525_v24  ;;  %v1526_v28 = vpack.c.bf16 %v865_v25, %v865_v25  ;;  %1313 = vst.msk [vmem:[%s2556_s3 + $0x130] sm:$0xf] %vm1236_vm3, %v1567_v26  ;;  %v1568_v29 = vpack.c.bf16 %v907_v27, %v907_v27 }
 0x179   :  { %v648_v30 = vpop.f32.mrb[72].mxu0  ;;  %v816_v31 = vpop.f32.mrb[72].mxu1 }
 0x17a   :  { %1272 = vst.msk [vmem:[%s2556_s3 + $0x8c] sm:$0xf] %vm1236_vm3, %v1526_v28  ;;  %v649_v32 = vadd.f32 %v2146_v48, %v648_v30  ;;  %v1702_v33 = vpop.f32.mrb[73].mxu0  ;;  %1314 = vst.msk [vmem:[%s2556_s3 + $0x134] sm:$0xf] %vm1236_vm3, %v1568_v29  ;;  %v817_v34 = vadd.f32 %v2146_v48, %v816_v31  ;;  %v1786_v35 = vpop.f32.mrb[73].mxu1 }
 0x17b   :  { %v651_v36 = vpop.f32.mrb[74].mxu0  ;;  %v819_v37 = vpop.f32.mrb[74].mxu1 }
 0x17c   :  { %v866_v38 = vmax.f32 %v649_v32, 0.0  ;;  %v652_v39 = vadd.f32 %v2146_v48, %v651_v36  ;;  %v1703_v40 = vpop.f32.mrb[75].mxu0  ;;  %v908_v41 = vmax.f32 %v817_v34, 0.0  ;;  %v820_v42 = vadd.f32 %v2146_v48, %v819_v37  ;;  %v1787_v43 = vpop.f32.mrb[75].mxu1 }
 0x17e   :  { %v1527_v44 = vpack.c.bf16 %v866_v38, %v866_v38  ;;  %v867_v45 = vmax.f32 %v652_v39, 0.0  ;;  %v1569_v46 = vpack.c.bf16 %v908_v41, %v908_v41  ;;  %v909_v47 = vmax.f32 %v820_v42, 0.0 }
 0x180   :  { %1273 = vst.msk [vmem:[%s2556_s3 + $0x90] sm:$0xf] %vm1236_vm3, %v1527_v44  ;;  %v1528_v49 = vpack.c.bf16 %v867_v45, %v867_v45  ;;  %1315 = vst.msk [vmem:[%s2556_s3 + $0x138] sm:$0xf] %vm1236_vm3, %v1569_v46  ;;  %v1570_v50 = vpack.c.bf16 %v909_v47, %v909_v47 }
 0x181   :  { %v656_v51 = vpop.f32.mrb[76].mxu0  ;;  %v824_v52 = vpop.f32.mrb[76].mxu1 }
 0x182   :  { %1274 = vst.msk [vmem:[%s2556_s3 + $0x94] sm:$0xf] %vm1236_vm3, %v1528_v49  ;;  %v657_v53 = vadd.f32 %v2146_v48, %v656_v51  ;;  %v1706_v54 = vpop.f32.mrb[77].mxu0  ;;  %1316 = vst.msk [vmem:[%s2556_s3 + $0x13c] sm:$0xf] %vm1236_vm3, %v1570_v50  ;;  %v825_v55 = vadd.f32 %v2146_v48, %v824_v52  ;;  %v1790_v56 = vpop.f32.mrb[77].mxu1 }
 0x183   :  { %v659_v57 = vpop.f32.mrb[78].mxu0  ;;  %v827_v58 = vpop.f32.mrb[78].mxu1 }
 0x184   :  { %v868_v59 = vmax.f32 %v657_v53, 0.0  ;;  %v660_v60 = vadd.f32 %v2146_v48, %v659_v57  ;;  %v1707_v61 = vpop.f32.mrb[79].mxu0  ;;  %v910_v62 = vmax.f32 %v825_v55, 0.0  ;;  %v1791_v63 = vpop.f32.mrb[79].mxu1 }
 0x186   :  { %v1529_v0 = vpack.c.bf16 %v868_v59, %v868_v59  ;;  %v869_v1 = vmax.f32 %v660_v60, 0.0  ;;  %v1571_v2 = vpack.c.bf16 %v910_v62, %v910_v62 }
 0x188   :  { %1275 = vst.msk [vmem:[%s2556_s3 + $0x98] sm:$0xf] %vm1236_vm3, %v1529_v0  ;;  %v1530_v3 = vpack.c.bf16 %v869_v1, %v869_v1  ;;  %1317 = vst.msk [vmem:[%s2556_s3 + $0x140] sm:$0xf] %vm1236_vm3, %v1571_v2 }
 0x189   :  { %v664_v4 = vpop.f32.mrb[80].mxu0 }
 0x18a   :  { %1276 = vst.msk [vmem:[%s2556_s3 + $0x9c] sm:$0xf] %vm1236_vm3, %v1530_v3  ;;  %v665_v5 = vadd.f32 %v2146_v48, %v664_v4  ;;  %v1710_v6 = vpop.f32.mrb[81].mxu0 }
 0x18b   :  { %v667_v7 = vpop.f32.mrb[82].mxu0 }
 0x18c   :  { %v870_v8 = vmax.f32 %v665_v5, 0.0  ;;  %v668_v9 = vadd.f32 %v2146_v48, %v667_v7  ;;  %v1711_v10 = vpop.f32.mrb[83].mxu0 }
 0x18e   :  { %v1531_v11 = vpack.c.bf16 %v870_v8, %v870_v8  ;;  %v871_v12 = vmax.f32 %v668_v9, 0.0 }
 0x190   :  { %1277 = vst.msk [vmem:[%s2556_s3 + $0xa0] sm:$0xf] %vm1236_vm3, %v1531_v11  ;;  %v1532_v13 = vpack.c.bf16 %v871_v12, %v871_v12 }
 0x192   :  { %1278 = vst.msk [vmem:[%s2556_s3 + $0xa4] sm:$0xf] %vm1236_vm3, %v1532_v13 }

// kernel: simple_cnn_forward.5
= control target key start
LH: loop header
LB: loop body
LE: loop exit
PB: predicated region body
PF: predicated region fallthrough
CT: control target
= control target key end

     0   :  { %v205_v27 = vlaneseq  ;;  %v1638_v35 = vmov 1966171168   ;;  %vm1640_vm0 = vmmov 0   ;;  %s2045_s0 = inlined_call_operand.vmem [shape: bf16[2,1296], index: 0, kind: input, shape index: {}]   ;;  %s2046_s1 = inlined_call_operand.vmem [shape: bf16[1296,128], index: 1, kind: input, shape index: {}]   ;;  %s2047_s2 = inlined_call_operand.vmem [shape: f32[1,128], index: 2, kind: input, shape index: {}]   ;;  %s2048_s3 = inlined_call_operand.vmem [shape: f32[128,56], index: 3, kind: input, shape index: {}]   ;;  %s2049_s4 = inlined_call_operand.vmem [shape: f32[1,56], index: 4, kind: input, shape index: {}]   ;;  %s2050_s5 = inlined_call_operand.vmem [shape: f32[56,10], index: 5, kind: input, shape index: {}]   ;;  %s2051_s6 = inlined_call_operand.vmem [shape: f32[1,10], index: 6, kind: input, shape index: {}]   ;;  %s2052_s7 = inlined_call_operand.hbm [shape: f32[2,10], index: 7, kind: output, shape index: {}]  }
   0x1   :  { %v1532_v0 = vld [vmem:[%s2046_s1 + $0x40] sm:$0xff]   ;;  %v1536_v4 = vld [vmem:[%s2046_s1 + $0x48] sm:$0xff]   ;;  %v1540_v8 = vld [vmem:[%s2046_s1 + $0x50] sm:$0xff]   ;;  %v203_v36 = vunpack.c.l.s4 %v1638_v35 }
   0x2   :  { %v1533_v1 = vld [vmem:[%s2046_s1] sm:$0xff]   ;;  %1299 = vmatprep.subr.bf16.mxu0 %v1532_v0  ;;  %v1537_v5 = vld [vmem:[%s2046_s1 + $0x8] sm:$0xff]   ;;  %v1541_v9 = vld [vmem:[%s2046_s1 + $0x10] sm:$0xff]   ;;  %v206_v32 = vshrl.u32 %v205_v27, 7 }
   0x3   :  { %v1534_v2 = vld [vmem:[%s2046_s1 + $0xc0] sm:$0xff]   ;;  %1300 = vmatpush3.bf16.msra.mxu0 %v1533_v1  ;;  %v1538_v6 = vld [vmem:[%s2046_s1 + $0xc8] sm:$0xff]   ;;  %v1542_v10 = vld [vmem:[%s2046_s1 + $0xd0] sm:$0xff]   ;;  %v204_v39 = vunpack.c.0.s8 %v203_v36 }
   0x4   :  { %v1535_v3 = vld [vmem:[%s2046_s1 + $0x80] sm:$0xff]   ;;  %1321 = vmatprep.subr.bf16.mxu1 %v1534_v2  ;;  %1301 = vmatprep.subr.bf16.mxu0 %v1536_v4  ;;  %v1539_v7 = vld [vmem:[%s2046_s1 + $0x88] sm:$0xff]   ;;  %v1543_v11 = vld [vmem:[%s2046_s1 + $0x90] sm:$0xff]  }
   0x5   :  { %1322 = vmatpush3.bf16.msra.mxu1 %v1535_v3  ;;  %v1544_v12 = vld [vmem:[%s2046_s1 + $0x58] sm:$0xff]   ;;  %v1548_v16 = vld [vmem:[%s2046_s1 + $0x60] sm:$0xff]   ;;  %v1552_v20 = vld [vmem:[%s2046_s1 + $0x68] sm:$0xff]   ;;  %v1788_v41 = vsub.s32 %v204_v39, %v206_v32 }
   0x6   :  { %1323 = vmatprep.subr.bf16.mxu1 %v1538_v6  ;;  %v1545_v13 = vld [vmem:[%s2046_s1 + $0x18] sm:$0xff]   ;;  %v1549_v17 = vld [vmem:[%s2046_s1 + $0x20] sm:$0xff]   ;;  %v1553_v21 = vld [vmem:[%s2046_s1 + $0x28] sm:$0xff]  }
   0x7   :  { %1302 = vmatpush3.bf16.msra.mxu0 %v1537_v5  ;;  %v1546_v14 = vld [vmem:[%s2046_s1 + $0xd8] sm:$0xff]   ;;  %v1550_v18 = vld [vmem:[%s2046_s1 + $0xe0] sm:$0xff]   ;;  %v1554_v22 = vld [vmem:[%s2046_s1 + $0xe8] sm:$0xff]  }
   0x8   :  { %1303 = vmatprep.subr.bf16.mxu0 %v1540_v8  ;;  %v1547_v15 = vld [vmem:[%s2046_s1 + $0x98] sm:$0xff]   ;;  %v1551_v19 = vld [vmem:[%s2046_s1 + $0xa0] sm:$0xff]   ;;  %v1555_v23 = vld [vmem:[%s2046_s1 + $0xa8] sm:$0xff]  }
   0x9   :  { %1324 = vmatpush3.bf16.msra.mxu1 %v1539_v7  ;;  %v1556_v24 = vld [vmem:[%s2046_s1 + $0x70] sm:$0xff]   ;;  %v1560_v29 = vld [vmem:[%s2046_s1 + $0x78] sm:$0xff]   ;;  %v28_v33 = vld [vmem:[%s2045_s0] sm:$0xff] }
   0xa   :  { %1325 = vmatprep.subr.bf16.mxu1 %v1542_v10  ;;  %v1557_v25 = vld [vmem:[%s2046_s1 + $0x30] sm:$0xff]   ;;  %v1561_v30 = vld [vmem:[%s2046_s1 + $0x38] sm:$0xff]   ;;  %v1565_v37 = vld [vmem:[%s2046_s1 + $0x140] sm:$0xff]   ;;  %v201_v38 = vcombine.high %v28_v33, %v28_v33  ;;  %v208_v42 = vrot.slane %v28_v33, %v1788_v41 }
   0xb   :  { %1304 = vmatpush3.bf16.msra.mxu0 %v1541_v9  ;;  %v1558_v26 = vld [vmem:[%s2046_s1 + $0xf0] sm:$0xff]   ;;  %v1562_v31 = vld [vmem:[%s2046_s1 + $0xf8] sm:$0xff]   ;;  %v1567_v40 = vld [vmem:[%s2046_s1 + $0x1c0] sm:$0xff]  }
   0xc   :  { %1305 = vmatprep.subr.bf16.mxu0 %v1544_v12  ;;  %v1559_v28 = vld [vmem:[%s2046_s1 + $0xb0] sm:$0xff]   ;;  %v1564_v34 = vld [vmem:[%s2046_s1 + $0xb8] sm:$0xff]   ;;  %v1792_v43 = vrot.slane %v201_v38, %v1788_v41  ;;  %v216_v44 = vcombine.high %v208_v42, %v208_v42  ;;  %v224_v45 = vrot.slane %v208_v42, %v1788_v41  ;;  %v1566_v48 = vld [vmem:[%s2046_s1 + $0x100] sm:$0xff]  }
   0xd   :  { %1326 = vmatpush3.bf16.msra.mxu1 %v1543_v11  ;;  %v1569_v51 = vld [vmem:[%s2046_s1 + $0x148] sm:$0xff]   ;;  %v1568_v53 = vld [vmem:[%s2046_s1 + $0x180] sm:$0xff]   ;;  %v1573_v57 = vld [vmem:[%s2046_s1 + $0x150] sm:$0xff]  }
   0xe   :  { %1327 = vmatprep.subr.bf16.mxu1 %v1546_v14  ;;  %v217_v46 = vcombine.high %v1792_v43, %v1792_v43  ;;  %v238_v47 = vrot.slane %v216_v44, %v1788_v41  ;;  %v246_v50 = vcombine.high %v224_v45, %v224_v45  ;;  %v1571_v54 = vld [vmem:[%s2046_s1 + $0x1c8] sm:$0xff]   ;;  %v1575_v59 = vld [vmem:[%s2046_s1 + $0x1d0] sm:$0xff]   ;;  %v1577_v61 = vld [vmem:[%s2046_s1 + $0x158] sm:$0xff]  }
   0xf   :  { %1306 = vmatpush3.bf16.msra.mxu0 %v1545_v13  ;;  %v1570_v56 = vld [vmem:[%s2046_s1 + $0x108] sm:$0xff]   ;;  %v1574_v60 = vld [vmem:[%s2046_s1 + $0x110] sm:$0xff]   ;;  %v1579_v63 = vld [vmem:[%s2046_s1 + $0x1d8] sm:$0xff]  }
  0x10   :  { %1307 = vmatprep.subr.bf16.mxu0 %v1548_v16  ;;  %v245_v49 = vrot.slane %v217_v46, %v1788_v41  ;;  %805 = vmatprep.mubr.bf16.mxu0 %v238_v47  ;;  %v248_v52 = vcombine.high %v238_v47, %v238_v47  ;;  %v1572_v58 = vld [vmem:[%s2046_s1 + $0x188] sm:$0xff]   ;;  %v1576_v62 = vld [vmem:[%s2046_s1 + $0x190] sm:$0xff]   ;;  %v1578_v0 = vld [vmem:[%s2046_s1 + $0x118] sm:$0xff]  }
  0x11   :  { %1328 = vmatpush3.bf16.msra.mxu1 %v1547_v15  ;;  %v1581_v1 = vld [vmem:[%s2046_s1 + $0x160] sm:$0xff]   ;;  %v1580_v2 = vld [vmem:[%s2046_s1 + $0x198] sm:$0xff]   ;;  %v1585_v5 = vld [vmem:[%s2046_s1 + $0x168] sm:$0xff]  }
  0x12   :  { %1329 = vmatprep.subr.bf16.mxu1 %v1550_v18  ;;  %v249_v55 = vcombine.high %v245_v49, %v245_v49  ;;  %845 = vmatprep.mubr.bf16.mxu1 %v248_v52  ;;  %v1583_v3 = vld [vmem:[%s2046_s1 + $0x1e0] sm:$0xff]   ;;  %v1587_v7 = vld [vmem:[%s2046_s1 + $0x1e8] sm:$0xff]   ;;  %v1589_v9 = vld [vmem:[%s2046_s1 + $0x170] sm:$0xff]  }
  0x13   :  { %1308 = vmatpush3.bf16.msra.mxu0 %v1549_v17  ;;  %v1582_v4 = vld [vmem:[%s2046_s1 + $0x120] sm:$0xff]   ;;  %v1586_v8 = vld [vmem:[%s2046_s1 + $0x128] sm:$0xff]   ;;  %v1591_v11 = vld [vmem:[%s2046_s1 + $0x1f0] sm:$0xff]   ;;  %v231_v17 = vrot.slane %v1792_v43, %v1788_v41 }
  0x14   :  { %1309 = vmatprep.subr.bf16.mxu0 %v1552_v20  ;;  %v1584_v6 = vld [vmem:[%s2046_s1 + $0x1a0] sm:$0xff]   ;;  %v1588_v10 = vld [vmem:[%s2046_s1 + $0x1a8] sm:$0xff]   ;;  %v1590_v12 = vld [vmem:[%s2046_s1 + $0x130] sm:$0xff]  }
  0x15   :  { %1330 = vmatpush3.bf16.msra.mxu1 %v1551_v19  ;;  %v1593_v13 = vld [vmem:[%s2046_s1 + $0x178] sm:$0xff]   ;;  %v1592_v14 = vld [vmem:[%s2046_s1 + $0x1b0] sm:$0xff]   ;;  %v1597_v18 = vld [vmem:[%s2046_s1 + $0x240] sm:$0xff]  }
  0x16   :  { %1331 = vmatprep.subr.bf16.mxu1 %v1554_v22  ;;  %v1595_v15 = vld [vmem:[%s2046_s1 + $0x1f8] sm:$0xff]   ;;  %v1598_v20 = vld [vmem:[%s2046_s1 + $0x200] sm:$0xff]   ;;  %v1599_v22 = vld [vmem:[%s2046_s1 + $0x248] sm:$0xff]  }
  0x17   :  { %1310 = vmatpush3.bf16.msra.mxu0 %v1553_v21  ;;  %v1594_v16 = vld [vmem:[%s2046_s1 + $0x138] sm:$0xff]   ;;  %v247_v21 = vcombine.high %v231_v17, %v231_v17  ;;  %v1213_v27 = vld.sshfl [vmem:[%s2045_s0 + $0x8] sm:$0x13 pattern:$0x75316420] }
  0x18   :  { %1311 = vmatprep.subr.bf16.mxu0 %v1556_v24  ;;  %v1596_v19 = vld [vmem:[%s2046_s1 + $0x1b8] sm:$0xff]   ;;  %v1600_v24 = vld [vmem:[%s2046_s1 + $0x208] sm:$0xff]  }
  0x19   :  { %1332 = vmatpush3.bf16.msra.mxu1 %v1555_v23  ;;  %v1639_v23 = vmov 0.0  }
  0x1a   :  { %1333 = vmatprep.subr.bf16.mxu1 %v1558_v26  ;;  %v1613_v26 = vld [vmem:[%s2046_s1 + $0x280] sm:$0xff]  }
  0x1b   :  { %1312 = vmatpush3.bf16.msra.mxu0 %v1557_v25  ;;  %v1601_v25 = vld [vmem:[%s2046_s1 + $0x250] sm:$0xff]  }
  0x1c   :  { %1313 = vmatprep.subr.bf16.mxu0 %v1560_v29  ;;  %v257_v29 = vcombine.high %v1213_v27, %v1213_v27 }
  0x1d   :  { %1334 = vmatpush3.bf16.msra.mxu1 %v1559_v28  ;;  %v1602_v28 = vld [vmem:[%s2046_s1 + $0x210] sm:$0xff]  }
  0x1e   :  { %1335 = vmatprep.subr.bf16.mxu1 %v1562_v31 }
  0x1f   :  { %1314 = vmatpush3.bf16.msra.mxu0 %v1561_v30  ;;  %v264_v30 = vrot.slane %v1213_v27, %v1788_v41 }
  0x20   :  { %1343 = vmatprep.subr.bf16.mxu0 %v1565_v37 }
  0x21   :  { %1336 = vmatpush3.bf16.msra.mxu1 %v1564_v34 }
  0x22   :  { %1365 = vmatprep.subr.bf16.mxu1 %v1567_v40  ;;  %806 = vmatmul.mubr.bf16.vlgmr.msra.gmra.mrb[0].mxu0 %v224_v45 }
  0x23   :  { %1344 = vmatpush3.bf16.msra.mxu0 %v1566_v48  ;;  %885 = vmatprep.mubr.bf16.mxu0 %v245_v49 }
  0x24   :  { %846 = vmatmul.mubr.bf16.vlgmr.msra.gmra.mrb[0].mxu1 %v246_v50  ;;  %1345 = vmatprep.subr.bf16.mxu0 %v1569_v51 }
  0x25   :  { %1366 = vmatpush3.bf16.msra.mxu1 %v1568_v53  ;;  %925 = vmatprep.mubr.bf16.mxu1 %v249_v55 }
  0x26   :  { %1367 = vmatprep.subr.bf16.mxu1 %v1571_v54 }
  0x27   :  { %1346 = vmatpush3.bf16.msra.mxu0 %v1570_v56 }
  0x28   :  { %1347 = vmatprep.subr.bf16.mxu0 %v1573_v57 }
  0x29   :  { %1368 = vmatpush3.bf16.msra.mxu1 %v1572_v58 }
  0x2a   :  { %1369 = vmatprep.subr.bf16.mxu1 %v1575_v59 }
  0x2b   :  { %1348 = vmatpush3.bf16.msra.mxu0 %v1574_v60 }
  0x2c   :  { %1349 = vmatprep.subr.bf16.mxu0 %v1577_v61 }
  0x2d   :  { %1370 = vmatpush3.bf16.msra.mxu1 %v1576_v62 }
  0x2e   :  { %1371 = vmatprep.subr.bf16.mxu1 %v1579_v63 }
  0x2f   :  { %1350 = vmatpush3.bf16.msra.mxu0 %v1578_v0 }
  0x30   :  { %1351 = vmatprep.subr.bf16.mxu0 %v1581_v1 }
  0x31   :  { %1372 = vmatpush3.bf16.msra.mxu1 %v1580_v2 }
  0x32   :  { %1373 = vmatprep.subr.bf16.mxu1 %v1583_v3 }
  0x33   :  { %1352 = vmatpush3.bf16.msra.mxu0 %v1582_v4 }
  0x34   :  { %1353 = vmatprep.subr.bf16.mxu0 %v1585_v5 }
  0x35   :  { %1374 = vmatpush3.bf16.msra.mxu1 %v1584_v6 }
  0x36   :  { %1375 = vmatprep.subr.bf16.mxu1 %v1587_v7 }
  0x37   :  { %1354 = vmatpush3.bf16.msra.mxu0 %v1586_v8 }
  0x38   :  { %1355 = vmatprep.subr.bf16.mxu0 %v1589_v9 }
  0x39   :  { %1376 = vmatpush3.bf16.msra.mxu1 %v1588_v10 }
  0x3a   :  { %1377 = vmatprep.subr.bf16.mxu1 %v1591_v11 }
  0x3b   :  { %1356 = vmatpush3.bf16.msra.mxu0 %v1590_v12 }
  0x3c   :  { %1357 = vmatprep.subr.bf16.mxu0 %v1593_v13 }
  0x3d   :  { %1378 = vmatpush3.bf16.msra.mxu1 %v1592_v14 }
  0x3e   :  { %1379 = vmatprep.subr.bf16.mxu1 %v1595_v15 }
  0x3f   :  { %1358 = vmatpush3.bf16.msra.mxu0 %v1594_v16 }
  0x40   :  { %1387 = vmatprep.subr.bf16.mxu0 %v1597_v18 }
  0x41   :  { %1380 = vmatpush3.bf16.msra.mxu1 %v1596_v19 }
  0x42   :  { %886 = vmatmul.mubr.bf16.vlgmr.msra.gmra.mrb[4].mxu0 %v231_v17  ;;  %1436 = vmatprep.subr.bf16.mxu1 %v1639_v23 }
  0x43   :  { %1388 = vmatpush3.bf16.msra.mxu0 %v1598_v20 }
  0x44   :  { %926 = vmatmul.mubr.bf16.vlgmr.msra.gmra.mrb[4].mxu1 %v247_v21  ;;  %1389 = vmatprep.subr.bf16.mxu0 %v1599_v22 }
  0x45   :  { %1438 = vmatprep.mubr.msk.bf16.mxu1 %vm1640_vm0, %v1639_v23 }
  0x47   :  { %1390 = vmatpush3.bf16.msra.mxu0 %v1600_v24 }
  0x48   :  { %12 = vsyncpa [#allocation3], 0  ;;  %1391 = vmatprep.subr.bf16.mxu0 %v1601_v25  ;;  %v1603_v31 = vld [vmem:[%s2046_s1 + $0x258] sm:$0xff]   ;;  %1437 = vmatpush3.bf16.msra.mxu1 %v1613_v26  ;;  %v271_v32 = vrot.slane %v257_v29, %v1788_v41  ;;  %v272_v33 = vcombine.high %v264_v30, %v264_v30  ;;  %vm769_vm1 = vcmask 130048   ;;  %v1605_v35 = vld [vmem:[%s2046_s1 + $0x260] sm:$0xff]   ;;  %v1641_v46 = vmov 0.0|0.0  }
  0x49   :  { %v1604_v34 = vld [vmem:[%s2046_s1 + $0x218] sm:$0xff]   ;;  %v1606_v36 = vld [vmem:[%s2046_s1 + $0x220] sm:$0xff]   ;;  %v1607_v37 = vld [vmem:[%s2046_s1 + $0x268] sm:$0xff]   ;;  %1494 = vmatprep.subr.bf16.mxu1 %v1641_v46  ;;  %vm1122_vm2 = vcmask 457728   ;;  %s1642_s28 = smov [#allocation2]   ;;  %vm1196_vm3 = vcmask 74752  }
  0x4a   :  { %965 = vmatprep.mubr.bf16.mxu0 %v271_v32  ;;  %v1608_v38 = vld [vmem:[%s2046_s1 + $0x228] sm:$0xff]   ;;  %v1609_v39 = vld [vmem:[%s2046_s1 + $0x270] sm:$0xff]   ;;  %v1611_v41 = vld [vmem:[%s2046_s1 + $0x278] sm:$0xff]   ;;  %s1204_s29 = sshll.u32 %s1642_s28, 4  ;;  %s1205_s29 = int_to_ptr.vmem [resolvable:$true] %s1204_s29 }
  0x4b   :  { %1392 = vmatpush3.bf16.msra.mxu0 %v1602_v28  ;;  %v1610_v40 = vld [vmem:[%s2046_s1 + $0x230] sm:$0xff]   ;;  %v1612_v42 = vld [vmem:[%s2046_s1 + $0x238] sm:$0xff]   ;;  %v1014_v43 = vld [vmem:[%s2048_s3] sm:$0xff]  ;;  %p1619_p1 = scmp.lt.s32.totalorder %s1205_s29, %s1205_s29 }
  0x4c   :  { %1393 = vmatprep.subr.bf16.mxu0 %v1603_v31  ;;  %1439 = vmatmul.mubr.msk.bf16.vlgmr.msra.gmra.mrb[8].mxu1 %vm769_vm1, %v272_v33  ;;  %v1015_v44 = vld [vmem:[%s2048_s3 + $0x8] sm:$0xff]  ;;  %v1016_v45 = vld [vmem:[%s2048_s3 + $0x10] sm:$0xff]  ;;  %v1017_v48 = vld [vmem:[%s2048_s3 + $0x18] sm:$0xff] }
  0x4d   :  { %1474 = vmatprep.mubr.msk.f32.mxu1 %vm1640_vm0, %v1639_v23  ;;  %v1495_v47 = vpack.c.bf16 %v1015_v44, %v1014_v43  ;;  %v1498_v49 = vpack.c.bf16 %v1017_v48, %v1016_v45  ;;  %v1018_v50 = vld [vmem:[%s2048_s3 + $0x20] sm:$0xff]  ;;  %v1019_v51 = vld [vmem:[%s2048_s3 + $0x28] sm:$0xff]  ;;  %v1020_v53 = vld [vmem:[%s2048_s3 + $0x30] sm:$0xff] }
  0x4e   :  { %v1501_v52 = vpack.c.bf16 %v1019_v51, %v1018_v50  ;;  %v1021_v54 = vld [vmem:[%s2048_s3 + $0x38] sm:$0xff]  ;;  %v1022_v56 = vld [vmem:[%s2048_s3 + $0x40] sm:$0xff]  ;;  %v1023_v57 = vld [vmem:[%s2048_s3 + $0x48] sm:$0xff] }
  0x4f   :  { %1394 = vmatpush3.bf16.msra.mxu0 %v1604_v34  ;;  %1496 = vmatpush3.bf16.msra.mxu1 %v1495_v47  ;;  %v1504_v55 = vpack.c.bf16 %v1021_v54, %v1020_v53  ;;  %v1507_v58 = vpack.c.bf16 %v1023_v57, %v1022_v56  ;;  %v1024_v59 = vld [vmem:[%s2048_s3 + $0x50] sm:$0xff]  ;;  %v1025_v60 = vld [vmem:[%s2048_s3 + $0x58] sm:$0xff]  ;;  %v1026_v62 = vld [vmem:[%s2048_s3 + $0x60] sm:$0xff] }
  0x50   :  { %1395 = vmatprep.subr.bf16.mxu0 %v1605_v35  ;;  %1497 = vmatprep.subr.bf16.mxu1 %v1641_v46  ;;  %v1510_v61 = vpack.c.bf16 %v1025_v60, %v1024_v59  ;;  %v1027_v63 = vld [vmem:[%s2048_s3 + $0x68] sm:$0xff]  ;;  %v1028_v1 = vld [vmem:[%s2048_s3 + $0x70] sm:$0xff]  ;;  %v1029_v2 = vld [vmem:[%s2048_s3 + $0x78] sm:$0xff] }
  0x51   :  { %v1513_v0 = vpack.c.bf16 %v1027_v63, %v1026_v62  ;;  %v1516_v3 = vpack.c.bf16 %v1029_v2, %v1028_v1  ;;  %v1108_v4 = vld [vmem:[%s2050_s5] sm:$0xff]  ;;  %v1109_v5 = vld [vmem:[%s2050_s5 + $0x8] sm:$0xff]  ;;  %v1110_v6 = vld [vmem:[%s2050_s5 + $0x10] sm:$0xff] }
  0x52   :  { %v1519_v7 = vpack.c.bf16 %v1109_v5, %v1108_v4  ;;  %v1111_v8 = vld [vmem:[%s2050_s5 + $0x18] sm:$0xff]  ;;  %v1112_v10 = vld [vmem:[%s2050_s5 + $0x20] sm:$0xff]  ;;  %v1113_v11 = vld [vmem:[%s2050_s5 + $0x28] sm:$0xff] }
  0x53   :  { %1396 = vmatpush3.bf16.msra.mxu0 %v1606_v36  ;;  %1499 = vmatpush3.bf16.msra.mxu1 %v1498_v49  ;;  %v1522_v9 = vpack.c.bf16 %v1111_v8, %v1110_v6  ;;  %v1525_v12 = vpack.c.bf16 %v1113_v11, %v1112_v10  ;;  %v1212_v14 = vld [vmem:[%s2047_s2] ss:$0 sm:$0xff]  ;;  %v1114_v50 = vld [vmem:[%s2050_s5 + $0x30] sm:$0xff]  ;;  %s1614_s5 = scalar_lea.vmem %s1205_s29, 32 }
  0x54   :  { %1397 = vmatprep.subr.bf16.mxu0 %v1607_v37  ;;  %1500 = vmatprep.subr.bf16.mxu1 %v1641_v46  ;;  %v1296_v51 = vld [vmem:[%s2049_s4] ss:$0 sm:$0xff]  ;;  %p1615_p0 = scmp.ne.s32.totalorder %s1205_s29, %s1614_s5  ;;  %p1620_p2 = scmp.lt.s32.totalorder %s1614_s5, %s1614_s5 }
  0x55   :  { %v1297_v56 = vld [vmem:[%s2051_s6] ss:$0 sm:$0xff] }
  0x56   :  { %p1621_p3 = por %p1620_p2, %p1619_p1 }
  0x57   :  { %1398 = vmatpush3.bf16.msra.mxu0 %v1608_v38  ;;  %1502 = vmatpush3.bf16.msra.mxu1 %v1501_v52 }
  0x58   :  { %1399 = vmatprep.subr.bf16.mxu0 %v1609_v39  ;;  %1503 = vmatprep.subr.bf16.mxu1 %v1641_v46  ;;  %p1622_p4 = pnand %p1621_p3, %p1615_p0 }
  0x5b   :  { %1400 = vmatpush3.bf16.msra.mxu0 %v1610_v40  ;;  %1505 = vmatpush3.bf16.msra.mxu1 %v1504_v55 }
  0x5c   :  { %1401 = vmatprep.subr.bf16.mxu0 %v1611_v41  ;;  %1506 = vmatprep.subr.bf16.mxu1 %v1641_v46 }
  0x5f   :  { %1402 = vmatpush3.bf16.msra.mxu0 %v1612_v42  ;;  %1508 = vmatpush3.bf16.msra.mxu1 %v1507_v58 }
  0x60   :  { %1518 = vmatprep.subr.bf16.mxu0 %v1641_v46  ;;  %1509 = vmatprep.subr.bf16.mxu1 %v1641_v46 }
  0x62   :  { %966 = vmatmul.mubr.bf16.vlgmr.msra.gmra.mrb[8].mxu0 %v264_v30 }
  0x63   :  { %1491 = vmatprep.mubr.msk.f32.mxu0 %vm1640_vm0, %v1639_v23  ;;  %1511 = vmatpush3.bf16.msra.mxu1 %v1510_v61 }
  0x64   :  { %1512 = vmatprep.subr.bf16.mxu1 %v1641_v46  ;;  %1520 = vmatpush3.bf16.msra.mxu0 %v1519_v7 }
  0x65   :  { %1521 = vmatprep.subr.bf16.mxu0 %v1641_v46 }
  0x67   :  { %1514 = vmatpush3.bf16.msra.mxu1 %v1513_v0 }
  0x68   :  { %1515 = vmatprep.subr.bf16.mxu1 %v1641_v46  ;;  %1523 = vmatpush3.bf16.msra.mxu0 %v1522_v9 }
  0x69   :  { %1524 = vmatprep.subr.bf16.mxu0 %v1641_v46 }
  0x6b   :  { %1517 = vmatpush3.bf16.msra.mxu1 %v1516_v3 }
  0x6c   :  { %1526 = vmatpush3.bf16.msra.mxu0 %v1525_v12 }
  0x6d   :  { %1489 = vmatprep.subr.mxu0 %v1639_v23 }
  0x70   :  { %1490 = vmatpush3.msra.mxu0 %v1114_v50 }
  0xf5   :  { %v1315_v13 = vpop.f32.mrb[0].mxu0 }
  0xf6   :  { %v1316_v15 = vpop.f32.mrb[1].mxu0 }
  0xf7   :  { %v1317_v16 = vadd.f32 %v1316_v15, %v1315_v13  ;;  %v1318_v17 = vpop.f32.mrb[2].mxu0  ;;  %v1337_v18 = vpop.f32.mrb[0].mxu1 }
  0xf8   :  { %v1319_v19 = vpop.f32.mrb[3].mxu0  ;;  %v1338_v20 = vpop.f32.mrb[1].mxu1 }
  0xf9   :  { %v808_v21 = vadd.f32 %v1317_v16, %v1212_v14  ;;  %v1339_v22 = vadd.f32 %v1338_v20, %v1337_v18  ;;  %v1340_v24 = vpop.f32.mrb[2].mxu1 }
  0xfa   :  { %v1341_v25 = vpop.f32.mrb[3].mxu1 }
  0xfb   :  { %v848_v26 = vadd.f32 %v1339_v22, %v808_v21 }
 0x115   :  { %v1359_v27 = vpop.f32.mrb[4].mxu0 }
 0x116   :  { %v1360_v28 = vpop.f32.mrb[5].mxu0 }
 0x117   :  { %v1361_v29 = vadd.f32 %v1360_v28, %v1359_v27  ;;  %v1362_v23 = vpop.f32.mrb[6].mxu0  ;;  %v1381_v30 = vpop.f32.mrb[4].mxu1 }
 0x118   :  { %v1363_v31 = vpop.f32.mrb[7].mxu0  ;;  %v1382_v32 = vpop.f32.mrb[5].mxu1 }
 0x119   :  { %v888_v33 = vadd.f32 %v1361_v29, %v848_v26  ;;  %v1383_v34 = vadd.f32 %v1382_v32, %v1381_v30  ;;  %v1384_v35 = vpop.f32.mrb[6].mxu1 }
 0x11a   :  { %v1385_v36 = vpop.f32.mrb[7].mxu1 }
 0x11b   :  { %v928_v37 = vadd.f32 %v1383_v34, %v888_v33 }
 0x11f   :  { %v1007_v38 = vpop.f32.mrb[8].mxu1 }
 0x120   :  { %v1440_v39 = vpop.f32.mrb[9].mxu1 }
 0x121   :  { %v1010_v40 = vpop.f32.mrb[10].mxu1 }
 0x122   :  { %v1441_v41 = vpop.f32.mrb[11].mxu1 }
 0x135   :  { %v1403_v42 = vpop.f32.mrb[8].mxu0 }
 0x136   :  { %v1404_v43 = vpop.f32.mrb[9].mxu0 }
 0x137   :  { %v1405_v44 = vadd.f32 %v1404_v43, %v1403_v42  ;;  %v1406_v45 = vpop.f32.mrb[10].mxu0 }
 0x138   :  { %v1407_v46 = vpop.f32.mrb[11].mxu0 }
 0x139   :  { %v968_v47 = vadd.f32 %v1405_v44, %v928_v37 }
 0x13b   :  { %v1008_v48 = vadd.f32 %v1007_v38, %v968_v47 }
 0x13d   :  { %v1013_v49 = vmax.f32 %v1008_v48, 0.0 }
 0x13f   :  { %1475 = vmatmul.mubr.f32.vlgmr.msra.gmra.mrb[12].mxu1 %v1013_v49 }
 0x212   :  { %v1103_v52 = vpop.f32.mrb[12].mxu1 }
 0x213   :  { %v1104_v53 = vadd.f32 %v1296_v51, %v1103_v52  ;;  %v1476_v54 = vpop.f32.mrb[13].mxu1 }
 0x215   :  { %v1107_v55 = vmax.f32 %v1104_v53, 0.0 }
 0x217   :  { %1492 = vmatmul.mubr.msk.f32.vlgmr.msra.gmra.mrb[12].mxu0 %vm1122_vm2, %v1107_v55 }
 0x2ea   :  { %v1192_v57 = vpop.f32.mrb[12].mxu0 }
 0x2eb   :  { %v1193_v58 = vadd.f32 %v1297_v56, %v1192_v57  ;;  %v1493_v59 = vpop.f32.mrb[13].mxu0 }
 0x2ed   :  { %1197 = vst.msk [vmem:[#allocation2] sm:$0x3] %vm1196_vm3, %v1193_v58 }
 0x2ee   :  { %1625 = shalt.err (!%p1622_p4)
}
 0x2ef   :  { %s1626_s8 = scalar_lea.hbm %s2052_s7, 32 }
 0x2f0   :  { %p1627_p5 = scmp.ne.s32.totalorder %s2052_s7, %s1626_s8  ;;  %p1630_p6 = scmp.lt.u32.totalorder %s1626_s8, %s2052_s7 }
 0x2f2   :  { %p1632_p7 = pnand %p1630_p6, %p1627_p5 }
 0x2f4   :  { %1635 = shalt.err (!%p1632_p7)
}
 0x2f5   :  { %1207 = dma.vmem_to_hbm [thread:$0]  %s1205_s29, 32, %s2052_s7, [#allocation3]  }
 0x2f6   :  { %1636 = dma.done.wait [#allocation3], 32  }
 0x2f7   :  { %1637 = vsyncadd [#allocation3], 4294967264 }
 0x2f8   :  { %1211 = vsyncpa [#allocation3], 1 }

</bundles_post_ra>
